<compile_context>
chip_gen: v6e
topology: v6e:2x2x1
jax: 0.10.0
libtpu: 0.0.40
codegen_flags: <defaults>
</compile_context>

<pallas_src>
import functools
import math

import jax
import jax.numpy as jnp
from jax.experimental import pallas as pl
from jax.experimental.pallas import tpu as pltpu


# --------------------------------------------------------------------------- #
# Fused kernel: whole SIREN stack for one tile of positions.
# --------------------------------------------------------------------------- #
def _fused_siren_kernel(*refs, layer_cfgs):
    """refs layout (L = number of layers):
         refs[0]          x_ref    (Din0, TN)          f32
         refs[1 + 2*l]    W_ref[l] (Din_l, Dout_l, TN) bf16/f32
         refs[2 + 2*l]    b_ref[l] (Dout_l, TN)        bf16/f32
         refs[1 + 2*L]    out_ref  (Dout_last, TN)     f32
         refs[2 + 2*L]    h_ref    VMEM scratch (hidden, TN) f32
    """
    nl = len(layer_cfgs)
    x_ref = refs[0]
    w_refs = refs[1:1 + 2 * nl:2]
    b_refs = refs[2:2 + 2 * nl:2]
    out_ref = refs[1 + 2 * nl]
    h_ref = refs[2 + 2 * nl]

    for li, (d_in, d_out, w0, act) in enumerate(layer_cfgs):
        w_ref = w_refs[li]
        b_ref = b_refs[li]

        # acc[o, n] = b[o, n] + sum_i h[i, n] * W[i, o, n]
        # Pure lane-parallel VPU FMAs; working set stays at a few (Dout, TN) vregs.
        acc = b_ref[...].astype(jnp.float32)                       # (d_out, TN)
        for i in range(d_in):
            if li == 0:
                xi = x_ref[i:i + 1, :].astype(jnp.float32)         # (1, TN)
            else:
                xi = h_ref[i:i + 1, :]                             # (1, TN) f32
            wi = w_ref[i].astype(jnp.float32)                      # (d_out, TN)
            acc = acc + xi * wi

        if act == "sine":
            h = jnp.sin(w0 * acc)
        else:  # "sigmoid"
            h = jax.nn.sigmoid(acc)

        if li < nl - 1:
            h_ref[0:d_out, :] = h          # keep activation in VMEM for next layer
        else:
            out_ref[...] = h.astype(out_ref.dtype)


def _pick_tile_n(n):
    """Largest lane-dense tile that still leaves >=2 grid steps (v7x megacore)."""
    for t in (1024, 512, 256):
        if n >= 2 * t:
            return t
    return 128


# --------------------------------------------------------------------------- #
# Parameter construction (deterministic stand-in for torch's per-forward init).
# Layout is already lane-dense: W (Din, Dout, N), b (Dout, N).
# --------------------------------------------------------------------------- #
def make_siren_net_params(key, data_size, input_size, hidden_size, output_size,
                          num_layers, w0=1.0, w0_initial=30.0, c=6.0,
                          param_dtype=jnp.bfloat16):
    n = math.prod(data_size)

    cfgs = []
    for i in range(num_layers):
        is_first = i == 0
        cfgs.append(dict(d_in=input_size if is_first else hidden_size,
                         d_out=hidden_size,
                         w0=w0_initial if is_first else w0,
                         is_first=is_first, act="sine"))
    cfgs.append(dict(d_in=hidden_size, d_out=output_size, w0=w0,
                     is_first=False, act="sigmoid"))

    params = []
    for cfg in cfgs:
        key, kw, kb = jax.random.split(key, 3)
        if cfg["is_first"]:
            w_std = 1.0 / cfg["d_in"]
        else:
            w_std = math.sqrt(c / cfg["d_in"]) / cfg["w0"]
        W = jax.random.uniform(kw, (cfg["d_in"], cfg["d_out"], n),
                               minval=-w_std, maxval=w_std,
                               dtype=jnp.float32).astype(param_dtype)
        b = jax.random.uniform(kb, (cfg["d_out"], n),
                               minval=-w_std, maxval=w_std,
                               dtype=jnp.float32).astype(param_dtype)
        params.append(dict(W=W, b=b, w0=float(cfg["w0"]), act=cfg["act"]))
    return params


# --------------------------------------------------------------------------- #
# Forward wrapper: one fused pallas_call over tiles of the position axis.
# --------------------------------------------------------------------------- #
def siren_net_forward(x, params, tile_n=None):
    """x: (*data_size, input_size) channels-last -> (*data_size, output_size)."""
    data_size = x.shape[:-1]
    d_in0 = x.shape[-1]
    n = math.prod(data_size)

    if tile_n is None:
        tile_n = _pick_tile_n(n)
    n_pad = pl.cdiv(n, tile_n) * tile_n

    # Lane-dense activation layout: (Din, N), positions on the 128-lane axis.
    h = x.reshape(n, d_in0).T.astype(jnp.float32)
    if n_pad != n:
        h = jnp.pad(h, ((0, 0), (0, n_pad - n)))

    ins = [h]
    layer_cfgs = []
    for p in params:
        W, b = p["W"], p["b"]
        d_in, d_out = W.shape[0], W.shape[1]
        if n_pad != n:
            W = jnp.pad(W, ((0, 0), (0, 0), (0, n_pad - n)))
            b = jnp.pad(b, ((0, 0), (0, n_pad - n)))
        ins += [W, b]
        layer_cfgs.append((d_in, d_out, float(p["w0"]), p["act"]))

    d_out_last = layer_cfgs[-1][1]
    hidden = max([cfg[1] for cfg in layer_cfgs[:-1]] + [8])

    in_specs = [pl.BlockSpec((d_in0, tile_n), lambda i: (0, i))]
    for (d_in, d_out, _, _) in layer_cfgs:
        in_specs.append(pl.BlockSpec((d_in, d_out, tile_n), lambda i: (0, 0, i)))
        in_specs.append(pl.BlockSpec((d_out, tile_n), lambda i: (0, i)))

    kernel = functools.partial(_fused_siren_kernel, layer_cfgs=tuple(layer_cfgs))

    out = pl.pallas_call(
        kernel,
        out_shape=jax.ShapeDtypeStruct((d_out_last, n_pad), jnp.float32),
        grid=(n_pad // tile_n,),
        in_specs=in_specs,
        out_specs=pl.BlockSpec((d_out_last, tile_n), lambda i: (0, i)),
        scratch_shapes=[pltpu.VMEM((hidden, tile_n), jnp.float32)],
        compiler_params=pltpu.CompilerParams(
            dimension_semantics=("parallel",),
            # Safe on all generations (v7x has 64 MiB per-core physical VMEM).
            vmem_limit_bytes=40 * 1024 * 1024,
        ),
    )(*ins)

    out = out[:, :n].T.reshape(*data_size, d_out_last)
    return out.astype(x.dtype)


# --------------------------------------------------------------------------- #
# Plain-JAX reference (identical math, f32 accumulation) for validation.
# --------------------------------------------------------------------------- #
def siren_net_reference(x, params):
    data_size = x.shape[:-1]
    n = math.prod(data_size)
    h = x.reshape(n, x.shape[-1]).T.astype(jnp.float32)            # (Din, N)
    for p in params:
        W = p["W"].astype(jnp.float32)                             # (Din, Dout, N)
        b = p["b"].astype(jnp.float32)                             # (Dout, N)
        pre = jnp.einsum("ion,in->on", W, h) + b
        h = jnp.sin(p["w0"] * pre) if p["act"] == "sine" else jax.nn.sigmoid(pre)
    return h.T.reshape(*data_size, h.shape[0]).astype(x.dtype)


if __name__ == "__main__":
    key = jax.random.PRNGKey(0)
    k_x, k_p = jax.random.split(key)

    # SIREN-style config: 2-D coords -> 3 output channels, data_size=(2,16,16).
    data_size = (2, 16, 16)                       # N = 512 -> tile_n=256, grid=2
    input_size, hidden_size, output_size, num_layers = 2, 32, 3, 3

    x = jax.random.uniform(k_x, (*data_size, input_size), minval=-1.0, maxval=1.0,
                           dtype=jnp.float32)
    params = make_siren_net_params(k_p, data_size, input_size, hidden_size,
                                   output_size, num_layers)

    out = siren_net_forward(x, params)
    out = jax.block_until_ready(out)

    ref = siren_net_reference(x, params)
    assert out.shape == (*data_size, output_size), out.shape
    assert jnp.allclose(out, ref, atol=1e-3, rtol=1e-3), (
        "mismatch vs reference, max abs err = "
        f"{float(jnp.max(jnp.abs(out - ref)))}")

    print("KERNEL_OK")
</pallas_src>

<mosaic_0001>
module attributes {stable_mosaic.version = 11 : i64} {
  func.func @_fused_siren_kernel(%arg0: i32, %arg1: memref<2x256xf32, #tpu.memory_space<vmem>>, %arg2: memref<2x32x256xbf16, #tpu.memory_space<vmem>>, %arg3: memref<32x256xbf16, #tpu.memory_space<vmem>>, %arg4: memref<32x32x256xbf16, #tpu.memory_space<vmem>>, %arg5: memref<32x256xbf16, #tpu.memory_space<vmem>>, %arg6: memref<32x32x256xbf16, #tpu.memory_space<vmem>>, %arg7: memref<32x256xbf16, #tpu.memory_space<vmem>>, %arg8: memref<32x3x256xbf16, #tpu.memory_space<vmem>>, %arg9: memref<3x256xbf16, #tpu.memory_space<vmem>>, %arg10: memref<3x256xf32, #tpu.memory_space<vmem>>, %arg11: memref<32x256xf32, #tpu.memory_space<vmem>>) attributes {dimension_semantics = [#tpu.dimension_semantics<parallel>], iteration_bounds = array<i64: 2>, scalar_prefetch = 0 : i64, scratch_operands = 1 : i64, tpu.core_type = #tpu.core_type<tc>, window_params = [{transform_indices = @transform_0, window_bounds = array<i64: 2, 256>}, {transform_indices = @transform_1, window_bounds = array<i64: 2, 32, 256>}, {transform_indices = @transform_2, window_bounds = array<i64: 32, 256>}, {transform_indices = @transform_3, window_bounds = array<i64: 32, 32, 256>}, {transform_indices = @transform_4, window_bounds = array<i64: 32, 256>}, {transform_indices = @transform_5, window_bounds = array<i64: 32, 32, 256>}, {transform_indices = @transform_6, window_bounds = array<i64: 32, 256>}, {transform_indices = @transform_7, window_bounds = array<i64: 32, 3, 256>}, {transform_indices = @transform_8, window_bounds = array<i64: 3, 256>}, {transform_indices = @transform_9, window_bounds = array<i64: 3, 256>}]} {
    %c0 = arith.constant 0 : index
    %c0_0 = arith.constant 0 : index
    %0 = vector.load %arg3[%c0, %c0_0] : memref<32x256xbf16, #tpu.memory_space<vmem>>, vector<32x256xbf16>
    %1 = arith.extf %0 : vector<32x256xbf16> to vector<32x256xf32>
    %c0_1 = arith.constant 0 : index
    %c0_2 = arith.constant 0 : index
    %2 = vector.load %arg1[%c0_1, %c0_2] : memref<2x256xf32, #tpu.memory_space<vmem>>, vector<1x256xf32>
    %c0_3 = arith.constant 0 : index
    %c0_4 = arith.constant 0 : index
    %c0_5 = arith.constant 0 : index
    %3 = vector.load %arg2[%c0_3, %c0_4, %c0_5] : memref<2x32x256xbf16, #tpu.memory_space<vmem>>, vector<1x32x256xbf16>
    %4 = vector.shape_cast %3 : vector<1x32x256xbf16> to vector<32x256xbf16>
    %5 = arith.extf %4 : vector<32x256xbf16> to vector<32x256xf32>
    %6 = vector.broadcast %2 : vector<1x256xf32> to vector<32x256xf32>
    %7 = arith.mulf %6, %5 : vector<32x256xf32>
    %8 = arith.addf %1, %7 : vector<32x256xf32>
    %c1 = arith.constant 1 : index
    %c0_6 = arith.constant 0 : index
    %9 = vector.load %arg1[%c1, %c0_6] : memref<2x256xf32, #tpu.memory_space<vmem>>, vector<1x256xf32>
    %c1_7 = arith.constant 1 : index
    %c0_8 = arith.constant 0 : index
    %c0_9 = arith.constant 0 : index
    %10 = vector.load %arg2[%c1_7, %c0_8, %c0_9] : memref<2x32x256xbf16, #tpu.memory_space<vmem>>, vector<1x32x256xbf16>
    %11 = vector.shape_cast %10 : vector<1x32x256xbf16> to vector<32x256xbf16>
    %12 = arith.extf %11 : vector<32x256xbf16> to vector<32x256xf32>
    %13 = vector.broadcast %9 : vector<1x256xf32> to vector<32x256xf32>
    %14 = arith.mulf %13, %12 : vector<32x256xf32>
    %15 = arith.addf %8, %14 : vector<32x256xf32>
    %cst = arith.constant 3.000000e+01 : f32
    %16 = vector.broadcast %cst : f32 to vector<32x256xf32>
    %17 = arith.mulf %16, %15 : vector<32x256xf32>
    %18 = math.sin %17 : vector<32x256xf32>
    %c0_10 = arith.constant 0 : index
    %c0_11 = arith.constant 0 : index
    %19 = vector.load %arg11[%c0_10, %c0_11] : memref<32x256xf32, #tpu.memory_space<vmem>>, vector<32x256xf32>
    tpu.vector_store %arg11[%c0_10, %c0_11], %18 {strides = array<i32>} : memref<32x256xf32, #tpu.memory_space<vmem>>, vector<32x256xf32>,
    %c0_12 = arith.constant 0 : index
    %c0_13 = arith.constant 0 : index
    %20 = vector.load %arg5[%c0_12, %c0_13] : memref<32x256xbf16, #tpu.memory_space<vmem>>, vector<32x256xbf16>
    %21 = arith.extf %20 : vector<32x256xbf16> to vector<32x256xf32>
    %c0_14 = arith.constant 0 : index
    %c0_15 = arith.constant 0 : index
    %22 = vector.load %arg11[%c0_14, %c0_15] : memref<32x256xf32, #tpu.memory_space<vmem>>, vector<1x256xf32>
    %c0_16 = arith.constant 0 : index
    %c0_17 = arith.constant 0 : index
    %c0_18 = arith.constant 0 : index
    %23 = vector.load %arg4[%c0_16, %c0_17, %c0_18] : memref<32x32x256xbf16, #tpu.memory_space<vmem>>, vector<1x32x256xbf16>
    %24 = vector.shape_cast %23 : vector<1x32x256xbf16> to vector<32x256xbf16>
    %25 = arith.extf %24 : vector<32x256xbf16> to vector<32x256xf32>
    %26 = vector.broadcast %22 : vector<1x256xf32> to vector<32x256xf32>
    %27 = arith.mulf %26, %25 : vector<32x256xf32>
    %28 = arith.addf %21, %27 : vector<32x256xf32>
    %c1_19 = arith.constant 1 : index
    %c0_20 = arith.constant 0 : index
    %29 = vector.load %arg11[%c1_19, %c0_20] : memref<32x256xf32, #tpu.memory_space<vmem>>, vector<1x256xf32>
    %c1_21 = arith.constant 1 : index
    %c0_22 = arith.constant 0 : index
    %c0_23 = arith.constant 0 : index
    %30 = vector.load %arg4[%c1_21, %c0_22, %c0_23] : memref<32x32x256xbf16, #tpu.memory_space<vmem>>, vector<1x32x256xbf16>
    %31 = vector.shape_cast %30 : vector<1x32x256xbf16> to vector<32x256xbf16>
    %32 = arith.extf %31 : vector<32x256xbf16> to vector<32x256xf32>
    %33 = vector.broadcast %29 : vector<1x256xf32> to vector<32x256xf32>
    %34 = arith.mulf %33, %32 : vector<32x256xf32>
    %35 = arith.addf %28, %34 : vector<32x256xf32>
    %c2 = arith.constant 2 : index
    %c0_24 = arith.constant 0 : index
    %36 = vector.load %arg11[%c2, %c0_24] : memref<32x256xf32, #tpu.memory_space<vmem>>, vector<1x256xf32>
    %c2_25 = arith.constant 2 : index
    %c0_26 = arith.constant 0 : index
    %c0_27 = arith.constant 0 : index
    %37 = vector.load %arg4[%c2_25, %c0_26, %c0_27] : memref<32x32x256xbf16, #tpu.memory_space<vmem>>, vector<1x32x256xbf16>
    %38 = vector.shape_cast %37 : vector<1x32x256xbf16> to vector<32x256xbf16>
    %39 = arith.extf %38 : vector<32x256xbf16> to vector<32x256xf32>
    %40 = vector.broadcast %36 : vector<1x256xf32> to vector<32x256xf32>
    %41 = arith.mulf %40, %39 : vector<32x256xf32>
    %42 = arith.addf %35, %41 : vector<32x256xf32>
    %c3 = arith.constant 3 : index
    %c0_28 = arith.constant 0 : index
    %43 = vector.load %arg11[%c3, %c0_28] : memref<32x256xf32, #tpu.memory_space<vmem>>, vector<1x256xf32>
    %c3_29 = arith.constant 3 : index
    %c0_30 = arith.constant 0 : index
    %c0_31 = arith.constant 0 : index
    %44 = vector.load %arg4[%c3_29, %c0_30, %c0_31] : memref<32x32x256xbf16, #tpu.memory_space<vmem>>, vector<1x32x256xbf16>
    %45 = vector.shape_cast %44 : vector<1x32x256xbf16> to vector<32x256xbf16>
    %46 = arith.extf %45 : vector<32x256xbf16> to vector<32x256xf32>
    %47 = vector.broadcast %43 : vector<1x256xf32> to vector<32x256xf32>
    %48 = arith.mulf %47, %46 : vector<32x256xf32>
    %49 = arith.addf %42, %48 : vector<32x256xf32>
    %c4 = arith.constant 4 : index
    %c0_32 = arith.constant 0 : index
    %50 = vector.load %arg11[%c4, %c0_32] : memref<32x256xf32, #tpu.memory_space<vmem>>, vector<1x256xf32>
    %c4_33 = arith.constant 4 : index
    %c0_34 = arith.constant 0 : index
    %c0_35 = arith.constant 0 : index
    %51 = vector.load %arg4[%c4_33, %c0_34, %c0_35] : memref<32x32x256xbf16, #tpu.memory_space<vmem>>, vector<1x32x256xbf16>
    %52 = vector.shape_cast %51 : vector<1x32x256xbf16> to vector<32x256xbf16>
    %53 = arith.extf %52 : vector<32x256xbf16> to vector<32x256xf32>
    %54 = vector.broadcast %50 : vector<1x256xf32> to vector<32x256xf32>
    %55 = arith.mulf %54, %53 : vector<32x256xf32>
    %56 = arith.addf %49, %55 : vector<32x256xf32>
    %c5 = arith.constant 5 : index
    %c0_36 = arith.constant 0 : index
    %57 = vector.load %arg11[%c5, %c0_36] : memref<32x256xf32, #tpu.memory_space<vmem>>, vector<1x256xf32>
    %c5_37 = arith.constant 5 : index
    %c0_38 = arith.constant 0 : index
    %c0_39 = arith.constant 0 : index
    %58 = vector.load %arg4[%c5_37, %c0_38, %c0_39] : memref<32x32x256xbf16, #tpu.memory_space<vmem>>, vector<1x32x256xbf16>
    %59 = vector.shape_cast %58 : vector<1x32x256xbf16> to vector<32x256xbf16>
    %60 = arith.extf %59 : vector<32x256xbf16> to vector<32x256xf32>
    %61 = vector.broadcast %57 : vector<1x256xf32> to vector<32x256xf32>
    %62 = arith.mulf %61, %60 : vector<32x256xf32>
    %63 = arith.addf %56, %62 : vector<32x256xf32>
    %c6 = arith.constant 6 : index
    %c0_40 = arith.constant 0 : index
    %64 = vector.load %arg11[%c6, %c0_40] : memref<32x256xf32, #tpu.memory_space<vmem>>, vector<1x256xf32>
    %c6_41 = arith.constant 6 : index
    %c0_42 = arith.constant 0 : index
    %c0_43 = arith.constant 0 : index
    %65 = vector.load %arg4[%c6_41, %c0_42, %c0_43] : memref<32x32x256xbf16, #tpu.memory_space<vmem>>, vector<1x32x256xbf16>
    %66 = vector.shape_cast %65 : vector<1x32x256xbf16> to vector<32x256xbf16>
    %67 = arith.extf %66 : vector<32x256xbf16> to vector<32x256xf32>
    %68 = vector.broadcast %64 : vector<1x256xf32> to vector<32x256xf32>
    %69 = arith.mulf %68, %67 : vector<32x256xf32>
    %70 = arith.addf %63, %69 : vector<32x256xf32>
    %c7 = arith.constant 7 : index
    %c0_44 = arith.constant 0 : index
    %71 = vector.load %arg11[%c7, %c0_44] : memref<32x256xf32, #tpu.memory_space<vmem>>, vector<1x256xf32>
    %c7_45 = arith.constant 7 : index
    %c0_46 = arith.constant 0 : index
    %c0_47 = arith.constant 0 : index
    %72 = vector.load %arg4[%c7_45, %c0_46, %c0_47] : memref<32x32x256xbf16, #tpu.memory_space<vmem>>, vector<1x32x256xbf16>
    %73 = vector.shape_cast %72 : vector<1x32x256xbf16> to vector<32x256xbf16>
    %74 = arith.extf %73 : vector<32x256xbf16> to vector<32x256xf32>
    %75 = vector.broadcast %71 : vector<1x256xf32> to vector<32x256xf32>
    %76 = arith.mulf %75, %74 : vector<32x256xf32>
    %77 = arith.addf %70, %76 : vector<32x256xf32>
    %c8 = arith.constant 8 : index
    %c0_48 = arith.constant 0 : index
    %78 = vector.load %arg11[%c8, %c0_48] : memref<32x256xf32, #tpu.memory_space<vmem>>, vector<1x256xf32>
    %c8_49 = arith.constant 8 : index
    %c0_50 = arith.constant 0 : index
    %c0_51 = arith.constant 0 : index
    %79 = vector.load %arg4[%c8_49, %c0_50, %c0_51] : memref<32x32x256xbf16, #tpu.memory_space<vmem>>, vector<1x32x256xbf16>
    %80 = vector.shape_cast %79 : vector<1x32x256xbf16> to vector<32x256xbf16>
    %81 = arith.extf %80 : vector<32x256xbf16> to vector<32x256xf32>
    %82 = vector.broadcast %78 : vector<1x256xf32> to vector<32x256xf32>
    %83 = arith.mulf %82, %81 : vector<32x256xf32>
    %84 = arith.addf %77, %83 : vector<32x256xf32>
    %c9 = arith.constant 9 : index
    %c0_52 = arith.constant 0 : index
    %85 = vector.load %arg11[%c9, %c0_52] : memref<32x256xf32, #tpu.memory_space<vmem>>, vector<1x256xf32>
    %c9_53 = arith.constant 9 : index
    %c0_54 = arith.constant 0 : index
    %c0_55 = arith.constant 0 : index
    %86 = vector.load %arg4[%c9_53, %c0_54, %c0_55] : memref<32x32x256xbf16, #tpu.memory_space<vmem>>, vector<1x32x256xbf16>
    %87 = vector.shape_cast %86 : vector<1x32x256xbf16> to vector<32x256xbf16>
    %88 = arith.extf %87 : vector<32x256xbf16> to vector<32x256xf32>
    %89 = vector.broadcast %85 : vector<1x256xf32> to vector<32x256xf32>
    %90 = arith.mulf %89, %88 : vector<32x256xf32>
    %91 = arith.addf %84, %90 : vector<32x256xf32>
    %c10 = arith.constant 10 : index
    %c0_56 = arith.constant 0 : index
    %92 = vector.load %arg11[%c10, %c0_56] : memref<32x256xf32, #tpu.memory_space<vmem>>, vector<1x256xf32>
    %c10_57 = arith.constant 10 : index
    %c0_58 = arith.constant 0 : index
    %c0_59 = arith.constant 0 : index
    %93 = vector.load %arg4[%c10_57, %c0_58, %c0_59] : memref<32x32x256xbf16, #tpu.memory_space<vmem>>, vector<1x32x256xbf16>
    %94 = vector.shape_cast %93 : vector<1x32x256xbf16> to vector<32x256xbf16>
    %95 = arith.extf %94 : vector<32x256xbf16> to vector<32x256xf32>
    %96 = vector.broadcast %92 : vector<1x256xf32> to vector<32x256xf32>
    %97 = arith.mulf %96, %95 : vector<32x256xf32>
    %98 = arith.addf %91, %97 : vector<32x256xf32>
    %c11 = arith.constant 11 : index
    %c0_60 = arith.constant 0 : index
    %99 = vector.load %arg11[%c11, %c0_60] : memref<32x256xf32, #tpu.memory_space<vmem>>, vector<1x256xf32>
    %c11_61 = arith.constant 11 : index
    %c0_62 = arith.constant 0 : index
    %c0_63 = arith.constant 0 : index
    %100 = vector.load %arg4[%c11_61, %c0_62, %c0_63] : memref<32x32x256xbf16, #tpu.memory_space<vmem>>, vector<1x32x256xbf16>
    %101 = vector.shape_cast %100 : vector<1x32x256xbf16> to vector<32x256xbf16>
    %102 = arith.extf %101 : vector<32x256xbf16> to vector<32x256xf32>
    %103 = vector.broadcast %99 : vector<1x256xf32> to vector<32x256xf32>
    %104 = arith.mulf %103, %102 : vector<32x256xf32>
    %105 = arith.addf %98, %104 : vector<32x256xf32>
    %c12 = arith.constant 12 : index
    %c0_64 = arith.constant 0 : index
    %106 = vector.load %arg11[%c12, %c0_64] : memref<32x256xf32, #tpu.memory_space<vmem>>, vector<1x256xf32>
    %c12_65 = arith.constant 12 : index
    %c0_66 = arith.constant 0 : index
    %c0_67 = arith.constant 0 : index
    %107 = vector.load %arg4[%c12_65, %c0_66, %c0_67] : memref<32x32x256xbf16, #tpu.memory_space<vmem>>, vector<1x32x256xbf16>
    %108 = vector.shape_cast %107 : vector<1x32x256xbf16> to vector<32x256xbf16>
    %109 = arith.extf %108 : vector<32x256xbf16> to vector<32x256xf32>
    %110 = vector.broadcast %106 : vector<1x256xf32> to vector<32x256xf32>
    %111 = arith.mulf %110, %109 : vector<32x256xf32>
    %112 = arith.addf %105, %111 : vector<32x256xf32>
    %c13 = arith.constant 13 : index
    %c0_68 = arith.constant 0 : index
    %113 = vector.load %arg11[%c13, %c0_68] : memref<32x256xf32, #tpu.memory_space<vmem>>, vector<1x256xf32>
    %c13_69 = arith.constant 13 : index
    %c0_70 = arith.constant 0 : index
    %c0_71 = arith.constant 0 : index
    %114 = vector.load %arg4[%c13_69, %c0_70, %c0_71] : memref<32x32x256xbf16, #tpu.memory_space<vmem>>, vector<1x32x256xbf16>
    %115 = vector.shape_cast %114 : vector<1x32x256xbf16> to vector<32x256xbf16>
    %116 = arith.extf %115 : vector<32x256xbf16> to vector<32x256xf32>
    %117 = vector.broadcast %113 : vector<1x256xf32> to vector<32x256xf32>
    %118 = arith.mulf %117, %116 : vector<32x256xf32>
    %119 = arith.addf %112, %118 : vector<32x256xf32>
    %c14 = arith.constant 14 : index
    %c0_72 = arith.constant 0 : index
    %120 = vector.load %arg11[%c14, %c0_72] : memref<32x256xf32, #tpu.memory_space<vmem>>, vector<1x256xf32>
    %c14_73 = arith.constant 14 : index
    %c0_74 = arith.constant 0 : index
    %c0_75 = arith.constant 0 : index
    %121 = vector.load %arg4[%c14_73, %c0_74, %c0_75] : memref<32x32x256xbf16, #tpu.memory_space<vmem>>, vector<1x32x256xbf16>
    %122 = vector.shape_cast %121 : vector<1x32x256xbf16> to vector<32x256xbf16>
    %123 = arith.extf %122 : vector<32x256xbf16> to vector<32x256xf32>
    %124 = vector.broadcast %120 : vector<1x256xf32> to vector<32x256xf32>
    %125 = arith.mulf %124, %123 : vector<32x256xf32>
    %126 = arith.addf %119, %125 : vector<32x256xf32>
    %c15 = arith.constant 15 : index
    %c0_76 = arith.constant 0 : index
    %127 = vector.load %arg11[%c15, %c0_76] : memref<32x256xf32, #tpu.memory_space<vmem>>, vector<1x256xf32>
    %c15_77 = arith.constant 15 : index
    %c0_78 = arith.constant 0 : index
    %c0_79 = arith.constant 0 : index
    %128 = vector.load %arg4[%c15_77, %c0_78, %c0_79] : memref<32x32x256xbf16, #tpu.memory_space<vmem>>, vector<1x32x256xbf16>
    %129 = vector.shape_cast %128 : vector<1x32x256xbf16> to vector<32x256xbf16>
    %130 = arith.extf %129 : vector<32x256xbf16> to vector<32x256xf32>
    %131 = vector.broadcast %127 : vector<1x256xf32> to vector<32x256xf32>
    %132 = arith.mulf %131, %130 : vector<32x256xf32>
    %133 = arith.addf %126, %132 : vector<32x256xf32>
    %c16 = arith.constant 16 : index
    %c0_80 = arith.constant 0 : index
    %134 = vector.load %arg11[%c16, %c0_80] : memref<32x256xf32, #tpu.memory_space<vmem>>, vector<1x256xf32>
    %c16_81 = arith.constant 16 : index
    %c0_82 = arith.constant 0 : index
    %c0_83 = arith.constant 0 : index
    %135 = vector.load %arg4[%c16_81, %c0_82, %c0_83] : memref<32x32x256xbf16, #tpu.memory_space<vmem>>, vector<1x32x256xbf16>
    %136 = vector.shape_cast %135 : vector<1x32x256xbf16> to vector<32x256xbf16>
    %137 = arith.extf %136 : vector<32x256xbf16> to vector<32x256xf32>
    %138 = vector.broadcast %134 : vector<1x256xf32> to vector<32x256xf32>
    %139 = arith.mulf %138, %137 : vector<32x256xf32>
    %140 = arith.addf %133, %139 : vector<32x256xf32>
    %c17 = arith.constant 17 : index
    %c0_84 = arith.constant 0 : index
    %141 = vector.load %arg11[%c17, %c0_84] : memref<32x256xf32, #tpu.memory_space<vmem>>, vector<1x256xf32>
    %c17_85 = arith.constant 17 : index
    %c0_86 = arith.constant 0 : index
    %c0_87 = arith.constant 0 : index
    %142 = vector.load %arg4[%c17_85, %c0_86, %c0_87] : memref<32x32x256xbf16, #tpu.memory_space<vmem>>, vector<1x32x256xbf16>
    %143 = vector.shape_cast %142 : vector<1x32x256xbf16> to vector<32x256xbf16>
    %144 = arith.extf %143 : vector<32x256xbf16> to vector<32x256xf32>
    %145 = vector.broadcast %141 : vector<1x256xf32> to vector<32x256xf32>
    %146 = arith.mulf %145, %144 : vector<32x256xf32>
    %147 = arith.addf %140, %146 : vector<32x256xf32>
    %c18 = arith.constant 18 : index
    %c0_88 = arith.constant 0 : index
    %148 = vector.load %arg11[%c18, %c0_88] : memref<32x256xf32, #tpu.memory_space<vmem>>, vector<1x256xf32>
    %c18_89 = arith.constant 18 : index
    %c0_90 = arith.constant 0 : index
    %c0_91 = arith.constant 0 : index
    %149 = vector.load %arg4[%c18_89, %c0_90, %c0_91] : memref<32x32x256xbf16, #tpu.memory_space<vmem>>, vector<1x32x256xbf16>
    %150 = vector.shape_cast %149 : vector<1x32x256xbf16> to vector<32x256xbf16>
    %151 = arith.extf %150 : vector<32x256xbf16> to vector<32x256xf32>
    %152 = vector.broadcast %148 : vector<1x256xf32> to vector<32x256xf32>
    %153 = arith.mulf %152, %151 : vector<32x256xf32>
    %154 = arith.addf %147, %153 : vector<32x256xf32>
    %c19 = arith.constant 19 : index
    %c0_92 = arith.constant 0 : index
    %155 = vector.load %arg11[%c19, %c0_92] : memref<32x256xf32, #tpu.memory_space<vmem>>, vector<1x256xf32>
    %c19_93 = arith.constant 19 : index
    %c0_94 = arith.constant 0 : index
    %c0_95 = arith.constant 0 : index
    %156 = vector.load %arg4[%c19_93, %c0_94, %c0_95] : memref<32x32x256xbf16, #tpu.memory_space<vmem>>, vector<1x32x256xbf16>
    %157 = vector.shape_cast %156 : vector<1x32x256xbf16> to vector<32x256xbf16>
    %158 = arith.extf %157 : vector<32x256xbf16> to vector<32x256xf32>
    %159 = vector.broadcast %155 : vector<1x256xf32> to vector<32x256xf32>
    %160 = arith.mulf %159, %158 : vector<32x256xf32>
    %161 = arith.addf %154, %160 : vector<32x256xf32>
    %c20 = arith.constant 20 : index
    %c0_96 = arith.constant 0 : index
    %162 = vector.load %arg11[%c20, %c0_96] : memref<32x256xf32, #tpu.memory_space<vmem>>, vector<1x256xf32>
    %c20_97 = arith.constant 20 : index
    %c0_98 = arith.constant 0 : index
    %c0_99 = arith.constant 0 : index
    %163 = vector.load %arg4[%c20_97, %c0_98, %c0_99] : memref<32x32x256xbf16, #tpu.memory_space<vmem>>, vector<1x32x256xbf16>
    %164 = vector.shape_cast %163 : vector<1x32x256xbf16> to vector<32x256xbf16>
    %165 = arith.extf %164 : vector<32x256xbf16> to vector<32x256xf32>
    %166 = vector.broadcast %162 : vector<1x256xf32> to vector<32x256xf32>
    %167 = arith.mulf %166, %165 : vector<32x256xf32>
    %168 = arith.addf %161, %167 : vector<32x256xf32>
    %c21 = arith.constant 21 : index
    %c0_100 = arith.constant 0 : index
    %169 = vector.load %arg11[%c21, %c0_100] : memref<32x256xf32, #tpu.memory_space<vmem>>, vector<1x256xf32>
    %c21_101 = arith.constant 21 : index
    %c0_102 = arith.constant 0 : index
    %c0_103 = arith.constant 0 : index
    %170 = vector.load %arg4[%c21_101, %c0_102, %c0_103] : memref<32x32x256xbf16, #tpu.memory_space<vmem>>, vector<1x32x256xbf16>
    %171 = vector.shape_cast %170 : vector<1x32x256xbf16> to vector<32x256xbf16>
    %172 = arith.extf %171 : vector<32x256xbf16> to vector<32x256xf32>
    %173 = vector.broadcast %169 : vector<1x256xf32> to vector<32x256xf32>
    %174 = arith.mulf %173, %172 : vector<32x256xf32>
    %175 = arith.addf %168, %174 : vector<32x256xf32>
    %c22 = arith.constant 22 : index
    %c0_104 = arith.constant 0 : index
    %176 = vector.load %arg11[%c22, %c0_104] : memref<32x256xf32, #tpu.memory_space<vmem>>, vector<1x256xf32>
    %c22_105 = arith.constant 22 : index
    %c0_106 = arith.constant 0 : index
    %c0_107 = arith.constant 0 : index
    %177 = vector.load %arg4[%c22_105, %c0_106, %c0_107] : memref<32x32x256xbf16, #tpu.memory_space<vmem>>, vector<1x32x256xbf16>
    %178 = vector.shape_cast %177 : vector<1x32x256xbf16> to vector<32x256xbf16>
    %179 = arith.extf %178 : vector<32x256xbf16> to vector<32x256xf32>
    %180 = vector.broadcast %176 : vector<1x256xf32> to vector<32x256xf32>
    %181 = arith.mulf %180, %179 : vector<32x256xf32>
    %182 = arith.addf %175, %181 : vector<32x256xf32>
    %c23 = arith.constant 23 : index
    %c0_108 = arith.constant 0 : index
    %183 = vector.load %arg11[%c23, %c0_108] : memref<32x256xf32, #tpu.memory_space<vmem>>, vector<1x256xf32>
    %c23_109 = arith.constant 23 : index
    %c0_110 = arith.constant 0 : index
    %c0_111 = arith.constant 0 : index
    %184 = vector.load %arg4[%c23_109, %c0_110, %c0_111] : memref<32x32x256xbf16, #tpu.memory_space<vmem>>, vector<1x32x256xbf16>
    %185 = vector.shape_cast %184 : vector<1x32x256xbf16> to vector<32x256xbf16>
    %186 = arith.extf %185 : vector<32x256xbf16> to vector<32x256xf32>
    %187 = vector.broadcast %183 : vector<1x256xf32> to vector<32x256xf32>
    %188 = arith.mulf %187, %186 : vector<32x256xf32>
    %189 = arith.addf %182, %188 : vector<32x256xf32>
    %c24 = arith.constant 24 : index
    %c0_112 = arith.constant 0 : index
    %190 = vector.load %arg11[%c24, %c0_112] : memref<32x256xf32, #tpu.memory_space<vmem>>, vector<1x256xf32>
    %c24_113 = arith.constant 24 : index
    %c0_114 = arith.constant 0 : index
    %c0_115 = arith.constant 0 : index
    %191 = vector.load %arg4[%c24_113, %c0_114, %c0_115] : memref<32x32x256xbf16, #tpu.memory_space<vmem>>, vector<1x32x256xbf16>
    %192 = vector.shape_cast %191 : vector<1x32x256xbf16> to vector<32x256xbf16>
    %193 = arith.extf %192 : vector<32x256xbf16> to vector<32x256xf32>
    %194 = vector.broadcast %190 : vector<1x256xf32> to vector<32x256xf32>
    %195 = arith.mulf %194, %193 : vector<32x256xf32>
    %196 = arith.addf %189, %195 : vector<32x256xf32>
    %c25 = arith.constant 25 : index
    %c0_116 = arith.constant 0 : index
    %197 = vector.load %arg11[%c25, %c0_116] : memref<32x256xf32, #tpu.memory_space<vmem>>, vector<1x256xf32>
    %c25_117 = arith.constant 25 : index
    %c0_118 = arith.constant 0 : index
    %c0_119 = arith.constant 0 : index
    %198 = vector.load %arg4[%c25_117, %c0_118, %c0_119] : memref<32x32x256xbf16, #tpu.memory_space<vmem>>, vector<1x32x256xbf16>
    %199 = vector.shape_cast %198 : vector<1x32x256xbf16> to vector<32x256xbf16>
    %200 = arith.extf %199 : vector<32x256xbf16> to vector<32x256xf32>
    %201 = vector.broadcast %197 : vector<1x256xf32> to vector<32x256xf32>
    %202 = arith.mulf %201, %200 : vector<32x256xf32>
    %203 = arith.addf %196, %202 : vector<32x256xf32>
    %c26 = arith.constant 26 : index
    %c0_120 = arith.constant 0 : index
    %204 = vector.load %arg11[%c26, %c0_120] : memref<32x256xf32, #tpu.memory_space<vmem>>, vector<1x256xf32>
    %c26_121 = arith.constant 26 : index
    %c0_122 = arith.constant 0 : index
    %c0_123 = arith.constant 0 : index
    %205 = vector.load %arg4[%c26_121, %c0_122, %c0_123] : memref<32x32x256xbf16, #tpu.memory_space<vmem>>, vector<1x32x256xbf16>
    %206 = vector.shape_cast %205 : vector<1x32x256xbf16> to vector<32x256xbf16>
    %207 = arith.extf %206 : vector<32x256xbf16> to vector<32x256xf32>
    %208 = vector.broadcast %204 : vector<1x256xf32> to vector<32x256xf32>
    %209 = arith.mulf %208, %207 : vector<32x256xf32>
    %210 = arith.addf %203, %209 : vector<32x256xf32>
    %c27 = arith.constant 27 : index
    %c0_124 = arith.constant 0 : index
    %211 = vector.load %arg11[%c27, %c0_124] : memref<32x256xf32, #tpu.memory_space<vmem>>, vector<1x256xf32>
    %c27_125 = arith.constant 27 : index
    %c0_126 = arith.constant 0 : index
    %c0_127 = arith.constant 0 : index
    %212 = vector.load %arg4[%c27_125, %c0_126, %c0_127] : memref<32x32x256xbf16, #tpu.memory_space<vmem>>, vector<1x32x256xbf16>
    %213 = vector.shape_cast %212 : vector<1x32x256xbf16> to vector<32x256xbf16>
    %214 = arith.extf %213 : vector<32x256xbf16> to vector<32x256xf32>
    %215 = vector.broadcast %211 : vector<1x256xf32> to vector<32x256xf32>
    %216 = arith.mulf %215, %214 : vector<32x256xf32>
    %217 = arith.addf %210, %216 : vector<32x256xf32>
    %c28 = arith.constant 28 : index
    %c0_128 = arith.constant 0 : index
    %218 = vector.load %arg11[%c28, %c0_128] : memref<32x256xf32, #tpu.memory_space<vmem>>, vector<1x256xf32>
    %c28_129 = arith.constant 28 : index
    %c0_130 = arith.constant 0 : index
    %c0_131 = arith.constant 0 : index
    %219 = vector.load %arg4[%c28_129, %c0_130, %c0_131] : memref<32x32x256xbf16, #tpu.memory_space<vmem>>, vector<1x32x256xbf16>
    %220 = vector.shape_cast %219 : vector<1x32x256xbf16> to vector<32x256xbf16>
    %221 = arith.extf %220 : vector<32x256xbf16> to vector<32x256xf32>
    %222 = vector.broadcast %218 : vector<1x256xf32> to vector<32x256xf32>
    %223 = arith.mulf %222, %221 : vector<32x256xf32>
    %224 = arith.addf %217, %223 : vector<32x256xf32>
    %c29 = arith.constant 29 : index
    %c0_132 = arith.constant 0 : index
    %225 = vector.load %arg11[%c29, %c0_132] : memref<32x256xf32, #tpu.memory_space<vmem>>, vector<1x256xf32>
    %c29_133 = arith.constant 29 : index
    %c0_134 = arith.constant 0 : index
    %c0_135 = arith.constant 0 : index
    %226 = vector.load %arg4[%c29_133, %c0_134, %c0_135] : memref<32x32x256xbf16, #tpu.memory_space<vmem>>, vector<1x32x256xbf16>
    %227 = vector.shape_cast %226 : vector<1x32x256xbf16> to vector<32x256xbf16>
    %228 = arith.extf %227 : vector<32x256xbf16> to vector<32x256xf32>
    %229 = vector.broadcast %225 : vector<1x256xf32> to vector<32x256xf32>
    %230 = arith.mulf %229, %228 : vector<32x256xf32>
    %231 = arith.addf %224, %230 : vector<32x256xf32>
    %c30 = arith.constant 30 : index
    %c0_136 = arith.constant 0 : index
    %232 = vector.load %arg11[%c30, %c0_136] : memref<32x256xf32, #tpu.memory_space<vmem>>, vector<1x256xf32>
    %c30_137 = arith.constant 30 : index
    %c0_138 = arith.constant 0 : index
    %c0_139 = arith.constant 0 : index
    %233 = vector.load %arg4[%c30_137, %c0_138, %c0_139] : memref<32x32x256xbf16, #tpu.memory_space<vmem>>, vector<1x32x256xbf16>
    %234 = vector.shape_cast %233 : vector<1x32x256xbf16> to vector<32x256xbf16>
    %235 = arith.extf %234 : vector<32x256xbf16> to vector<32x256xf32>
    %236 = vector.broadcast %232 : vector<1x256xf32> to vector<32x256xf32>
    %237 = arith.mulf %236, %235 : vector<32x256xf32>
    %238 = arith.addf %231, %237 : vector<32x256xf32>
    %c31 = arith.constant 31 : index
    %c0_140 = arith.constant 0 : index
    %239 = vector.load %arg11[%c31, %c0_140] : memref<32x256xf32, #tpu.memory_space<vmem>>, vector<1x256xf32>
    %c31_141 = arith.constant 31 : index
    %c0_142 = arith.constant 0 : index
    %c0_143 = arith.constant 0 : index
    %240 = vector.load %arg4[%c31_141, %c0_142, %c0_143] : memref<32x32x256xbf16, #tpu.memory_space<vmem>>, vector<1x32x256xbf16>
    %241 = vector.shape_cast %240 : vector<1x32x256xbf16> to vector<32x256xbf16>
    %242 = arith.extf %241 : vector<32x256xbf16> to vector<32x256xf32>
    %243 = vector.broadcast %239 : vector<1x256xf32> to vector<32x256xf32>
    %244 = arith.mulf %243, %242 : vector<32x256xf32>
    %245 = arith.addf %238, %244 : vector<32x256xf32>
    %cst_144 = arith.constant 1.000000e+00 : f32
    %246 = vector.broadcast %cst_144 : f32 to vector<32x256xf32>
    %247 = arith.mulf %246, %245 : vector<32x256xf32>
    %248 = math.sin %247 : vector<32x256xf32>
    %c0_145 = arith.constant 0 : index
    %c0_146 = arith.constant 0 : index
    %249 = vector.load %arg11[%c0_145, %c0_146] : memref<32x256xf32, #tpu.memory_space<vmem>>, vector<32x256xf32>
    tpu.vector_store %arg11[%c0_145, %c0_146], %248 {strides = array<i32>} : memref<32x256xf32, #tpu.memory_space<vmem>>, vector<32x256xf32>,
    %c0_147 = arith.constant 0 : index
    %c0_148 = arith.constant 0 : index
    %250 = vector.load %arg7[%c0_147, %c0_148] : memref<32x256xbf16, #tpu.memory_space<vmem>>, vector<32x256xbf16>
    %251 = arith.extf %250 : vector<32x256xbf16> to vector<32x256xf32>
    %c0_149 = arith.constant 0 : index
    %c0_150 = arith.constant 0 : index
    %252 = vector.load %arg11[%c0_149, %c0_150] : memref<32x256xf32, #tpu.memory_space<vmem>>, vector<1x256xf32>
    %c0_151 = arith.constant 0 : index
    %c0_152 = arith.constant 0 : index
    %c0_153 = arith.constant 0 : index
    %253 = vector.load %arg6[%c0_151, %c0_152, %c0_153] : memref<32x32x256xbf16, #tpu.memory_space<vmem>>, vector<1x32x256xbf16>
    %254 = vector.shape_cast %253 : vector<1x32x256xbf16> to vector<32x256xbf16>
    %255 = arith.extf %254 : vector<32x256xbf16> to vector<32x256xf32>
    %256 = vector.broadcast %252 : vector<1x256xf32> to vector<32x256xf32>
    %257 = arith.mulf %256, %255 : vector<32x256xf32>
    %258 = arith.addf %251, %257 : vector<32x256xf32>
    %c1_154 = arith.constant 1 : index
    %c0_155 = arith.constant 0 : index
    %259 = vector.load %arg11[%c1_154, %c0_155] : memref<32x256xf32, #tpu.memory_space<vmem>>, vector<1x256xf32>
    %c1_156 = arith.constant 1 : index
    %c0_157 = arith.constant 0 : index
    %c0_158 = arith.constant 0 : index
    %260 = vector.load %arg6[%c1_156, %c0_157, %c0_158] : memref<32x32x256xbf16, #tpu.memory_space<vmem>>, vector<1x32x256xbf16>
    %261 = vector.shape_cast %260 : vector<1x32x256xbf16> to vector<32x256xbf16>
    %262 = arith.extf %261 : vector<32x256xbf16> to vector<32x256xf32>
    %263 = vector.broadcast %259 : vector<1x256xf32> to vector<32x256xf32>
    %264 = arith.mulf %263, %262 : vector<32x256xf32>
    %265 = arith.addf %258, %264 : vector<32x256xf32>
    %c2_159 = arith.constant 2 : index
    %c0_160 = arith.constant 0 : index
    %266 = vector.load %arg11[%c2_159, %c0_160] : memref<32x256xf32, #tpu.memory_space<vmem>>, vector<1x256xf32>
    %c2_161 = arith.constant 2 : index
    %c0_162 = arith.constant 0 : index
    %c0_163 = arith.constant 0 : index
    %267 = vector.load %arg6[%c2_161, %c0_162, %c0_163] : memref<32x32x256xbf16, #tpu.memory_space<vmem>>, vector<1x32x256xbf16>
    %268 = vector.shape_cast %267 : vector<1x32x256xbf16> to vector<32x256xbf16>
    %269 = arith.extf %268 : vector<32x256xbf16> to vector<32x256xf32>
    %270 = vector.broadcast %266 : vector<1x256xf32> to vector<32x256xf32>
    %271 = arith.mulf %270, %269 : vector<32x256xf32>
    %272 = arith.addf %265, %271 : vector<32x256xf32>
    %c3_164 = arith.constant 3 : index
    %c0_165 = arith.constant 0 : index
    %273 = vector.load %arg11[%c3_164, %c0_165] : memref<32x256xf32, #tpu.memory_space<vmem>>, vector<1x256xf32>
    %c3_166 = arith.constant 3 : index
    %c0_167 = arith.constant 0 : index
    %c0_168 = arith.constant 0 : index
    %274 = vector.load %arg6[%c3_166, %c0_167, %c0_168] : memref<32x32x256xbf16, #tpu.memory_space<vmem>>, vector<1x32x256xbf16>
    %275 = vector.shape_cast %274 : vector<1x32x256xbf16> to vector<32x256xbf16>
    %276 = arith.extf %275 : vector<32x256xbf16> to vector<32x256xf32>
    %277 = vector.broadcast %273 : vector<1x256xf32> to vector<32x256xf32>
    %278 = arith.mulf %277, %276 : vector<32x256xf32>
    %279 = arith.addf %272, %278 : vector<32x256xf32>
    %c4_169 = arith.constant 4 : index
    %c0_170 = arith.constant 0 : index
    %280 = vector.load %arg11[%c4_169, %c0_170] : memref<32x256xf32, #tpu.memory_space<vmem>>, vector<1x256xf32>
    %c4_171 = arith.constant 4 : index
    %c0_172 = arith.constant 0 : index
    %c0_173 = arith.constant 0 : index
    %281 = vector.load %arg6[%c4_171, %c0_172, %c0_173] : memref<32x32x256xbf16, #tpu.memory_space<vmem>>, vector<1x32x256xbf16>
    %282 = vector.shape_cast %281 : vector<1x32x256xbf16> to vector<32x256xbf16>
    %283 = arith.extf %282 : vector<32x256xbf16> to vector<32x256xf32>
    %284 = vector.broadcast %280 : vector<1x256xf32> to vector<32x256xf32>
    %285 = arith.mulf %284, %283 : vector<32x256xf32>
    %286 = arith.addf %279, %285 : vector<32x256xf32>
    %c5_174 = arith.constant 5 : index
    %c0_175 = arith.constant 0 : index
    %287 = vector.load %arg11[%c5_174, %c0_175] : memref<32x256xf32, #tpu.memory_space<vmem>>, vector<1x256xf32>
    %c5_176 = arith.constant 5 : index
    %c0_177 = arith.constant 0 : index
    %c0_178 = arith.constant 0 : index
    %288 = vector.load %arg6[%c5_176, %c0_177, %c0_178] : memref<32x32x256xbf16, #tpu.memory_space<vmem>>, vector<1x32x256xbf16>
    %289 = vector.shape_cast %288 : vector<1x32x256xbf16> to vector<32x256xbf16>
    %290 = arith.extf %289 : vector<32x256xbf16> to vector<32x256xf32>
    %291 = vector.broadcast %287 : vector<1x256xf32> to vector<32x256xf32>
    %292 = arith.mulf %291, %290 : vector<32x256xf32>
    %293 = arith.addf %286, %292 : vector<32x256xf32>
    %c6_179 = arith.constant 6 : index
    %c0_180 = arith.constant 0 : index
    %294 = vector.load %arg11[%c6_179, %c0_180] : memref<32x256xf32, #tpu.memory_space<vmem>>, vector<1x256xf32>
    %c6_181 = arith.constant 6 : index
    %c0_182 = arith.constant 0 : index
    %c0_183 = arith.constant 0 : index
    %295 = vector.load %arg6[%c6_181, %c0_182, %c0_183] : memref<32x32x256xbf16, #tpu.memory_space<vmem>>, vector<1x32x256xbf16>
    %296 = vector.shape_cast %295 : vector<1x32x256xbf16> to vector<32x256xbf16>
    %297 = arith.extf %296 : vector<32x256xbf16> to vector<32x256xf32>
    %298 = vector.broadcast %294 : vector<1x256xf32> to vector<32x256xf32>
    %299 = arith.mulf %298, %297 : vector<32x256xf32>
    %300 = arith.addf %293, %299 : vector<32x256xf32>
    %c7_184 = arith.constant 7 : index
    %c0_185 = arith.constant 0 : index
    %301 = vector.load %arg11[%c7_184, %c0_185] : memref<32x256xf32, #tpu.memory_space<vmem>>, vector<1x256xf32>
    %c7_186 = arith.constant 7 : index
    %c0_187 = arith.constant 0 : index
    %c0_188 = arith.constant 0 : index
    %302 = vector.load %arg6[%c7_186, %c0_187, %c0_188] : memref<32x32x256xbf16, #tpu.memory_space<vmem>>, vector<1x32x256xbf16>
    %303 = vector.shape_cast %302 : vector<1x32x256xbf16> to vector<32x256xbf16>
    %304 = arith.extf %303 : vector<32x256xbf16> to vector<32x256xf32>
    %305 = vector.broadcast %301 : vector<1x256xf32> to vector<32x256xf32>
    %306 = arith.mulf %305, %304 : vector<32x256xf32>
    %307 = arith.addf %300, %306 : vector<32x256xf32>
    %c8_189 = arith.constant 8 : index
    %c0_190 = arith.constant 0 : index
    %308 = vector.load %arg11[%c8_189, %c0_190] : memref<32x256xf32, #tpu.memory_space<vmem>>, vector<1x256xf32>
    %c8_191 = arith.constant 8 : index
    %c0_192 = arith.constant 0 : index
    %c0_193 = arith.constant 0 : index
    %309 = vector.load %arg6[%c8_191, %c0_192, %c0_193] : memref<32x32x256xbf16, #tpu.memory_space<vmem>>, vector<1x32x256xbf16>
    %310 = vector.shape_cast %309 : vector<1x32x256xbf16> to vector<32x256xbf16>
    %311 = arith.extf %310 : vector<32x256xbf16> to vector<32x256xf32>
    %312 = vector.broadcast %308 : vector<1x256xf32> to vector<32x256xf32>
    %313 = arith.mulf %312, %311 : vector<32x256xf32>
    %314 = arith.addf %307, %313 : vector<32x256xf32>
    %c9_194 = arith.constant 9 : index
    %c0_195 = arith.constant 0 : index
    %315 = vector.load %arg11[%c9_194, %c0_195] : memref<32x256xf32, #tpu.memory_space<vmem>>, vector<1x256xf32>
    %c9_196 = arith.constant 9 : index
    %c0_197 = arith.constant 0 : index
    %c0_198 = arith.constant 0 : index
    %316 = vector.load %arg6[%c9_196, %c0_197, %c0_198] : memref<32x32x256xbf16, #tpu.memory_space<vmem>>, vector<1x32x256xbf16>
    %317 = vector.shape_cast %316 : vector<1x32x256xbf16> to vector<32x256xbf16>
    %318 = arith.extf %317 : vector<32x256xbf16> to vector<32x256xf32>
    %319 = vector.broadcast %315 : vector<1x256xf32> to vector<32x256xf32>
    %320 = arith.mulf %319, %318 : vector<32x256xf32>
    %321 = arith.addf %314, %320 : vector<32x256xf32>
    %c10_199 = arith.constant 10 : index
    %c0_200 = arith.constant 0 : index
    %322 = vector.load %arg11[%c10_199, %c0_200] : memref<32x256xf32, #tpu.memory_space<vmem>>, vector<1x256xf32>
    %c10_201 = arith.constant 10 : index
    %c0_202 = arith.constant 0 : index
    %c0_203 = arith.constant 0 : index
    %323 = vector.load %arg6[%c10_201, %c0_202, %c0_203] : memref<32x32x256xbf16, #tpu.memory_space<vmem>>, vector<1x32x256xbf16>
    %324 = vector.shape_cast %323 : vector<1x32x256xbf16> to vector<32x256xbf16>
    %325 = arith.extf %324 : vector<32x256xbf16> to vector<32x256xf32>
    %326 = vector.broadcast %322 : vector<1x256xf32> to vector<32x256xf32>
    %327 = arith.mulf %326, %325 : vector<32x256xf32>
    %328 = arith.addf %321, %327 : vector<32x256xf32>
    %c11_204 = arith.constant 11 : index
    %c0_205 = arith.constant 0 : index
    %329 = vector.load %arg11[%c11_204, %c0_205] : memref<32x256xf32, #tpu.memory_space<vmem>>, vector<1x256xf32>
    %c11_206 = arith.constant 11 : index
    %c0_207 = arith.constant 0 : index
    %c0_208 = arith.constant 0 : index
    %330 = vector.load %arg6[%c11_206, %c0_207, %c0_208] : memref<32x32x256xbf16, #tpu.memory_space<vmem>>, vector<1x32x256xbf16>
    %331 = vector.shape_cast %330 : vector<1x32x256xbf16> to vector<32x256xbf16>
    %332 = arith.extf %331 : vector<32x256xbf16> to vector<32x256xf32>
    %333 = vector.broadcast %329 : vector<1x256xf32> to vector<32x256xf32>
    %334 = arith.mulf %333, %332 : vector<32x256xf32>
    %335 = arith.addf %328, %334 : vector<32x256xf32>
    %c12_209 = arith.constant 12 : index
    %c0_210 = arith.constant 0 : index
    %336 = vector.load %arg11[%c12_209, %c0_210] : memref<32x256xf32, #tpu.memory_space<vmem>>, vector<1x256xf32>
    %c12_211 = arith.constant 12 : index
    %c0_212 = arith.constant 0 : index
    %c0_213 = arith.constant 0 : index
    %337 = vector.load %arg6[%c12_211, %c0_212, %c0_213] : memref<32x32x256xbf16, #tpu.memory_space<vmem>>, vector<1x32x256xbf16>
    %338 = vector.shape_cast %337 : vector<1x32x256xbf16> to vector<32x256xbf16>
    %339 = arith.extf %338 : vector<32x256xbf16> to vector<32x256xf32>
    %340 = vector.broadcast %336 : vector<1x256xf32> to vector<32x256xf32>
    %341 = arith.mulf %340, %339 : vector<32x256xf32>
    %342 = arith.addf %335, %341 : vector<32x256xf32>
    %c13_214 = arith.constant 13 : index
    %c0_215 = arith.constant 0 : index
    %343 = vector.load %arg11[%c13_214, %c0_215] : memref<32x256xf32, #tpu.memory_space<vmem>>, vector<1x256xf32>
    %c13_216 = arith.constant 13 : index
    %c0_217 = arith.constant 0 : index
    %c0_218 = arith.constant 0 : index
    %344 = vector.load %arg6[%c13_216, %c0_217, %c0_218] : memref<32x32x256xbf16, #tpu.memory_space<vmem>>, vector<1x32x256xbf16>
    %345 = vector.shape_cast %344 : vector<1x32x256xbf16> to vector<32x256xbf16>
    %346 = arith.extf %345 : vector<32x256xbf16> to vector<32x256xf32>
    %347 = vector.broadcast %343 : vector<1x256xf32> to vector<32x256xf32>
    %348 = arith.mulf %347, %346 : vector<32x256xf32>
    %349 = arith.addf %342, %348 : vector<32x256xf32>
    %c14_219 = arith.constant 14 : index
    %c0_220 = arith.constant 0 : index
    %350 = vector.load %arg11[%c14_219, %c0_220] : memref<32x256xf32, #tpu.memory_space<vmem>>, vector<1x256xf32>
    %c14_221 = arith.constant 14 : index
    %c0_222 = arith.constant 0 : index
    %c0_223 = arith.constant 0 : index
    %351 = vector.load %arg6[%c14_221, %c0_222, %c0_223] : memref<32x32x256xbf16, #tpu.memory_space<vmem>>, vector<1x32x256xbf16>
    %352 = vector.shape_cast %351 : vector<1x32x256xbf16> to vector<32x256xbf16>
    %353 = arith.extf %352 : vector<32x256xbf16> to vector<32x256xf32>
    %354 = vector.broadcast %350 : vector<1x256xf32> to vector<32x256xf32>
    %355 = arith.mulf %354, %353 : vector<32x256xf32>
    %356 = arith.addf %349, %355 : vector<32x256xf32>
    %c15_224 = arith.constant 15 : index
    %c0_225 = arith.constant 0 : index
    %357 = vector.load %arg11[%c15_224, %c0_225] : memref<32x256xf32, #tpu.memory_space<vmem>>, vector<1x256xf32>
    %c15_226 = arith.constant 15 : index
    %c0_227 = arith.constant 0 : index
    %c0_228 = arith.constant 0 : index
    %358 = vector.load %arg6[%c15_226, %c0_227, %c0_228] : memref<32x32x256xbf16, #tpu.memory_space<vmem>>, vector<1x32x256xbf16>
    %359 = vector.shape_cast %358 : vector<1x32x256xbf16> to vector<32x256xbf16>
    %360 = arith.extf %359 : vector<32x256xbf16> to vector<32x256xf32>
    %361 = vector.broadcast %357 : vector<1x256xf32> to vector<32x256xf32>
    %362 = arith.mulf %361, %360 : vector<32x256xf32>
    %363 = arith.addf %356, %362 : vector<32x256xf32>
    %c16_229 = arith.constant 16 : index
    %c0_230 = arith.constant 0 : index
    %364 = vector.load %arg11[%c16_229, %c0_230] : memref<32x256xf32, #tpu.memory_space<vmem>>, vector<1x256xf32>
    %c16_231 = arith.constant 16 : index
    %c0_232 = arith.constant 0 : index
    %c0_233 = arith.constant 0 : index
    %365 = vector.load %arg6[%c16_231, %c0_232, %c0_233] : memref<32x32x256xbf16, #tpu.memory_space<vmem>>, vector<1x32x256xbf16>
    %366 = vector.shape_cast %365 : vector<1x32x256xbf16> to vector<32x256xbf16>
    %367 = arith.extf %366 : vector<32x256xbf16> to vector<32x256xf32>
    %368 = vector.broadcast %364 : vector<1x256xf32> to vector<32x256xf32>
    %369 = arith.mulf %368, %367 : vector<32x256xf32>
    %370 = arith.addf %363, %369 : vector<32x256xf32>
    %c17_234 = arith.constant 17 : index
    %c0_235 = arith.constant 0 : index
    %371 = vector.load %arg11[%c17_234, %c0_235] : memref<32x256xf32, #tpu.memory_space<vmem>>, vector<1x256xf32>
    %c17_236 = arith.constant 17 : index
    %c0_237 = arith.constant 0 : index
    %c0_238 = arith.constant 0 : index
    %372 = vector.load %arg6[%c17_236, %c0_237, %c0_238] : memref<32x32x256xbf16, #tpu.memory_space<vmem>>, vector<1x32x256xbf16>
    %373 = vector.shape_cast %372 : vector<1x32x256xbf16> to vector<32x256xbf16>
    %374 = arith.extf %373 : vector<32x256xbf16> to vector<32x256xf32>
    %375 = vector.broadcast %371 : vector<1x256xf32> to vector<32x256xf32>
    %376 = arith.mulf %375, %374 : vector<32x256xf32>
    %377 = arith.addf %370, %376 : vector<32x256xf32>
    %c18_239 = arith.constant 18 : index
    %c0_240 = arith.constant 0 : index
    %378 = vector.load %arg11[%c18_239, %c0_240] : memref<32x256xf32, #tpu.memory_space<vmem>>, vector<1x256xf32>
    %c18_241 = arith.constant 18 : index
    %c0_242 = arith.constant 0 : index
    %c0_243 = arith.constant 0 : index
    %379 = vector.load %arg6[%c18_241, %c0_242, %c0_243] : memref<32x32x256xbf16, #tpu.memory_space<vmem>>, vector<1x32x256xbf16>
    %380 = vector.shape_cast %379 : vector<1x32x256xbf16> to vector<32x256xbf16>
    %381 = arith.extf %380 : vector<32x256xbf16> to vector<32x256xf32>
    %382 = vector.broadcast %378 : vector<1x256xf32> to vector<32x256xf32>
    %383 = arith.mulf %382, %381 : vector<32x256xf32>
    %384 = arith.addf %377, %383 : vector<32x256xf32>
    %c19_244 = arith.constant 19 : index
    %c0_245 = arith.constant 0 : index
    %385 = vector.load %arg11[%c19_244, %c0_245] : memref<32x256xf32, #tpu.memory_space<vmem>>, vector<1x256xf32>
    %c19_246 = arith.constant 19 : index
    %c0_247 = arith.constant 0 : index
    %c0_248 = arith.constant 0 : index
    %386 = vector.load %arg6[%c19_246, %c0_247, %c0_248] : memref<32x32x256xbf16, #tpu.memory_space<vmem>>, vector<1x32x256xbf16>
    %387 = vector.shape_cast %386 : vector<1x32x256xbf16> to vector<32x256xbf16>
    %388 = arith.extf %387 : vector<32x256xbf16> to vector<32x256xf32>
    %389 = vector.broadcast %385 : vector<1x256xf32> to vector<32x256xf32>
    %390 = arith.mulf %389, %388 : vector<32x256xf32>
    %391 = arith.addf %384, %390 : vector<32x256xf32>
    %c20_249 = arith.constant 20 : index
    %c0_250 = arith.constant 0 : index
    %392 = vector.load %arg11[%c20_249, %c0_250] : memref<32x256xf32, #tpu.memory_space<vmem>>, vector<1x256xf32>
    %c20_251 = arith.constant 20 : index
    %c0_252 = arith.constant 0 : index
    %c0_253 = arith.constant 0 : index
    %393 = vector.load %arg6[%c20_251, %c0_252, %c0_253] : memref<32x32x256xbf16, #tpu.memory_space<vmem>>, vector<1x32x256xbf16>
    %394 = vector.shape_cast %393 : vector<1x32x256xbf16> to vector<32x256xbf16>
    %395 = arith.extf %394 : vector<32x256xbf16> to vector<32x256xf32>
    %396 = vector.broadcast %392 : vector<1x256xf32> to vector<32x256xf32>
    %397 = arith.mulf %396, %395 : vector<32x256xf32>
    %398 = arith.addf %391, %397 : vector<32x256xf32>
    %c21_254 = arith.constant 21 : index
    %c0_255 = arith.constant 0 : index
    %399 = vector.load %arg11[%c21_254, %c0_255] : memref<32x256xf32, #tpu.memory_space<vmem>>, vector<1x256xf32>
    %c21_256 = arith.constant 21 : index
    %c0_257 = arith.constant 0 : index
    %c0_258 = arith.constant 0 : index
    %400 = vector.load %arg6[%c21_256, %c0_257, %c0_258] : memref<32x32x256xbf16, #tpu.memory_space<vmem>>, vector<1x32x256xbf16>
    %401 = vector.shape_cast %400 : vector<1x32x256xbf16> to vector<32x256xbf16>
    %402 = arith.extf %401 : vector<32x256xbf16> to vector<32x256xf32>
    %403 = vector.broadcast %399 : vector<1x256xf32> to vector<32x256xf32>
    %404 = arith.mulf %403, %402 : vector<32x256xf32>
    %405 = arith.addf %398, %404 : vector<32x256xf32>
    %c22_259 = arith.constant 22 : index
    %c0_260 = arith.constant 0 : index
    %406 = vector.load %arg11[%c22_259, %c0_260] : memref<32x256xf32, #tpu.memory_space<vmem>>, vector<1x256xf32>
    %c22_261 = arith.constant 22 : index
    %c0_262 = arith.constant 0 : index
    %c0_263 = arith.constant 0 : index
    %407 = vector.load %arg6[%c22_261, %c0_262, %c0_263] : memref<32x32x256xbf16, #tpu.memory_space<vmem>>, vector<1x32x256xbf16>
    %408 = vector.shape_cast %407 : vector<1x32x256xbf16> to vector<32x256xbf16>
    %409 = arith.extf %408 : vector<32x256xbf16> to vector<32x256xf32>
    %410 = vector.broadcast %406 : vector<1x256xf32> to vector<32x256xf32>
    %411 = arith.mulf %410, %409 : vector<32x256xf32>
    %412 = arith.addf %405, %411 : vector<32x256xf32>
    %c23_264 = arith.constant 23 : index
    %c0_265 = arith.constant 0 : index
    %413 = vector.load %arg11[%c23_264, %c0_265] : memref<32x256xf32, #tpu.memory_space<vmem>>, vector<1x256xf32>
    %c23_266 = arith.constant 23 : index
    %c0_267 = arith.constant 0 : index
    %c0_268 = arith.constant 0 : index
    %414 = vector.load %arg6[%c23_266, %c0_267, %c0_268] : memref<32x32x256xbf16, #tpu.memory_space<vmem>>, vector<1x32x256xbf16>
    %415 = vector.shape_cast %414 : vector<1x32x256xbf16> to vector<32x256xbf16>
    %416 = arith.extf %415 : vector<32x256xbf16> to vector<32x256xf32>
    %417 = vector.broadcast %413 : vector<1x256xf32> to vector<32x256xf32>
    %418 = arith.mulf %417, %416 : vector<32x256xf32>
    %419 = arith.addf %412, %418 : vector<32x256xf32>
    %c24_269 = arith.constant 24 : index
    %c0_270 = arith.constant 0 : index
    %420 = vector.load %arg11[%c24_269, %c0_270] : memref<32x256xf32, #tpu.memory_space<vmem>>, vector<1x256xf32>
    %c24_271 = arith.constant 24 : index
    %c0_272 = arith.constant 0 : index
    %c0_273 = arith.constant 0 : index
    %421 = vector.load %arg6[%c24_271, %c0_272, %c0_273] : memref<32x32x256xbf16, #tpu.memory_space<vmem>>, vector<1x32x256xbf16>
    %422 = vector.shape_cast %421 : vector<1x32x256xbf16> to vector<32x256xbf16>
    %423 = arith.extf %422 : vector<32x256xbf16> to vector<32x256xf32>
    %424 = vector.broadcast %420 : vector<1x256xf32> to vector<32x256xf32>
    %425 = arith.mulf %424, %423 : vector<32x256xf32>
    %426 = arith.addf %419, %425 : vector<32x256xf32>
    %c25_274 = arith.constant 25 : index
    %c0_275 = arith.constant 0 : index
    %427 = vector.load %arg11[%c25_274, %c0_275] : memref<32x256xf32, #tpu.memory_space<vmem>>, vector<1x256xf32>
    %c25_276 = arith.constant 25 : index
    %c0_277 = arith.constant 0 : index
    %c0_278 = arith.constant 0 : index
    %428 = vector.load %arg6[%c25_276, %c0_277, %c0_278] : memref<32x32x256xbf16, #tpu.memory_space<vmem>>, vector<1x32x256xbf16>
    %429 = vector.shape_cast %428 : vector<1x32x256xbf16> to vector<32x256xbf16>
    %430 = arith.extf %429 : vector<32x256xbf16> to vector<32x256xf32>
    %431 = vector.broadcast %427 : vector<1x256xf32> to vector<32x256xf32>
    %432 = arith.mulf %431, %430 : vector<32x256xf32>
    %433 = arith.addf %426, %432 : vector<32x256xf32>
    %c26_279 = arith.constant 26 : index
    %c0_280 = arith.constant 0 : index
    %434 = vector.load %arg11[%c26_279, %c0_280] : memref<32x256xf32, #tpu.memory_space<vmem>>, vector<1x256xf32>
    %c26_281 = arith.constant 26 : index
    %c0_282 = arith.constant 0 : index
    %c0_283 = arith.constant 0 : index
    %435 = vector.load %arg6[%c26_281, %c0_282, %c0_283] : memref<32x32x256xbf16, #tpu.memory_space<vmem>>, vector<1x32x256xbf16>
    %436 = vector.shape_cast %435 : vector<1x32x256xbf16> to vector<32x256xbf16>
    %437 = arith.extf %436 : vector<32x256xbf16> to vector<32x256xf32>
    %438 = vector.broadcast %434 : vector<1x256xf32> to vector<32x256xf32>
    %439 = arith.mulf %438, %437 : vector<32x256xf32>
    %440 = arith.addf %433, %439 : vector<32x256xf32>
    %c27_284 = arith.constant 27 : index
    %c0_285 = arith.constant 0 : index
    %441 = vector.load %arg11[%c27_284, %c0_285] : memref<32x256xf32, #tpu.memory_space<vmem>>, vector<1x256xf32>
    %c27_286 = arith.constant 27 : index
    %c0_287 = arith.constant 0 : index
    %c0_288 = arith.constant 0 : index
    %442 = vector.load %arg6[%c27_286, %c0_287, %c0_288] : memref<32x32x256xbf16, #tpu.memory_space<vmem>>, vector<1x32x256xbf16>
    %443 = vector.shape_cast %442 : vector<1x32x256xbf16> to vector<32x256xbf16>
    %444 = arith.extf %443 : vector<32x256xbf16> to vector<32x256xf32>
    %445 = vector.broadcast %441 : vector<1x256xf32> to vector<32x256xf32>
    %446 = arith.mulf %445, %444 : vector<32x256xf32>
    %447 = arith.addf %440, %446 : vector<32x256xf32>
    %c28_289 = arith.constant 28 : index
    %c0_290 = arith.constant 0 : index
    %448 = vector.load %arg11[%c28_289, %c0_290] : memref<32x256xf32, #tpu.memory_space<vmem>>, vector<1x256xf32>
    %c28_291 = arith.constant 28 : index
    %c0_292 = arith.constant 0 : index
    %c0_293 = arith.constant 0 : index
    %449 = vector.load %arg6[%c28_291, %c0_292, %c0_293] : memref<32x32x256xbf16, #tpu.memory_space<vmem>>, vector<1x32x256xbf16>
    %450 = vector.shape_cast %449 : vector<1x32x256xbf16> to vector<32x256xbf16>
    %451 = arith.extf %450 : vector<32x256xbf16> to vector<32x256xf32>
    %452 = vector.broadcast %448 : vector<1x256xf32> to vector<32x256xf32>
    %453 = arith.mulf %452, %451 : vector<32x256xf32>
    %454 = arith.addf %447, %453 : vector<32x256xf32>
    %c29_294 = arith.constant 29 : index
    %c0_295 = arith.constant 0 : index
    %455 = vector.load %arg11[%c29_294, %c0_295] : memref<32x256xf32, #tpu.memory_space<vmem>>, vector<1x256xf32>
    %c29_296 = arith.constant 29 : index
    %c0_297 = arith.constant 0 : index
    %c0_298 = arith.constant 0 : index
    %456 = vector.load %arg6[%c29_296, %c0_297, %c0_298] : memref<32x32x256xbf16, #tpu.memory_space<vmem>>, vector<1x32x256xbf16>
    %457 = vector.shape_cast %456 : vector<1x32x256xbf16> to vector<32x256xbf16>
    %458 = arith.extf %457 : vector<32x256xbf16> to vector<32x256xf32>
    %459 = vector.broadcast %455 : vector<1x256xf32> to vector<32x256xf32>
    %460 = arith.mulf %459, %458 : vector<32x256xf32>
    %461 = arith.addf %454, %460 : vector<32x256xf32>
    %c30_299 = arith.constant 30 : index
    %c0_300 = arith.constant 0 : index
    %462 = vector.load %arg11[%c30_299, %c0_300] : memref<32x256xf32, #tpu.memory_space<vmem>>, vector<1x256xf32>
    %c30_301 = arith.constant 30 : index
    %c0_302 = arith.constant 0 : index
    %c0_303 = arith.constant 0 : index
    %463 = vector.load %arg6[%c30_301, %c0_302, %c0_303] : memref<32x32x256xbf16, #tpu.memory_space<vmem>>, vector<1x32x256xbf16>
    %464 = vector.shape_cast %463 : vector<1x32x256xbf16> to vector<32x256xbf16>
    %465 = arith.extf %464 : vector<32x256xbf16> to vector<32x256xf32>
    %466 = vector.broadcast %462 : vector<1x256xf32> to vector<32x256xf32>
    %467 = arith.mulf %466, %465 : vector<32x256xf32>
    %468 = arith.addf %461, %467 : vector<32x256xf32>
    %c31_304 = arith.constant 31 : index
    %c0_305 = arith.constant 0 : index
    %469 = vector.load %arg11[%c31_304, %c0_305] : memref<32x256xf32, #tpu.memory_space<vmem>>, vector<1x256xf32>
    %c31_306 = arith.constant 31 : index
    %c0_307 = arith.constant 0 : index
    %c0_308 = arith.constant 0 : index
    %470 = vector.load %arg6[%c31_306, %c0_307, %c0_308] : memref<32x32x256xbf16, #tpu.memory_space<vmem>>, vector<1x32x256xbf16>
    %471 = vector.shape_cast %470 : vector<1x32x256xbf16> to vector<32x256xbf16>
    %472 = arith.extf %471 : vector<32x256xbf16> to vector<32x256xf32>
    %473 = vector.broadcast %469 : vector<1x256xf32> to vector<32x256xf32>
    %474 = arith.mulf %473, %472 : vector<32x256xf32>
    %475 = arith.addf %468, %474 : vector<32x256xf32>
    %cst_309 = arith.constant 1.000000e+00 : f32
    %476 = vector.broadcast %cst_309 : f32 to vector<32x256xf32>
    %477 = arith.mulf %476, %475 : vector<32x256xf32>
    %478 = math.sin %477 : vector<32x256xf32>
    %c0_310 = arith.constant 0 : index
    %c0_311 = arith.constant 0 : index
    %479 = vector.load %arg11[%c0_310, %c0_311] : memref<32x256xf32, #tpu.memory_space<vmem>>, vector<32x256xf32>
    tpu.vector_store %arg11[%c0_310, %c0_311], %478 {strides = array<i32>} : memref<32x256xf32, #tpu.memory_space<vmem>>, vector<32x256xf32>,
    %c0_312 = arith.constant 0 : index
    %c0_313 = arith.constant 0 : index
    %480 = vector.load %arg9[%c0_312, %c0_313] : memref<3x256xbf16, #tpu.memory_space<vmem>>, vector<3x256xbf16>
    %481 = arith.extf %480 : vector<3x256xbf16> to vector<3x256xf32>
    %c0_314 = arith.constant 0 : index
    %c0_315 = arith.constant 0 : index
    %482 = vector.load %arg11[%c0_314, %c0_315] : memref<32x256xf32, #tpu.memory_space<vmem>>, vector<1x256xf32>
    %c0_316 = arith.constant 0 : index
    %c0_317 = arith.constant 0 : index
    %c0_318 = arith.constant 0 : index
    %483 = vector.load %arg8[%c0_316, %c0_317, %c0_318] : memref<32x3x256xbf16, #tpu.memory_space<vmem>>, vector<1x3x256xbf16>
    %484 = vector.shape_cast %483 : vector<1x3x256xbf16> to vector<3x256xbf16>
    %485 = arith.extf %484 : vector<3x256xbf16> to vector<3x256xf32>
    %486 = vector.broadcast %482 : vector<1x256xf32> to vector<3x256xf32>
    %487 = arith.mulf %486, %485 : vector<3x256xf32>
    %488 = arith.addf %481, %487 : vector<3x256xf32>
    %c1_319 = arith.constant 1 : index
    %c0_320 = arith.constant 0 : index
    %489 = vector.load %arg11[%c1_319, %c0_320] : memref<32x256xf32, #tpu.memory_space<vmem>>, vector<1x256xf32>
    %c1_321 = arith.constant 1 : index
    %c0_322 = arith.constant 0 : index
    %c0_323 = arith.constant 0 : index
    %490 = vector.load %arg8[%c1_321, %c0_322, %c0_323] : memref<32x3x256xbf16, #tpu.memory_space<vmem>>, vector<1x3x256xbf16>
    %491 = vector.shape_cast %490 : vector<1x3x256xbf16> to vector<3x256xbf16>
    %492 = arith.extf %491 : vector<3x256xbf16> to vector<3x256xf32>
    %493 = vector.broadcast %489 : vector<1x256xf32> to vector<3x256xf32>
    %494 = arith.mulf %493, %492 : vector<3x256xf32>
    %495 = arith.addf %488, %494 : vector<3x256xf32>
    %c2_324 = arith.constant 2 : index
    %c0_325 = arith.constant 0 : index
    %496 = vector.load %arg11[%c2_324, %c0_325] : memref<32x256xf32, #tpu.memory_space<vmem>>, vector<1x256xf32>
    %c2_326 = arith.constant 2 : index
    %c0_327 = arith.constant 0 : index
    %c0_328 = arith.constant 0 : index
    %497 = vector.load %arg8[%c2_326, %c0_327, %c0_328] : memref<32x3x256xbf16, #tpu.memory_space<vmem>>, vector<1x3x256xbf16>
    %498 = vector.shape_cast %497 : vector<1x3x256xbf16> to vector<3x256xbf16>
    %499 = arith.extf %498 : vector<3x256xbf16> to vector<3x256xf32>
    %500 = vector.broadcast %496 : vector<1x256xf32> to vector<3x256xf32>
    %501 = arith.mulf %500, %499 : vector<3x256xf32>
    %502 = arith.addf %495, %501 : vector<3x256xf32>
    %c3_329 = arith.constant 3 : index
    %c0_330 = arith.constant 0 : index
    %503 = vector.load %arg11[%c3_329, %c0_330] : memref<32x256xf32, #tpu.memory_space<vmem>>, vector<1x256xf32>
    %c3_331 = arith.constant 3 : index
    %c0_332 = arith.constant 0 : index
    %c0_333 = arith.constant 0 : index
    %504 = vector.load %arg8[%c3_331, %c0_332, %c0_333] : memref<32x3x256xbf16, #tpu.memory_space<vmem>>, vector<1x3x256xbf16>
    %505 = vector.shape_cast %504 : vector<1x3x256xbf16> to vector<3x256xbf16>
    %506 = arith.extf %505 : vector<3x256xbf16> to vector<3x256xf32>
    %507 = vector.broadcast %503 : vector<1x256xf32> to vector<3x256xf32>
    %508 = arith.mulf %507, %506 : vector<3x256xf32>
    %509 = arith.addf %502, %508 : vector<3x256xf32>
    %c4_334 = arith.constant 4 : index
    %c0_335 = arith.constant 0 : index
    %510 = vector.load %arg11[%c4_334, %c0_335] : memref<32x256xf32, #tpu.memory_space<vmem>>, vector<1x256xf32>
    %c4_336 = arith.constant 4 : index
    %c0_337 = arith.constant 0 : index
    %c0_338 = arith.constant 0 : index
    %511 = vector.load %arg8[%c4_336, %c0_337, %c0_338] : memref<32x3x256xbf16, #tpu.memory_space<vmem>>, vector<1x3x256xbf16>
    %512 = vector.shape_cast %511 : vector<1x3x256xbf16> to vector<3x256xbf16>
    %513 = arith.extf %512 : vector<3x256xbf16> to vector<3x256xf32>
    %514 = vector.broadcast %510 : vector<1x256xf32> to vector<3x256xf32>
    %515 = arith.mulf %514, %513 : vector<3x256xf32>
    %516 = arith.addf %509, %515 : vector<3x256xf32>
    %c5_339 = arith.constant 5 : index
    %c0_340 = arith.constant 0 : index
    %517 = vector.load %arg11[%c5_339, %c0_340] : memref<32x256xf32, #tpu.memory_space<vmem>>, vector<1x256xf32>
    %c5_341 = arith.constant 5 : index
    %c0_342 = arith.constant 0 : index
    %c0_343 = arith.constant 0 : index
    %518 = vector.load %arg8[%c5_341, %c0_342, %c0_343] : memref<32x3x256xbf16, #tpu.memory_space<vmem>>, vector<1x3x256xbf16>
    %519 = vector.shape_cast %518 : vector<1x3x256xbf16> to vector<3x256xbf16>
    %520 = arith.extf %519 : vector<3x256xbf16> to vector<3x256xf32>
    %521 = vector.broadcast %517 : vector<1x256xf32> to vector<3x256xf32>
    %522 = arith.mulf %521, %520 : vector<3x256xf32>
    %523 = arith.addf %516, %522 : vector<3x256xf32>
    %c6_344 = arith.constant 6 : index
    %c0_345 = arith.constant 0 : index
    %524 = vector.load %arg11[%c6_344, %c0_345] : memref<32x256xf32, #tpu.memory_space<vmem>>, vector<1x256xf32>
    %c6_346 = arith.constant 6 : index
    %c0_347 = arith.constant 0 : index
    %c0_348 = arith.constant 0 : index
    %525 = vector.load %arg8[%c6_346, %c0_347, %c0_348] : memref<32x3x256xbf16, #tpu.memory_space<vmem>>, vector<1x3x256xbf16>
    %526 = vector.shape_cast %525 : vector<1x3x256xbf16> to vector<3x256xbf16>
    %527 = arith.extf %526 : vector<3x256xbf16> to vector<3x256xf32>
    %528 = vector.broadcast %524 : vector<1x256xf32> to vector<3x256xf32>
    %529 = arith.mulf %528, %527 : vector<3x256xf32>
    %530 = arith.addf %523, %529 : vector<3x256xf32>
    %c7_349 = arith.constant 7 : index
    %c0_350 = arith.constant 0 : index
    %531 = vector.load %arg11[%c7_349, %c0_350] : memref<32x256xf32, #tpu.memory_space<vmem>>, vector<1x256xf32>
    %c7_351 = arith.constant 7 : index
    %c0_352 = arith.constant 0 : index
    %c0_353 = arith.constant 0 : index
    %532 = vector.load %arg8[%c7_351, %c0_352, %c0_353] : memref<32x3x256xbf16, #tpu.memory_space<vmem>>, vector<1x3x256xbf16>
    %533 = vector.shape_cast %532 : vector<1x3x256xbf16> to vector<3x256xbf16>
    %534 = arith.extf %533 : vector<3x256xbf16> to vector<3x256xf32>
    %535 = vector.broadcast %531 : vector<1x256xf32> to vector<3x256xf32>
    %536 = arith.mulf %535, %534 : vector<3x256xf32>
    %537 = arith.addf %530, %536 : vector<3x256xf32>
    %c8_354 = arith.constant 8 : index
    %c0_355 = arith.constant 0 : index
    %538 = vector.load %arg11[%c8_354, %c0_355] : memref<32x256xf32, #tpu.memory_space<vmem>>, vector<1x256xf32>
    %c8_356 = arith.constant 8 : index
    %c0_357 = arith.constant 0 : index
    %c0_358 = arith.constant 0 : index
    %539 = vector.load %arg8[%c8_356, %c0_357, %c0_358] : memref<32x3x256xbf16, #tpu.memory_space<vmem>>, vector<1x3x256xbf16>
    %540 = vector.shape_cast %539 : vector<1x3x256xbf16> to vector<3x256xbf16>
    %541 = arith.extf %540 : vector<3x256xbf16> to vector<3x256xf32>
    %542 = vector.broadcast %538 : vector<1x256xf32> to vector<3x256xf32>
    %543 = arith.mulf %542, %541 : vector<3x256xf32>
    %544 = arith.addf %537, %543 : vector<3x256xf32>
    %c9_359 = arith.constant 9 : index
    %c0_360 = arith.constant 0 : index
    %545 = vector.load %arg11[%c9_359, %c0_360] : memref<32x256xf32, #tpu.memory_space<vmem>>, vector<1x256xf32>
    %c9_361 = arith.constant 9 : index
    %c0_362 = arith.constant 0 : index
    %c0_363 = arith.constant 0 : index
    %546 = vector.load %arg8[%c9_361, %c0_362, %c0_363] : memref<32x3x256xbf16, #tpu.memory_space<vmem>>, vector<1x3x256xbf16>
    %547 = vector.shape_cast %546 : vector<1x3x256xbf16> to vector<3x256xbf16>
    %548 = arith.extf %547 : vector<3x256xbf16> to vector<3x256xf32>
    %549 = vector.broadcast %545 : vector<1x256xf32> to vector<3x256xf32>
    %550 = arith.mulf %549, %548 : vector<3x256xf32>
    %551 = arith.addf %544, %550 : vector<3x256xf32>
    %c10_364 = arith.constant 10 : index
    %c0_365 = arith.constant 0 : index
    %552 = vector.load %arg11[%c10_364, %c0_365] : memref<32x256xf32, #tpu.memory_space<vmem>>, vector<1x256xf32>
    %c10_366 = arith.constant 10 : index
    %c0_367 = arith.constant 0 : index
    %c0_368 = arith.constant 0 : index
    %553 = vector.load %arg8[%c10_366, %c0_367, %c0_368] : memref<32x3x256xbf16, #tpu.memory_space<vmem>>, vector<1x3x256xbf16>
    %554 = vector.shape_cast %553 : vector<1x3x256xbf16> to vector<3x256xbf16>
    %555 = arith.extf %554 : vector<3x256xbf16> to vector<3x256xf32>
    %556 = vector.broadcast %552 : vector<1x256xf32> to vector<3x256xf32>
    %557 = arith.mulf %556, %555 : vector<3x256xf32>
    %558 = arith.addf %551, %557 : vector<3x256xf32>
    %c11_369 = arith.constant 11 : index
    %c0_370 = arith.constant 0 : index
    %559 = vector.load %arg11[%c11_369, %c0_370] : memref<32x256xf32, #tpu.memory_space<vmem>>, vector<1x256xf32>
    %c11_371 = arith.constant 11 : index
    %c0_372 = arith.constant 0 : index
    %c0_373 = arith.constant 0 : index
    %560 = vector.load %arg8[%c11_371, %c0_372, %c0_373] : memref<32x3x256xbf16, #tpu.memory_space<vmem>>, vector<1x3x256xbf16>
    %561 = vector.shape_cast %560 : vector<1x3x256xbf16> to vector<3x256xbf16>
    %562 = arith.extf %561 : vector<3x256xbf16> to vector<3x256xf32>
    %563 = vector.broadcast %559 : vector<1x256xf32> to vector<3x256xf32>
    %564 = arith.mulf %563, %562 : vector<3x256xf32>
    %565 = arith.addf %558, %564 : vector<3x256xf32>
    %c12_374 = arith.constant 12 : index
    %c0_375 = arith.constant 0 : index
    %566 = vector.load %arg11[%c12_374, %c0_375] : memref<32x256xf32, #tpu.memory_space<vmem>>, vector<1x256xf32>
    %c12_376 = arith.constant 12 : index
    %c0_377 = arith.constant 0 : index
    %c0_378 = arith.constant 0 : index
    %567 = vector.load %arg8[%c12_376, %c0_377, %c0_378] : memref<32x3x256xbf16, #tpu.memory_space<vmem>>, vector<1x3x256xbf16>
    %568 = vector.shape_cast %567 : vector<1x3x256xbf16> to vector<3x256xbf16>
    %569 = arith.extf %568 : vector<3x256xbf16> to vector<3x256xf32>
    %570 = vector.broadcast %566 : vector<1x256xf32> to vector<3x256xf32>
    %571 = arith.mulf %570, %569 : vector<3x256xf32>
    %572 = arith.addf %565, %571 : vector<3x256xf32>
    %c13_379 = arith.constant 13 : index
    %c0_380 = arith.constant 0 : index
    %573 = vector.load %arg11[%c13_379, %c0_380] : memref<32x256xf32, #tpu.memory_space<vmem>>, vector<1x256xf32>
    %c13_381 = arith.constant 13 : index
    %c0_382 = arith.constant 0 : index
    %c0_383 = arith.constant 0 : index
    %574 = vector.load %arg8[%c13_381, %c0_382, %c0_383] : memref<32x3x256xbf16, #tpu.memory_space<vmem>>, vector<1x3x256xbf16>
    %575 = vector.shape_cast %574 : vector<1x3x256xbf16> to vector<3x256xbf16>
    %576 = arith.extf %575 : vector<3x256xbf16> to vector<3x256xf32>
    %577 = vector.broadcast %573 : vector<1x256xf32> to vector<3x256xf32>
    %578 = arith.mulf %577, %576 : vector<3x256xf32>
    %579 = arith.addf %572, %578 : vector<3x256xf32>
    %c14_384 = arith.constant 14 : index
    %c0_385 = arith.constant 0 : index
    %580 = vector.load %arg11[%c14_384, %c0_385] : memref<32x256xf32, #tpu.memory_space<vmem>>, vector<1x256xf32>
    %c14_386 = arith.constant 14 : index
    %c0_387 = arith.constant 0 : index
    %c0_388 = arith.constant 0 : index
    %581 = vector.load %arg8[%c14_386, %c0_387, %c0_388] : memref<32x3x256xbf16, #tpu.memory_space<vmem>>, vector<1x3x256xbf16>
    %582 = vector.shape_cast %581 : vector<1x3x256xbf16> to vector<3x256xbf16>
    %583 = arith.extf %582 : vector<3x256xbf16> to vector<3x256xf32>
    %584 = vector.broadcast %580 : vector<1x256xf32> to vector<3x256xf32>
    %585 = arith.mulf %584, %583 : vector<3x256xf32>
    %586 = arith.addf %579, %585 : vector<3x256xf32>
    %c15_389 = arith.constant 15 : index
    %c0_390 = arith.constant 0 : index
    %587 = vector.load %arg11[%c15_389, %c0_390] : memref<32x256xf32, #tpu.memory_space<vmem>>, vector<1x256xf32>
    %c15_391 = arith.constant 15 : index
    %c0_392 = arith.constant 0 : index
    %c0_393 = arith.constant 0 : index
    %588 = vector.load %arg8[%c15_391, %c0_392, %c0_393] : memref<32x3x256xbf16, #tpu.memory_space<vmem>>, vector<1x3x256xbf16>
    %589 = vector.shape_cast %588 : vector<1x3x256xbf16> to vector<3x256xbf16>
    %590 = arith.extf %589 : vector<3x256xbf16> to vector<3x256xf32>
    %591 = vector.broadcast %587 : vector<1x256xf32> to vector<3x256xf32>
    %592 = arith.mulf %591, %590 : vector<3x256xf32>
    %593 = arith.addf %586, %592 : vector<3x256xf32>
    %c16_394 = arith.constant 16 : index
    %c0_395 = arith.constant 0 : index
    %594 = vector.load %arg11[%c16_394, %c0_395] : memref<32x256xf32, #tpu.memory_space<vmem>>, vector<1x256xf32>
    %c16_396 = arith.constant 16 : index
    %c0_397 = arith.constant 0 : index
    %c0_398 = arith.constant 0 : index
    %595 = vector.load %arg8[%c16_396, %c0_397, %c0_398] : memref<32x3x256xbf16, #tpu.memory_space<vmem>>, vector<1x3x256xbf16>
    %596 = vector.shape_cast %595 : vector<1x3x256xbf16> to vector<3x256xbf16>
    %597 = arith.extf %596 : vector<3x256xbf16> to vector<3x256xf32>
    %598 = vector.broadcast %594 : vector<1x256xf32> to vector<3x256xf32>
    %599 = arith.mulf %598, %597 : vector<3x256xf32>
    %600 = arith.addf %593, %599 : vector<3x256xf32>
    %c17_399 = arith.constant 17 : index
    %c0_400 = arith.constant 0 : index
    %601 = vector.load %arg11[%c17_399, %c0_400] : memref<32x256xf32, #tpu.memory_space<vmem>>, vector<1x256xf32>
    %c17_401 = arith.constant 17 : index
    %c0_402 = arith.constant 0 : index
    %c0_403 = arith.constant 0 : index
    %602 = vector.load %arg8[%c17_401, %c0_402, %c0_403] : memref<32x3x256xbf16, #tpu.memory_space<vmem>>, vector<1x3x256xbf16>
    %603 = vector.shape_cast %602 : vector<1x3x256xbf16> to vector<3x256xbf16>
    %604 = arith.extf %603 : vector<3x256xbf16> to vector<3x256xf32>
    %605 = vector.broadcast %601 : vector<1x256xf32> to vector<3x256xf32>
    %606 = arith.mulf %605, %604 : vector<3x256xf32>
    %607 = arith.addf %600, %606 : vector<3x256xf32>
    %c18_404 = arith.constant 18 : index
    %c0_405 = arith.constant 0 : index
    %608 = vector.load %arg11[%c18_404, %c0_405] : memref<32x256xf32, #tpu.memory_space<vmem>>, vector<1x256xf32>
    %c18_406 = arith.constant 18 : index
    %c0_407 = arith.constant 0 : index
    %c0_408 = arith.constant 0 : index
    %609 = vector.load %arg8[%c18_406, %c0_407, %c0_408] : memref<32x3x256xbf16, #tpu.memory_space<vmem>>, vector<1x3x256xbf16>
    %610 = vector.shape_cast %609 : vector<1x3x256xbf16> to vector<3x256xbf16>
    %611 = arith.extf %610 : vector<3x256xbf16> to vector<3x256xf32>
    %612 = vector.broadcast %608 : vector<1x256xf32> to vector<3x256xf32>
    %613 = arith.mulf %612, %611 : vector<3x256xf32>
    %614 = arith.addf %607, %613 : vector<3x256xf32>
    %c19_409 = arith.constant 19 : index
    %c0_410 = arith.constant 0 : index
    %615 = vector.load %arg11[%c19_409, %c0_410] : memref<32x256xf32, #tpu.memory_space<vmem>>, vector<1x256xf32>
    %c19_411 = arith.constant 19 : index
    %c0_412 = arith.constant 0 : index
    %c0_413 = arith.constant 0 : index
    %616 = vector.load %arg8[%c19_411, %c0_412, %c0_413] : memref<32x3x256xbf16, #tpu.memory_space<vmem>>, vector<1x3x256xbf16>
    %617 = vector.shape_cast %616 : vector<1x3x256xbf16> to vector<3x256xbf16>
    %618 = arith.extf %617 : vector<3x256xbf16> to vector<3x256xf32>
    %619 = vector.broadcast %615 : vector<1x256xf32> to vector<3x256xf32>
    %620 = arith.mulf %619, %618 : vector<3x256xf32>
    %621 = arith.addf %614, %620 : vector<3x256xf32>
    %c20_414 = arith.constant 20 : index
    %c0_415 = arith.constant 0 : index
    %622 = vector.load %arg11[%c20_414, %c0_415] : memref<32x256xf32, #tpu.memory_space<vmem>>, vector<1x256xf32>
    %c20_416 = arith.constant 20 : index
    %c0_417 = arith.constant 0 : index
    %c0_418 = arith.constant 0 : index
    %623 = vector.load %arg8[%c20_416, %c0_417, %c0_418] : memref<32x3x256xbf16, #tpu.memory_space<vmem>>, vector<1x3x256xbf16>
    %624 = vector.shape_cast %623 : vector<1x3x256xbf16> to vector<3x256xbf16>
    %625 = arith.extf %624 : vector<3x256xbf16> to vector<3x256xf32>
    %626 = vector.broadcast %622 : vector<1x256xf32> to vector<3x256xf32>
    %627 = arith.mulf %626, %625 : vector<3x256xf32>
    %628 = arith.addf %621, %627 : vector<3x256xf32>
    %c21_419 = arith.constant 21 : index
    %c0_420 = arith.constant 0 : index
    %629 = vector.load %arg11[%c21_419, %c0_420] : memref<32x256xf32, #tpu.memory_space<vmem>>, vector<1x256xf32>
    %c21_421 = arith.constant 21 : index
    %c0_422 = arith.constant 0 : index
    %c0_423 = arith.constant 0 : index
    %630 = vector.load %arg8[%c21_421, %c0_422, %c0_423] : memref<32x3x256xbf16, #tpu.memory_space<vmem>>, vector<1x3x256xbf16>
    %631 = vector.shape_cast %630 : vector<1x3x256xbf16> to vector<3x256xbf16>
    %632 = arith.extf %631 : vector<3x256xbf16> to vector<3x256xf32>
    %633 = vector.broadcast %629 : vector<1x256xf32> to vector<3x256xf32>
    %634 = arith.mulf %633, %632 : vector<3x256xf32>
    %635 = arith.addf %628, %634 : vector<3x256xf32>
    %c22_424 = arith.constant 22 : index
    %c0_425 = arith.constant 0 : index
    %636 = vector.load %arg11[%c22_424, %c0_425] : memref<32x256xf32, #tpu.memory_space<vmem>>, vector<1x256xf32>
    %c22_426 = arith.constant 22 : index
    %c0_427 = arith.constant 0 : index
    %c0_428 = arith.constant 0 : index
    %637 = vector.load %arg8[%c22_426, %c0_427, %c0_428] : memref<32x3x256xbf16, #tpu.memory_space<vmem>>, vector<1x3x256xbf16>
    %638 = vector.shape_cast %637 : vector<1x3x256xbf16> to vector<3x256xbf16>
    %639 = arith.extf %638 : vector<3x256xbf16> to vector<3x256xf32>
    %640 = vector.broadcast %636 : vector<1x256xf32> to vector<3x256xf32>
    %641 = arith.mulf %640, %639 : vector<3x256xf32>
    %642 = arith.addf %635, %641 : vector<3x256xf32>
    %c23_429 = arith.constant 23 : index
    %c0_430 = arith.constant 0 : index
    %643 = vector.load %arg11[%c23_429, %c0_430] : memref<32x256xf32, #tpu.memory_space<vmem>>, vector<1x256xf32>
    %c23_431 = arith.constant 23 : index
    %c0_432 = arith.constant 0 : index
    %c0_433 = arith.constant 0 : index
    %644 = vector.load %arg8[%c23_431, %c0_432, %c0_433] : memref<32x3x256xbf16, #tpu.memory_space<vmem>>, vector<1x3x256xbf16>
    %645 = vector.shape_cast %644 : vector<1x3x256xbf16> to vector<3x256xbf16>
    %646 = arith.extf %645 : vector<3x256xbf16> to vector<3x256xf32>
    %647 = vector.broadcast %643 : vector<1x256xf32> to vector<3x256xf32>
    %648 = arith.mulf %647, %646 : vector<3x256xf32>
    %649 = arith.addf %642, %648 : vector<3x256xf32>
    %c24_434 = arith.constant 24 : index
    %c0_435 = arith.constant 0 : index
    %650 = vector.load %arg11[%c24_434, %c0_435] : memref<32x256xf32, #tpu.memory_space<vmem>>, vector<1x256xf32>
    %c24_436 = arith.constant 24 : index
    %c0_437 = arith.constant 0 : index
    %c0_438 = arith.constant 0 : index
    %651 = vector.load %arg8[%c24_436, %c0_437, %c0_438] : memref<32x3x256xbf16, #tpu.memory_space<vmem>>, vector<1x3x256xbf16>
    %652 = vector.shape_cast %651 : vector<1x3x256xbf16> to vector<3x256xbf16>
    %653 = arith.extf %652 : vector<3x256xbf16> to vector<3x256xf32>
    %654 = vector.broadcast %650 : vector<1x256xf32> to vector<3x256xf32>
    %655 = arith.mulf %654, %653 : vector<3x256xf32>
    %656 = arith.addf %649, %655 : vector<3x256xf32>
    %c25_439 = arith.constant 25 : index
    %c0_440 = arith.constant 0 : index
    %657 = vector.load %arg11[%c25_439, %c0_440] : memref<32x256xf32, #tpu.memory_space<vmem>>, vector<1x256xf32>
    %c25_441 = arith.constant 25 : index
    %c0_442 = arith.constant 0 : index
    %c0_443 = arith.constant 0 : index
    %658 = vector.load %arg8[%c25_441, %c0_442, %c0_443] : memref<32x3x256xbf16, #tpu.memory_space<vmem>>, vector<1x3x256xbf16>
    %659 = vector.shape_cast %658 : vector<1x3x256xbf16> to vector<3x256xbf16>
    %660 = arith.extf %659 : vector<3x256xbf16> to vector<3x256xf32>
    %661 = vector.broadcast %657 : vector<1x256xf32> to vector<3x256xf32>
    %662 = arith.mulf %661, %660 : vector<3x256xf32>
    %663 = arith.addf %656, %662 : vector<3x256xf32>
    %c26_444 = arith.constant 26 : index
    %c0_445 = arith.constant 0 : index
    %664 = vector.load %arg11[%c26_444, %c0_445] : memref<32x256xf32, #tpu.memory_space<vmem>>, vector<1x256xf32>
    %c26_446 = arith.constant 26 : index
    %c0_447 = arith.constant 0 : index
    %c0_448 = arith.constant 0 : index
    %665 = vector.load %arg8[%c26_446, %c0_447, %c0_448] : memref<32x3x256xbf16, #tpu.memory_space<vmem>>, vector<1x3x256xbf16>
    %666 = vector.shape_cast %665 : vector<1x3x256xbf16> to vector<3x256xbf16>
    %667 = arith.extf %666 : vector<3x256xbf16> to vector<3x256xf32>
    %668 = vector.broadcast %664 : vector<1x256xf32> to vector<3x256xf32>
    %669 = arith.mulf %668, %667 : vector<3x256xf32>
    %670 = arith.addf %663, %669 : vector<3x256xf32>
    %c27_449 = arith.constant 27 : index
    %c0_450 = arith.constant 0 : index
    %671 = vector.load %arg11[%c27_449, %c0_450] : memref<32x256xf32, #tpu.memory_space<vmem>>, vector<1x256xf32>
    %c27_451 = arith.constant 27 : index
    %c0_452 = arith.constant 0 : index
    %c0_453 = arith.constant 0 : index
    %672 = vector.load %arg8[%c27_451, %c0_452, %c0_453] : memref<32x3x256xbf16, #tpu.memory_space<vmem>>, vector<1x3x256xbf16>
    %673 = vector.shape_cast %672 : vector<1x3x256xbf16> to vector<3x256xbf16>
    %674 = arith.extf %673 : vector<3x256xbf16> to vector<3x256xf32>
    %675 = vector.broadcast %671 : vector<1x256xf32> to vector<3x256xf32>
    %676 = arith.mulf %675, %674 : vector<3x256xf32>
    %677 = arith.addf %670, %676 : vector<3x256xf32>
    %c28_454 = arith.constant 28 : index
    %c0_455 = arith.constant 0 : index
    %678 = vector.load %arg11[%c28_454, %c0_455] : memref<32x256xf32, #tpu.memory_space<vmem>>, vector<1x256xf32>
    %c28_456 = arith.constant 28 : index
    %c0_457 = arith.constant 0 : index
    %c0_458 = arith.constant 0 : index
    %679 = vector.load %arg8[%c28_456, %c0_457, %c0_458] : memref<32x3x256xbf16, #tpu.memory_space<vmem>>, vector<1x3x256xbf16>
    %680 = vector.shape_cast %679 : vector<1x3x256xbf16> to vector<3x256xbf16>
    %681 = arith.extf %680 : vector<3x256xbf16> to vector<3x256xf32>
    %682 = vector.broadcast %678 : vector<1x256xf32> to vector<3x256xf32>
    %683 = arith.mulf %682, %681 : vector<3x256xf32>
    %684 = arith.addf %677, %683 : vector<3x256xf32>
    %c29_459 = arith.constant 29 : index
    %c0_460 = arith.constant 0 : index
    %685 = vector.load %arg11[%c29_459, %c0_460] : memref<32x256xf32, #tpu.memory_space<vmem>>, vector<1x256xf32>
    %c29_461 = arith.constant 29 : index
    %c0_462 = arith.constant 0 : index
    %c0_463 = arith.constant 0 : index
    %686 = vector.load %arg8[%c29_461, %c0_462, %c0_463] : memref<32x3x256xbf16, #tpu.memory_space<vmem>>, vector<1x3x256xbf16>
    %687 = vector.shape_cast %686 : vector<1x3x256xbf16> to vector<3x256xbf16>
    %688 = arith.extf %687 : vector<3x256xbf16> to vector<3x256xf32>
    %689 = vector.broadcast %685 : vector<1x256xf32> to vector<3x256xf32>
    %690 = arith.mulf %689, %688 : vector<3x256xf32>
    %691 = arith.addf %684, %690 : vector<3x256xf32>
    %c30_464 = arith.constant 30 : index
    %c0_465 = arith.constant 0 : index
    %692 = vector.load %arg11[%c30_464, %c0_465] : memref<32x256xf32, #tpu.memory_space<vmem>>, vector<1x256xf32>
    %c30_466 = arith.constant 30 : index
    %c0_467 = arith.constant 0 : index
    %c0_468 = arith.constant 0 : index
    %693 = vector.load %arg8[%c30_466, %c0_467, %c0_468] : memref<32x3x256xbf16, #tpu.memory_space<vmem>>, vector<1x3x256xbf16>
    %694 = vector.shape_cast %693 : vector<1x3x256xbf16> to vector<3x256xbf16>
    %695 = arith.extf %694 : vector<3x256xbf16> to vector<3x256xf32>
    %696 = vector.broadcast %692 : vector<1x256xf32> to vector<3x256xf32>
    %697 = arith.mulf %696, %695 : vector<3x256xf32>
    %698 = arith.addf %691, %697 : vector<3x256xf32>
    %c31_469 = arith.constant 31 : index
    %c0_470 = arith.constant 0 : index
    %699 = vector.load %arg11[%c31_469, %c0_470] : memref<32x256xf32, #tpu.memory_space<vmem>>, vector<1x256xf32>
    %c31_471 = arith.constant 31 : index
    %c0_472 = arith.constant 0 : index
    %c0_473 = arith.constant 0 : index
    %700 = vector.load %arg8[%c31_471, %c0_472, %c0_473] : memref<32x3x256xbf16, #tpu.memory_space<vmem>>, vector<1x3x256xbf16>
    %701 = vector.shape_cast %700 : vector<1x3x256xbf16> to vector<3x256xbf16>
    %702 = arith.extf %701 : vector<3x256xbf16> to vector<3x256xf32>
    %703 = vector.broadcast %699 : vector<1x256xf32> to vector<3x256xf32>
    %704 = arith.mulf %703, %702 : vector<3x256xf32>
    %705 = arith.addf %698, %704 : vector<3x256xf32>
    %706 = arith.negf %705 : vector<3x256xf32>
    %707 = math.exp %706 : vector<3x256xf32>
    %cst_474 = arith.constant 1.000000e+00 : f32
    %708 = vector.broadcast %cst_474 : f32 to vector<3x256xf32>
    %709 = arith.addf %708, %707 : vector<3x256xf32>
    %710 = arith.divf %708, %709 : vector<3x256xf32>
    %c0_475 = arith.constant 0 : index
    %c0_476 = arith.constant 0 : index
    %711 = vector.load %arg10[%c0_475, %c0_476] : memref<3x256xf32, #tpu.memory_space<vmem>>, vector<3x256xf32>
    tpu.vector_store %arg10[%c0_475, %c0_476], %710 {strides = array<i32>} : memref<3x256xf32, #tpu.memory_space<vmem>>, vector<3x256xf32>,
    return
  }
  func.func @transform_0(%arg0: i32) -> (i32, i32) {
    %c0_i32 = arith.constant 0 : i32
    %c0_i32_0 = arith.constant 0 : i32
    return %c0_i32, %arg0 : i32, i32
  }
  func.func @transform_1(%arg0: i32) -> (i32, i32, i32) {
    %c0_i32 = arith.constant 0 : i32
    %c0_i32_0 = arith.constant 0 : i32
    %c0_i32_1 = arith.constant 0 : i32
    return %c0_i32, %c0_i32_0, %arg0 : i32, i32, i32
  }
  func.func @transform_2(%arg0: i32) -> (i32, i32) {
    %c0_i32 = arith.constant 0 : i32
    %c0_i32_0 = arith.constant 0 : i32
    return %c0_i32, %arg0 : i32, i32
  }
  func.func @transform_3(%arg0: i32) -> (i32, i32, i32) {
    %c0_i32 = arith.constant 0 : i32
    %c0_i32_0 = arith.constant 0 : i32
    %c0_i32_1 = arith.constant 0 : i32
    return %c0_i32, %c0_i32_0, %arg0 : i32, i32, i32
  }
  func.func @transform_4(%arg0: i32) -> (i32, i32) {
    %c0_i32 = arith.constant 0 : i32
    %c0_i32_0 = arith.constant 0 : i32
    return %c0_i32, %arg0 : i32, i32
  }
  func.func @transform_5(%arg0: i32) -> (i32, i32, i32) {
    %c0_i32 = arith.constant 0 : i32
    %c0_i32_0 = arith.constant 0 : i32
    %c0_i32_1 = arith.constant 0 : i32
    return %c0_i32, %c0_i32_0, %arg0 : i32, i32, i32
  }
  func.func @transform_6(%arg0: i32) -> (i32, i32) {
    %c0_i32 = arith.constant 0 : i32
    %c0_i32_0 = arith.constant 0 : i32
    return %c0_i32, %arg0 : i32, i32
  }
  func.func @transform_7(%arg0: i32) -> (i32, i32, i32) {
    %c0_i32 = arith.constant 0 : i32
    %c0_i32_0 = arith.constant 0 : i32
    %c0_i32_1 = arith.constant 0 : i32
    return %c0_i32, %c0_i32_0, %arg0 : i32, i32, i32
  }
  func.func @transform_8(%arg0: i32) -> (i32, i32) {
    %c0_i32 = arith.constant 0 : i32
    %c0_i32_0 = arith.constant 0 : i32
    return %c0_i32, %arg0 : i32, i32
  }
  func.func @transform_9(%arg0: i32) -> (i32, i32) {
    %c0_i32 = arith.constant 0 : i32
    %c0_i32_0 = arith.constant 0 : i32
    return %c0_i32, %arg0 : i32, i32
  }
}

</mosaic_0001>

<bundles_post_ra>
// kernel: tpu_custom_call.1
= control target key start
LH: loop header
LB: loop body
LE: loop exit
PB: predicated region body
PF: predicated region fallthrough
CT: control target
= control target key end

     0   :  { %s11238_s0 = inlined_call_operand.vmem [shape: f32[2,512], index: 0, kind: input, shape index: {}]   ;;  %s11239_s1 = inlined_call_operand.vmem [shape: bf16[2,32,512], index: 1, kind: input, shape index: {}]   ;;  %s11240_s2 = inlined_call_operand.vmem [shape: bf16[32,512], index: 2, kind: input, shape index: {}]   ;;  %s11241_s3 = inlined_call_operand.hbm [shape: bf16[32,32,512], index: 3, kind: input, shape index: {}]   ;;  %s11242_s4 = inlined_call_operand.vmem [shape: bf16[32,512], index: 4, kind: input, shape index: {}]   ;;  %s11243_s5 = inlined_call_operand.hbm [shape: bf16[32,32,512], index: 5, kind: input, shape index: {}]   ;;  %s11244_s6 = inlined_call_operand.vmem [shape: bf16[32,512], index: 6, kind: input, shape index: {}]   ;;  %s11245_s7 = inlined_call_operand.vmem [shape: bf16[32,3,512], index: 7, kind: input, shape index: {}]   ;;  %s11246_s8 = inlined_call_operand.vmem [shape: bf16[3,512], index: 8, kind: input, shape index: {}]   ;;  %s11247_s9 = inlined_call_operand.hbm [shape: f32[3,512], index: 9, kind: output, shape index: {}]  }
   0x1   :  { %11254 = sst [smem:[#allocation17_spill]] %s11239_s1 }
   0x2   :  { %11255 = sst [smem:[#allocation18_spill]] %s11240_s2 }
   0x3   :  { %11256 = sst [smem:[#allocation19_spill]] %s11241_s3 }
   0x4   :  { %14 = vsyncpa [#allocation6], 0 }
   0x5   :  { %16 = vsyncpa [#allocation6 + $0x1], 0 }
   0x6   :  { %17 = vsyncpa [#allocation10], 0 }
   0x7   :  { %19 = vsyncpa [#allocation10 + $0x1], 0 }
   0x8   :  { %20 = vsyncpa [#allocation7], 0 }
   0x9   :  { %22 = vsyncpa [#allocation7 + $0x1], 0  ;;  %s8111_s30 = smov 0   ;;  %s8113_s10 = smov 0  }
   0xa   :  { %s8115_s11 = smov 0   ;;  %s8117_s12 = smov 0  }
   0xb LB: > { %s8132_s13 = sadd.s32 4294967295, %s8047_s12   ;;  %s7248_s14 = sadd.s32 4294967294, %s8047_s12   ;;  %s8047_s12 = sphi %s8117_s12, %s11322_s12   ;;  %s8043_s11 = sphi %s8115_s11, %s11321_s11   ;;  %s8039_s10 = sphi %s8113_s10, %s11320_s10   ;;  %s8035_s30 = sphi %s8111_s30, %s11319_s30  }
   0xc   : > { %s8136_s15 = sadd.s32 1, %s8047_s12   ;;  %s61_s16 = sadd.s32 1, %s8043_s11 }
   0xd   : > { %s58_s17 = ssub.s32 %s8047_s12, %s8136_s15  ;;  %p68_p0 = scmp.ne.s32.totalorder %s8043_s11, %s8039_s10 }
   0xe   : > { %p59_p1 = scmp.eq.s32.totalorder %s58_s17, 0  ;;  %p69_p2 = scmp.eq.s32.totalorder %s8047_s12, 0 }
   0xf   : > { %p126_p3 = scmp.ne.s32.totalorder %s8039_s10, %s8035_s30  ;;  %p127_p4 = scmp.eq.s32.totalorder %s8132_s13, 0 }
  0x10   : > { %s8148_s18 = scalar_select %p59_p1, %s8043_s11, %s61_s16  }
  0x11   : > { %p8150_p5 = por %p69_p2, %p68_p0  ;;  %p8154_p6 = por %p127_p4, %p126_p3 }
  0x12   : > { %p280_p7 = scmp.eq.s32.totalorder %s8132_s13, 1  ;;  %p286_p8 = scmp.eq.s32.totalorder %s7248_s14, 1 }
  0x13   : > { %p11250_p11 = scmp.ge.s32.totalorder %s8047_s12, 2 }
  0x14   : > { %p8159_p9 = por %p280_p7, %p68_p0  ;;  %p8163_p10 = por %p286_p8, %p126_p3 }
  0x15   : > { %302 = sbr.rel (%p11250_p11) target bundleno = 144 (0x90), region = 16 }
  0x16   : > { %s11259_s21 = scalar_select %p8159_p9, 1, 0 }
  0x17   : > { %s11260_s22 = scalar_select %p8163_p10, 1, 0 }
  0x1a   : > { %314 = sbr.rel (!%p8150_p5) target bundleno = 40 (0x28), region = 24  ;;  %s316_s23 = sand.u32 (%p8150_p5), 1, %s8043_s11  }
  0x1b   : > { %s7671_s24 = sshll.u32 (%p8150_p5), %s8047_s12, 3  ;;  %s7251_s25 = sshll.u32 (%p8150_p5), %s316_s23, 6 }
  0x1c   : > { %s11261_s1 = sld [smem:[#allocation17_spill]] (%p8150_p5)  ;;  %s318_s29 = scalar_lea.vmem (%p8150_p5), [#allocation3], %s7251_s25 }
  0x22   : > { %s321_s28 = scalar_lea.vmem %s11261_s1, %s7671_s24 }
  0x23   : > { %v364_v0 = vld [vmem:[%s321_s28] sm:$0xff]  ;;  %v366_v1 = vld [vmem:[%s321_s28 + $0x10] sm:$0xff] }
  0x24   : > { %v368_v2 = vld [vmem:[%s321_s28 + $0x20] sm:$0xff]  ;;  %365 = vst [vmem:[%s318_s29] sm:$0xff] %v364_v0  ;;  %367 = vst [vmem:[%s318_s29 + $0x8] sm:$0xff] %v366_v1  ;;  %v370_v3 = vld [vmem:[%s321_s28 + $0x30] sm:$0xff] }
  0x25   : > { %369 = vst [vmem:[%s318_s29 + $0x10] sm:$0xff] %v368_v2  ;;  %v372_v4 = vld [vmem:[%s321_s28 + $0x40] sm:$0xff]  ;;  %v374_v5 = vld [vmem:[%s321_s28 + $0x50] sm:$0xff]  ;;  %371 = vst [vmem:[%s318_s29 + $0x18] sm:$0xff] %v370_v3 }
  0x26   : > { %373 = vst [vmem:[%s318_s29 + $0x20] sm:$0xff] %v372_v4  ;;  %375 = vst [vmem:[%s318_s29 + $0x28] sm:$0xff] %v374_v5  ;;  %v376_v6 = vld [vmem:[%s321_s28 + $0x60] sm:$0xff]  ;;  %v378_v7 = vld [vmem:[%s321_s28 + $0x70] sm:$0xff] }
  0x27   : > { %377 = vst [vmem:[%s318_s29 + $0x30] sm:$0xff] %v376_v6  ;;  %379 = vst [vmem:[%s318_s29 + $0x38] sm:$0xff] %v378_v7 }
  0x28 PF: > { %385 = sbr.rel (!%p8150_p5) target bundleno = 52 (0x34), region = 62  ;;  %s387_s14 = sand.u32 (%p8150_p5), 1, %s8043_s11  }
  0x29   : > { %s7672_s16 = sshll.u32 (%p8150_p5), %s8047_s12, 3  ;;  %s7254_s17 = sshll.u32 (%p8150_p5), %s387_s14, 5 }
  0x2a   : > { %s11262_s2 = sld [smem:[#allocation18_spill]] (%p8150_p5)  ;;  %s389_s26 = scalar_lea.vmem (%p8150_p5), [#allocation4], %s7254_s17 }
  0x30   : > { %s392_s25 = scalar_lea.vmem %s11262_s2, %s7672_s16 }
  0x31   : > { %v427_v8 = vld [vmem:[%s392_s25] sm:$0xff]  ;;  %v429_v9 = vld [vmem:[%s392_s25 + $0x10] sm:$0xff] }
  0x32   : > { %v431_v10 = vld [vmem:[%s392_s25 + $0x20] sm:$0xff]  ;;  %428 = vst [vmem:[%s389_s26] sm:$0xff] %v427_v8  ;;  %430 = vst [vmem:[%s389_s26 + $0x8] sm:$0xff] %v429_v9  ;;  %v433_v11 = vld [vmem:[%s392_s25 + $0x30] sm:$0xff] }
  0x33   : > { %432 = vst [vmem:[%s389_s26 + $0x10] sm:$0xff] %v431_v10  ;;  %434 = vst [vmem:[%s389_s26 + $0x18] sm:$0xff] %v433_v11 }
  0x34 PF: > { %s8185_s27 = sand.u32 1, %s8043_s11   ;;  %s11248_s28 = sshll.u32 %s8047_s12, 7 }
  0x35   : > { %s11249_s29 = sshll.u32 %s8185_s27, 10  ;;  %s11263_s3 = sld [smem:[#allocation19_spill]] }
  0x36   : > { %s445_s23 = scalar_lea.vmem [#allocation5], %s11249_s29  ;;  %s442_s25 = scalar_lea.sflag [#allocation6], %s8185_s27 }
  0x37   : > { %s452_s24 = sshll.u32 %s445_s23, 4  ;;  %s8198_s24 = int_to_ptr.vmem [resolvable:$true] %s452_s24 }
  0x3b   : > { %s8194_s17 = scalar_lea.hbm %s11263_s3, %s11248_s28  ;;  %s7931_s14 = scalar_lea.hbm %s11263_s3, 32768 }
  0x3c   : > { %s7927_s26 = scalar_lea.hbm %s8194_s17, 16384  ;;  %p7932_p1 = scmp.lt.s32.totalorder %s8194_s17, %s11263_s3 }
  0x3d   : > { %p7928_p12 = scmp.ne.s32.totalorder %s8194_s17, %s7927_s26  ;;  %p7933_p2 = scmp.lt.s32.totalorder %s7931_s14, %s7927_s26 }
  0x3f   : > { %p7929_p13 = pnand %p7928_p12, %p8150_p5  ;;  %p7934_p3 = por %p7933_p2, %p7932_p1 }
  0x41   : > { %p7930_p0 = pneg %p7929_p13 }
  0x43   : > { %p7935_p4 = pnand %p7934_p3, %p7930_p0 }
  0x45   : > { %7938 = shalt.err (!%p7935_p4)
}
  0x46   : > { %s7939_s23 = scalar_lea.vmem %s8198_s24, 16384  ;;  %s8049_s29 = smov [#allocation5]  }
  0x47   : > { %p7940_p7 = scmp.ne.s32.totalorder %s8198_s24, %s7939_s23  ;;  %s7943_s1 = sshll.u32 %s8049_s29, 4  ;;  %s7944_s1 = int_to_ptr.vmem [resolvable:$false] %s7943_s1 }
  0x48   : > { %s7945_s2 = scalar_lea.vmem %s7944_s1, 32768  ;;  %p7946_p13 = scmp.lt.s32.totalorder %s8198_s24, %s7944_s1 }
  0x49   : > { %p7941_p8 = pnand %p7940_p7, %p8150_p5  ;;  %p7947_p11 = scmp.lt.s32.totalorder %s7945_s2, %s7939_s23 }
  0x4b   : > { %p7942_p12 = pneg %p7941_p8  ;;  %p7948_p10 = por %p7947_p11, %p7946_p13 }
  0x4d   : > { %p7949_p9 = pnand %p7948_p10, %p7942_p12 }
  0x4f   : > { %7952 = shalt.err (!%p7949_p9)
}
  0x50   : > { %s11252_s28 = smov 256   ;;  %s11253_s26 = smov 128  }
  0x51   : > { %s8052_s14 = smov 8   ;;  %461 = sbr.rel (!%p8150_p5) target bundleno = 88 (0x58), region = 104 }
  0x52   : > { %7775 = dma.hbm_to_vmem [thread:$0]  (%p8150_p5), %s8194_s17, 16384, %s8198_s24, %s442_s25, %s11252_s28, %s11253_s26, %s8052_s14  }
  0x53   : > { %s7260_s29 = sshll.u32 (%p8150_p5), %s8185_s27, 5  ;;  %s7674_s16 = sshll.u32 (%p8150_p5), %s8047_s12, 3 }
  0x54   : > { %s468_s2 = scalar_lea.vmem (%p8150_p5), %s11242_s4, %s7674_s16  ;;  %s465_s3 = scalar_lea.vmem (%p8150_p5), [#allocation8], %s7260_s29 }
  0x55   : > { %v503_v12 = vld [vmem:[%s468_s2] sm:$0xff] (%p8150_p5)  ;;  %v505_v13 = vld [vmem:[%s468_s2 + $0x10] sm:$0xff] (%p8150_p5) }
  0x56   : > { %v507_v14 = vld [vmem:[%s468_s2 + $0x20] sm:$0xff]  ;;  %504 = vst [vmem:[%s465_s3] sm:$0xff] %v503_v12  ;;  %506 = vst [vmem:[%s465_s3 + $0x8] sm:$0xff] %v505_v13  ;;  %v509_v15 = vld [vmem:[%s468_s2 + $0x30] sm:$0xff] }
  0x57   : > { %508 = vst [vmem:[%s465_s3 + $0x10] sm:$0xff] %v507_v14  ;;  %510 = vst [vmem:[%s465_s3 + $0x18] sm:$0xff] %v509_v15 }
  0x58 PF: > { %s11264_s17 = sshll.u32 %s8047_s12, 7  ;;  %s11265_s16 = sshll.u32 %s8185_s27, 10 }
  0x59   : > { %s8238_s23 = scalar_lea.hbm %s11243_s5, %s11264_s17  ;;  %s521_s29 = scalar_lea.vmem [#allocation9], %s11265_s16 }
  0x5a   : > { %s528_s1 = sshll.u32 %s521_s29, 4  ;;  %s518_s3 = scalar_lea.sflag [#allocation10], %s8185_s27  ;;  %s8242_s1 = int_to_ptr.vmem [resolvable:$true] %s528_s1 }
  0x5b   : > { %s7953_s2 = scalar_lea.hbm %s8238_s23, 16384  ;;  %s7957_s28 = scalar_lea.hbm %s11243_s5, 32768 }
  0x5c   : > { %p7954_p9 = scmp.ne.s32.totalorder %s8238_s23, %s7953_s2  ;;  %p7958_p0 = scmp.lt.s32.totalorder %s8238_s23, %s11243_s5 }
  0x5d   : > { %p7959_p1 = scmp.lt.s32.totalorder %s7957_s28, %s7953_s2 }
  0x5e   : > { %p7955_p10 = pnand %p7954_p9, %p8150_p5 }
  0x5f   : > { %p7960_p2 = por %p7959_p1, %p7958_p0 }
  0x60   : > { %p7956_p11 = pneg %p7955_p10 }
  0x62   : > { %p7961_p3 = pnand %p7960_p2, %p7956_p11 }
  0x64   : > { %7964 = shalt.err (!%p7961_p3)
}
  0x65   : > { %s7965_s16 = scalar_lea.vmem %s8242_s1, 16384  ;;  %s8053_s29 = smov [#allocation9]  }
  0x66   : > { %p7966_p4 = scmp.ne.s32.totalorder %s8242_s1, %s7965_s16  ;;  %s7969_s24 = sshll.u32 %s8053_s29, 4  ;;  %s7970_s24 = int_to_ptr.vmem [resolvable:$false] %s7969_s24 }
  0x67   : > { %s7971_s25 = scalar_lea.vmem %s7970_s24, 32768  ;;  %p7972_p12 = scmp.lt.s32.totalorder %s8242_s1, %s7970_s24 }
  0x68   : > { %p7967_p7 = pnand %p7966_p4, %p8150_p5  ;;  %p7973_p13 = scmp.lt.s32.totalorder %s7971_s25, %s7965_s16 }
  0x6a   : > { %p7968_p8 = pneg %p7967_p7  ;;  %p7974_p9 = por %p7973_p13, %p7972_p12 }
  0x6c   : > { %p7975_p10 = pnand %p7974_p9, %p7968_p8 }
  0x6e   : > { %7978 = shalt.err (!%p7975_p10)
}
  0x6f   : > { %s11266_s28 = smov 128   ;;  %s11267_s26 = smov 256  }
  0x70   : > { %7776 = dma.hbm_to_vmem [thread:$0]  (%p8150_p5), %s8238_s23, 16384, %s8242_s1, %s518_s3, %s11267_s26, %s11266_s28, %s8052_s14  }
  0x71   : > { %537 = sbr.rel (!%p8150_p5) target bundleno = 119 (0x77), region = 146  ;;  %s7266_s2 = sshll.u32 (%p8150_p5), %s8185_s27, 5 }
  0x72   : > { %s7676_s17 = sshll.u32 (%p8150_p5), %s8047_s12, 3  ;;  %s541_s25 = scalar_lea.vmem (%p8150_p5), [#allocation11], %s7266_s2 }
  0x73   : > { %s544_s24 = scalar_lea.vmem (%p8150_p5), %s11244_s6, %s7676_s17 }
  0x74   : > { %v579_v16 = vld [vmem:[%s544_s24] sm:$0xff] (%p8150_p5)  ;;  %v581_v17 = vld [vmem:[%s544_s24 + $0x10] sm:$0xff] (%p8150_p5) }
  0x75   : > { %v583_v18 = vld [vmem:[%s544_s24 + $0x20] sm:$0xff] (%p8150_p5)  ;;  %580 = vst [vmem:[%s541_s25] sm:$0xff] (%p8150_p5), %v579_v16  ;;  %582 = vst [vmem:[%s541_s25 + $0x8] sm:$0xff] (%p8150_p5), %v581_v17  ;;  %v585_v19 = vld [vmem:[%s544_s24 + $0x30] sm:$0xff] (%p8150_p5) }
  0x76   : > { %584 = vst [vmem:[%s541_s25 + $0x10] sm:$0xff] %v583_v18  ;;  %586 = vst [vmem:[%s541_s25 + $0x18] sm:$0xff] %v585_v19 }
  0x77 PF: > { %592 = sbr.rel (!%p8150_p5) target bundleno = 144 (0x90), region = 184  ;;  %s7269_s14 = sshll.u32 (%p8150_p5), %s8185_s27, 7 }
  0x78   : > { %s7677_s23 = sshll.u32 (%p8150_p5), %s8047_s12, 2  ;;  %s8287_s19 = scalar_lea.vmem (%p8150_p5), [#allocation12], %s7269_s14 }
  0x79   : > { %s8282_s28 = scalar_lea.vmem (%p8150_p5), %s11245_s7, %s7677_s23 }
  0x7a   : > { %v616_v20 = vld [vmem:[%s8282_s28] sm:$0xf] (%p8150_p5)  ;;  %v618_v21 = vld [vmem:[%s8282_s28 + $0x8] sm:$0xf] (%p8150_p5)  ;;  %v620_v22 = vld [vmem:[%s8282_s28 + $0x10] sm:$0xf] (%p8150_p5) }
  0x7b   : > { %617 = vst [vmem:[%s8287_s19] sm:$0xf] (%p8150_p5), %v616_v20  ;;  %619 = vst [vmem:[%s8287_s19 + $0x4] sm:$0xf] (%p8150_p5), %v618_v21  ;;  %v622_v23 = vld [vmem:[%s8282_s28 + $0x18] sm:$0xf] (%p8150_p5) }
  0x7c   : > { %621 = vst [vmem:[%s8287_s19 + $0x8] sm:$0xf] %v620_v22  ;;  %v624_v24 = vld [vmem:[%s8282_s28 + $0x20] sm:$0xf]  ;;  %v626_v25 = vld [vmem:[%s8282_s28 + $0x28] sm:$0xf] }
  0x7d   : > { %623 = vst [vmem:[%s8287_s19 + $0xc] sm:$0xf] %v622_v23  ;;  %625 = vst [vmem:[%s8287_s19 + $0x10] sm:$0xf] %v624_v24  ;;  %v628_v26 = vld [vmem:[%s8282_s28 + $0x30] sm:$0xf] }
  0x7e   : > { %627 = vst [vmem:[%s8287_s19 + $0x14] sm:$0xf] %v626_v25  ;;  %v630_v27 = vld [vmem:[%s8282_s28 + $0x38] sm:$0xf]  ;;  %v632_v28 = vld [vmem:[%s8282_s28 + $0x40] sm:$0xf] }
  0x7f   : > { %629 = vst [vmem:[%s8287_s19 + $0x18] sm:$0xf] %v628_v26  ;;  %631 = vst [vmem:[%s8287_s19 + $0x1c] sm:$0xf] %v630_v27  ;;  %v634_v29 = vld [vmem:[%s8282_s28 + $0x48] sm:$0xf] }
  0x80   : > { %633 = vst [vmem:[%s8287_s19 + $0x20] sm:$0xf] %v632_v28  ;;  %v636_v30 = vld [vmem:[%s8282_s28 + $0x50] sm:$0xf]  ;;  %v638_v31 = vld [vmem:[%s8282_s28 + $0x58] sm:$0xf] }
  0x81   : > { %635 = vst [vmem:[%s8287_s19 + $0x24] sm:$0xf] %v634_v29  ;;  %637 = vst [vmem:[%s8287_s19 + $0x28] sm:$0xf] %v636_v30  ;;  %v640_v32 = vld [vmem:[%s8282_s28 + $0x60] sm:$0xf] }
  0x82   : > { %639 = vst [vmem:[%s8287_s19 + $0x2c] sm:$0xf] %v638_v31  ;;  %v642_v33 = vld [vmem:[%s8282_s28 + $0x68] sm:$0xf]  ;;  %v644_v34 = vld [vmem:[%s8282_s28 + $0x70] sm:$0xf] }
  0x83   : > { %641 = vst [vmem:[%s8287_s19 + $0x30] sm:$0xf] %v640_v32  ;;  %643 = vst [vmem:[%s8287_s19 + $0x34] sm:$0xf] %v642_v33  ;;  %v646_v35 = vld [vmem:[%s8282_s28 + $0x78] sm:$0xf] }
  0x84   : > { %645 = vst [vmem:[%s8287_s19 + $0x38] sm:$0xf] %v644_v34  ;;  %v648_v36 = vld [vmem:[%s8282_s28 + $0x80] sm:$0xf]  ;;  %v650_v37 = vld [vmem:[%s8282_s28 + $0x88] sm:$0xf] }
  0x85   : > { %647 = vst [vmem:[%s8287_s19 + $0x3c] sm:$0xf] %v646_v35  ;;  %649 = vst [vmem:[%s8287_s19 + $0x40] sm:$0xf] %v648_v36  ;;  %v652_v38 = vld [vmem:[%s8282_s28 + $0x90] sm:$0xf] }
  0x86   : > { %651 = vst [vmem:[%s8287_s19 + $0x44] sm:$0xf] %v650_v37  ;;  %v654_v39 = vld [vmem:[%s8282_s28 + $0x98] sm:$0xf]  ;;  %v656_v40 = vld [vmem:[%s8282_s28 + $0xa0] sm:$0xf] }
  0x87   : > { %653 = vst [vmem:[%s8287_s19 + $0x48] sm:$0xf] %v652_v38  ;;  %655 = vst [vmem:[%s8287_s19 + $0x4c] sm:$0xf] %v654_v39  ;;  %v658_v41 = vld [vmem:[%s8282_s28 + $0xa8] sm:$0xf] }
  0x88   : > { %657 = vst [vmem:[%s8287_s19 + $0x50] sm:$0xf] %v656_v40  ;;  %v660_v42 = vld [vmem:[%s8282_s28 + $0xb0] sm:$0xf]  ;;  %v662_v43 = vld [vmem:[%s8282_s28 + $0xb8] sm:$0xf] }
  0x89   : > { %659 = vst [vmem:[%s8287_s19 + $0x54] sm:$0xf] %v658_v41  ;;  %661 = vst [vmem:[%s8287_s19 + $0x58] sm:$0xf] %v660_v42  ;;  %v664_v44 = vld [vmem:[%s8282_s28 + $0xc0] sm:$0xf] }
  0x8a   : > { %663 = vst [vmem:[%s8287_s19 + $0x5c] sm:$0xf] %v662_v43  ;;  %v666_v45 = vld [vmem:[%s8282_s28 + $0xc8] sm:$0xf]  ;;  %v668_v46 = vld [vmem:[%s8282_s28 + $0xd0] sm:$0xf] }
  0x8b   : > { %665 = vst [vmem:[%s8287_s19 + $0x60] sm:$0xf] %v664_v44  ;;  %667 = vst [vmem:[%s8287_s19 + $0x64] sm:$0xf] %v666_v45  ;;  %v670_v47 = vld [vmem:[%s8282_s28 + $0xd8] sm:$0xf] }
  0x8c   : > { %669 = vst [vmem:[%s8287_s19 + $0x68] sm:$0xf] %v668_v46  ;;  %v672_v48 = vld [vmem:[%s8282_s28 + $0xe0] sm:$0xf]  ;;  %v674_v49 = vld [vmem:[%s8282_s28 + $0xe8] sm:$0xf] }
  0x8d   : > { %671 = vst [vmem:[%s8287_s19 + $0x6c] sm:$0xf] %v670_v47  ;;  %673 = vst [vmem:[%s8287_s19 + $0x70] sm:$0xf] %v672_v48  ;;  %v676_v50 = vld [vmem:[%s8282_s28 + $0xf0] sm:$0xf] }
  0x8e   : > { %675 = vst [vmem:[%s8287_s19 + $0x74] sm:$0xf] %v674_v49  ;;  %v678_v51 = vld [vmem:[%s8282_s28 + $0xf8] sm:$0xf]  ;;  %677 = vst [vmem:[%s8287_s19 + $0x78] sm:$0xf] %v676_v50 }
  0x8f   : > { %679 = vst [vmem:[%s8287_s19 + $0x7c] sm:$0xf] %v678_v51 }
  0x90 PF: > { %p7272_p5 = scmp.ge.s32.totalorder %s8047_s12, 1  ;;  %p775_p11 = scmp.lt.s32.totalorder %s8047_s12, 3 }
  0x92   : > { %p776_p0 = pnand %p7272_p5, %p775_p11 }
  0x93   : > { %s8353_s27 = sand.u32 (!%p776_p0), 1, %s8039_s10  }
  0x94   : > { %779 = sbr.rel (%p776_p0) target bundleno = 1315 (0x523), region = 229  ;;  %s7273_s26 = sshll.u32 (!%p776_p0), %s8353_s27, 6 }
  0x95   : > { %s8357_s2 = sshll.u32 (!%p776_p0), %s8353_s27, 5  ;;  %s7275_s17 = sshll.u32 (!%p776_p0), %s8353_s27, 10 }
  0x96   : > { %s8360_s29 = scalar_lea.vmem (!%p776_p0), [#allocation3], %s7273_s26  ;;  %s791_s16 = scalar_lea.vmem (!%p776_p0), [#allocation4], %s8357_s2 }
  0x97   : > { %s796_s24 = scalar_lea.sflag (!%p776_p0), [#allocation6], %s8353_s27  ;;  %s8364_s25 = scalar_lea.vmem (!%p776_p0), [#allocation5], %s7275_s17 }
  0x99   : > { %8022 = dma.done.wait (%p8154_p6), %s796_s24, 16384  }
  0x9a   : > { %8024 = vsyncadd (%p8154_p6), %s796_s24, 4294950912  ;;  %s8371_s14 = scalar_lea.vmem [#allocation8], %s8357_s2  ;;  %s812_s23 = scalar_lea.sflag [#allocation10], %s8353_s27 }
  0x9b   : > { %s8374_s1 = scalar_lea.vmem [#allocation9], %s7275_s17 }
  0x9c   : > { %8026 = dma.done.wait (%p8154_p6), %s812_s23, 16384  }
  0x9d   : > { %8028 = vsyncadd (%p8154_p6), %s812_s23, 4294950912  ;;  %v945_v52 = vlaneseq  ;;  %s7281_s3 = sshll.u32 %s8132_s13, 1  ;;  %v919_v54 = vld [vmem:[%s791_s16] sm:$0xff]  ;;  %v8393_v56 = vld [vmem:[%s8360_s29 + $0x8] sm:$0xff]  ;;  %s9960_s17 = scalar_lea.vmem [#allocation11], %s8357_s2 }
  0x9e   : > { %p900_p1 = scmp.lt.s32.totalorder %s7281_s3, 3  ;;  %v932_v55 = vld [vmem:[%s8360_s29] sm:$0xff]  ;;  %v934_v60 = vld [vmem:[%s8360_s29 + $0x10] sm:$0xff]  ;;  %v935_v61 = vld [vmem:[%s8360_s29 + $0x18] sm:$0xff]  ;;  %v938_v3 = vunpack.c.l.bf16 %v8393_v56  ;;  %v923_v8 = vunpack.c.l.bf16 %v919_v54  ;;  %v924_v9 = vunpack.c.h.bf16 %v919_v54  ;;  %s7279_s2 = sshll.u32 %s8353_s27, 7 }
  0x9f   : > { %v946_v53 = vshrl.u32 %v945_v52, 7  ;;  %v8402_v62 = vld [vmem:[%s791_s16 + $0x8] sm:$0xff]  ;;  %v921_v63 = vld [vmem:[%s791_s16 + $0x10] sm:$0xff]  ;;  %v922_v0 = vld [vmem:[%s791_s16 + $0x18] sm:$0xff]  ;;  %v936_v1 = vunpack.c.l.bf16 %v932_v55  ;;  %v937_v2 = vunpack.c.h.bf16 %v932_v55  ;;  %v940_v4 = vunpack.c.l.bf16 %v934_v60  ;;  %s7678_s23 = sshll.u32 %s8132_s13, 7  ;;  %p11316_p2 = scmp.ne.s32.totalorder %s11259_s21, 0 }
  0xa0   : > { %s11324_s3 = smov (!%p900_p1, %s7281_s3), 3  ;;  %v941_v5 = vunpack.c.h.bf16 %v934_v60  ;;  %v942_v6 = vunpack.c.l.bf16 %v935_v61  ;;  %v943_v7 = vunpack.c.h.bf16 %v935_v61  ;;  %v925_v12 = vunpack.c.l.bf16 %v8402_v62  ;;  %v7286_v16 = vld [vmem:[%s8360_s29 + $0x20] sm:$0xff]  ;;  %v7287_v17 = vld [vmem:[%s8360_s29 + $0x28] sm:$0xff]  ;;  %v7288_v18 = vld [vmem:[%s8360_s29 + $0x30] sm:$0xff]  ;;  %s11201_s26 = scalar_lea.hbm %s11247_s9, %s7678_s23 }
  0xa1   : > { %s7282_s28 = sshll.u32 %s11324_s3, 1  ;;  %v8395_v57 = vsub.s32 0, %v946_v53  ;;  %v8397_v58 = vsub.s32 1, %v946_v53  ;;  %v927_v13 = vunpack.c.l.bf16 %v921_v63  ;;  %v928_v14 = vunpack.c.h.bf16 %v921_v63  ;;  %v7289_v28 = vld [vmem:[%s8360_s29 + $0x38] sm:$0xff]  ;;  %s10938_s29 = scalar_lea.vmem [#allocation12], %s7279_s2 }
  0xa2   : > { %s8389_s20 = scalar_lea.vmem %s11238_s0, %s7282_s28  ;;  %v929_v15 = vunpack.c.l.bf16 %v922_v0  ;;  %v930_v19 = vunpack.c.h.bf16 %v922_v0  ;;  %v978_v29 = vunpack.c.l.bf16 %v7286_v16  ;;  %v979_v30 = vunpack.c.h.bf16 %v7286_v16  ;;  %s8060_s2 = smov [#allocation13]  }
  0xa3   : > { %v931_v59 = vld [vmem:[%s8389_s20] ss:$2 sm:$0x3]  ;;  %v7285_v27 = vld [vmem:[%s8389_s20 + $0x1] ss:$2 sm:$0x3]  ;;  %v980_v31 = vunpack.c.l.bf16 %v7287_v17  ;;  %v982_v32 = vunpack.c.l.bf16 %v7288_v18  ;;  %v983_v36 = vunpack.c.h.bf16 %v7288_v18  ;;  %v984_v37 = vunpack.c.l.bf16 %v7289_v28 }
  0xa4   : > { %v948_v10 = vrot.slane %v931_v59, %v8395_v57  ;;  %v952_v11 = vrot.slane %v931_v59, %v8397_v58  ;;  %v985_v38 = vunpack.c.h.bf16 %v7289_v28  ;;  %v990_v39 = vrot.slane %v7285_v27, %v8395_v57  ;;  %s7027_s20 = scalar_lea.sflag [#allocation7], %s8353_s27 }
  0xa5   : > { %v994_v40 = vrot.slane %v7285_v27, %v8397_v58  ;;  %v939_v52 = vunpack.c.h.bf16 %v8393_v56 }
  0xa6   : > { %v955_v20 = vmul.f32 %v948_v10, %v936_v1  ;;  %v956_v21 = vmul.f32 %v952_v11, %v937_v2  ;;  %v957_v22 = vmul.f32 %v948_v10, %v938_v3  ;;  %v959_v23 = vmul.f32 %v948_v10, %v940_v4 }
  0xa7   : > { %v960_v24 = vmul.f32 %v952_v11, %v941_v5  ;;  %v961_v25 = vmul.f32 %v948_v10, %v942_v6  ;;  %v962_v26 = vmul.f32 %v952_v11, %v943_v7  ;;  %v997_v45 = vmul.f32 %v990_v39, %v978_v29 }
  0xa8   : > { %v963_v33 = vadd.f32 %v955_v20, %v923_v8  ;;  %v964_v34 = vadd.f32 %v956_v21, %v924_v9  ;;  %v965_v35 = vadd.f32 %v957_v22, %v925_v12  ;;  %v967_v41 = vadd.f32 %v959_v23, %v927_v13 }
  0xa9   : > { %v968_v42 = vadd.f32 %v960_v24, %v928_v14  ;;  %v969_v43 = vadd.f32 %v961_v25, %v929_v15  ;;  %v970_v44 = vadd.f32 %v962_v26, %v930_v19  ;;  %v998_v46 = vmul.f32 %v994_v40, %v979_v30 }
  0xaa   : > { %v999_v47 = vmul.f32 %v990_v39, %v980_v31  ;;  %v1001_v48 = vmul.f32 %v990_v39, %v982_v32  ;;  %v1002_v49 = vmul.f32 %v994_v40, %v983_v36  ;;  %v1003_v50 = vmul.f32 %v990_v39, %v984_v37 }
  0xab   : > { %v1004_v51 = vmul.f32 %v994_v40, %v985_v38  ;;  %v1005_v53 = vadd.f32 %v997_v45, %v963_v33  ;;  %v1006_v54 = vadd.f32 %v998_v46, %v964_v34  ;;  %v926_v3 = vunpack.c.h.bf16 %v8402_v62 }
  0xac   : > { %v1007_v55 = vadd.f32 %v999_v47, %v965_v35  ;;  %v8416_v59 = vadd.f32 %v1001_v48, %v967_v41  ;;  %v8418_v60 = vadd.f32 %v1002_v49, %v968_v42  ;;  %v8420_v61 = vadd.f32 %v1003_v50, %v969_v43 }
  0xad   : > { %v8422_v63 = vadd.f32 %v1004_v51, %v970_v44  ;;  %v8424_v0 = vmul.f32 30.0, %v1005_v53  ;;  %v8426_v1 = vmul.f32 30.0, %v1006_v54  ;;  %v958_v5 = vmul.f32 %v952_v11, %v939_v52 }
  0xae   : > { %v8428_v2 = vmul.f32 30.0, %v1007_v55  ;;  %v981_v6 = vunpack.c.h.bf16 %v7287_v17  ;;  %v8054_v35 = vmov 683565275   ;;  %v8055_v37 = vmov 2475754826  }
  0xaf   : > { %v1021_v56 = vand.u32 2147483647, %v8424_v0  ;;  %v1024_v4 = vand.u32 2139095040, %v8424_v0  ;;  %v1125_v7 = vand.u32 2147483647, %v8426_v1  ;;  %v1128_v8 = vand.u32 2139095040, %v8426_v1 }
  0xb0   : > { %v1232_v62 = vand.u32 2139095040, %v8428_v2  ;;  %v966_v15 = vadd.f32 %v958_v5, %v926_v3  ;;  %v1000_v16 = vmul.f32 %v994_v40, %v981_v6  ;;  %v1229_v22 = vand.u32 2147483647, %v8428_v2 }
  0xb1   : > { %v1025_v9 = vshrl.u32 %v1024_v4, 23  ;;  %v1028_v10 = vand.u32 8388607, %v1021_v56  ;;  %v1129_v12 = vshrl.u32 %v1128_v8, 23  ;;  %v1132_v13 = vand.u32 8388607, %v1125_v7 }
  0xb2   : > { %v1233_v11 = vshrl.u32 %v1232_v62, 23  ;;  %v8441_v24 = vadd.f32 %v1000_v16, %v966_v15  ;;  %v8449_v32 = vand.u32 8388607, %v1229_v22  ;;  %v8056_v39 = vmov 2131351028  }
  0xb3   : > { %v7290_v14 = vadd.s32 4294967169, %v1025_v9  ;;  %v7294_v18 = vadd.s32 4294967169, %v1129_v12  ;;  %v1029_v17 = vor.u32 8388608, %v1028_v10  ;;  %v1133_v20 = vor.u32 8388608, %v1132_v13 }
  0xb4   : > { %v7298_v23 = vadd.s32 4294967169, %v1233_v11  ;;  %v8057_v41 = vmov 2102212464   ;;  %v8058_v43 = vmov 920167782   ;;  %vm1023_vm12 = vcmp.lt.s32.totalorder %v8424_v0, 0 }
  0xb5   : > { %v1031_v19 = vadd.s32 1, %v7290_v14  ;;  %v1135_v21 = vadd.s32 1, %v7294_v18  ;;  %v8443_v28 = vshll.u32 %v1029_v17, 8  ;;  %v8445_v31 = vshll.u32 %v1133_v20, 8 }
  0xb6   : > { %v8451_v33 = vadd.s32 1, %v7298_v23  ;;  %v8059_v51 = vmov 1326507024   ;;  %vm8535_vm14 = vcmp.le.f32.partialorder %v1021_v56, 0.7853982 }
  0xb7   : > { %vm1032_vm0 = vcmp.gt.s32.totalorder %v1031_v19, 0  ;;  %vm1136_vm1 = vcmp.gt.s32.totalorder %v1135_v21, 0 }
  0xb8   : > { %v1033_v25 = vsel %vm1032_vm0, %v1031_v19, 0  ;;  %v1137_v29 = vsel %vm1136_vm1, %v1135_v21, 0  ;;  %vm1240_vm6 = vcmp.gt.s32.totalorder %v8451_v33, 0 }
  0xb9   : > { %v1034_v26 = vshrl.u32 %v1033_v25, 5  ;;  %v1035_v27 = vand.u32 31, %v1033_v25  ;;  %v1139_v30 = vand.u32 31, %v1137_v29  ;;  %v8458_v45 = vshrl.u32 %v1137_v29, 5 }
  0xbb   : > { %v1036_v34 = vsub.s32 32, %v1035_v27  ;;  %v1038_v36 = vshll.u32 %v8054_v35, %v1035_v27  ;;  %v1041_v38 = vshll.u32 %v8055_v37, %v1035_v27  ;;  %v1044_v40 = vshll.u32 %v8056_v39, %v1035_v27 }
  0xbc   : > { %v1047_v42 = vshll.u32 %v8057_v41, %v1035_v27  ;;  %v1050_v44 = vshll.u32 %v8058_v43, %v1035_v27  ;;  %vm1053_vm2 = vcmp.lt.s32.totalorder %v1034_v26, 1  ;;  %vm1054_vm3 = vcmp.lt.s32.totalorder %v1034_v26, 2 }
  0xbd   : > { %v1037_v46 = vshrl.u32 %v8054_v35, %v1036_v34  ;;  %v1039_v47 = vshrl.u32 %v8055_v37, %v1036_v34  ;;  %v1042_v48 = vshrl.u32 %v8056_v39, %v1036_v34  ;;  %v1045_v49 = vshrl.u32 %v8057_v41, %v1036_v34 }
  0xbe   : > { %v1048_v50 = vshrl.u32 %v8058_v43, %v1036_v34  ;;  %v1051_v52 = vshrl.u32 %v8059_v51, %v1036_v34  ;;  %vm1056_vm4 = vcmp.lt.s32.totalorder %v1034_v26, 4  ;;  %v1140_v3 = vsub.s32 32, %v1139_v30 }
  0xbf   : > { %v1040_v53 = vor.u32 %v1039_v47, %v1038_v36  ;;  %v1043_v54 = vor.u32 %v1042_v48, %v1041_v38  ;;  %v1046_v55 = vor.u32 %v1045_v49, %v1044_v40  ;;  %vm1055_vm5 = vcmp.lt.s32.totalorder %v1034_v26, 3 }
  0xc0   : > { %v1049_v4 = vor.u32 %v1048_v50, %v1047_v42  ;;  %v1052_v5 = vor.u32 %v1051_v52, %v1050_v44  ;;  %v1142_v6 = vshll.u32 %v8054_v35, %v1139_v30  ;;  %v1145_v15 = vshll.u32 %v8055_v37, %v1139_v30 }
  0xc1   : > { %v1057_v8 = vsel %vm1053_vm2, %v1037_v46, %v1040_v53  ;;  %v1058_v9 = vsel %vm1056_vm4, %v1046_v55, 2102212464  ;;  %v1061_v10 = vsel %vm1053_vm2, %v1040_v53, %v1043_v54  ;;  %v1065_v12 = vsel %vm1053_vm2, %v1043_v54, %v1046_v55 }
  0xc2   : > { %v1059_v13 = vsel %vm1055_vm5, %v1043_v54, %v1058_v9  ;;  %v1062_v62 = vsel %vm1056_vm4, %v1049_v4, 920167782  ;;  %v1066_v14 = vsel %vm1056_vm4, %v1052_v5, 1326507024  ;;  %v1141_v11 = vshrl.u32 %v8054_v35, %v1140_v3 }
  0xc3   : > { %v1063_v16 = vsel %vm1055_vm5, %v1046_v55, %v1062_v62  ;;  %v1067_v18 = vsel %vm1055_vm5, %v1049_v4, %v1066_v14  ;;  %v1143_v17 = vshrl.u32 %v8055_v37, %v1140_v3  ;;  %v1060_v19 = vsel %vm1054_vm3, %v1057_v8, %v1059_v13 }
  0xc4   : > { %v1064_v20 = vsel %vm1054_vm3, %v1061_v10, %v1063_v16  ;;  %v1068_v21 = vsel %vm1054_vm3, %v1065_v12, %v1067_v18  ;;  %v1146_v23 = vshrl.u32 %v8056_v39, %v1140_v3  ;;  %v1148_v40 = vshll.u32 %v8056_v39, %v1139_v30 }
  0xc5   : > { %v8479_v25 = vmul.u32.u64.low %v8443_v28, %v1068_v21  ;;  %v8480_v27 = vmul.u32.u64.high %v8443_v28, %v1068_v21, %v8479_v25  ;;  %v8483_v29 = vmul.u32.u64.low %v8443_v28, %v1064_v20  ;;  %v8484_v34 = vmul.u32.u64.high %v8443_v28, %v1064_v20, %v8483_v29 }
  0xc6   : > { %v1144_v36 = vor.u32 %v1143_v17, %v1142_v6  ;;  %v1147_v38 = vor.u32 %v1146_v23, %v1145_v15  ;;  %v1149_v42 = vshrl.u32 %v8057_v41, %v1140_v3  ;;  %v1151_v26 = vshll.u32 %v8057_v41, %v1139_v30 }
  0xc7   : > { %v1152_v44 = vshrl.u32 %v8058_v43, %v1140_v3  ;;  %v1154_v46 = vshll.u32 %v8058_v43, %v1139_v30  ;;  %v1155_v47 = vshrl.u32 %v8059_v51, %v1140_v3  ;;  %v1076_v48 = vmul.u32 %v8443_v28, %v1060_v19 }
  0xc8   : > { %v1150_v49 = vor.u32 %v1149_v42, %v1148_v40  ;;  %vm1157_vm7 = vcmp.lt.s32.totalorder %v8458_v45, 1  ;;  %vm1158_vm8 = vcmp.lt.s32.totalorder %v8458_v45, 2  ;;  %vm1078_vm9 = vc.u32 %v8480_v27, %v8483_v29 }
  0xc9   : > { %v1079_v50 = vadd.s32 1, %v8484_v34  ;;  %v1153_v52 = vor.u32 %v1152_v44, %v1151_v26  ;;  %vm1159_vm10 = vcmp.lt.s32.totalorder %v8458_v45, 3  ;;  %v1156_v53 = vor.u32 %v1155_v47, %v1154_v46 }
  0xca   : > { %vm1160_vm11 = vcmp.lt.s32.totalorder %v8458_v45, 4  ;;  %v1161_v30 = vsel %vm1157_vm7, %v1141_v11, %v1144_v36  ;;  %v1165_v54 = vsel %vm1157_vm7, %v1144_v36, %v1147_v38  ;;  %v1169_v4 = vsel %vm1157_vm7, %v1147_v38, %v1150_v49 }
  0xcb   : > { %v1080_v28 = vsel %vm1078_vm9, %v1079_v50, %v8484_v34  ;;  %v1162_v55 = vsel %vm1160_vm11, %v1150_v49, 2102212464  ;;  %v1166_v3 = vsel %vm1160_vm11, %v1153_v52, 920167782  ;;  %v1170_v9 = vsel %vm1160_vm11, %v1156_v53, 1326507024 }
  0xcc   : > { %v1081_v5 = vadd.s32 %v1080_v28, %v1076_v48  ;;  %v1163_v6 = vsel %vm1159_vm10, %v1147_v38, %v1162_v55  ;;  %v1167_v8 = vsel %vm1159_vm10, %v1150_v49, %v1166_v3  ;;  %v1171_v13 = vsel %vm1159_vm10, %v1153_v52, %v1170_v9 }
  0xcd   : > { %v1164_v10 = vsel %vm1158_vm8, %v1161_v30, %v1163_v6  ;;  %v1168_v12 = vsel %vm1158_vm8, %v1165_v54, %v1167_v8  ;;  %v1241_v62 = vsel %vm1240_vm6, %v8451_v33, 0  ;;  %v1172_v15 = vsel %vm1158_vm8, %v1169_v4, %v1171_v13 }
  0xce   : > { %v1082_v14 = vadd.s32 536870912, %v1081_v5  ;;  %v8512_v16 = vmul.u32.u64.low %v8445_v31, %v1168_v12  ;;  %v8513_v18 = vmul.u32.u64.high %v8445_v31, %v1168_v12, %v8512_v16  ;;  %v8517_v11 = vmul.f32 30.0, %v8441_v24 }
  0xcf   : > { %v8520_v17 = vmul.u32.u64.low %v8445_v31, %v1172_v15  ;;  %v8521_v19 = vmul.u32.u64.high %v8445_v31, %v1172_v15, %v8520_v17  ;;  %v1237_v20 = vor.u32 8388608, %v8449_v32  ;;  %v1243_v33 = vand.u32 31, %v1241_v62 }
  0xd0   : > { %v1083_v21 = vshrl.u32 %v1082_v14, 30  ;;  %v1180_v23 = vmul.u32 %v8445_v31, %v1164_v10  ;;  %v1183_v25 = vadd.s32 1, %v8513_v18  ;;  %v1333_v36 = vand.u32 2147483647, %v8517_v11 }
  0xd1   : > { %v1244_v34 = vsub.s32 32, %v1243_v33  ;;  %vm1182_vm13 = vc.u32 %v8521_v19, %v8512_v16  ;;  %v8529_v24 = vshll.u32 %v1237_v20, 8  ;;  %v1336_v38 = vand.u32 2139095040, %v8517_v11 }
  0xd2   : > { %v1084_v45 = vshll.u32 %v1083_v21, 30  ;;  %v1107_v40 = vsub.s32 4, %v1083_v21  ;;  %v1184_v42 = vsel %vm1182_vm13, %v1183_v25, %v8513_v18  ;;  %v1242_v26 = vshrl.u32 %v1241_v62, 5 }
  0xd3   : > { %v1185_v44 = vadd.s32 %v1184_v42, %v1180_v23  ;;  %v1246_v46 = vshll.u32 %v8054_v35, %v1243_v33  ;;  %v1247_v47 = vshrl.u32 %v8055_v37, %v1244_v34  ;;  %v1249_v48 = vshll.u32 %v8055_v37, %v1243_v33 }
  0xd4   : > { %v8539_v31 = vsub.s32 %v1081_v5, %v1084_v45  ;;  %v1250_v56 = vshrl.u32 %v8056_v39, %v1244_v34  ;;  %v1252_v50 = vshll.u32 %v8056_v39, %v1243_v33  ;;  %v1253_v52 = vshrl.u32 %v8057_v41, %v1244_v34 }
  0xd5   : > { %v1077_v53 = vadd.s32 %v8483_v29, %v8480_v27  ;;  %v1186_v30 = vadd.s32 536870912, %v1185_v44  ;;  %v1255_v54 = vshll.u32 %v8057_v41, %v1243_v33  ;;  %v1337_v28 = vshrl.u32 %v1336_v38, 23 }
  0xd6   : > { %v1087_v49 = vsub.s32 0, %v8539_v31  ;;  %v1108_v3 = vsel %vm1023_vm12, %v1107_v40, %v1083_v21  ;;  %v1256_v4 = vshrl.u32 %v8058_v43, %v1244_v34  ;;  %vm1264_vm15 = vcmp.lt.s32.totalorder %v1242_v26, 4 }
  0xd7   : > { %v8556_v5 = vshrl.u32 %v1186_v30, 30  ;;  %v1245_v6 = vshrl.u32 %v8054_v35, %v1244_v34  ;;  %v1258_v8 = vshll.u32 %v8058_v43, %v1243_v33  ;;  %v1259_v27 = vshrl.u32 %v8059_v51, %v1244_v34 }
  0xd8   : > { %v7291_v55 = vmin.u32 %v1087_v49, %v8539_v31  ;;  %v1248_v9 = vor.u32 %v1247_v47, %v1246_v46  ;;  %v1251_v10 = vor.u32 %v1250_v56, %v1249_v48  ;;  %v1254_v12 = vor.u32 %v1253_v52, %v1252_v50 }
  0xd9   : > { %v1188_v13 = vshll.u32 %v8556_v5, 30  ;;  %v1257_v62 = vor.u32 %v1256_v4, %v1255_v54  ;;  %vm1261_vm0 = vcmp.lt.s32.totalorder %v1242_v26, 1  ;;  %vm1263_vm1 = vcmp.lt.s32.totalorder %v1242_v26, 3 }
  0xda   : > { %v1089_v29 = vclz %v7291_v55  ;;  %v1260_v15 = vor.u32 %v1259_v27, %v1258_v8  ;;  %v1266_v18 = vsel %vm1264_vm15, %v1254_v12, 2102212464  ;;  %v7302_v17 = vadd.s32 4294967169, %v1337_v28 }
  0xdb   : > { %v1110_v20 = vsel %vm8535_vm14, 0, %v1108_v3  ;;  %v8565_v21 = vsub.s32 %v1185_v44, %v1188_v13  ;;  %vm1262_vm2 = vcmp.lt.s32.totalorder %v1242_v26, 2  ;;  %v1270_v33 = vsel %vm1264_vm15, %v1257_v62, 920167782 }
  0xdc   : > { %v7292_v14 = vadd.s32 4294967294, %v1089_v29  ;;  %v1265_v23 = vsel %vm1261_vm0, %v1245_v6, %v1248_v9  ;;  %v1269_v45 = vsel %vm1261_vm0, %v1248_v9, %v1251_v10  ;;  %v1271_v25 = vsel %vm1263_vm1, %v1254_v12, %v1270_v33 }
  0xdd   : > { %v1191_v38 = vsub.s32 0, %v8565_v21  ;;  %v1267_v40 = vsel %vm1263_vm1, %v1251_v10, %v1266_v18  ;;  %v1273_v42 = vsel %vm1261_vm0, %v1251_v10, %v1254_v12  ;;  %v1274_v48 = vsel %vm1264_vm15, %v1260_v15, 1326507024 }
  0xde   : > { %vm7293_vm3 = vcmp.lt.s32.totalorder %v7292_v14, 0  ;;  %v1272_v56 = vsel %vm1262_vm2, %v1269_v45, %v1271_v25  ;;  %v1275_v50 = vsel %vm1263_vm1, %v1257_v62, %v1274_v48  ;;  %v8581_v52 = vand.u32 8388607, %v1333_v36 }
  0xdf   : > { %v1092_v34 = vsel %vm7293_vm3, 0, %v7292_v14  ;;  %v7295_v49 = vmin.u32 %v1191_v38, %v8565_v21  ;;  %v1276_v28 = vsel %vm1262_vm2, %v1273_v42, %v1275_v50  ;;  %v1343_v55 = vadd.s32 1, %v7302_v17 }
  0xe0   : > { %v1093_v46 = vsub.s32 32, %v1092_v34  ;;  %v1094_v44 = vshll.u32 %v8539_v31, %v1092_v34  ;;  %v1097_v47 = vsub.s32 4294967266, %v1092_v34  ;;  %v8585_v31 = vmul.f32 30.0, %v8416_v59 }
  0xe1   : > { %v1114_v3 = vadd.s32 3, %v1110_v20  ;;  %v1193_v4 = vclz %v7295_v49  ;;  %v1268_v6 = vsel %vm1262_vm2, %v1265_v23, %v1267_v40  ;;  %vm1344_vm4 = vcmp.gt.s32.totalorder %v1343_v55, 0 }
  0xe2   : > { %v1095_v30 = vshrl.u32 %v1077_v53, %v1093_v46  ;;  %v1098_v54 = vadd.s32 127, %v1097_v47  ;;  %v8589_v29 = vmul.u32.u64.low %v8529_v24, %v1276_v28  ;;  %v8590_v9 = vmul.u32.u64.high %v8529_v24, %v1276_v28, %v8589_v29 }
  0xe3   : > { %v7296_v10 = vadd.s32 4294967294, %v1193_v4  ;;  %v8593_v53 = vmul.u32.u64.low %v8529_v24, %v1272_v56  ;;  %v8594_v12 = vmul.u32.u64.high %v8529_v24, %v1272_v56, %v8593_v53  ;;  %v1341_v62 = vor.u32 8388608, %v8581_v52 }
  0xe4   : > { %v1096_v8 = vor.u32 %v1095_v30, %v1094_v44  ;;  %v1099_v27 = vshll.u32 %v1098_v54, 23  ;;  %v1345_v14 = vsel %vm1344_vm4, %v1343_v55, 0  ;;  %v8598_v26 = vand.u32 3, %v1114_v3 }
  0xe5   : > { %v1181_v15 = vadd.s32 %v8512_v16, %v8521_v19  ;;  %vm7297_vm5 = vcmp.lt.s32.totalorder %v7296_v10, 0  ;;  %v1347_v18 = vand.u32 31, %v1345_v14  ;;  %v1284_v33 = vmul.u32 %v8529_v24, %v1268_v6 }
  0xe6   : > { %v1100_v13 = vor.u32 4788187, %v1099_v27  ;;  %v1103_v59 = vcvt.s32.f32 %v1096_v8  ;;  %v1196_v20 = vsel %vm7297_vm5, 0, %v7296_v10  ;;  %vm1286_vm6 = vc.u32 %v8590_v9, %v8593_v53 }
  0xe7   : > { %vm1127_vm7 = vcmp.lt.s32.totalorder %v8426_v1, 0  ;;  %v1197_v23 = vsub.s32 32, %v1196_v20  ;;  %v1198_v45 = vshll.u32 %v8565_v21, %v1196_v20  ;;  %v1201_v25 = vsub.s32 4294967266, %v1196_v20 }
  0xe8   : > { %v1101_v17 = vand.u32 2147483647, %v1100_v13  ;;  %v1287_v34 = vadd.s32 1, %v8594_v12  ;;  %v1211_v16 = vsub.s32 4, %v8556_v5  ;;  %v8609_v19 = vshrl.u32 %v1345_v14, 5 }
  0xe9   : > { %v1348_v40 = vsub.s32 32, %v1347_v18  ;;  %v1199_v42 = vshrl.u32 %v1181_v15, %v1197_v23  ;;  %v1202_v46 = vadd.s32 127, %v1201_v25  ;;  %v1350_v44 = vshll.u32 %v8054_v35, %v1347_v18 }
  0xea   : > { %v1104_v38 = vmul.f32 %v1103_v59, %v1101_v17  ;;  %v1288_v24 = vsel %vm1286_vm6, %v1287_v34, %v8594_v12  ;;  %v1353_v21 = vshll.u32 %v8055_v37, %v1347_v18  ;;  %vm8617_vm8 = vcmp.le.f32.partialorder %v1125_v7, 0.7853982 }
  0xeb   : > { %v1289_v48 = vadd.s32 %v1288_v24, %v1284_v33  ;;  %v1351_v49 = vshrl.u32 %v8055_v37, %v1348_v40  ;;  %v1200_v50 = vor.u32 %v1199_v42, %v1198_v45  ;;  %v1203_v52 = vshll.u32 %v1202_v46, 23 }
  0xec   : > { %v1105_v47 = vxor.u32 2147483648, %v1104_v38  ;;  %v1354_v30 = vshrl.u32 %v8056_v39, %v1348_v40  ;;  %v1356_v54 = vshll.u32 %v8056_v39, %v1347_v18  ;;  %v1357_v3 = vshrl.u32 %v8057_v41, %v1348_v40 }
  0xed   : > { %v1290_v55 = vadd.s32 536870912, %v1289_v48  ;;  %v1359_v4 = vshll.u32 %v8057_v41, %v1347_v18  ;;  %v1204_v6 = vor.u32 4788187, %v1203_v52  ;;  %v1207_v8 = vcvt.s32.f32 %v1200_v50 }
  0xee   : > { %v1106_v28 = vsel %vm1023_vm12, %v1105_v47, %v1104_v38  ;;  %v1352_v27 = vor.u32 %v1351_v49, %v1350_v44  ;;  %v1355_v10 = vor.u32 %v1354_v30, %v1353_v21  ;;  %v1360_v12 = vshrl.u32 %v8058_v43, %v1348_v40 }
  0xef   : > { %v1109_v7 = vsel %vm8535_vm14, %v8424_v0, %v1106_v28  ;;  %v1291_v29 = vshrl.u32 %v1290_v55, 30  ;;  %v1205_v13 = vand.u32 2147483647, %v1204_v6  ;;  %v1362_v59 = vshll.u32 %v8058_v43, %v1347_v18 }
  0xf0   : > { %7827 = vcosq.f32 %v1109_v7  ;;  %v1363_v14 = vshrl.u32 %v8059_v51, %v1348_v40  ;;  %v1212_v15 = vsel %vm1127_vm7, %v1211_v16, %v8556_v5  ;;  %v1361_v17 = vor.u32 %v1360_v12, %v1359_v4 }
  0xf1   : > { %7829 = vsinq.f32 %v1109_v7  ;;  %v1292_v32 = vshll.u32 %v1291_v29, 30  ;;  %vm1365_vm9 = vcmp.lt.s32.totalorder %v8609_v19, 1  ;;  %v1208_v20 = vmul.f32 %v1207_v8, %v1205_v13 }
  0xf2   : > { %v1349_v33 = vshrl.u32 %v8054_v35, %v1348_v40  ;;  %v1358_v23 = vor.u32 %v1357_v3, %v1356_v54  ;;  %v8638_v45 = vshll.u32 %v1341_v62, 8  ;;  %vm1231_vm10 = vcmp.lt.s32.totalorder %v8428_v2, 0 }
  0xf3   : > { %v8641_v25 = vsub.s32 %v1289_v48, %v1292_v32  ;;  %v1364_v18 = vor.u32 %v1363_v14, %v1362_v59  ;;  %vm1367_vm11 = vcmp.lt.s32.totalorder %v8609_v19, 3  ;;  %vm1368_vm12 = vcmp.lt.s32.totalorder %v8609_v19, 4 }
  0xf4   : > { %v1209_v5 = vxor.u32 2147483648, %v1208_v20  ;;  %vm1366_vm13 = vcmp.lt.s32.totalorder %v8609_v19, 2  ;;  %v1370_v34 = vsel %vm1368_vm12, %v1358_v23, 2102212464  ;;  %v1373_v38 = vsel %vm1365_vm9, %v1352_v27, %v1355_v10 }
  0xf5   : > { %v1214_v62 = vsel %vm8617_vm8, 0, %v1212_v15  ;;  %v1295_v16 = vsub.s32 0, %v8641_v25  ;;  %v1315_v40 = vsub.s32 4, %v1291_v29  ;;  %v1374_v42 = vsel %vm1368_vm12, %v1361_v17, 920167782 }
  0xf6   : > { %v1210_v46 = vsel %vm1127_vm7, %v1209_v5, %v1208_v20  ;;  %v1369_v24 = vsel %vm1365_vm9, %v1349_v33, %v1352_v27  ;;  %v1371_v44 = vsel %vm1367_vm11, %v1355_v10, %v1370_v34  ;;  %v1375_v47 = vsel %vm1367_vm11, %v1358_v23, %v1374_v42 }
  0xf7   : > { %vm1113_vm14 = vweird.f32 %v8424_v0  ;;  %v1213_v48 = vsel %vm8617_vm8, %v8426_v1, %v1210_v46  ;;  %v7299_v49 = vmin.u32 %v1295_v16, %v8641_v25  ;;  %v1376_v21 = vsel %vm1366_vm13, %v1373_v38, %v1375_v47 }
  0xf8   : > { %v1377_v50 = vsel %vm1365_vm9, %v1355_v10, %v1358_v23  ;;  %7831 = vcosq.f32 %v1213_v48  ;;  %v1378_v52 = vsel %vm1368_vm12, %v1364_v18, 1326507024  ;;  %vm1116_vm15 = vcmp.lt.s32.totalorder %v8598_v26, 2 }
  0xf9   : > { %v8675_v30 = vmul.u32.u64.low %v8638_v45, %v1376_v21  ;;  %v8676_v54 = vmul.u32.u64.high %v8638_v45, %v1376_v21, %v8675_v30  ;;  %7833 = vsinq.f32 %v1213_v48  ;;  %vm8682_vm0 = vcmp.le.f32.partialorder %v1229_v22, 0.7853982 }
  0xfa   : > { %v1297_v28 = vclz %v7299_v49  ;;  %vm1117_vm1 = vcmp.eq.s32.totalorder %v8598_v26, 0  ;;  %vm1120_vm2 = vcmp.eq.s32.totalorder %v8598_v26, 2  ;;  %v1218_v55 = vadd.s32 3, %v1214_v62 }
  0xfb   : > { %v1379_v3 = vsel %vm1367_vm11, %v1361_v17, %v1378_v52  ;;  %v1372_v7 = vsel %vm1366_vm13, %v1369_v24, %v1371_v44  ;;  %v1440_v22 = vand.u32 2139095040, %v8585_v31  ;;  %v1285_v27 = vadd.s32 %v8593_v53, %v8590_v9 }
  0xfc   : > { %v7300_v4 = vadd.s32 4294967294, %v1297_v28  ;;  %v1380_v6 = vsel %vm1366_vm13, %v1377_v50, %v1379_v3  ;;  %v1316_v10 = vsel %vm1231_vm10, %v1315_v40, %v1291_v29  ;;  %v1391_v15 = vadd.s32 1, %v8676_v54 }
  0xfd   : > { %v7828_v8 = vpop.eup %7827  ;;  %v8700_v12 = vmul.u32.u64.low %v8638_v45, %v1380_v6  ;;  %v8701_v13 = vmul.u32.u64.high %v8638_v45, %v1380_v6, %v8700_v12  ;;  %v1441_v19 = vshrl.u32 %v1440_v22, 23  ;;  %v1219_v17 = vand.u32 3, %v1218_v55 }
  0xfe   : > { %v7830_v59 = vpop.eup %7829  ;;  %v1121_v14 = vxor.u32 2147483648, %v7828_v8  ;;  %vm7301_vm3 = vcmp.lt.s32.totalorder %v7300_v4, 0  ;;  %v1388_v33 = vmul.u32 %v8638_v45, %v1372_v7  ;;  %v1318_v5 = vsel %vm8682_vm0, 0, %v1316_v10 }
  0xff   : > { %v1118_v32 = vxor.u32 2147483648, %v7830_v59  ;;  %v1300_v20 = vsel %vm7301_vm3, 0, %v7300_v4  ;;  %vm1390_vm4 = vc.u32 %v8701_v13, %v8675_v30  ;;  %v7306_v34 = vadd.s32 4294967169, %v1441_v19 }
 0x100   : > { %v1122_v9 = vsel %vm1120_vm2, %v1121_v14, %v7830_v59  ;;  %v1301_v53 = vsub.s32 32, %v1300_v20  ;;  %v1302_v29 = vshll.u32 %v8641_v25, %v1300_v20  ;;  %v1305_v23 = vsub.s32 4294967266, %v1300_v20 }
 0x101   : > { %v1119_v18 = vsel %vm1117_vm1, %v7828_v8, %v1118_v32  ;;  %v1392_v16 = vsel %vm1390_vm4, %v1391_v15, %v8676_v54  ;;  %v1437_v42 = vand.u32 2147483647, %v8585_v31  ;;  %v1447_v46 = vadd.s32 1, %v7306_v34 }
 0x102   : > { %v1123_v45 = vsel %vm1116_vm15, %v1119_v18, %v1122_v9  ;;  %v1303_v38 = vshrl.u32 %v1285_v27, %v1301_v53  ;;  %v1306_v62 = vadd.s32 127, %v1305_v23  ;;  %v1393_v40 = vadd.s32 %v1392_v16, %v1388_v33 }
 0x103   : > { %v1124_v25 = vsel %vm1113_vm14, nan, %v1123_v45  ;;  %v8721_v24 = vmul.f32 30.0, %v8418_v60  ;;  %v8724_v44 = vmul.f32 30.0, %v8420_v61  ;;  %vm1221_vm5 = vcmp.eq.s32.totalorder %v1219_v17, 0 }
 0x104   : > { %v1304_v47 = vor.u32 %v1303_v38, %v1302_v29  ;;  %v1307_v26 = vshll.u32 %v1306_v62, 23  ;;  %1853 = vst [vmem:[#allocation2] sm:$0xff] %v1124_v25  ;;  %v1322_v48 = vadd.s32 3, %v1318_v5  ;;  %v1394_v49 = vadd.s32 536870912, %v1393_v40 }
 0x105   : > { %vm1448_vm6 = vcmp.gt.s32.totalorder %v1447_v46, 0  ;;  %v7832_v21 = vpop.eup %7831  ;;  %vm1224_vm7 = vcmp.eq.s32.totalorder %v1219_v17, 2  ;;  %v1444_v60 = vand.u32 8388607, %v1437_v42  ;;  %vm1217_vm8 = vweird.f32 %v8426_v1 }
 0x106   : > { %v1308_v0 = vor.u32 4788187, %v1307_v26  ;;  %v1311_v50 = vcvt.s32.f32 %v1304_v47  ;;  %v1449_v52 = vsel %vm1448_vm6, %v1447_v46, 0  ;;  %v7834_v54 = vpop.eup %7833  ;;  %v1225_v28 = vxor.u32 2147483648, %v7832_v21 }
 0x107   : > { %v8726_v55 = vshrl.u32 %v1394_v49, 30  ;;  %v1451_v61 = vand.u32 31, %v1449_v52  ;;  %vm1220_vm9 = vcmp.lt.s32.totalorder %v1219_v17, 2  ;;  %v1222_v3 = vxor.u32 2147483648, %v7834_v54 }
 0x108   : > { %v1309_v4 = vand.u32 2147483647, %v1308_v0  ;;  %v1226_v7 = vsel %vm1224_vm7, %v1225_v28, %v7834_v54  ;;  %v8731_v6 = vand.u32 3, %v1322_v48  ;;  %v1389_v12 = vadd.s32 %v8675_v30, %v8701_v13 }
 0x109   : > { %v1396_v22 = vshll.u32 %v8726_v55, 30  ;;  %v1452_v8 = vsub.s32 32, %v1451_v61  ;;  %v1223_v27 = vsel %vm1221_vm5, %v7832_v21, %v1222_v3  ;;  %v1541_v59 = vand.u32 2147483647, %v8721_v24 }
 0x10a   : > { %v1312_v10 = vmul.f32 %v1311_v50, %v1309_v4  ;;  %v1227_v14 = vsel %vm1220_vm9, %v1223_v27, %v1226_v7  ;;  %v1445_v19 = vor.u32 8388608, %v1444_v60  ;;  %v1454_v32 = vshll.u32 %v8054_v35, %v1451_v61 }
 0x10b   : > { %v8738_v15 = vsub.s32 %v1393_v40, %v1396_v22  ;;  %v1228_v20 = vsel %vm1217_vm8, nan, %v1227_v14  ;;  %v1455_v9 = vshrl.u32 %v8055_v37, %v1452_v8  ;;  %v1457_v17 = vshll.u32 %v8055_v37, %v1451_v61 }
 0x10c   : > { %v1313_v33 = vxor.u32 2147483648, %v1312_v10  ;;  %v1450_v29 = vshrl.u32 %v1449_v52, 5  ;;  %v1458_v30 = vshrl.u32 %v8056_v39, %v1452_v8  ;;  %v1544_v13 = vand.u32 2139095040, %v8721_v24  ;;  %1854 = vst [vmem:[#allocation2 + $0x8] sm:$0xff] %v1228_v20 }
 0x10d   : > { %v1399_v53 = vsub.s32 0, %v8738_v15  ;;  %v1460_v18 = vshll.u32 %v8056_v39, %v1451_v61  ;;  %v1461_v1 = vshrl.u32 %v8057_v41, %v1452_v8  ;;  %v1463_v5 = vshll.u32 %v8057_v41, %v1451_v61 }
 0x10e   : > { %v1314_v23 = vsel %vm1231_vm10, %v1313_v33, %v1312_v10  ;;  %v1456_v38 = vor.u32 %v1455_v9, %v1454_v32  ;;  %v8757_v62 = vshll.u32 %v1445_v19, 8  ;;  %v1459_v16 = vor.u32 %v1458_v30, %v1457_v17 }
 0x10f   : > { %v1317_v34 = vsel %vm8682_vm0, %v8428_v2, %v1314_v23  ;;  %v7303_v45 = vmin.u32 %v1399_v53, %v8738_v15  ;;  %v1464_v25 = vshrl.u32 %v8058_v43, %v1452_v8  ;;  %v1466_v40 = vshll.u32 %v8058_v43, %v1451_v61 }
 0x110   : > { %7835 = vcosq.f32 %v1317_v34  ;;  %v1453_v47 = vshrl.u32 %v8054_v35, %v1452_v8  ;;  %v1545_v26 = vshrl.u32 %v1544_v13, 23  ;;  %v1462_v48 = vor.u32 %v1461_v1, %v1460_v18 }
 0x111   : > { %7837 = vsinq.f32 %v1317_v34  ;;  %v1401_v46 = vclz %v7303_v45  ;;  %v1465_v49 = vor.u32 %v1464_v25, %v1463_v5  ;;  %v1467_v56 = vshrl.u32 %v8059_v51, %v1452_v8 }
 0x112   : > { %vm1469_vm10 = vcmp.lt.s32.totalorder %v1450_v29, 1  ;;  %v1419_v0 = vsub.s32 4, %v8726_v55  ;;  %vm1471_vm11 = vcmp.lt.s32.totalorder %v1450_v29, 3  ;;  %vm1472_vm12 = vcmp.lt.s32.totalorder %v1450_v29, 4 }
 0x113   : > { %v7304_v21 = vadd.s32 4294967294, %v1401_v46  ;;  %v1468_v50 = vor.u32 %v1467_v56, %v1466_v40  ;;  %vm1470_vm13 = vcmp.lt.s32.totalorder %v1450_v29, 2  ;;  %v1474_v52 = vsel %vm1472_vm12, %v1462_v48, 2102212464 }
 0x114   : > { %v1477_v54 = vsel %vm1469_vm10, %v1456_v38, %v1459_v16  ;;  %v1473_v28 = vsel %vm1469_vm10, %v1453_v47, %v1456_v38  ;;  %v1475_v60 = vsel %vm1471_vm11, %v1459_v16, %v1474_v52  ;;  %v1478_v61 = vsel %vm1472_vm12, %v1465_v49, 920167782 }
 0x115   : > { %vm7305_vm14 = vcmp.lt.s32.totalorder %v7304_v21, 0  ;;  %v1479_v4 = vsel %vm1471_vm11, %v1462_v48, %v1478_v61  ;;  %v1481_v7 = vsel %vm1469_vm10, %v1459_v16, %v1462_v48  ;;  %v1482_v22 = vsel %vm1472_vm12, %v1468_v50, 1326507024 }
 0x116   : > { %v1404_v3 = vsel %vm7305_vm14, 0, %v7304_v21  ;;  %v1480_v14 = vsel %vm1470_vm13, %v1477_v54, %v1479_v4  ;;  %vm1321_vm15 = vweird.f32 %v8428_v2  ;;  %v1476_v19 = vsel %vm1470_vm13, %v1473_v28, %v1475_v60 }
 0x117   : > { %v1405_v8 = vsub.s32 32, %v1404_v3  ;;  %v1406_v27 = vshll.u32 %v8738_v15, %v1404_v3  ;;  %v1409_v10 = vsub.s32 4294967266, %v1404_v3  ;;  %v1483_v32 = vsel %vm1471_vm11, %v1465_v49, %v1482_v22 }
 0x118   : > { %v8772_v20 = vmul.u32.u64.low %v8757_v62, %v1480_v14  ;;  %v8773_v33 = vmul.u32.u64.high %v8757_v62, %v1480_v14, %v8772_v20  ;;  %v1484_v53 = vsel %vm1470_vm13, %v1481_v7, %v1483_v32  ;;  %v7310_v30 = vadd.s32 4294967169, %v1545_v26 }
 0x119   : > { %v1407_v9 = vshrl.u32 %v1389_v12, %v1405_v8  ;;  %v1410_v17 = vadd.s32 127, %v1409_v10  ;;  %vm8779_vm0 = vcmp.le.f32.partialorder %v1333_v36, 0.7853982  ;;  %vm1335_vm1 = vcmp.lt.s32.totalorder %v8517_v11, 0 }
 0x11a   : > { %v8785_v13 = vmul.u32.u64.low %v8757_v62, %v1484_v53  ;;  %v8786_v23 = vmul.u32.u64.high %v8757_v62, %v1484_v53, %v8785_v13  ;;  %v1420_v12 = vsel %vm1335_vm1, %v1419_v0, %v8726_v55  ;;  %v1551_v29 = vadd.s32 1, %v7310_v30 }
 0x11b   : > { %v1408_v18 = vor.u32 %v1407_v9, %v1406_v27  ;;  %v1411_v1 = vshll.u32 %v1410_v17, 23  ;;  %vm1325_vm2 = vcmp.eq.s32.totalorder %v8731_v6, 0  ;;  %v1492_v36 = vmul.u32 %v8757_v62, %v1476_v19 }
 0x11c   : > { %v1495_v5 = vadd.s32 1, %v8773_v33  ;;  %v1548_v34 = vand.u32 8388607, %v1541_v59  ;;  %vm1328_vm3 = vcmp.eq.s32.totalorder %v8731_v6, 2  ;;  %vm1552_vm4 = vcmp.gt.s32.totalorder %v1551_v29, 0 }
 0x11d   : > { %v7836_v45 = vpop.eup %7835  ;;  %v1412_v38 = vor.u32 4788187, %v1411_v1  ;;  %v1415_v16 = vcvt.s32.f32 %v1408_v18  ;;  %v1422_v55 = vsel %vm8779_vm0, 0, %v1420_v12  ;;  %vm1494_vm5 = vc.u32 %v8786_v23, %v8772_v20 }
 0x11e   : > { %v7838_v25 = vpop.eup %7837  ;;  %v1329_v40 = vxor.u32 2147483648, %v7836_v45  ;;  %v1553_v62 = vsel %vm1552_vm4, %v1551_v29, 0  ;;  %vm1324_vm6 = vcmp.lt.s32.totalorder %v8731_v6, 2  ;;  %v1496_v26 = vsel %vm1494_vm5, %v1495_v5, %v8773_v33 }
 0x11f   : > { %v1326_v46 = vxor.u32 2147483648, %v7838_v25  ;;  %v1413_v47 = vand.u32 2147483647, %v1412_v38  ;;  %v1497_v49 = vadd.s32 %v1496_v26, %v1492_v36  ;;  %v1549_v56 = vor.u32 8388608, %v1548_v34 }
 0x120   : > { %v1330_v48 = vsel %vm1328_vm3, %v1329_v40, %v7838_v25  ;;  %v1555_v21 = vand.u32 31, %v1553_v62  ;;  %v1426_v52 = vadd.s32 3, %v1422_v55  ;;  %v1648_v54 = vand.u32 2139095040, %v8724_v44 }
 0x121   : > { %v1327_v0 = vsel %vm1325_vm2, %v7836_v45, %v1326_v46  ;;  %v1416_v50 = vmul.f32 %v1415_v16, %v1413_v47  ;;  %v1498_v60 = vadd.s32 536870912, %v1497_v49  ;;  %v1554_v61 = vshrl.u32 %v1553_v62, 5 }
 0x122   : > { %v1331_v28 = vsel %vm1324_vm6, %v1327_v0, %v1330_v48  ;;  %v1556_v3 = vsub.s32 32, %v1555_v21  ;;  %v1558_v22 = vshll.u32 %v8054_v35, %v1555_v21  ;;  %v1561_v8 = vshll.u32 %v8055_v37, %v1555_v21 }
 0x123   : > { %v1332_v4 = vsel %vm1321_vm15, nan, %v1331_v28  ;;  %v1417_v7 = vxor.u32 2147483648, %v1416_v50  ;;  %v1499_v27 = vshrl.u32 %v1498_v60, 30  ;;  %v1564_v14 = vshll.u32 %v8056_v39, %v1555_v21 }
 0x124   : > { %v1559_v6 = vshrl.u32 %v8055_v37, %v1556_v3  ;;  %v1562_v10 = vshrl.u32 %v8056_v39, %v1556_v3  ;;  %1855 = vst [vmem:[#allocation2 + $0x10] sm:$0xff] %v1332_v4  ;;  %vm1439_vm7 = vcmp.lt.s32.totalorder %v8585_v31, 0  ;;  %v1565_v2 = vshrl.u32 %v8057_v41, %v1556_v3 }
 0x125   : > { %v1418_v19 = vsel %vm1335_vm1, %v1417_v7, %v1416_v50  ;;  %v1567_v32 = vshll.u32 %v8057_v41, %v1555_v21  ;;  %v1568_v33 = vshrl.u32 %v8058_v43, %v1556_v3  ;;  %v1500_v17 = vshll.u32 %v1499_v27, 30 }
 0x126   : > { %v1421_v9 = vsel %vm8779_vm0, %v8517_v11, %v1418_v19  ;;  %v1557_v53 = vshrl.u32 %v8054_v35, %v1556_v3  ;;  %vm1573_vm8 = vcmp.lt.s32.totalorder %v1554_v61, 1  ;;  %v1560_v30 = vor.u32 %v1559_v6, %v1558_v22 }
 0x127   : > { %7839 = vcosq.f32 %v1421_v9  ;;  %v1563_v13 = vor.u32 %v1562_v10, %v1561_v8  ;;  %v1569_v18 = vor.u32 %v1568_v33, %v1567_v32  ;;  %v8823_v1 = vsub.s32 %v1497_v49, %v1500_v17 }
 0x128   : > { %7841 = vsinq.f32 %v1421_v9  ;;  %v1566_v12 = vor.u32 %v1565_v2, %v1564_v14  ;;  %v1570_v29 = vshll.u32 %v8058_v43, %v1555_v21  ;;  %v1571_v36 = vshrl.u32 %v8059_v51, %v1556_v3 }
 0x129   : > { %vm1575_vm9 = vcmp.lt.s32.totalorder %v1554_v61, 3  ;;  %vm1576_vm10 = vcmp.lt.s32.totalorder %v1554_v61, 4  ;;  %v1589_v15 = vshll.u32 %v1549_v56, 8  ;;  %v1503_v5 = vsub.s32 0, %v8823_v1 }
 0x12a   : > { %v1523_v34 = vsub.s32 4, %v1499_v27  ;;  %vm1574_vm11 = vcmp.lt.s32.totalorder %v1554_v61, 2  ;;  %v1578_v45 = vsel %vm1576_vm10, %v1566_v12, 2102212464  ;;  %v1572_v38 = vor.u32 %v1571_v36, %v1570_v29 }
 0x12b   : > { %v1581_v16 = vsel %vm1573_vm8, %v1560_v30, %v1563_v13  ;;  %v1582_v25 = vsel %vm1576_vm10, %v1569_v18, 920167782  ;;  %v1649_v40 = vshrl.u32 %v1648_v54, 23  ;;  %v1427_v55 = vand.u32 3, %v1426_v52 }
 0x12c   : > { %v7307_v62 = vmin.u32 %v1503_v5, %v8823_v1  ;;  %v1577_v46 = vsel %vm1573_vm8, %v1557_v53, %v1560_v30  ;;  %v1583_v47 = vsel %vm1575_vm9, %v1566_v12, %v1582_v25  ;;  %v1579_v26 = vsel %vm1575_vm9, %v1563_v13, %v1578_v45 }
 0x12d   : > { %v1584_v48 = vsel %vm1574_vm11, %v1581_v16, %v1583_v47  ;;  %v1585_v49 = vsel %vm1573_vm8, %v1563_v13, %v1566_v12  ;;  %v1586_v56 = vsel %vm1576_vm10, %v1572_v38, 1326507024  ;;  %v8839_v21 = vmul.f32 30.0, %v8422_v63 }
 0x12e   : > { %vm8843_vm12 = vcmp.le.f32.partialorder %v1437_v42, 0.7853982  ;;  %v1505_v50 = vclz %v7307_v62  ;;  %v1524_v52 = vsel %vm1439_vm7, %v1523_v34, %v1499_v27  ;;  %vm1425_vm13 = vweird.f32 %v8517_v11 }
 0x12f   : > { %v1587_v54 = vsel %vm1575_vm9, %v1569_v18, %v1586_v56  ;;  %v8851_v28 = vmul.u32.u64.low %v1589_v15, %v1584_v48  ;;  %v8852_v60 = vmul.u32.u64.high %v1589_v15, %v1584_v48, %v8851_v28  ;;  %v7314_v63 = vadd.s32 4294967169, %v1649_v40 }
 0x130   : > { %vm1428_vm14 = vcmp.lt.s32.totalorder %v1427_v55, 2  ;;  %v7308_v3 = vadd.s32 4294967294, %v1505_v50  ;;  %v1580_v42 = vsel %vm1574_vm11, %v1577_v46, %v1579_v26  ;;  %v1588_v4 = vsel %vm1574_vm11, %v1585_v49, %v1587_v54 }
 0x131   : > { %vm1432_vm15 = vcmp.eq.s32.totalorder %v1427_v55, 2  ;;  %v8857_v7 = vmul.u32.u64.low %v1589_v15, %v1588_v4  ;;  %v8858_v22 = vmul.u32.u64.high %v1589_v15, %v1588_v4, %v8857_v7  ;;  %v1655_v8 = vadd.s32 1, %v7314_v63 }
 0x132   : > { %v1493_v27 = vadd.s32 %v8772_v20, %v8786_v23  ;;  %vm7309_vm0 = vcmp.lt.s32.totalorder %v7308_v3, 0  ;;  %v1526_v6 = vsel %vm8843_vm12, 0, %v1524_v52  ;;  %v1645_v10 = vand.u32 2147483647, %v8724_v44 }
 0x133   : > { %v1508_v14 = vsel %vm7309_vm0, 0, %v7308_v3  ;;  %v1596_v19 = vmul.u32 %v1589_v15, %v1580_v42  ;;  %v1599_v2 = vadd.s32 1, %v8852_v60  ;;  %vm1656_vm1 = vcmp.gt.s32.totalorder %v1655_v8, 0 }
 0x134   : > { %v7840_v61 = vpop.eup %7839  ;;  %v1509_v32 = vsub.s32 32, %v1508_v14  ;;  %v1510_v33 = vshll.u32 %v8823_v1, %v1508_v14  ;;  %v1513_v9 = vsub.s32 4294967266, %v1508_v14  ;;  %v1657_v17 = vsel %vm1656_vm1, %v1655_v8, 0 }
 0x135   : > { %v7842_v53 = vpop.eup %7841  ;;  %vm1429_vm2 = vcmp.eq.s32.totalorder %v1427_v55, 0  ;;  %v1433_v20 = vxor.u32 2147483648, %v7840_v61  ;;  %v8867_v23 = vadd.s32 3, %v1526_v6  ;;  %vm1598_vm3 = vc.u32 %v8858_v22, %v8851_v28 }
 0x136   : > { %v1430_v30 = vxor.u32 2147483648, %v7842_v53  ;;  %v1511_v13 = vshrl.u32 %v1493_v27, %v1509_v32  ;;  %v1514_v18 = vadd.s32 127, %v1513_v9  ;;  %v1600_v12 = vsel %vm1598_vm3, %v1599_v2, %v8852_v60 }
 0x137   : > { %v1434_v29 = vsel %vm1432_vm15, %v1433_v20, %v7842_v53  ;;  %v1601_v36 = vadd.s32 %v1600_v12, %v1596_v19  ;;  %v8875_v1 = vand.u32 8388607, %v1645_v10  ;;  %v1659_v15 = vand.u32 31, %v1657_v17 }
 0x138   : > { %v1431_v5 = vsel %vm1429_vm2, %v7840_v61, %v1430_v30  ;;  %v1512_v34 = vor.u32 %v1511_v13, %v1510_v33  ;;  %v1515_v45 = vshll.u32 %v1514_v18, 23  ;;  %v1749_v38 = vand.u32 2147483647, %v8839_v21 }
 0x139   : > { %v1435_v16 = vsel %vm1428_vm14, %v1431_v5, %v1434_v29  ;;  %v1602_v25 = vadd.s32 536870912, %v1601_v36  ;;  %v8879_v40 = vshrl.u32 %v1657_v17, 5  ;;  %v1660_v62 = vsub.s32 32, %v1659_v15 }
 0x13a   : > { %v1436_v46 = vsel %vm1425_vm13, nan, %v1435_v16  ;;  %v1516_v47 = vor.u32 4788187, %v1515_v45  ;;  %v1519_v26 = vcvt.s32.f32 %v1512_v34  ;;  %v1662_v48 = vshll.u32 %v8054_v35, %v1659_v15 }
 0x13b   : > { %v1603_v49 = vshrl.u32 %v1602_v25, 30  ;;  %v1663_v56 = vshrl.u32 %v8055_v37, %v1660_v62  ;;  %v1665_v50 = vshll.u32 %v8055_v37, %v1659_v15  ;;  %v1666_v52 = vshrl.u32 %v8056_v39, %v1660_v62  ;;  %1856 = vst [vmem:[#allocation2 + $0x18] sm:$0xff] %v1436_v46 }
 0x13c   : > { %v1517_v55 = vand.u32 2147483647, %v1516_v47  ;;  %vm1543_vm4 = vcmp.lt.s32.totalorder %v8721_v24, 0  ;;  %v1668_v54 = vshll.u32 %v8056_v39, %v1659_v15  ;;  %v1669_v11 = vshrl.u32 %v8057_v41, %v1660_v62 }
 0x13d   : > { %v1671_v60 = vshll.u32 %v8057_v41, %v1659_v15  ;;  %v1604_v63 = vshll.u32 %v1603_v49, 30  ;;  %v1653_v3 = vor.u32 8388608, %v8875_v1  ;;  %vm1677_vm5 = vcmp.lt.s32.totalorder %v8879_v40, 1 }
 0x13e   : > { %v1752_v42 = vand.u32 2139095040, %v8839_v21  ;;  %v1520_v4 = vmul.f32 %v1519_v26, %v1517_v55  ;;  %v1661_v7 = vshrl.u32 %v8054_v35, %v1660_v62  ;;  %v1672_v8 = vshrl.u32 %v8058_v43, %v1660_v62 }
 0x13f   : > { %v1674_v27 = vshll.u32 %v8058_v43, %v1659_v15  ;;  %vm8899_vm6 = vcmp.le.f32.partialorder %v1541_v59, 0.7853982  ;;  %v8903_v14 = vsub.s32 %v1601_v36, %v1604_v63  ;;  %v1664_v19 = vor.u32 %v1663_v56, %v1662_v48 }
 0x140   : > { %v1667_v2 = vor.u32 %v1666_v52, %v1665_v50  ;;  %v1675_v61 = vshrl.u32 %v8059_v51, %v1660_v62  ;;  %v1521_v32 = vxor.u32 2147483648, %v1520_v4  ;;  %v1670_v33 = vor.u32 %v1669_v11, %v1668_v54 }
 0x141   : > { %v1673_v9 = vor.u32 %v1672_v8, %v1671_v60  ;;  %vm1680_vm8 = vcmp.lt.s32.totalorder %v8879_v40, 4  ;;  %v1607_v17 = vsub.s32 0, %v8903_v14  ;;  %v1627_v53 = vsub.s32 4, %v1603_v49 }
 0x142   : > { %vm1679_vm9 = vcmp.lt.s32.totalorder %v8879_v40, 3  ;;  %v1756_v59 = vand.u32 8388607, %v1749_v38  ;;  %v1522_v20 = vsel %vm1439_vm7, %v1521_v32, %v1520_v4  ;;  %v1676_v30 = vor.u32 %v1675_v61, %v1674_v27 }
 0x143   : > { %v1682_v13 = vsel %vm1680_vm8, %v1670_v33, 2102212464  ;;  %v1686_v18 = vsel %vm1680_vm8, %v1673_v9, 920167782  ;;  %v1525_v12 = vsel %vm8843_vm12, %v8585_v31, %v1522_v20  ;;  %v7311_v29 = vmin.u32 %v1607_v17, %v8903_v14  ;;  %v8967_v17 = vld [vmem:[%s8371_s14 + $0x8] sm:$0xff] }
 0x144   : > { %vm1678_vm10 = vcmp.lt.s32.totalorder %v8879_v40, 2  ;;  %v1685_v36 = vsel %vm1677_vm5, %v1664_v19, %v1667_v2  ;;  %7843 = vcosq.f32 %v1525_v12  ;;  %v1681_v1 = vsel %vm1677_vm5, %v1661_v7, %v1664_v19 }
 0x145   : > { %v1683_v15 = vsel %vm1679_vm9, %v1667_v2, %v1682_v13  ;;  %v1687_v5 = vsel %vm1679_vm9, %v1670_v33, %v1686_v18  ;;  %7845 = vsinq.f32 %v1525_v12  ;;  %v1609_v0 = vclz %v7311_v29 }
 0x146   : > { %v1628_v34 = vsel %vm1543_vm4, %v1627_v53, %v1603_v49  ;;  %v1689_v45 = vsel %vm1677_vm5, %v1667_v2, %v1670_v33  ;;  %v1597_v16 = vadd.s32 %v8851_v28, %v8858_v22  ;;  %v1688_v25 = vsel %vm1678_vm10, %v1685_v36, %v1687_v5 }
 0x147   : > { %v1690_v62 = vsel %vm1680_vm8, %v1676_v30, 1326507024  ;;  %v1693_v46 = vshll.u32 %v1653_v3, 8  ;;  %v7312_v47 = vadd.s32 4294967294, %v1609_v0  ;;  %v1684_v26 = vsel %vm1678_vm10, %v1681_v1, %v1683_v15 }
 0x148   : > { %v1691_v48 = vsel %vm1679_vm9, %v1673_v9, %v1690_v62  ;;  %v1753_v49 = vshrl.u32 %v1752_v42, 23  ;;  %v1630_v56 = vsel %vm8899_vm6, 0, %v1628_v34  ;;  %v1531_v11 = vand.u32 3, %v8867_v23 }
 0x149   : > { %v1692_v28 = vsel %vm1678_vm10, %v1689_v45, %v1691_v48  ;;  %v8948_v22 = vmul.u32.u64.low %v1693_v46, %v1688_v25  ;;  %v8949_v50 = vmul.u32.u64.high %v1693_v46, %v1688_v25, %v8948_v22  ;;  %vm7313_vm7 = vcmp.lt.s32.totalorder %v7312_v47, 0 }
 0x14a   : > { %v8952_v52 = vmul.u32.u64.low %v1693_v46, %v1692_v28  ;;  %v8953_v55 = vmul.u32.u64.high %v1693_v46, %v1692_v28, %v8952_v52  ;;  %v7318_v54 = vadd.s32 4294967169, %v1753_v49  ;;  %v1612_v60 = vsel %vm7313_vm7, 0, %v7312_v47 }
 0x14b   : > { %v1700_v63 = vmul.u32 %v1693_v46, %v1684_v26  ;;  %v1613_v3 = vsub.s32 32, %v1612_v60  ;;  %v1614_v42 = vshll.u32 %v8903_v14, %v1612_v60  ;;  %v1617_v4 = vsub.s32 4294967266, %v1612_v60  ;;  %v8964_v14 = vld [vmem:[%s8371_s14] sm:$0xff] }
 0x14c   : > { %v1759_v40 = vadd.s32 1, %v7318_v54  ;;  %v1634_v7 = vadd.s32 3, %v1630_v56  ;;  %v1703_v8 = vadd.s32 1, %v8949_v50  ;;  %v1757_v27 = vor.u32 8388608, %v1756_v59 }
 0x14d   : > { %vm1529_vm11 = vweird.f32 %v8585_v31  ;;  %v1615_v19 = vshrl.u32 %v1597_v16, %v1613_v3  ;;  %v1618_v2 = vadd.s32 127, %v1617_v4  ;;  %vm1702_vm12 = vc.u32 %v8953_v55, %v8948_v22 }
 0x14e   : > { %vm1532_vm13 = vcmp.lt.s32.totalorder %v1531_v11, 2  ;;  %vm1533_vm14 = vcmp.eq.s32.totalorder %v1531_v11, 0  ;;  %vm1647_vm15 = vcmp.lt.s32.totalorder %v8724_v44, 0  ;;  %v1704_v23 = vsel %vm1702_vm12, %v1703_v8, %v8949_v50 }
 0x14f   : > { %vm1760_vm0 = vcmp.gt.s32.totalorder %v1759_v40, 0  ;;  %v1616_v61 = vor.u32 %v1615_v19, %v1614_v42  ;;  %v1619_v32 = vshll.u32 %v1618_v2, 23  ;;  %v1705_v33 = vadd.s32 %v1704_v23, %v1700_v63 }
 0x150   : > { %v1761_v9 = vsel %vm1760_vm0, %v1759_v40, 0  ;;  %vm1536_vm1 = vcmp.eq.s32.totalorder %v1531_v11, 2  ;;  %v8969_v53 = vand.u32 3, %v1634_v7  ;;  %v8971_v20 = vshll.u32 %v1757_v27, 8 }
 0x151   : > { %v1763_v59 = vand.u32 31, %v1761_v9  ;;  %v7844_v30 = vpop.eup %7843  ;;  %v1620_v13 = vor.u32 4788187, %v1619_v32  ;;  %v1623_v18 = vcvt.s32.f32 %v1616_v61  ;;  %vm8975_vm2 = vcmp.le.f32.partialorder %v1645_v10, 0.7853982 }
 0x152   : > { %v1706_v29 = vadd.s32 536870912, %v1705_v33  ;;  %v1865_v36 = vunpack.c.l.bf16 %v8964_v14  ;;  %v7846_v1 = vpop.eup %7845  ;;  %v1537_v15 = vxor.u32 2147483648, %v7844_v30  ;;  %v1866_v0 = vunpack.c.h.bf16 %v8964_v14 }
 0x153   : > { %v1764_v5 = vsub.s32 32, %v1763_v59  ;;  %v1867_v34 = vunpack.c.l.bf16 %v8967_v17  ;;  %v1534_v45 = vxor.u32 2147483648, %v7846_v1  ;;  %v1621_v16 = vand.u32 2147483647, %v1620_v13  ;;  %v9015_v13 = vld [vmem:[%s8371_s14 + $0x10] sm:$0xff] }
 0x154   : > { %v1707_v25 = vshrl.u32 %v1706_v29, 30  ;;  %v1766_v62 = vshll.u32 %v8054_v35, %v1763_v59  ;;  %v1538_v10 = vsel %vm1536_vm1, %v1537_v15, %v7846_v1  ;;  %v1769_v47 = vshll.u32 %v8055_v37, %v1763_v59 }
 0x155   : > { %v1767_v46 = vshrl.u32 %v8055_v37, %v1764_v5  ;;  %v1770_v26 = vshrl.u32 %v8056_v39, %v1764_v5  ;;  %v1535_v48 = vsel %vm1533_vm14, %v7844_v30, %v1534_v45  ;;  %v1624_v49 = vmul.f32 %v1623_v18, %v1621_v16 }
 0x156   : > { %v1708_v56 = vshll.u32 %v1707_v25, 30  ;;  %v1731_v28 = vsub.s32 4, %v1707_v25  ;;  %v1539_v50 = vsel %vm1532_vm13, %v1535_v48, %v1538_v10  ;;  %v8989_v52 = vshrl.u32 %v1761_v9, 5 }
 0x157   : > { %v1772_v54 = vshll.u32 %v8056_v39, %v1763_v59  ;;  %v1773_v60 = vshrl.u32 %v8057_v41, %v1764_v5  ;;  %v1540_v63 = vsel %vm1529_vm11, nan, %v1539_v50  ;;  %v1625_v3 = vxor.u32 2147483648, %v1624_v49 }
 0x158   : > { %v8995_v42 = vsub.s32 %v1705_v33, %v1708_v56  ;;  %v1732_v4 = vsel %vm1647_vm15, %v1731_v28, %v1707_v25  ;;  %v1765_v40 = vshrl.u32 %v8054_v35, %v1764_v5  ;;  %v1768_v7 = vor.u32 %v1767_v46, %v1766_v62  ;;  %1857 = vst [vmem:[#allocation2 + $0x20] sm:$0xff] %v1540_v63  ;;  %v9035_v62 = vld [vmem:[%s8371_s14 + $0x18] sm:$0xff]  ;;  %v1874_v28 = vld [vmem:[%s8364_s25] sm:$0xff]  ;;  %s7280_s14 = sshll.u32 %s8353_s27, 3 }
 0x159   : > { %v1775_v11 = vshll.u32 %v8057_v41, %v1763_v59  ;;  %v1776_v8 = vshrl.u32 %v8058_v43, %v1764_v5  ;;  %v1626_v27 = vsel %vm1543_vm4, %v1625_v3, %v1624_v49  ;;  %v1771_v19 = vor.u32 %v1770_v26, %v1769_v47 }
 0x15a   : > { %v1711_v31 = vsub.s32 0, %v8995_v42  ;;  %v1778_v2 = vshll.u32 %v8058_v43, %v1763_v59  ;;  %v1629_v23 = vsel %vm8899_vm6, %v8721_v24, %v1626_v27  ;;  %v1734_v61 = vsel %vm8975_vm2, 0, %v1732_v4 }
 0x15b   : > { %v1777_v32 = vor.u32 %v1776_v8, %v1775_v11  ;;  %v1779_v33 = vshrl.u32 %v8059_v51, %v1764_v5  ;;  %7847 = vcosq.f32 %v1629_v23  ;;  %v1774_v30 = vor.u32 %v1773_v60, %v1772_v54  ;;  %v1875_v11 = vld [vmem:[%s8364_s25 + $0x8] sm:$0xff] }
 0x15c   : > { %v7315_v9 = vmin.u32 %v1711_v31, %v8995_v42  ;;  %vm1781_vm3 = vcmp.lt.s32.totalorder %v8989_v52, 1  ;;  %7849 = vsinq.f32 %v1629_v23  ;;  %vm1783_vm4 = vcmp.lt.s32.totalorder %v8989_v52, 3 }
 0x15d   : > { %v1780_v59 = vor.u32 %v1779_v33, %v1778_v2  ;;  %vm1784_vm5 = vcmp.lt.s32.totalorder %v8989_v52, 4  ;;  %v1701_v6 = vadd.s32 %v8948_v22, %v8953_v55  ;;  %vm1782_vm6 = vcmp.lt.s32.totalorder %v8989_v52, 2  ;;  %v1877_v2 = vld [vmem:[%s8364_s25 + $0x18] sm:$0xff]  ;;  %v1873_v52 = vld [vmem:[#allocation2] ss:$8 sm:$0x3] }
 0x15e   : > { %v1713_v18 = vclz %v7315_v9  ;;  %v1868_v29 = vunpack.c.h.bf16 %v8967_v17  ;;  %v1786_v1 = vsel %vm1784_vm5, %v1774_v30, 2102212464  ;;  %v1789_v15 = vsel %vm1781_vm3, %v1768_v7, %v1771_v19 }
 0x15f   : > { %v1790_v5 = vsel %vm1784_vm5, %v1777_v32, 920167782  ;;  %v1869_v45 = vunpack.c.l.bf16 %v9015_v13  ;;  %v1738_v25 = vadd.s32 3, %v1734_v61  ;;  %v1793_v55 = vsel %vm1781_vm3, %v1771_v19, %v1774_v30 }
 0x160   : > { %v7316_v16 = vadd.s32 4294967294, %v1713_v18  ;;  %v1791_v22 = vsel %vm1783_vm4, %v1774_v30, %v1790_v5  ;;  %vm1640_vm8 = vcmp.eq.s32.totalorder %v8969_v53, 2  ;;  %v1785_v10 = vsel %vm1781_vm3, %v1765_v40, %v1768_v7 }
 0x161   : > { %v1787_v46 = vsel %vm1783_vm4, %v1771_v19, %v1786_v1  ;;  %v1792_v47 = vsel %vm1782_vm6, %v1789_v15, %v1791_v22  ;;  %v1794_v26 = vsel %vm1784_vm5, %v1780_v59, 1326507024  ;;  %vm1637_vm9 = vcmp.eq.s32.totalorder %v8969_v53, 0  ;;  %v1876_v19 = vld [vmem:[%s8364_s25 + $0x10] sm:$0xff]  ;;  %v9077_v22 = vld [vmem:[%s8364_s25 + $0x20] sm:$0xff] }
 0x162   : > { %vm7317_vm10 = vcmp.lt.s32.totalorder %v7316_v16, 0  ;;  %v1795_v48 = vsel %vm1783_vm4, %v1777_v32, %v1794_v26  ;;  %v9050_v49 = vmul.u32.u64.low %v8971_v20, %v1792_v47  ;;  %v9051_v56 = vmul.u32.u64.high %v8971_v20, %v1792_v47, %v9050_v49 }
 0x163   : > { %vm1636_vm7 = vcmp.lt.s32.totalorder %v8969_v53, 2  ;;  %v1716_v50 = vsel %vm7317_vm10, 0, %v7316_v16  ;;  %v1796_v54 = vsel %vm1782_vm6, %v1793_v55, %v1795_v48  ;;  %v1870_v60 = vunpack.c.h.bf16 %v9015_v13 }
 0x164   : > { %v1871_v63 = vunpack.c.l.bf16 %v9035_v62  ;;  %vm1633_vm11 = vweird.f32 %v8721_v24  ;;  %v1717_v3 = vsub.s32 32, %v1716_v50  ;;  %v1718_v4 = vshll.u32 %v8995_v42, %v1716_v50 }
 0x165   : > { %v1721_v40 = vsub.s32 4294967266, %v1716_v50  ;;  %v1788_v7 = vsel %vm1782_vm6, %v1785_v10, %v1787_v46  ;;  %v9066_v8 = vmul.u32.u64.low %v8971_v20, %v1796_v54  ;;  %v9067_v27 = vmul.u32.u64.high %v8971_v20, %v1796_v54, %v9066_v8  ;;  %v9084_v46 = vld [vmem:[%s8364_s25 + $0x28] sm:$0xff] }
 0x166   : > { %v1872_v31 = vunpack.c.h.bf16 %v9035_v62  ;;  %v1878_v23 = vunpack.c.l.bf16 %v1874_v28  ;;  %v1719_v61 = vshrl.u32 %v1701_v6, %v1717_v3  ;;  %v9072_v33 = vand.u32 3, %v1738_v25 }
 0x167   : > { %v1722_v32 = vadd.s32 127, %v1721_v40  ;;  %v1807_v42 = vadd.s32 1, %v9051_v56  ;;  %v1804_v9 = vmul.u32 %v8971_v20, %v1788_v7  ;;  %v1879_v30 = vunpack.c.h.bf16 %v1874_v28 }
 0x168   : > { %v1880_v59 = vunpack.c.l.bf16 %v1875_v11  ;;  %v1881_v18 = vunpack.c.h.bf16 %v1875_v11  ;;  %v1720_v1 = vor.u32 %v1719_v61, %v1718_v4  ;;  %v1882_v5 = vunpack.c.l.bf16 %v1876_v19  ;;  %v7848_v55 = vpop.eup %7847 }
 0x169   : > { %v1723_v15 = vshll.u32 %v1722_v32, 23  ;;  %v1883_v16 = vunpack.c.h.bf16 %v1876_v19  ;;  %vm1806_vm12 = vc.u32 %v9067_v27, %v9050_v49  ;;  %v1884_v6 = vunpack.c.l.bf16 %v1877_v2  ;;  %v7850_v20 = vpop.eup %7849 }
 0x16a   : > { %v1890_v25 = vrot.slane %v1873_v52, %v8395_v57  ;;  %v1894_v10 = vrot.slane %v1873_v52, %v8397_v58  ;;  %v1641_v47 = vxor.u32 2147483648, %v7848_v55  ;;  %v1727_v48 = vcvt.s32.f32 %v1720_v1 }
 0x16b   : > { %v1724_v26 = vor.u32 4788187, %v1723_v15  ;;  %vm1751_vm13 = vcmp.lt.s32.totalorder %v8839_v21, 0  ;;  %v1808_v28 = vsel %vm1806_vm12, %v1807_v42, %v9051_v56  ;;  %v1638_v50 = vxor.u32 2147483648, %v7850_v20 }
 0x16c   : > { %vm9090_vm14 = vcmp.le.f32.partialorder %v1749_v38, 0.7853982  ;;  %v1809_v3 = vadd.s32 %v1808_v28, %v1804_v9  ;;  %v1885_v4 = vunpack.c.h.bf16 %v1877_v2  ;;  %v1920_v40 = vunpack.c.l.bf16 %v9077_v22 }
 0x16d   : > { %v1642_v7 = vsel %vm1640_vm8, %v1641_v47, %v7850_v20  ;;  %v1725_v11 = vand.u32 2147483647, %v1724_v26  ;;  %v1921_v8 = vunpack.c.h.bf16 %v9077_v22  ;;  %v1922_v56 = vunpack.c.l.bf16 %v9084_v46 }
 0x16e   : > { %v1639_v19 = vsel %vm1637_vm9, %v7848_v55, %v1638_v50  ;;  %v1810_v38 = vadd.s32 536870912, %v1809_v3  ;;  %v1897_v61 = vmul.f32 %v1890_v25, %v1878_v23  ;;  %v1898_v32 = vmul.f32 %v1894_v10, %v1879_v30  ;;  %v7324_v55 = vld [vmem:[%s8364_s25 + $0x30] sm:$0xff] }
 0x16f   : > { %v1643_v2 = vsel %vm1636_vm7, %v1639_v19, %v1642_v7  ;;  %v1728_v42 = vmul.f32 %v1727_v48, %v1725_v11  ;;  %v1899_v52 = vmul.f32 %v1890_v25, %v1880_v59  ;;  %v1900_v9 = vmul.f32 %v1894_v10, %v1881_v18 }
 0x170   : > { %v1644_v1 = vsel %vm1633_vm11, nan, %v1643_v2  ;;  %v9107_v15 = vadd.s32 %v9050_v49, %v9067_v27  ;;  %v1811_v22 = vshrl.u32 %v1810_v38, 30  ;;  %v1901_v20 = vmul.f32 %v1890_v25, %v1882_v5  ;;  %v1914_v49 = vld [vmem:[#allocation2 + $0x1] ss:$8 sm:$0x3] }
 0x171   : > { %v1729_v47 = vxor.u32 2147483648, %v1728_v42  ;;  %1858 = vst [vmem:[#allocation2 + $0x28] sm:$0xff] %v1644_v1  ;;  %v1902_v23 = vmul.f32 %v1894_v10, %v1883_v16  ;;  %v1903_v30 = vmul.f32 %v1890_v25, %v1884_v6  ;;  %v1904_v53 = vmul.f32 %v1894_v10, %v1885_v4  ;;  %v7325_v16 = vld [vmem:[%s8364_s25 + $0x38] sm:$0xff] }
 0x172   : > { %v1812_v26 = vshll.u32 %v1811_v22, 30  ;;  %v1835_v48 = vsub.s32 4, %v1811_v22  ;;  %v1905_v59 = vadd.f32 %v1897_v61, %v1865_v36  ;;  %v1906_v24 = vadd.f32 %v1898_v32, %v1866_v0 }
 0x173   : > { %v1730_v27 = vsel %vm1647_vm15, %v1729_v47, %v1728_v42  ;;  %v1907_v18 = vadd.f32 %v1899_v52, %v1867_v34  ;;  %v1908_v5 = vadd.f32 %v1900_v9, %v1868_v29  ;;  %v1924_v6 = vunpack.c.l.bf16 %v7324_v55  ;;  %v7326_v29 = vld [vmem:[%s8364_s25 + $0x40] sm:$0xff] }
 0x174   : > { %v1733_v36 = vsel %vm8975_vm2, %v8724_v44, %v1730_v27  ;;  %v9124_v25 = vsub.s32 %v1809_v3, %v1812_v26  ;;  %v1836_v14 = vsel %vm1751_vm13, %v1835_v48, %v1811_v22  ;;  %v1925_v0 = vunpack.c.h.bf16 %v7324_v55  ;;  %v1956_v22 = vld [vmem:[#allocation2 + $0x2] ss:$8 sm:$0x3]  ;;  %v7329_v26 = vld [vmem:[%s8364_s25 + $0x58] sm:$0xff] }
 0x175   : > { %7851 = vcosq.f32 %v1733_v36  ;;  %v1838_v10 = vsel %vm9090_vm14, 0, %v1836_v14  ;;  %v1932_v34 = vrot.slane %v1914_v49, %v8395_v57  ;;  %v1936_v17 = vrot.slane %v1914_v49, %v8397_v58 }
 0x176   : > { %7853 = vsinq.f32 %v1733_v36  ;;  %v1815_v28 = vsub.s32 0, %v9124_v25  ;;  %v1926_v12 = vunpack.c.l.bf16 %v7325_v16  ;;  %v1927_v50 = vunpack.c.h.bf16 %v7325_v16 }
 0x177   : > { %v1842_v3 = vadd.s32 3, %v1838_v10  ;;  %v1909_v4 = vadd.f32 %v1901_v20, %v1869_v45  ;;  %v1910_v7 = vadd.f32 %v1902_v23, %v1870_v60  ;;  %v1923_v11 = vunpack.c.h.bf16 %v9084_v46 }
 0x178   : > { %v7319_v19 = vmin.u32 %v1815_v28, %v9124_v25  ;;  %v1911_v38 = vadd.f32 %v1903_v30, %v1871_v63  ;;  %v1912_v61 = vadd.f32 %v1904_v53, %v1872_v31  ;;  %v1962_v32 = vunpack.c.l.bf16 %v7326_v29 }
 0x179   : > { %v1939_v2 = vmul.f32 %v1932_v34, %v1920_v40  ;;  %v1940_v42 = vmul.f32 %v1936_v17, %v1921_v8  ;;  %v1943_v52 = vmul.f32 %v1932_v34, %v1924_v6  ;;  %v1944_v9 = vmul.f32 %v1936_v17, %v1925_v0  ;;  %v7327_v40 = vld [vmem:[%s8364_s25 + $0x48] sm:$0xff]  ;;  %v9161_v6 = vld [vmem:[%s8364_s25 + $0x60] sm:$0xff] }
 0x17a   : > { %vm1744_vm15 = vcmp.eq.s32.totalorder %v9072_v33, 2  ;;  %v1817_v13 = vclz %v7319_v19  ;;  %v1941_v45 = vmul.f32 %v1932_v34, %v1922_v56  ;;  %v1945_v60 = vmul.f32 %v1932_v34, %v1926_v12  ;;  %v7328_v56 = vld [vmem:[%s8364_s25 + $0x50] sm:$0xff] }
 0x17b   : > { %v1946_v46 = vmul.f32 %v1936_v17, %v1927_v50  ;;  %vm1741_vm0 = vcmp.eq.s32.totalorder %v9072_v33, 0  ;;  %v9146_v1 = vand.u32 3, %v1842_v3  ;;  %v1942_v62 = vmul.f32 %v1936_v17, %v1923_v11 }
 0x17c   : > { %v1951_v63 = vadd.f32 %v1943_v52, %v1909_v4  ;;  %v1952_v31 = vadd.f32 %v1944_v9, %v1910_v7  ;;  %vm1740_vm1 = vcmp.lt.s32.totalorder %v9072_v33, 2  ;;  %v7320_v8 = vadd.s32 4294967294, %v1817_v13  ;;  %v7331_v9 = vld [vmem:[%s8364_s25 + $0x68] sm:$0xff] }
 0x17d   : > { %v1947_v20 = vadd.f32 %v1939_v2, %v1905_v59  ;;  %v1953_v55 = vadd.f32 %v1945_v60, %v1911_v38  ;;  %v1954_v47 = vadd.f32 %v1946_v46, %v1912_v61  ;;  %vm1737_vm2 = vweird.f32 %v8724_v44  ;;  %v7332_v46 = vld [vmem:[%s8364_s25 + $0x70] sm:$0xff] }
 0x17e   : > { %v9152_v23 = vadd.f32 %v1940_v42, %v1906_v24  ;;  %v9154_v30 = vadd.f32 %v1941_v45, %v1907_v18  ;;  %v9156_v53 = vadd.f32 %v1942_v62, %v1908_v5  ;;  %v1963_v48 = vunpack.c.h.bf16 %v7326_v29 }
 0x17f   : > { %vm7321_vm3 = vcmp.lt.s32.totalorder %v7320_v8, 0  ;;  %v1964_v49 = vunpack.c.l.bf16 %v7327_v40  ;;  %v1965_v27 = vunpack.c.h.bf16 %v7327_v40  ;;  %v1974_v16 = vrot.slane %v1956_v22, %v8395_v57 }
 0x180   : > { %v1820_v59 = vsel %vm7321_vm3, 0, %v7320_v8  ;;  %v1966_v36 = vunpack.c.l.bf16 %v7328_v56  ;;  %v1967_v14 = vunpack.c.h.bf16 %v7328_v56  ;;  %v1978_v0 = vrot.slane %v1956_v22, %v8397_v58  ;;  %v1998_v56 = vld [vmem:[#allocation2 + $0x3] ss:$8 sm:$0x3] }
 0x181   : > { %v1821_v24 = vsub.s32 32, %v1820_v59  ;;  %v1822_v18 = vshll.u32 %v9124_v25, %v1820_v59  ;;  %v1825_v10 = vsub.s32 4294967266, %v1820_v59  ;;  %v1968_v5 = vunpack.c.l.bf16 %v7329_v26 }
 0x182   : > { %v1969_v34 = vunpack.c.h.bf16 %v7329_v26  ;;  %v1981_v17 = vmul.f32 %v1974_v16, %v1962_v32  ;;  %v2004_v29 = vunpack.c.l.bf16 %v9161_v6  ;;  %v2005_v28 = vunpack.c.h.bf16 %v9161_v6  ;;  %v7852_v12 = vpop.eup %7851  ;;  %v7333_v26 = vld [vmem:[%s8364_s25 + $0x78] sm:$0xff] }
 0x183   : > { %v1823_v50 = vshrl.u32 %v9107_v15, %v1821_v24  ;;  %v1826_v3 = vadd.s32 127, %v1825_v10  ;;  %v1982_v4 = vmul.f32 %v1978_v0, %v1963_v48  ;;  %v1983_v7 = vmul.f32 %v1974_v16, %v1964_v49  ;;  %v7854_v11 = vpop.eup %7853 }
 0x184   : > { %v1745_v19 = vxor.u32 2147483648, %v7852_v12  ;;  %v1984_v38 = vmul.f32 %v1978_v0, %v1965_v27  ;;  %v1985_v25 = vmul.f32 %v1974_v16, %v1966_v36  ;;  %v1986_v61 = vmul.f32 %v1978_v0, %v1967_v14  ;;  %v7334_v36 = vld [vmem:[%s8364_s25 + $0x80] sm:$0xff]  ;;  %v7335_v14 = vld [vmem:[%s8364_s25 + $0x88] sm:$0xff] }
 0x185   : > { %v1742_v2 = vxor.u32 2147483648, %v7854_v11  ;;  %v1824_v32 = vor.u32 %v1823_v50, %v1822_v18  ;;  %v1827_v42 = vshll.u32 %v1826_v3, 23  ;;  %v1987_v52 = vmul.f32 %v1974_v16, %v1968_v5 }
 0x186   : > { %v1746_v13 = vsel %vm1744_vm15, %v1745_v19, %v7854_v11  ;;  %v1988_v45 = vmul.f32 %v1978_v0, %v1969_v34  ;;  %v1993_v15 = vadd.f32 %v1985_v25, %v1951_v63  ;;  %v1994_v60 = vadd.f32 %v1986_v61, %v1952_v31 }
 0x187   : > { %v1743_v62 = vsel %vm1741_vm0, %v7852_v12, %v1742_v2  ;;  %v1828_v22 = vor.u32 4788187, %v1827_v42  ;;  %v1831_v40 = vcvt.s32.f32 %v1824_v32  ;;  %v1995_v8 = vadd.f32 %v1987_v52, %v1953_v55  ;;  %v7336_v32 = vld [vmem:[%s8364_s25 + $0x90] sm:$0xff] }
 0x188   : > { %v1747_v48 = vsel %vm1740_vm1, %v1743_v62, %v1746_v13  ;;  %v1989_v49 = vadd.f32 %v1981_v17, %v1947_v20  ;;  %v1996_v27 = vadd.f32 %v1988_v45, %v1954_v47  ;;  %v2006_v16 = vunpack.c.l.bf16 %v7331_v9  ;;  %v7339_v62 = vld [vmem:[%s8364_s25 + $0xa8] sm:$0xff] }
 0x189   : > { %v1748_v63 = vsel %vm1737_vm2, nan, %v1747_v48  ;;  %v1829_v31 = vand.u32 2147483647, %v1828_v22  ;;  %v2008_v6 = vunpack.c.l.bf16 %v7332_v46  ;;  %v2009_v59 = vunpack.c.h.bf16 %v7332_v46  ;;  %v7338_v46 = vld [vmem:[%s8364_s25 + $0xa0] sm:$0xff] }
 0x18a   : > { %1859 = vst [vmem:[#allocation2 + $0x30] sm:$0xff] %v1748_v63  ;;  %v2010_v0 = vunpack.c.l.bf16 %v7333_v26  ;;  %v2011_v24 = vunpack.c.h.bf16 %v7333_v26  ;;  %v2016_v55 = vrot.slane %v1998_v56, %v8395_v57  ;;  %v2020_v18 = vrot.slane %v1998_v56, %v8397_v58 }
 0x18b   : > { %v1832_v33 = vmul.f32 %v1831_v40, %v1829_v31  ;;  %v1990_v20 = vadd.f32 %v1982_v4, %v9152_v23  ;;  %v1991_v44 = vadd.f32 %v1983_v7, %v9154_v30  ;;  %v2007_v47 = vunpack.c.h.bf16 %v7331_v9  ;;  %v7337_v23 = vld [vmem:[%s8364_s25 + $0x98] sm:$0xff] }
 0x18c   : > { %v1992_v10 = vadd.f32 %v1984_v38, %v9156_v53  ;;  %v2046_v5 = vunpack.c.l.bf16 %v7334_v36  ;;  %v2047_v34 = vunpack.c.h.bf16 %v7334_v36  ;;  %v2048_v17 = vunpack.c.l.bf16 %v7335_v14  ;;  %v2040_v38 = vld [vmem:[#allocation2 + $0x4] ss:$8 sm:$0x3]  ;;  %v7340_v36 = vld [vmem:[%s8364_s25 + $0xb0] sm:$0xff] }
 0x18d   : > { %v1833_v12 = vxor.u32 2147483648, %v1832_v33  ;;  %v2023_v50 = vmul.f32 %v2016_v55, %v2004_v29  ;;  %v2027_v3 = vmul.f32 %v2016_v55, %v2008_v6  ;;  %v2028_v11 = vmul.f32 %v2020_v18, %v2009_v59 }
 0x18e   : > { %v2024_v19 = vmul.f32 %v2020_v18, %v2005_v28  ;;  %v2025_v25 = vmul.f32 %v2016_v55, %v2006_v16  ;;  %v2029_v61 = vmul.f32 %v2016_v55, %v2010_v0  ;;  %v2030_v2 = vmul.f32 %v2020_v18, %v2011_v24 }
 0x18f   : > { %v1834_v30 = vsel %vm1751_vm13, %v1833_v12, %v1832_v33  ;;  %v2026_v4 = vmul.f32 %v2020_v18, %v2007_v47  ;;  %v2035_v53 = vadd.f32 %v2027_v3, %v1993_v15  ;;  %v2036_v7 = vadd.f32 %v2028_v11, %v1994_v60  ;;  %v2082_v18 = vld [vmem:[#allocation2 + $0x5] ss:$8 sm:$0x3] }
 0x190   : > { %v1837_v29 = vsel %vm9090_vm14, %v8839_v21, %v1834_v30  ;;  %v2037_v42 = vadd.f32 %v2029_v61, %v1995_v8  ;;  %v2038_v28 = vadd.f32 %v2030_v2, %v1996_v27  ;;  %v2049_v52 = vunpack.c.h.bf16 %v7335_v14  ;;  %v7341_v14 = vld [vmem:[%s8364_s25 + $0xb8] sm:$0xff] }
 0x191   : > { %7855 = vcosq.f32 %v1837_v29  ;;  %v2050_v9 = vunpack.c.l.bf16 %v7336_v32  ;;  %v2051_v13 = vunpack.c.h.bf16 %v7336_v32  ;;  %v2052_v45 = vunpack.c.l.bf16 %v7337_v23 }
 0x192   : > { %7857 = vsinq.f32 %v1837_v29  ;;  %v2053_v22 = vunpack.c.h.bf16 %v7337_v23  ;;  %v2058_v15 = vrot.slane %v2040_v38, %v8395_v57  ;;  %v2062_v60 = vrot.slane %v2040_v38, %v8397_v58 }
 0x193   : > { %v2031_v40 = vadd.f32 %v2023_v50, %v1989_v49  ;;  %v2032_v54 = vadd.f32 %v2024_v19, %v1990_v20  ;;  %v2033_v56 = vadd.f32 %v2025_v25, %v1991_v44  ;;  %v2034_v8 = vadd.f32 %v2026_v4, %v1992_v10  ;;  %v7342_v10 = vld [vmem:[%s8364_s25 + $0xc0] sm:$0xff]  ;;  %v7344_v19 = vld [vmem:[%s8364_s25 + $0xd0] sm:$0xff] }
 0x194   : > { %v2088_v26 = vunpack.c.l.bf16 %v7338_v46  ;;  %v2089_v48 = vunpack.c.h.bf16 %v7338_v46  ;;  %v2090_v27 = vunpack.c.l.bf16 %v7339_v62  ;;  %v2091_v16 = vunpack.c.h.bf16 %v7339_v62 }
 0x195   : > { %v2069_v63 = vmul.f32 %v2058_v15, %v2050_v9  ;;  %v2070_v31 = vmul.f32 %v2062_v60, %v2051_v13  ;;  %v2071_v6 = vmul.f32 %v2058_v15, %v2052_v45  ;;  %v2072_v59 = vmul.f32 %v2062_v60, %v2053_v22  ;;  %v2124_v9 = vld [vmem:[#allocation2 + $0x6] ss:$8 sm:$0x3]  ;;  %v7345_v13 = vld [vmem:[%s8364_s25 + $0xd8] sm:$0xff] }
 0x196   : > { %vm1848_vm4 = vcmp.eq.s32.totalorder %v9146_v1, 2  ;;  %v2065_v0 = vmul.f32 %v2058_v15, %v2046_v5  ;;  %v2066_v24 = vmul.f32 %v2062_v60, %v2047_v34  ;;  %v2067_v49 = vmul.f32 %v2058_v15, %v2048_v17  ;;  %v7343_v5 = vld [vmem:[%s8364_s25 + $0xc8] sm:$0xff] }
 0x197   : > { %v2068_v55 = vmul.f32 %v2062_v60, %v2049_v52  ;;  %vm1845_vm5 = vcmp.eq.s32.totalorder %v9146_v1, 0  ;;  %v2077_v33 = vadd.f32 %v2069_v63, %v2035_v53  ;;  %v2078_v20 = vadd.f32 %v2070_v31, %v2036_v7 }
 0x198   : > { %v2079_v44 = vadd.f32 %v2071_v6, %v2037_v42  ;;  %v2080_v47 = vadd.f32 %v2072_v59, %v2038_v28  ;;  %vm1844_vm6 = vcmp.lt.s32.totalorder %v9146_v1, 2  ;;  %v2092_v12 = vunpack.c.l.bf16 %v7340_v36 }
 0x199   : > { %v2093_v50 = vunpack.c.h.bf16 %v7340_v36  ;;  %v2094_v3 = vunpack.c.l.bf16 %v7341_v14  ;;  %v2095_v11 = vunpack.c.h.bf16 %v7341_v14  ;;  %vm1841_vm8 = vweird.f32 %v8839_v21 }
 0x19a   : > { %v2073_v34 = vadd.f32 %v2065_v0, %v2031_v40  ;;  %v2074_v17 = vadd.f32 %v2066_v24, %v2032_v54  ;;  %v2100_v25 = vrot.slane %v2082_v18, %v8395_v57  ;;  %v2104_v61 = vrot.slane %v2082_v18, %v8397_v58 }
 0x19b   : > { %v2075_v2 = vadd.f32 %v2067_v49, %v2033_v56  ;;  %v2076_v32 = vadd.f32 %v2068_v55, %v2034_v8  ;;  %v2130_v23 = vunpack.c.l.bf16 %v7342_v10  ;;  %v2131_v30 = vunpack.c.h.bf16 %v7342_v10  ;;  %v7346_v8 = vld [vmem:[%s8364_s25 + $0xe0] sm:$0xff] }
 0x19c   : > { %v2132_v4 = vunpack.c.l.bf16 %v7343_v5  ;;  %v2133_v53 = vunpack.c.h.bf16 %v7343_v5  ;;  %v2134_v7 = vunpack.c.l.bf16 %v7344_v19  ;;  %v2135_v38 = vunpack.c.h.bf16 %v7344_v19 }
 0x19d   : > { %v2111_v29 = vmul.f32 %v2100_v25, %v2092_v12  ;;  %v2112_v42 = vmul.f32 %v2104_v61, %v2093_v50  ;;  %v2113_v28 = vmul.f32 %v2100_v25, %v2094_v3  ;;  %v2114_v52 = vmul.f32 %v2104_v61, %v2095_v11  ;;  %v7347_v50 = vld [vmem:[%s8364_s25 + $0xe8] sm:$0xff]  ;;  %v7348_v3 = vld [vmem:[%s8364_s25 + $0xf0] sm:$0xff] }
 0x19e   : > { %v2107_v45 = vmul.f32 %v2100_v25, %v2088_v26  ;;  %v2108_v46 = vmul.f32 %v2104_v61, %v2089_v48  ;;  %v2109_v62 = vmul.f32 %v2100_v25, %v2090_v27  ;;  %v2110_v22 = vmul.f32 %v2104_v61, %v2091_v16  ;;  %v7856_v15 = vpop.eup %7855  ;;  %v7349_v25 = vld [vmem:[%s8364_s25 + $0xf8] sm:$0xff] }
 0x19f   : > { %v2119_v60 = vadd.f32 %v2111_v29, %v2077_v33  ;;  %v2120_v40 = vadd.f32 %v2112_v42, %v2078_v20  ;;  %v2121_v54 = vadd.f32 %v2113_v28, %v2079_v44  ;;  %v2122_v56 = vadd.f32 %v2114_v52, %v2080_v47  ;;  %v7858_v63 = vpop.eup %7857  ;;  %v7350_v42 = vld [vmem:[%s8364_s25 + $0x100] sm:$0xff]  ;;  %v7351_v28 = vld [vmem:[%s8364_s25 + $0x108] sm:$0xff] }
 0x1a0   : > { %v1849_v31 = vxor.u32 2147483648, %v7856_v15  ;;  %v2136_v6 = vunpack.c.l.bf16 %v7345_v13  ;;  %v2137_v59 = vunpack.c.h.bf16 %v7345_v13  ;;  %v2142_v36 = vrot.slane %v2124_v9, %v8395_v57 }
 0x1a1   : > { %v1846_v14 = vxor.u32 2147483648, %v7858_v63  ;;  %v2115_v0 = vadd.f32 %v2107_v45, %v2073_v34  ;;  %v2116_v26 = vadd.f32 %v2108_v46, %v2074_v17  ;;  %v2146_v48 = vrot.slane %v2124_v9, %v8397_v58  ;;  %v2166_v17 = vld [vmem:[#allocation2 + $0x7] ss:$8 sm:$0x3] }
 0x1a2   : > { %v1850_v27 = vsel %vm1848_vm4, %v1849_v31, %v7858_v63  ;;  %v2117_v16 = vadd.f32 %v2109_v62, %v2075_v2  ;;  %v2118_v24 = vadd.f32 %v2110_v22, %v2076_v32  ;;  %v2172_v49 = vunpack.c.l.bf16 %v7346_v8  ;;  %v7353_v63 = vld [vmem:[%s8364_s25 + $0x118] sm:$0xff] }
 0x1a3   : > { %v1847_v55 = vsel %vm1845_vm5, %v7856_v15, %v1846_v14  ;;  %v2149_v18 = vmul.f32 %v2142_v36, %v2130_v23  ;;  %v2153_v33 = vmul.f32 %v2142_v36, %v2134_v7  ;;  %v2173_v20 = vunpack.c.h.bf16 %v7346_v8  ;;  %v7352_v8 = vld [vmem:[%s8364_s25 + $0x110] sm:$0xff] }
 0x1a4   : > { %v1851_v44 = vsel %vm1844_vm6, %v1847_v55, %v1850_v27  ;;  %v2154_v47 = vmul.f32 %v2146_v48, %v2135_v38  ;;  %v2155_v10 = vmul.f32 %v2142_v36, %v2136_v6  ;;  %v2156_v12 = vmul.f32 %v2146_v48, %v2137_v59  ;;  %v2208_v14 = vld [vmem:[#allocation2 + $0x10] ss:$8 sm:$0x3] }
 0x1a5   : > { %v1852_v11 = vsel %vm1841_vm8, nan, %v1851_v44  ;;  %v2150_v5 = vmul.f32 %v2146_v48, %v2131_v30  ;;  %v2151_v19 = vmul.f32 %v2142_v36, %v2132_v4  ;;  %v2152_v34 = vmul.f32 %v2146_v48, %v2133_v53 }
 0x1a6   : > { %1860 = vst [vmem:[#allocation2 + $0x38] sm:$0xff] %v1852_v11  ;;  %v2161_v61 = vadd.f32 %v2153_v33, %v2119_v60  ;;  %v2162_v2 = vadd.f32 %v2154_v47, %v2120_v40  ;;  %v2163_v1 = vadd.f32 %v2155_v10, %v2121_v54  ;;  %v2164_v32 = vadd.f32 %v2156_v12, %v2122_v56 }
 0x1a7   : > { %v2174_v23 = vunpack.c.l.bf16 %v7347_v50  ;;  %v2175_v7 = vunpack.c.h.bf16 %v7347_v50  ;;  %v2176_v38 = vunpack.c.l.bf16 %v7348_v3  ;;  %v2177_v29 = vunpack.c.h.bf16 %v7348_v3  ;;  %v7355_v50 = vld [vmem:[%s8364_s25 + $0x128] sm:$0xff]  ;;  %v7356_v3 = vld [vmem:[%s8364_s25 + $0x130] sm:$0xff] }
 0x1a8   : > { %v2178_v21 = vunpack.c.l.bf16 %v7349_v25  ;;  %v2179_v52 = vunpack.c.h.bf16 %v7349_v25  ;;  %v2184_v30 = vrot.slane %v2166_v17, %v8395_v57  ;;  %v2188_v4 = vrot.slane %v2166_v17, %v8397_v58 }
 0x1a9   : > { %v2157_v53 = vadd.f32 %v2149_v18, %v2115_v0  ;;  %v2158_v9 = vadd.f32 %v2150_v5, %v2116_v26  ;;  %v2159_v13 = vadd.f32 %v2151_v19, %v2117_v16  ;;  %v2160_v45 = vadd.f32 %v2152_v34, %v2118_v24  ;;  %v7354_v16 = vld [vmem:[%s8364_s25 + $0x120] sm:$0xff] }
 0x1aa   : > { %v2214_v46 = vunpack.c.l.bf16 %v7350_v42  ;;  %v2215_v62 = vunpack.c.h.bf16 %v7350_v42  ;;  %v2216_v22 = vunpack.c.l.bf16 %v7351_v28  ;;  %v2217_v15 = vunpack.c.h.bf16 %v7351_v28 }
 0x1ab   : > { %v2195_v60 = vmul.f32 %v2184_v30, %v2176_v38  ;;  %v2196_v40 = vmul.f32 %v2188_v4, %v2177_v29  ;;  %v2197_v54 = vmul.f32 %v2184_v30, %v2178_v21  ;;  %v2198_v56 = vmul.f32 %v2188_v4, %v2179_v52 }
 0x1ac   : > { %v2191_v31 = vmul.f32 %v2184_v30, %v2172_v49  ;;  %v2192_v6 = vmul.f32 %v2188_v4, %v2173_v20  ;;  %v2193_v59 = vmul.f32 %v2184_v30, %v2174_v23  ;;  %v2194_v36 = vmul.f32 %v2188_v4, %v2175_v7  ;;  %v2250_v23 = vld [vmem:[#allocation2 + $0x11] ss:$8 sm:$0x3] }
 0x1ad   : > { %v2203_v0 = vadd.f32 %v2195_v60, %v2161_v61  ;;  %v2204_v26 = vadd.f32 %v2196_v40, %v2162_v2  ;;  %v2205_v48 = vadd.f32 %v2197_v54, %v2163_v1  ;;  %v2206_v27 = vadd.f32 %v2198_v56, %v2164_v32  ;;  %v7357_v7 = vld [vmem:[%s8364_s25 + $0x138] sm:$0xff] }
 0x1ae   : > { %v2218_v24 = vunpack.c.l.bf16 %v7352_v8  ;;  %v2219_v55 = vunpack.c.h.bf16 %v7352_v8  ;;  %v2220_v18 = vunpack.c.l.bf16 %v7353_v63  ;;  %v2221_v33 = vunpack.c.h.bf16 %v7353_v63 }
 0x1af   : > { %v2199_v44 = vadd.f32 %v2191_v31, %v2157_v53  ;;  %v2200_v47 = vadd.f32 %v2192_v6, %v2158_v9  ;;  %v2226_v10 = vrot.slane %v2208_v14, %v8395_v57  ;;  %v2230_v49 = vrot.slane %v2208_v14, %v8397_v58  ;;  %v7358_v53 = vld [vmem:[%s8364_s25 + $0x140] sm:$0xff]  ;;  %v7359_v9 = vld [vmem:[%s8364_s25 + $0x148] sm:$0xff]  ;;  %v7360_v14 = vld [vmem:[%s8364_s25 + $0x150] sm:$0xff] }
 0x1b0   : > { %v2201_v20 = vadd.f32 %v2193_v59, %v2159_v13  ;;  %v2202_v12 = vadd.f32 %v2194_v36, %v2160_v45  ;;  %v2256_v11 = vunpack.c.l.bf16 %v7354_v16  ;;  %v2257_v5 = vunpack.c.h.bf16 %v7354_v16 }
 0x1b1   : > { %v2233_v19 = vmul.f32 %v2226_v10, %v2214_v46  ;;  %v2234_v34 = vmul.f32 %v2230_v49, %v2215_v62  ;;  %v2235_v17 = vmul.f32 %v2226_v10, %v2216_v22  ;;  %v2236_v25 = vmul.f32 %v2230_v49, %v2217_v15 }
 0x1b2   : > { %v2237_v61 = vmul.f32 %v2226_v10, %v2218_v24  ;;  %v2238_v2 = vmul.f32 %v2230_v49, %v2219_v55  ;;  %v2239_v1 = vmul.f32 %v2226_v10, %v2220_v18  ;;  %v2240_v32 = vmul.f32 %v2230_v49, %v2221_v33  ;;  %v2292_v24 = vld [vmem:[#allocation2 + $0x12] ss:$8 sm:$0x3] }
 0x1b3   : > { %v2258_v38 = vunpack.c.l.bf16 %v7355_v50  ;;  %v2259_v29 = vunpack.c.h.bf16 %v7355_v50  ;;  %v2260_v42 = vunpack.c.l.bf16 %v7356_v3  ;;  %v2261_v28 = vunpack.c.h.bf16 %v7356_v3  ;;  %v7363_v50 = vld [vmem:[%s8364_s25 + $0x168] sm:$0xff]  ;;  %v7364_v3 = vld [vmem:[%s8364_s25 + $0x170] sm:$0xff] }
 0x1b4   : > { %v2245_v21 = vadd.f32 %v2237_v61, %v2203_v0  ;;  %v2246_v52 = vadd.f32 %v2238_v2, %v2204_v26  ;;  %v2247_v30 = vadd.f32 %v2239_v1, %v2205_v48  ;;  %v2248_v4 = vadd.f32 %v2240_v32, %v2206_v27  ;;  %v7361_v0 = vld [vmem:[%s8364_s25 + $0x158] sm:$0xff] }
 0x1b5   : > { %v2262_v13 = vunpack.c.l.bf16 %v7357_v7  ;;  %v2263_v45 = vunpack.c.h.bf16 %v7357_v7  ;;  %v2268_v46 = vrot.slane %v2250_v23, %v8395_v57  ;;  %v2272_v62 = vrot.slane %v2250_v23, %v8397_v58 }
 0x1b6   : > { %v2241_v22 = vadd.f32 %v2233_v19, %v2199_v44  ;;  %v2242_v15 = vadd.f32 %v2234_v34, %v2200_v47  ;;  %v2243_v60 = vadd.f32 %v2235_v17, %v2201_v20  ;;  %v2244_v40 = vadd.f32 %v2236_v25, %v2202_v12  ;;  %v7362_v47 = vld [vmem:[%s8364_s25 + $0x160] sm:$0xff] }
 0x1b7   : > { %v2298_v54 = vunpack.c.l.bf16 %v7358_v53  ;;  %v2299_v56 = vunpack.c.h.bf16 %v7358_v53  ;;  %v2300_v8 = vunpack.c.l.bf16 %v7359_v9  ;;  %v2301_v63 = vunpack.c.h.bf16 %v7359_v9 }
 0x1b8   : > { %v2279_v31 = vmul.f32 %v2268_v46, %v2260_v42  ;;  %v2280_v6 = vmul.f32 %v2272_v62, %v2261_v28  ;;  %v2281_v59 = vmul.f32 %v2268_v46, %v2262_v13  ;;  %v2282_v36 = vmul.f32 %v2272_v62, %v2263_v45 }
 0x1b9   : > { %v2275_v26 = vmul.f32 %v2268_v46, %v2256_v11  ;;  %v2276_v48 = vmul.f32 %v2272_v62, %v2257_v5  ;;  %v2277_v27 = vmul.f32 %v2268_v46, %v2258_v38  ;;  %v2278_v16 = vmul.f32 %v2272_v62, %v2259_v29 }
 0x1ba   : > { %v2287_v55 = vadd.f32 %v2279_v31, %v2245_v21  ;;  %v2288_v18 = vadd.f32 %v2280_v6, %v2246_v52  ;;  %v2289_v33 = vadd.f32 %v2281_v59, %v2247_v30  ;;  %v2290_v44 = vadd.f32 %v2282_v36, %v2248_v4  ;;  %v2334_v21 = vld [vmem:[#allocation2 + $0x13] ss:$8 sm:$0x3] }
 0x1bb   : > { %v2302_v10 = vunpack.c.l.bf16 %v7360_v14  ;;  %v2303_v49 = vunpack.c.h.bf16 %v7360_v14  ;;  %v2304_v20 = vunpack.c.l.bf16 %v7361_v0  ;;  %v2305_v12 = vunpack.c.h.bf16 %v7361_v0  ;;  %v7365_v52 = vld [vmem:[%s8364_s25 + $0x178] sm:$0xff] }
 0x1bc   : > { %v2283_v19 = vadd.f32 %v2275_v26, %v2241_v22  ;;  %v2284_v34 = vadd.f32 %v2276_v48, %v2242_v15  ;;  %v2310_v11 = vrot.slane %v2292_v24, %v8395_v57  ;;  %v2314_v5 = vrot.slane %v2292_v24, %v8397_v58  ;;  %v7366_v22 = vld [vmem:[%s8364_s25 + $0x180] sm:$0xff]  ;;  %v7367_v15 = vld [vmem:[%s8364_s25 + $0x188] sm:$0xff]  ;;  %v7368_v24 = vld [vmem:[%s8364_s25 + $0x190] sm:$0xff] }
 0x1bd   : > { %v2285_v17 = vadd.f32 %v2277_v27, %v2243_v60  ;;  %v2286_v25 = vadd.f32 %v2278_v16, %v2244_v40  ;;  %v2340_v61 = vunpack.c.l.bf16 %v7362_v47  ;;  %v2341_v2 = vunpack.c.h.bf16 %v7362_v47 }
 0x1be   : > { %v2342_v1 = vunpack.c.l.bf16 %v7363_v50  ;;  %v2343_v32 = vunpack.c.h.bf16 %v7363_v50  ;;  %v2344_v23 = vunpack.c.l.bf16 %v7364_v3  ;;  %v2345_v7 = vunpack.c.h.bf16 %v7364_v3  ;;  %v7370_v3 = vld [vmem:[%s8364_s25 + $0x1a0] sm:$0xff] }
 0x1bf   : > { %v2321_v38 = vmul.f32 %v2310_v11, %v2302_v10  ;;  %v2322_v29 = vmul.f32 %v2314_v5, %v2303_v49  ;;  %v2323_v42 = vmul.f32 %v2310_v11, %v2304_v20  ;;  %v2324_v28 = vmul.f32 %v2314_v5, %v2305_v12  ;;  %v2376_v10 = vld [vmem:[#allocation2 + $0x14] ss:$8 sm:$0x3] }
 0x1c0   : > { %v2317_v30 = vmul.f32 %v2310_v11, %v2298_v54  ;;  %v2318_v4 = vmul.f32 %v2314_v5, %v2299_v56  ;;  %v2319_v53 = vmul.f32 %v2310_v11, %v2300_v8  ;;  %v2320_v9 = vmul.f32 %v2314_v5, %v2301_v63 }
 0x1c1   : > { %v2329_v13 = vadd.f32 %v2321_v38, %v2287_v55  ;;  %v2330_v45 = vadd.f32 %v2322_v29, %v2288_v18  ;;  %v2331_v46 = vadd.f32 %v2323_v42, %v2289_v33  ;;  %v2332_v62 = vadd.f32 %v2324_v28, %v2290_v44  ;;  %v7369_v55 = vld [vmem:[%s8364_s25 + $0x198] sm:$0xff] }
 0x1c2   : > { %v2346_v60 = vunpack.c.l.bf16 %v7365_v52  ;;  %v2347_v40 = vunpack.c.h.bf16 %v7365_v52  ;;  %v2352_v31 = vrot.slane %v2334_v21, %v8395_v57  ;;  %v2356_v6 = vrot.slane %v2334_v21, %v8397_v58 }
 0x1c3   : > { %v2325_v59 = vadd.f32 %v2317_v30, %v2283_v19  ;;  %v2326_v36 = vadd.f32 %v2318_v4, %v2284_v34  ;;  %v2327_v54 = vadd.f32 %v2319_v53, %v2285_v17  ;;  %v2328_v56 = vadd.f32 %v2320_v9, %v2286_v25  ;;  %v7371_v17 = vld [vmem:[%s8364_s25 + $0x1a8] sm:$0xff]  ;;  %v7372_v25 = vld [vmem:[%s8364_s25 + $0x1b0] sm:$0xff] }
 0x1c4   : > { %v2382_v8 = vunpack.c.l.bf16 %v7366_v22  ;;  %v2383_v63 = vunpack.c.h.bf16 %v7366_v22  ;;  %v2384_v14 = vunpack.c.l.bf16 %v7367_v15  ;;  %v2385_v0 = vunpack.c.h.bf16 %v7367_v15 }
 0x1c5   : > { %v2363_v26 = vmul.f32 %v2352_v31, %v2344_v23  ;;  %v2364_v48 = vmul.f32 %v2356_v6, %v2345_v7  ;;  %v2365_v27 = vmul.f32 %v2352_v31, %v2346_v60  ;;  %v2366_v16 = vmul.f32 %v2356_v6, %v2347_v40 }
 0x1c6   : > { %v2359_v18 = vmul.f32 %v2352_v31, %v2340_v61  ;;  %v2360_v33 = vmul.f32 %v2356_v6, %v2341_v2  ;;  %v2361_v44 = vmul.f32 %v2352_v31, %v2342_v1  ;;  %v2362_v47 = vmul.f32 %v2356_v6, %v2343_v32 }
 0x1c7   : > { %v2371_v49 = vadd.f32 %v2363_v26, %v2329_v13  ;;  %v2372_v20 = vadd.f32 %v2364_v48, %v2330_v45  ;;  %v2373_v12 = vadd.f32 %v2365_v27, %v2331_v46  ;;  %v2374_v50 = vadd.f32 %v2366_v16, %v2332_v62  ;;  %v2418_v13 = vld [vmem:[#allocation2 + $0x15] ss:$8 sm:$0x3] }
 0x1c8   : > { %v2386_v19 = vunpack.c.l.bf16 %v7368_v24  ;;  %v2387_v34 = vunpack.c.h.bf16 %v7368_v24  ;;  %v2388_v11 = vunpack.c.l.bf16 %v7369_v55  ;;  %v2389_v5 = vunpack.c.h.bf16 %v7369_v55  ;;  %v7373_v45 = vld [vmem:[%s8364_s25 + $0x1b8] sm:$0xff] }
 0x1c9   : > { %v2367_v23 = vadd.f32 %v2359_v18, %v2325_v59  ;;  %v2368_v7 = vadd.f32 %v2360_v33, %v2326_v36  ;;  %v2394_v61 = vrot.slane %v2376_v10, %v8395_v57  ;;  %v2398_v2 = vrot.slane %v2376_v10, %v8397_v58  ;;  %v7374_v59 = vld [vmem:[%s8364_s25 + $0x1c0] sm:$0xff]  ;;  %v7375_v36 = vld [vmem:[%s8364_s25 + $0x1c8] sm:$0xff]  ;;  %v7376_v10 = vld [vmem:[%s8364_s25 + $0x1d0] sm:$0xff] }
 0x1ca   : > { %v2369_v1 = vadd.f32 %v2361_v44, %v2327_v54  ;;  %v2370_v32 = vadd.f32 %v2362_v47, %v2328_v56  ;;  %v2424_v38 = vunpack.c.l.bf16 %v7370_v3  ;;  %v2425_v29 = vunpack.c.h.bf16 %v7370_v3 }
 0x1cb   : > { %v2426_v42 = vunpack.c.l.bf16 %v7371_v17  ;;  %v2427_v28 = vunpack.c.h.bf16 %v7371_v17  ;;  %v2428_v21 = vunpack.c.l.bf16 %v7372_v25  ;;  %v2429_v52 = vunpack.c.h.bf16 %v7372_v25  ;;  %v7378_v25 = vld [vmem:[%s8364_s25 + $0x1e0] sm:$0xff] }
 0x1cc   : > { %v2405_v30 = vmul.f32 %v2394_v61, %v2386_v19  ;;  %v2406_v4 = vmul.f32 %v2398_v2, %v2387_v34  ;;  %v2407_v53 = vmul.f32 %v2394_v61, %v2388_v11  ;;  %v2408_v9 = vmul.f32 %v2398_v2, %v2389_v5  ;;  %v2460_v19 = vld [vmem:[#allocation2 + $0x16] ss:$8 sm:$0x3] }
 0x1cd   : > { %v2401_v46 = vmul.f32 %v2394_v61, %v2382_v8  ;;  %v2402_v62 = vmul.f32 %v2398_v2, %v2383_v63  ;;  %v2403_v22 = vmul.f32 %v2394_v61, %v2384_v14  ;;  %v2404_v15 = vmul.f32 %v2398_v2, %v2385_v0 }
 0x1ce   : > { %v2413_v60 = vadd.f32 %v2405_v30, %v2371_v49  ;;  %v2414_v40 = vadd.f32 %v2406_v4, %v2372_v20  ;;  %v2415_v31 = vadd.f32 %v2407_v53, %v2373_v12  ;;  %v2416_v6 = vadd.f32 %v2408_v9, %v2374_v50  ;;  %v7377_v49 = vld [vmem:[%s8364_s25 + $0x1d8] sm:$0xff] }
 0x1cf   : > { %v2430_v54 = vunpack.c.l.bf16 %v7373_v45  ;;  %v2431_v56 = vunpack.c.h.bf16 %v7373_v45  ;;  %v2436_v26 = vrot.slane %v2418_v13, %v8395_v57  ;;  %v2440_v48 = vrot.slane %v2418_v13, %v8397_v58 }
 0x1d0   : > { %v2409_v27 = vadd.f32 %v2401_v46, %v2367_v23  ;;  %v2410_v16 = vadd.f32 %v2402_v62, %v2368_v7  ;;  %v2411_v8 = vadd.f32 %v2403_v22, %v2369_v1  ;;  %v2412_v63 = vadd.f32 %v2404_v15, %v2370_v32  ;;  %v7379_v1 = vld [vmem:[%s8364_s25 + $0x1e8] sm:$0xff]  ;;  %v7380_v32 = vld [vmem:[%s8364_s25 + $0x1f0] sm:$0xff] }
 0x1d1   : > { %v2466_v14 = vunpack.c.l.bf16 %v7374_v59  ;;  %v2467_v0 = vunpack.c.h.bf16 %v7374_v59  ;;  %v2468_v24 = vunpack.c.l.bf16 %v7375_v36  ;;  %v2469_v55 = vunpack.c.h.bf16 %v7375_v36 }
 0x1d2   : > { %v2447_v18 = vmul.f32 %v2436_v26, %v2428_v21  ;;  %v2448_v33 = vmul.f32 %v2440_v48, %v2429_v52  ;;  %v2449_v44 = vmul.f32 %v2436_v26, %v2430_v54  ;;  %v2450_v47 = vmul.f32 %v2440_v48, %v2431_v56 }
 0x1d3   : > { %v2443_v20 = vmul.f32 %v2436_v26, %v2424_v38  ;;  %v2444_v12 = vmul.f32 %v2440_v48, %v2425_v29  ;;  %v2445_v50 = vmul.f32 %v2436_v26, %v2426_v42  ;;  %v2446_v3 = vmul.f32 %v2440_v48, %v2427_v28 }
 0x1d4   : > { %v2455_v34 = vadd.f32 %v2447_v18, %v2413_v60  ;;  %v2456_v11 = vadd.f32 %v2448_v33, %v2414_v40  ;;  %v2457_v5 = vadd.f32 %v2449_v44, %v2415_v31  ;;  %v2458_v17 = vadd.f32 %v2450_v47, %v2416_v6  ;;  %v2502_v60 = vld [vmem:[#allocation2 + $0x17] ss:$8 sm:$0x3] }
 0x1d5   : > { %v2470_v23 = vunpack.c.l.bf16 %v7376_v10  ;;  %v2471_v7 = vunpack.c.h.bf16 %v7376_v10  ;;  %v2472_v61 = vunpack.c.l.bf16 %v7377_v49  ;;  %v2473_v2 = vunpack.c.h.bf16 %v7377_v49  ;;  %v7381_v40 = vld [vmem:[%s8364_s25 + $0x1f8] sm:$0xff] }
 0x1d6   : > { %v2451_v21 = vadd.f32 %v2443_v20, %v2409_v27  ;;  %v2452_v52 = vadd.f32 %v2444_v12, %v2410_v16  ;;  %v2478_v38 = vrot.slane %v2460_v19, %v8395_v57  ;;  %v2482_v29 = vrot.slane %v2460_v19, %v8397_v58  ;;  %v7382_v27 = vld [vmem:[%s8364_s25 + $0x200] sm:$0xff]  ;;  %v7383_v16 = vld [vmem:[%s8364_s25 + $0x208] sm:$0xff]  ;;  %v7384_v19 = vld [vmem:[%s8364_s25 + $0x210] sm:$0xff] }
 0x1d7   : > { %v2453_v42 = vadd.f32 %v2445_v50, %v2411_v8  ;;  %v2454_v28 = vadd.f32 %v2446_v3, %v2412_v63  ;;  %v2508_v30 = vunpack.c.l.bf16 %v7378_v25  ;;  %v2509_v4 = vunpack.c.h.bf16 %v7378_v25 }
 0x1d8   : > { %v2510_v53 = vunpack.c.l.bf16 %v7379_v1  ;;  %v2511_v9 = vunpack.c.h.bf16 %v7379_v1  ;;  %v2512_v13 = vunpack.c.l.bf16 %v7380_v32  ;;  %v2513_v45 = vunpack.c.h.bf16 %v7380_v32  ;;  %v7386_v32 = vld [vmem:[%s8364_s25 + $0x220] sm:$0xff] }
 0x1d9   : > { %v2489_v46 = vmul.f32 %v2478_v38, %v2470_v23  ;;  %v2490_v62 = vmul.f32 %v2482_v29, %v2471_v7  ;;  %v2491_v22 = vmul.f32 %v2478_v38, %v2472_v61  ;;  %v2492_v15 = vmul.f32 %v2482_v29, %v2473_v2  ;;  %v2544_v23 = vld [vmem:[#allocation2 + $0x20] ss:$8 sm:$0x3] }
 0x1da   : > { %v2485_v31 = vmul.f32 %v2478_v38, %v2466_v14  ;;  %v2486_v6 = vmul.f32 %v2482_v29, %v2467_v0  ;;  %v2487_v59 = vmul.f32 %v2478_v38, %v2468_v24  ;;  %v2488_v36 = vmul.f32 %v2482_v29, %v2469_v55 }
 0x1db   : > { %v2497_v54 = vadd.f32 %v2489_v46, %v2455_v34  ;;  %v2498_v56 = vadd.f32 %v2490_v62, %v2456_v11  ;;  %v2499_v26 = vadd.f32 %v2491_v22, %v2457_v5  ;;  %v2500_v48 = vadd.f32 %v2492_v15, %v2458_v17  ;;  %v7385_v34 = vld [vmem:[%s8364_s25 + $0x218] sm:$0xff] }
 0x1dc   : > { %v2514_v8 = vunpack.c.l.bf16 %v7381_v40  ;;  %v2515_v63 = vunpack.c.h.bf16 %v7381_v40  ;;  %v2520_v18 = vrot.slane %v2502_v60, %v8395_v57  ;;  %v2524_v33 = vrot.slane %v2502_v60, %v8397_v58 }
 0x1dd   : > { %v2493_v44 = vadd.f32 %v2485_v31, %v2451_v21  ;;  %v2494_v47 = vadd.f32 %v2486_v6, %v2452_v52  ;;  %v2495_v14 = vadd.f32 %v2487_v59, %v2453_v42  ;;  %v2496_v0 = vadd.f32 %v2488_v36, %v2454_v28 }
 0x1de   : > { %v2550_v24 = vunpack.c.l.bf16 %v7382_v27  ;;  %v2551_v55 = vunpack.c.h.bf16 %v7382_v27  ;;  %v2552_v10 = vunpack.c.l.bf16 %v7383_v16  ;;  %v2553_v49 = vunpack.c.h.bf16 %v7383_v16 }
 0x1df   : > { %v2531_v20 = vmul.f32 %v2520_v18, %v2512_v13  ;;  %v2532_v12 = vmul.f32 %v2524_v33, %v2513_v45  ;;  %v2533_v50 = vmul.f32 %v2520_v18, %v2514_v8  ;;  %v2534_v3 = vmul.f32 %v2524_v33, %v2515_v63  ;;  %v7388_v45 = vld [vmem:[%s8364_s25 + $0x230] sm:$0xff] }
 0x1e0   : > { %v2527_v11 = vmul.f32 %v2520_v18, %v2508_v30  ;;  %v2528_v5 = vmul.f32 %v2524_v33, %v2509_v4  ;;  %v2529_v17 = vmul.f32 %v2520_v18, %v2510_v53  ;;  %v2530_v25 = vmul.f32 %v2524_v33, %v2511_v9  ;;  %v7387_v9 = vld [vmem:[%s8364_s25 + $0x228] sm:$0xff] }
 0x1e1   : > { %v2539_v7 = vadd.f32 %v2531_v20, %v2497_v54  ;;  %v2540_v61 = vadd.f32 %v2532_v12, %v2498_v56  ;;  %v2541_v2 = vadd.f32 %v2533_v50, %v2499_v26  ;;  %v2542_v1 = vadd.f32 %v2534_v3, %v2500_v48  ;;  %v2586_v54 = vld [vmem:[#allocation2 + $0x21] ss:$8 sm:$0x3]  ;;  %v7389_v56 = vld [vmem:[%s8364_s25 + $0x238] sm:$0xff] }
 0x1e2   : > { %v2554_v21 = vunpack.c.l.bf16 %v7384_v19  ;;  %v2555_v52 = vunpack.c.h.bf16 %v7384_v19  ;;  %v2556_v38 = vunpack.c.l.bf16 %v7385_v34  ;;  %v2557_v29 = vunpack.c.h.bf16 %v7385_v34 }
 0x1e3   : > { %v2535_v42 = vadd.f32 %v2527_v11, %v2493_v44  ;;  %v2536_v28 = vadd.f32 %v2528_v5, %v2494_v47  ;;  %v2562_v13 = vrot.slane %v2544_v23, %v8395_v57  ;;  %v2566_v30 = vrot.slane %v2544_v23, %v8397_v58  ;;  %v7390_v44 = vld [vmem:[%s8364_s25 + $0x240] sm:$0xff]  ;;  %v7391_v47 = vld [vmem:[%s8364_s25 + $0x248] sm:$0xff]  ;;  %v7392_v23 = vld [vmem:[%s8364_s25 + $0x250] sm:$0xff] }
 0x1e4   : > { %v2537_v4 = vadd.f32 %v2529_v17, %v2495_v14  ;;  %v2538_v53 = vadd.f32 %v2530_v25, %v2496_v0  ;;  %v2592_v46 = vunpack.c.l.bf16 %v7386_v32  ;;  %v2593_v62 = vunpack.c.h.bf16 %v7386_v32 }
 0x1e5   : > { %v2569_v22 = vmul.f32 %v2562_v13, %v2550_v24  ;;  %v2570_v15 = vmul.f32 %v2566_v30, %v2551_v55  ;;  %v2571_v60 = vmul.f32 %v2562_v13, %v2552_v10  ;;  %v2572_v40 = vmul.f32 %v2566_v30, %v2553_v49 }
 0x1e6   : > { %v2573_v31 = vmul.f32 %v2562_v13, %v2554_v21  ;;  %v2574_v6 = vmul.f32 %v2566_v30, %v2555_v52  ;;  %v2575_v59 = vmul.f32 %v2562_v13, %v2556_v38  ;;  %v2576_v36 = vmul.f32 %v2566_v30, %v2557_v29  ;;  %v2628_v21 = vld [vmem:[#allocation2 + $0x22] ss:$8 sm:$0x3] }
 0x1e7   : > { %v2594_v26 = vunpack.c.l.bf16 %v7387_v9  ;;  %v2595_v48 = vunpack.c.h.bf16 %v7387_v9  ;;  %v2596_v27 = vunpack.c.l.bf16 %v7388_v45  ;;  %v2597_v16 = vunpack.c.h.bf16 %v7388_v45  ;;  %v7395_v9 = vld [vmem:[%s8364_s25 + $0x268] sm:$0xff]  ;;  %v7396_v45 = vld [vmem:[%s8364_s25 + $0x270] sm:$0xff] }
 0x1e8   : > { %v2581_v8 = vadd.f32 %v2573_v31, %v2539_v7  ;;  %v2582_v63 = vadd.f32 %v2574_v6, %v2540_v61  ;;  %v2583_v18 = vadd.f32 %v2575_v59, %v2541_v2  ;;  %v2584_v33 = vadd.f32 %v2576_v36, %v2542_v1  ;;  %v7393_v7 = vld [vmem:[%s8364_s25 + $0x258] sm:$0xff] }
 0x1e9   : > { %v2598_v14 = vunpack.c.l.bf16 %v7389_v56  ;;  %v2599_v0 = vunpack.c.h.bf16 %v7389_v56  ;;  %v2604_v24 = vrot.slane %v2586_v54, %v8395_v57  ;;  %v2608_v55 = vrot.slane %v2586_v54, %v8397_v58 }
 0x1ea   : > { %v2577_v10 = vadd.f32 %v2569_v22, %v2535_v42  ;;  %v2578_v49 = vadd.f32 %v2570_v15, %v2536_v28  ;;  %v2579_v20 = vadd.f32 %v2571_v60, %v2537_v4  ;;  %v2580_v12 = vadd.f32 %v2572_v40, %v2538_v53  ;;  %v7394_v28 = vld [vmem:[%s8364_s25 + $0x260] sm:$0xff] }
 0x1eb   : > { %v2634_v50 = vunpack.c.l.bf16 %v7390_v44  ;;  %v2635_v3 = vunpack.c.h.bf16 %v7390_v44  ;;  %v2636_v19 = vunpack.c.l.bf16 %v7391_v47  ;;  %v2637_v34 = vunpack.c.h.bf16 %v7391_v47 }
 0x1ec   : > { %v2615_v11 = vmul.f32 %v2604_v24, %v2596_v27  ;;  %v2616_v5 = vmul.f32 %v2608_v55, %v2597_v16  ;;  %v2617_v17 = vmul.f32 %v2604_v24, %v2598_v14  ;;  %v2618_v25 = vmul.f32 %v2608_v55, %v2599_v0 }
 0x1ed   : > { %v2611_v61 = vmul.f32 %v2604_v24, %v2592_v46  ;;  %v2612_v2 = vmul.f32 %v2608_v55, %v2593_v62  ;;  %v2613_v1 = vmul.f32 %v2604_v24, %v2594_v26  ;;  %v2614_v32 = vmul.f32 %v2608_v55, %v2595_v48 }
 0x1ee   : > { %v2623_v52 = vadd.f32 %v2615_v11, %v2581_v8  ;;  %v2624_v38 = vadd.f32 %v2616_v5, %v2582_v63  ;;  %v2625_v29 = vadd.f32 %v2617_v17, %v2583_v18  ;;  %v2626_v42 = vadd.f32 %v2618_v25, %v2584_v33  ;;  %v2670_v8 = vld [vmem:[#allocation2 + $0x23] ss:$8 sm:$0x3]  ;;  %v7397_v63 = vld [vmem:[%s8364_s25 + $0x278] sm:$0xff] }
 0x1ef   : > { %v2638_v13 = vunpack.c.l.bf16 %v7392_v23  ;;  %v2639_v30 = vunpack.c.h.bf16 %v7392_v23  ;;  %v2640_v4 = vunpack.c.l.bf16 %v7393_v7  ;;  %v2641_v53 = vunpack.c.h.bf16 %v7393_v7 }
 0x1f0   : > { %v2619_v22 = vadd.f32 %v2611_v61, %v2577_v10  ;;  %v2620_v15 = vadd.f32 %v2612_v2, %v2578_v49  ;;  %v2646_v46 = vrot.slane %v2628_v21, %v8395_v57  ;;  %v2650_v62 = vrot.slane %v2628_v21, %v8397_v58  ;;  %v7398_v10 = vld [vmem:[%s8364_s25 + $0x280] sm:$0xff]  ;;  %v7399_v49 = vld [vmem:[%s8364_s25 + $0x288] sm:$0xff]  ;;  %v7400_v21 = vld [vmem:[%s8364_s25 + $0x290] sm:$0xff] }
 0x1f1   : > { %v2621_v60 = vadd.f32 %v2613_v1, %v2579_v20  ;;  %v2622_v40 = vadd.f32 %v2614_v32, %v2580_v12  ;;  %v2676_v31 = vunpack.c.l.bf16 %v7394_v28  ;;  %v2677_v6 = vunpack.c.h.bf16 %v7394_v28 }
 0x1f2   : > { %v2678_v59 = vunpack.c.l.bf16 %v7395_v9  ;;  %v2679_v36 = vunpack.c.h.bf16 %v7395_v9  ;;  %v2680_v54 = vunpack.c.l.bf16 %v7396_v45  ;;  %v2681_v56 = vunpack.c.h.bf16 %v7396_v45  ;;  %v7402_v45 = vld [vmem:[%s8364_s25 + $0x2a0] sm:$0xff] }
 0x1f3   : > { %v2657_v26 = vmul.f32 %v2646_v46, %v2638_v13  ;;  %v2658_v48 = vmul.f32 %v2650_v62, %v2639_v30  ;;  %v2659_v27 = vmul.f32 %v2646_v46, %v2640_v4  ;;  %v2660_v16 = vmul.f32 %v2650_v62, %v2641_v53  ;;  %v2712_v13 = vld [vmem:[#allocation2 + $0x24] ss:$8 sm:$0x3] }
 0x1f4   : > { %v2653_v18 = vmul.f32 %v2646_v46, %v2634_v50  ;;  %v2654_v33 = vmul.f32 %v2650_v62, %v2635_v3  ;;  %v2655_v44 = vmul.f32 %v2646_v46, %v2636_v19  ;;  %v2656_v47 = vmul.f32 %v2650_v62, %v2637_v34 }
 0x1f5   : > { %v2665_v14 = vadd.f32 %v2657_v26, %v2623_v52  ;;  %v2666_v0 = vadd.f32 %v2658_v48, %v2624_v38  ;;  %v2667_v24 = vadd.f32 %v2659_v27, %v2625_v29  ;;  %v2668_v55 = vadd.f32 %v2660_v16, %v2626_v42  ;;  %v7401_v52 = vld [vmem:[%s8364_s25 + $0x298] sm:$0xff] }
 0x1f6   : > { %v2682_v20 = vunpack.c.l.bf16 %v7397_v63  ;;  %v2683_v12 = vunpack.c.h.bf16 %v7397_v63  ;;  %v2688_v11 = vrot.slane %v2670_v8, %v8395_v57  ;;  %v2692_v5 = vrot.slane %v2670_v8, %v8397_v58 }
 0x1f7   : > { %v2661_v17 = vadd.f32 %v2653_v18, %v2619_v22  ;;  %v2662_v25 = vadd.f32 %v2654_v33, %v2620_v15  ;;  %v2663_v50 = vadd.f32 %v2655_v44, %v2621_v60  ;;  %v2664_v3 = vadd.f32 %v2656_v47, %v2622_v40  ;;  %v7403_v60 = vld [vmem:[%s8364_s25 + $0x2a8] sm:$0xff]  ;;  %v7404_v40 = vld [vmem:[%s8364_s25 + $0x2b0] sm:$0xff] }
 0x1f8   : > { %v2718_v19 = vunpack.c.l.bf16 %v7398_v10  ;;  %v2719_v34 = vunpack.c.h.bf16 %v7398_v10  ;;  %v2720_v23 = vunpack.c.l.bf16 %v7399_v49  ;;  %v2721_v7 = vunpack.c.h.bf16 %v7399_v49 }
 0x1f9   : > { %v2699_v61 = vmul.f32 %v2688_v11, %v2680_v54  ;;  %v2700_v2 = vmul.f32 %v2692_v5, %v2681_v56  ;;  %v2701_v1 = vmul.f32 %v2688_v11, %v2682_v20  ;;  %v2702_v32 = vmul.f32 %v2692_v5, %v2683_v12 }
 0x1fa   : > { %v2695_v38 = vmul.f32 %v2688_v11, %v2676_v31  ;;  %v2696_v29 = vmul.f32 %v2692_v5, %v2677_v6  ;;  %v2697_v42 = vmul.f32 %v2688_v11, %v2678_v59  ;;  %v2698_v28 = vmul.f32 %v2692_v5, %v2679_v36 }
 0x1fb   : > { %v2707_v30 = vadd.f32 %v2699_v61, %v2665_v14  ;;  %v2708_v4 = vadd.f32 %v2700_v2, %v2666_v0  ;;  %v2709_v53 = vadd.f32 %v2701_v1, %v2667_v24  ;;  %v2710_v9 = vadd.f32 %v2702_v32, %v2668_v55  ;;  %v2754_v14 = vld [vmem:[#allocation2 + $0x25] ss:$8 sm:$0x3]  ;;  %v7405_v0 = vld [vmem:[%s8364_s25 + $0x2b8] sm:$0xff] }
 0x1fc   : > { %v2722_v22 = vunpack.c.l.bf16 %v7400_v21  ;;  %v2723_v15 = vunpack.c.h.bf16 %v7400_v21  ;;  %v2724_v46 = vunpack.c.l.bf16 %v7401_v52  ;;  %v2725_v62 = vunpack.c.h.bf16 %v7401_v52 }
 0x1fd   : > { %v2703_v54 = vadd.f32 %v2695_v38, %v2661_v17  ;;  %v2704_v56 = vadd.f32 %v2696_v29, %v2662_v25  ;;  %v2730_v31 = vrot.slane %v2712_v13, %v8395_v57  ;;  %v2734_v6 = vrot.slane %v2712_v13, %v8397_v58  ;;  %v7406_v17 = vld [vmem:[%s8364_s25 + $0x2c0] sm:$0xff]  ;;  %v7407_v25 = vld [vmem:[%s8364_s25 + $0x2c8] sm:$0xff]  ;;  %v7408_v13 = vld [vmem:[%s8364_s25 + $0x2d0] sm:$0xff] }
 0x1fe   : > { %v2705_v59 = vadd.f32 %v2697_v42, %v2663_v50  ;;  %v2706_v36 = vadd.f32 %v2698_v28, %v2664_v3  ;;  %v2760_v26 = vunpack.c.l.bf16 %v7402_v45  ;;  %v2761_v48 = vunpack.c.h.bf16 %v7402_v45 }
 0x1ff   : > { %v2762_v27 = vunpack.c.l.bf16 %v7403_v60  ;;  %v2763_v16 = vunpack.c.h.bf16 %v7403_v60  ;;  %v2764_v8 = vunpack.c.l.bf16 %v7404_v40  ;;  %v2765_v63 = vunpack.c.h.bf16 %v7404_v40  ;;  %v7410_v40 = vld [vmem:[%s8364_s25 + $0x2e0] sm:$0xff] }
 0x200   : > { %v2741_v18 = vmul.f32 %v2730_v31, %v2722_v22  ;;  %v2742_v33 = vmul.f32 %v2734_v6, %v2723_v15  ;;  %v2743_v44 = vmul.f32 %v2730_v31, %v2724_v46  ;;  %v2744_v47 = vmul.f32 %v2734_v6, %v2725_v62  ;;  %v2796_v22 = vld [vmem:[#allocation2 + $0x26] ss:$8 sm:$0x3] }
 0x201   : > { %v2737_v24 = vmul.f32 %v2730_v31, %v2718_v19  ;;  %v2738_v55 = vmul.f32 %v2734_v6, %v2719_v34  ;;  %v2739_v10 = vmul.f32 %v2730_v31, %v2720_v23  ;;  %v2740_v49 = vmul.f32 %v2734_v6, %v2721_v7 }
 0x202   : > { %v2749_v20 = vadd.f32 %v2741_v18, %v2707_v30  ;;  %v2750_v12 = vadd.f32 %v2742_v33, %v2708_v4  ;;  %v2751_v11 = vadd.f32 %v2743_v44, %v2709_v53  ;;  %v2752_v5 = vadd.f32 %v2744_v47, %v2710_v9  ;;  %v7409_v30 = vld [vmem:[%s8364_s25 + $0x2d8] sm:$0xff] }
 0x203   : > { %v2766_v50 = vunpack.c.l.bf16 %v7405_v0  ;;  %v2767_v3 = vunpack.c.h.bf16 %v7405_v0  ;;  %v2772_v61 = vrot.slane %v2754_v14, %v8395_v57  ;;  %v2776_v2 = vrot.slane %v2754_v14, %v8397_v58 }
 0x204   : > { %v2745_v1 = vadd.f32 %v2737_v24, %v2703_v54  ;;  %v2746_v32 = vadd.f32 %v2738_v55, %v2704_v56  ;;  %v2747_v19 = vadd.f32 %v2739_v10, %v2705_v59  ;;  %v2748_v34 = vadd.f32 %v2740_v49, %v2706_v36  ;;  %v7411_v59 = vld [vmem:[%s8364_s25 + $0x2e8] sm:$0xff]  ;;  %v7412_v36 = vld [vmem:[%s8364_s25 + $0x2f0] sm:$0xff] }
 0x205   : > { %v2802_v23 = vunpack.c.l.bf16 %v7406_v17  ;;  %v2803_v7 = vunpack.c.h.bf16 %v7406_v17  ;;  %v2804_v21 = vunpack.c.l.bf16 %v7407_v25  ;;  %v2805_v52 = vunpack.c.h.bf16 %v7407_v25 }
 0x206   : > { %v2783_v38 = vmul.f32 %v2772_v61, %v2764_v8  ;;  %v2784_v29 = vmul.f32 %v2776_v2, %v2765_v63  ;;  %v2785_v42 = vmul.f32 %v2772_v61, %v2766_v50  ;;  %v2786_v28 = vmul.f32 %v2776_v2, %v2767_v3 }
 0x207   : > { %v2779_v4 = vmul.f32 %v2772_v61, %v2760_v26  ;;  %v2780_v53 = vmul.f32 %v2776_v2, %v2761_v48  ;;  %v2781_v9 = vmul.f32 %v2772_v61, %v2762_v27  ;;  %v2782_v45 = vmul.f32 %v2776_v2, %v2763_v16 }
 0x208   : > { %v2791_v15 = vadd.f32 %v2783_v38, %v2749_v20  ;;  %v2792_v46 = vadd.f32 %v2784_v29, %v2750_v12  ;;  %v2793_v62 = vadd.f32 %v2785_v42, %v2751_v11  ;;  %v2794_v60 = vadd.f32 %v2786_v28, %v2752_v5  ;;  %v2838_v20 = vld [vmem:[#allocation2 + $0x27] ss:$8 sm:$0x3]  ;;  %v7413_v12 = vld [vmem:[%s8364_s25 + $0x2f8] sm:$0xff] }
 0x209   : > { %v2806_v54 = vunpack.c.l.bf16 %v7408_v13  ;;  %v2807_v56 = vunpack.c.h.bf16 %v7408_v13  ;;  %v2808_v31 = vunpack.c.l.bf16 %v7409_v30  ;;  %v2809_v6 = vunpack.c.h.bf16 %v7409_v30 }
 0x20a   : > { %v2787_v8 = vadd.f32 %v2779_v4, %v2745_v1  ;;  %v2788_v63 = vadd.f32 %v2780_v53, %v2746_v32  ;;  %v2814_v26 = vrot.slane %v2796_v22, %v8395_v57  ;;  %v2818_v48 = vrot.slane %v2796_v22, %v8397_v58  ;;  %v7414_v1 = vld [vmem:[%s8364_s25 + $0x300] sm:$0xff]  ;;  %v7415_v32 = vld [vmem:[%s8364_s25 + $0x308] sm:$0xff]  ;;  %v7417_v22 = vld [vmem:[%s8364_s25 + $0x318] sm:$0xff] }
 0x20b   : > { %v2789_v27 = vadd.f32 %v2781_v9, %v2747_v19  ;;  %v2790_v16 = vadd.f32 %v2782_v45, %v2748_v34  ;;  %v2844_v18 = vunpack.c.l.bf16 %v7410_v40  ;;  %v2845_v33 = vunpack.c.h.bf16 %v7410_v40  ;;  %v7416_v45 = vld [vmem:[%s8364_s25 + $0x310] sm:$0xff] }
 0x20c   : > { %v2846_v44 = vunpack.c.l.bf16 %v7411_v59  ;;  %v2847_v47 = vunpack.c.h.bf16 %v7411_v59  ;;  %v2848_v14 = vunpack.c.l.bf16 %v7412_v36  ;;  %v2849_v0 = vunpack.c.h.bf16 %v7412_v36  ;;  %v2880_v40 = vld [vmem:[#allocation2 + $0x30] ss:$8 sm:$0x3]  ;;  %v7418_v59 = vld [vmem:[%s8364_s25 + $0x320] sm:$0xff] }
 0x20d   : > { %v2825_v24 = vmul.f32 %v2814_v26, %v2806_v54  ;;  %v2826_v55 = vmul.f32 %v2818_v48, %v2807_v56  ;;  %v2827_v10 = vmul.f32 %v2814_v26, %v2808_v31  ;;  %v2828_v49 = vmul.f32 %v2818_v48, %v2809_v6 }
 0x20e   : > { %v2821_v11 = vmul.f32 %v2814_v26, %v2802_v23  ;;  %v2822_v5 = vmul.f32 %v2818_v48, %v2803_v7  ;;  %v2823_v17 = vmul.f32 %v2814_v26, %v2804_v21  ;;  %v2824_v25 = vmul.f32 %v2818_v48, %v2805_v52  ;;  %v9327_v48 = vld [vmem:[%s8364_s25 + $0x328] sm:$0xff] }
 0x20f   : > { %v2833_v50 = vadd.f32 %v2825_v24, %v2791_v15  ;;  %v2834_v3 = vadd.f32 %v2826_v55, %v2792_v46  ;;  %v2835_v61 = vadd.f32 %v2827_v10, %v2793_v62  ;;  %v2836_v2 = vadd.f32 %v2828_v49, %v2794_v60 }
 0x210   : > { %v2850_v19 = vunpack.c.l.bf16 %v7413_v12  ;;  %v2851_v34 = vunpack.c.h.bf16 %v7413_v12  ;;  %v2856_v38 = vrot.slane %v2838_v20, %v8395_v57  ;;  %v2860_v29 = vrot.slane %v2838_v20, %v8397_v58 }
 0x211   : > { %v2829_v42 = vadd.f32 %v2821_v11, %v2787_v8  ;;  %v2830_v28 = vadd.f32 %v2822_v5, %v2788_v63  ;;  %v2831_v23 = vadd.f32 %v2823_v17, %v2789_v27  ;;  %v2832_v7 = vadd.f32 %v2824_v25, %v2790_v16  ;;  %v7420_v27 = vld [vmem:[%s8364_s25 + $0x330] sm:$0xff] }
 0x212   : > { %v2886_v21 = vunpack.c.l.bf16 %v7414_v1  ;;  %v2887_v52 = vunpack.c.h.bf16 %v7414_v1  ;;  %v2888_v13 = vunpack.c.l.bf16 %v7415_v32  ;;  %v2867_v30 = vmul.f32 %v2856_v38, %v2848_v14  ;;  %v2922_v25 = vld [vmem:[#allocation2 + $0x31] ss:$8 sm:$0x3] }
 0x213   : > { %v2868_v4 = vmul.f32 %v2860_v29, %v2849_v0  ;;  %v2869_v53 = vmul.f32 %v2856_v38, %v2850_v19  ;;  %v2870_v9 = vmul.f32 %v2860_v29, %v2851_v34  ;;  %v2863_v15 = vmul.f32 %v2856_v38, %v2844_v18 }
 0x214   : > { %v2864_v46 = vmul.f32 %v2860_v29, %v2845_v33  ;;  %v2865_v62 = vmul.f32 %v2856_v38, %v2846_v44  ;;  %v2866_v60 = vmul.f32 %v2860_v29, %v2847_v47  ;;  %v2875_v54 = vadd.f32 %v2867_v30, %v2833_v50  ;;  %v7421_v50 = vld [vmem:[%s8364_s25 + $0x338] sm:$0xff]  ;;  %v7422_v30 = vld [vmem:[%s8364_s25 + $0x340] sm:$0xff] }
 0x215   : > { %v2876_v56 = vadd.f32 %v2868_v4, %v2834_v3  ;;  %v2877_v31 = vadd.f32 %v2869_v53, %v2835_v61  ;;  %v2878_v6 = vadd.f32 %v2870_v9, %v2836_v2  ;;  %v2890_v36 = vunpack.c.l.bf16 %v7416_v45 }
 0x216   : > { %v2891_v8 = vunpack.c.h.bf16 %v7416_v45  ;;  %v2892_v63 = vunpack.c.l.bf16 %v7417_v22  ;;  %v2893_v26 = vunpack.c.h.bf16 %v7417_v22  ;;  %v2871_v16 = vadd.f32 %v2863_v15, %v2829_v42  ;;  %v7424_v15 = vld [vmem:[%s8364_s25 + $0x350] sm:$0xff] }
 0x217   : > { %v2889_v14 = vunpack.c.h.bf16 %v7415_v32  ;;  %v2898_v18 = vrot.slane %v2880_v40, %v8395_v57  ;;  %v2902_v33 = vrot.slane %v2880_v40, %v8397_v58  ;;  %v2872_v44 = vadd.f32 %v2864_v46, %v2830_v28  ;;  %v7425_v46 = vld [vmem:[%s8364_s25 + $0x358] sm:$0xff] }
 0x218   : > { %v2873_v47 = vadd.f32 %v2865_v62, %v2831_v23  ;;  %v2874_v0 = vadd.f32 %v2866_v60, %v2832_v7  ;;  %v2928_v24 = vunpack.c.l.bf16 %v7418_v59  ;;  %v2929_v55 = vunpack.c.h.bf16 %v7418_v59 }
 0x219   : > { %v2930_v10 = vunpack.c.l.bf16 %v9327_v48  ;;  %v2932_v49 = vunpack.c.l.bf16 %v7420_v27  ;;  %v2933_v20 = vunpack.c.h.bf16 %v7420_v27  ;;  %v2909_v12 = vmul.f32 %v2898_v18, %v2890_v36 }
 0x21a   : > { %v2910_v11 = vmul.f32 %v2902_v33, %v2891_v8  ;;  %v2911_v5 = vmul.f32 %v2898_v18, %v2892_v63  ;;  %v2912_v17 = vmul.f32 %v2902_v33, %v2893_v26  ;;  %v2905_v3 = vmul.f32 %v2898_v18, %v2886_v21 }
 0x21b   : > { %v2906_v61 = vmul.f32 %v2902_v33, %v2887_v52  ;;  %v2907_v2 = vmul.f32 %v2898_v18, %v2888_v13  ;;  %v2908_v1 = vmul.f32 %v2902_v33, %v2889_v14  ;;  %v2917_v32 = vadd.f32 %v2909_v12, %v2875_v54  ;;  %v2964_v54 = vld [vmem:[#allocation2 + $0x32] ss:$8 sm:$0x3]  ;;  %v9345_v14 = vld [vmem:[%s8364_s25 + $0x368] sm:$0xff] }
 0x21c   : > { %v2918_v19 = vadd.f32 %v2910_v11, %v2876_v56  ;;  %v2919_v34 = vadd.f32 %v2911_v5, %v2877_v31  ;;  %v2920_v38 = vadd.f32 %v2912_v17, %v2878_v6  ;;  %v2934_v29 = vunpack.c.l.bf16 %v7421_v50  ;;  %v9341_v56 = vld [vmem:[%s8364_s25 + $0x348] sm:$0xff]  ;;  %v7428_v18 = vld [vmem:[%s8364_s25 + $0x370] sm:$0xff] }
 0x21d   : > { %v2935_v42 = vunpack.c.h.bf16 %v7421_v50  ;;  %v2940_v28 = vrot.slane %v2922_v25, %v8395_v57  ;;  %v2944_v23 = vrot.slane %v2922_v25, %v8397_v58  ;;  %v2931_v7 = vunpack.c.h.bf16 %v9327_v48 }
 0x21e   : > { %v2913_v21 = vadd.f32 %v2905_v3, %v2871_v16  ;;  %v2914_v52 = vadd.f32 %v2906_v61, %v2872_v44  ;;  %v2915_v13 = vadd.f32 %v2907_v2, %v2873_v47  ;;  %v2916_v4 = vadd.f32 %v2908_v1, %v2874_v0  ;;  %v7426_v16 = vld [vmem:[%s8364_s25 + $0x360] sm:$0xff]  ;;  %v3006_v61 = vld [vmem:[#allocation2 + $0x33] ss:$8 sm:$0x3] }
 0x21f   : > { %v2951_v53 = vmul.f32 %v2940_v28, %v2932_v49  ;;  %v2952_v9 = vmul.f32 %v2944_v23, %v2933_v20  ;;  %v2953_v45 = vmul.f32 %v2940_v28, %v2934_v29  ;;  %v2954_v22 = vmul.f32 %v2944_v23, %v2935_v42  ;;  %v7429_v2 = vld [vmem:[%s8364_s25 + $0x378] sm:$0xff] }
 0x220   : > { %v2947_v62 = vmul.f32 %v2940_v28, %v2928_v24  ;;  %v2948_v60 = vmul.f32 %v2944_v23, %v2929_v55  ;;  %v2949_v40 = vmul.f32 %v2940_v28, %v2930_v10  ;;  %v2970_v31 = vunpack.c.l.bf16 %v7422_v30 }
 0x221   : > { %v2959_v6 = vadd.f32 %v2951_v53, %v2917_v32  ;;  %v2960_v59 = vadd.f32 %v2952_v9, %v2918_v19  ;;  %v2961_v36 = vadd.f32 %v2953_v45, %v2919_v34  ;;  %v2962_v8 = vadd.f32 %v2954_v22, %v2920_v38 }
 0x222   : > { %v2974_v63 = vunpack.c.l.bf16 %v7424_v15  ;;  %v2975_v26 = vunpack.c.h.bf16 %v7424_v15  ;;  %v2976_v48 = vunpack.c.l.bf16 %v7425_v46  ;;  %v2977_v27 = vunpack.c.h.bf16 %v7425_v46 }
 0x223   : > { %v2971_v33 = vunpack.c.h.bf16 %v7422_v30  ;;  %v2972_v44 = vunpack.c.l.bf16 %v9341_v56  ;;  %v2982_v47 = vrot.slane %v2964_v54, %v8395_v57  ;;  %v2986_v0 = vrot.slane %v2964_v54, %v8397_v58 }
 0x224   : > { %v2950_v24 = vmul.f32 %v2944_v23, %v2931_v7  ;;  %v2955_v55 = vadd.f32 %v2947_v62, %v2913_v21  ;;  %v2956_v10 = vadd.f32 %v2948_v60, %v2914_v52  ;;  %v2957_v49 = vadd.f32 %v2949_v40, %v2915_v13  ;;  %v7430_v23 = vld [vmem:[%s8364_s25 + $0x380] sm:$0xff] }
 0x225   : > { %v3012_v20 = vunpack.c.l.bf16 %v7426_v16  ;;  %v3013_v12 = vunpack.c.h.bf16 %v7426_v16  ;;  %v3014_v11 = vunpack.c.l.bf16 %v9345_v14  ;;  %v3016_v5 = vunpack.c.l.bf16 %v7428_v18 }
 0x226   : > { %v2993_v17 = vmul.f32 %v2982_v47, %v2974_v63  ;;  %v2994_v25 = vmul.f32 %v2986_v0, %v2975_v26  ;;  %v2995_v50 = vmul.f32 %v2982_v47, %v2976_v48  ;;  %v2996_v3 = vmul.f32 %v2986_v0, %v2977_v27 }
 0x227   : > { %v2989_v1 = vmul.f32 %v2982_v47, %v2970_v31  ;;  %v2990_v32 = vmul.f32 %v2986_v0, %v2971_v33  ;;  %v2991_v19 = vmul.f32 %v2982_v47, %v2972_v44  ;;  %v3017_v34 = vunpack.c.h.bf16 %v7428_v18  ;;  %v7432_v31 = vld [vmem:[%s8364_s25 + $0x390] sm:$0xff] }
 0x228   : > { %v3001_v38 = vadd.f32 %v2993_v17, %v2959_v6  ;;  %v3002_v29 = vadd.f32 %v2994_v25, %v2960_v59  ;;  %v3003_v42 = vadd.f32 %v2995_v50, %v2961_v36  ;;  %v3004_v28 = vadd.f32 %v2996_v3, %v2962_v8  ;;  %v7433_v6 = vld [vmem:[%s8364_s25 + $0x398] sm:$0xff]  ;;  %v9366_v8 = vld [vmem:[%s8364_s25 + $0x388] sm:$0xff] }
 0x229   : > { %v3018_v7 = vunpack.c.l.bf16 %v7429_v2  ;;  %v3019_v30 = vunpack.c.h.bf16 %v7429_v2  ;;  %v3024_v21 = vrot.slane %v3006_v61, %v8395_v57  ;;  %v9356_v52 = vrot.slane %v3006_v61, %v8397_v58  ;;  %v3048_v36 = vld [vmem:[#allocation2 + $0x34] ss:$8 sm:$0x3] }
 0x22a   : > { %v2958_v13 = vadd.f32 %v2950_v24, %v2916_v4  ;;  %v2973_v53 = vunpack.c.h.bf16 %v9341_v56  ;;  %v3015_v9 = vunpack.c.h.bf16 %v9345_v14  ;;  %v2997_v45 = vadd.f32 %v2989_v1, %v2955_v55  ;;  %v7434_v14 = vld [vmem:[%s8364_s25 + $0x3a0] sm:$0xff]  ;;  %v9370_v24 = vld [vmem:[%s8364_s25 + $0x3a8] sm:$0xff]  ;;  %v7436_v55 = vld [vmem:[%s8364_s25 + $0x3b0] sm:$0xff] }
 0x22b   : > { %v2998_v22 = vadd.f32 %v2990_v32, %v2956_v10  ;;  %v2999_v15 = vadd.f32 %v2991_v19, %v2957_v49  ;;  %v3054_v46 = vunpack.c.l.bf16 %v7430_v23  ;;  %v3035_v62 = vmul.f32 %v3024_v21, %v3016_v5 }
 0x22c   : > { %v3036_v60 = vmul.f32 %v9356_v52, %v3017_v34  ;;  %v3037_v40 = vmul.f32 %v3024_v21, %v3018_v7  ;;  %v3038_v54 = vmul.f32 %v9356_v52, %v3019_v30  ;;  %v3031_v4 = vmul.f32 %v3024_v21, %v3012_v20 }
 0x22d   : > { %v3032_v56 = vmul.f32 %v9356_v52, %v3013_v12  ;;  %v3033_v59 = vmul.f32 %v3024_v21, %v3014_v11  ;;  %v3055_v63 = vunpack.c.h.bf16 %v7430_v23  ;;  %v3043_v26 = vadd.f32 %v3035_v62, %v3001_v38  ;;  %v3090_v38 = vld [vmem:[#allocation2 + $0x35] ss:$8 sm:$0x3] }
 0x22e   : > { %v3044_v48 = vadd.f32 %v3036_v60, %v3002_v29  ;;  %v3045_v27 = vadd.f32 %v3037_v40, %v3003_v42  ;;  %v3046_v16 = vadd.f32 %v3038_v54, %v3004_v28  ;;  %v3058_v18 = vunpack.c.l.bf16 %v7432_v31  ;;  %v7437_v29 = vld [vmem:[%s8364_s25 + $0x3b8] sm:$0xff] }
 0x22f   : > { %v3059_v33 = vunpack.c.h.bf16 %v7432_v31  ;;  %v3060_v44 = vunpack.c.l.bf16 %v7433_v6  ;;  %v3061_v47 = vunpack.c.h.bf16 %v7433_v6  ;;  %v3039_v10 = vadd.f32 %v3031_v4, %v2997_v45  ;;  %v7438_v45 = vld [vmem:[%s8364_s25 + $0x3c0] sm:$0xff]  ;;  %v9391_v6 = vld [vmem:[%s8364_s25 + $0x3c8] sm:$0xff] }
 0x230   : > { %v3056_v49 = vunpack.c.l.bf16 %v9366_v8  ;;  %v3066_v20 = vrot.slane %v3048_v36, %v8395_v57  ;;  %v9376_v12 = vrot.slane %v3048_v36, %v8397_v58  ;;  %v2992_v11 = vmul.f32 %v2986_v0, %v2973_v53 }
 0x231   : > { %v3040_v5 = vadd.f32 %v3032_v56, %v2998_v22  ;;  %v3041_v17 = vadd.f32 %v3033_v59, %v2999_v15  ;;  %v3096_v25 = vunpack.c.l.bf16 %v7434_v14  ;;  %v3097_v3 = vunpack.c.h.bf16 %v7434_v14  ;;  %v3132_v14 = vld [vmem:[#allocation2 + $0x36] ss:$8 sm:$0x3] }
 0x232   : > { %v3073_v50 = vmul.f32 %v3066_v20, %v3054_v46  ;;  %v3098_v61 = vunpack.c.l.bf16 %v9370_v24  ;;  %v3100_v2 = vunpack.c.l.bf16 %v7436_v55  ;;  %v3077_v1 = vmul.f32 %v3066_v20, %v3058_v18 }
 0x233   : > { %v3078_v32 = vmul.f32 %v9376_v12, %v3059_v33  ;;  %v3079_v19 = vmul.f32 %v3066_v20, %v3060_v44  ;;  %v3080_v34 = vmul.f32 %v9376_v12, %v3061_v47  ;;  %v3074_v42 = vmul.f32 %v9376_v12, %v3055_v63 }
 0x234   : > { %v3075_v0 = vmul.f32 %v3066_v20, %v3056_v49  ;;  %v3081_v28 = vadd.f32 %v3073_v50, %v3039_v10  ;;  %v3101_v23 = vunpack.c.h.bf16 %v7436_v55  ;;  %v3085_v7 = vadd.f32 %v3077_v1, %v3043_v26  ;;  %v7442_v10 = vld [vmem:[%s8364_s25 + $0x3e0] sm:$0xff]  ;;  %v9401_v49 = vld [vmem:[%s8364_s25 + $0x3e8] sm:$0xff] }
 0x235   : > { %v3086_v30 = vadd.f32 %v3078_v32, %v3044_v48  ;;  %v3087_v21 = vadd.f32 %v3079_v19, %v3045_v27  ;;  %v3088_v53 = vadd.f32 %v3080_v34, %v3046_v16  ;;  %v3102_v22 = vunpack.c.l.bf16 %v7437_v29  ;;  %v7441_v16 = vld [vmem:[%s8364_s25 + $0x3d8] sm:$0xff] }
 0x236   : > { %v3103_v15 = vunpack.c.h.bf16 %v7437_v29  ;;  %v3108_v46 = vrot.slane %v3090_v38, %v8395_v57  ;;  %v9386_v62 = vrot.slane %v3090_v38, %v8397_v58  ;;  %v3000_v60 = vadd.f32 %v2992_v11, %v2958_v13  ;;  %v7440_v13 = vld [vmem:[%s8364_s25 + $0x3d0] sm:$0xff] }
 0x237   : > { %v3034_v40 = vmul.f32 %v9356_v52, %v3015_v9  ;;  %v3057_v54 = vunpack.c.h.bf16 %v9366_v8  ;;  %v3082_v31 = vadd.f32 %v3074_v42, %v3040_v5  ;;  %v3083_v4 = vadd.f32 %v3075_v0, %v3041_v17 }
 0x238   : > { %v3115_v56 = vmul.f32 %v3108_v46, %v3096_v25  ;;  %v3138_v59 = vunpack.c.l.bf16 %v7438_v45  ;;  %v3139_v36 = vunpack.c.h.bf16 %v7438_v45  ;;  %v3119_v63 = vmul.f32 %v3108_v46, %v3100_v2  ;;  %v7444_v25 = vld [vmem:[%s8364_s25 + $0x3f0] sm:$0xff] }
 0x239   : > { %v3120_v26 = vmul.f32 %v9386_v62, %v3101_v23  ;;  %v3121_v48 = vmul.f32 %v3108_v46, %v3102_v22  ;;  %v3122_v27 = vmul.f32 %v9386_v62, %v3103_v15  ;;  %v3116_v52 = vmul.f32 %v9386_v62, %v3097_v3 }
 0x23a   : > { %v3117_v9 = vmul.f32 %v3108_v46, %v3098_v61  ;;  %v3123_v8 = vadd.f32 %v3115_v56, %v3081_v28  ;;  %v3140_v18 = vunpack.c.l.bf16 %v9391_v6  ;;  %v3127_v33 = vadd.f32 %v3119_v63, %v3085_v7 }
 0x23b   : > { %v3128_v44 = vadd.f32 %v3120_v26, %v3086_v30  ;;  %v3129_v47 = vadd.f32 %v3121_v48, %v3087_v21  ;;  %v3130_v55 = vadd.f32 %v3122_v27, %v3088_v53  ;;  %v3142_v20 = vunpack.c.l.bf16 %v7440_v13  ;;  %v3174_v21 = vld [vmem:[#allocation2 + $0x37] ss:$8 sm:$0x3] }
 0x23c   : > { %v3143_v11 = vunpack.c.h.bf16 %v7440_v13  ;;  %v3144_v5 = vunpack.c.l.bf16 %v7441_v16  ;;  %v3145_v17 = vunpack.c.h.bf16 %v7441_v16  ;;  %v3124_v50 = vadd.f32 %v3116_v52, %v3082_v31  ;;  %v7445_v53 = vld [vmem:[%s8364_s25 + $0x3f8] sm:$0xff]  ;;  %s916_s25 = scalar_lea.vmem %s11246_s8, %s7282_s28 }
 0x23d   : > { %v3125_v2 = vadd.f32 %v3117_v9, %v3083_v4  ;;  %v3150_v3 = vrot.slane %v3132_v14, %v8395_v57  ;;  %v3154_v61 = vrot.slane %v3132_v14, %v8397_v58  ;;  %v3042_v1 = vadd.f32 %v3034_v40, %v3000_v60 }
 0x23e   : > { %v3180_v32 = vunpack.c.l.bf16 %v7442_v10  ;;  %v3181_v19 = vunpack.c.h.bf16 %v7442_v10  ;;  %v3182_v34 = vunpack.c.l.bf16 %v9401_v49  ;;  %v3184_v0 = vunpack.c.l.bf16 %v7444_v25 }
 0x23f   : > { %v3157_v38 = vmul.f32 %v3150_v3, %v3138_v59  ;;  %v3158_v29 = vmul.f32 %v3154_v61, %v3139_v36  ;;  %v3159_v42 = vmul.f32 %v3150_v3, %v3140_v18  ;;  %v3161_v28 = vmul.f32 %v3150_v3, %v3142_v20 }
 0x240   : > { %v3162_v23 = vmul.f32 %v3154_v61, %v3143_v11  ;;  %v3163_v7 = vmul.f32 %v3150_v3, %v3144_v5  ;;  %v3164_v30 = vmul.f32 %v3154_v61, %v3145_v17  ;;  %v3185_v46 = vunpack.c.h.bf16 %v7444_v25 }
 0x241   : > { %v3165_v45 = vadd.f32 %v3157_v38, %v3123_v8  ;;  %v3166_v22 = vadd.f32 %v3158_v29, %v3124_v50  ;;  %v3167_v15 = vadd.f32 %v3159_v42, %v3125_v2  ;;  %v3169_v31 = vadd.f32 %v3161_v28, %v3127_v33 }
 0x242   : > { %v3170_v60 = vadd.f32 %v3162_v23, %v3128_v44  ;;  %v3171_v40 = vadd.f32 %v3163_v7, %v3129_v47  ;;  %v3172_v4 = vadd.f32 %v3164_v30, %v3130_v55  ;;  %v3186_v56 = vunpack.c.l.bf16 %v7445_v53 }
 0x243   : > { %v3187_v63 = vunpack.c.h.bf16 %v7445_v53  ;;  %v3192_v59 = vrot.slane %v3174_v21, %v8395_v57  ;;  %v3196_v36 = vrot.slane %v3174_v21, %v8397_v58  ;;  %v3099_v26 = vunpack.c.h.bf16 %v9370_v24 }
 0x244   : > { %v3076_v48 = vmul.f32 %v9376_v12, %v3057_v54  ;;  %v3141_v20 = vunpack.c.h.bf16 %v9391_v6 }
 0x245   : > { %v3199_v27 = vmul.f32 %v3192_v59, %v3180_v32  ;;  %v3200_v13 = vmul.f32 %v3196_v36, %v3181_v19  ;;  %v3201_v16 = vmul.f32 %v3192_v59, %v3182_v34  ;;  %v3203_v52 = vmul.f32 %v3192_v59, %v3184_v0 }
 0x246   : > { %v3204_v9 = vmul.f32 %v3196_v36, %v3185_v46  ;;  %v3205_v8 = vmul.f32 %v3192_v59, %v3186_v56  ;;  %v3206_v14 = vmul.f32 %v3196_v36, %v3187_v63  ;;  %v3084_v18 = vadd.f32 %v3076_v48, %v3042_v1 }
 0x247   : > { %v9412_v33 = vadd.f32 %v3199_v27, %v3165_v45  ;;  %v9414_v44 = vadd.f32 %v3200_v13, %v3166_v22  ;;  %v9416_v47 = vadd.f32 %v3201_v16, %v3167_v15  ;;  %v9418_v55 = vadd.f32 %v3203_v52, %v3169_v31 }
 0x248   : > { %v9420_v10 = vadd.f32 %v3204_v9, %v3170_v60  ;;  %v9422_v24 = vadd.f32 %v3205_v8, %v3171_v40  ;;  %v9424_v12 = vadd.f32 %v3206_v14, %v3172_v4  ;;  %v3118_v54 = vmul.f32 %v9386_v62, %v3099_v26 }
 0x249   : > { %v3215_v11 = vand.u32 2147483647, %v9412_v33  ;;  %v3218_v5 = vand.u32 2139095040, %v9412_v33  ;;  %v3319_v17 = vand.u32 2147483647, %v9414_v44  ;;  %v3322_v25 = vand.u32 2139095040, %v9414_v44 }
 0x24a   : > { %v3126_v50 = vadd.f32 %v3118_v54, %v3084_v18  ;;  %v3426_v62 = vand.u32 2139095040, %v9416_v47  ;;  %v3160_v6 = vmul.f32 %v3154_v61, %v3141_v20  ;;  %v3183_v19 = vunpack.c.h.bf16 %v9401_v49 }
 0x24b   : > { %v3219_v2 = vshrl.u32 %v3218_v5, 23  ;;  %v3222_v3 = vand.u32 8388607, %v3215_v11  ;;  %v3323_v1 = vshrl.u32 %v3322_v25, 23  ;;  %v3326_v32 = vand.u32 8388607, %v3319_v17 }
 0x24c   : > { %v3427_v29 = vshrl.u32 %v3426_v62, 23  ;;  %v3168_v42 = vadd.f32 %v3160_v6, %v3126_v50  ;;  %v3423_v30 = vand.u32 2147483647, %v9416_v47  ;;  %v3202_v53 = vmul.f32 %v3196_v36, %v3183_v19 }
 0x24d   : > { %v7446_v34 = vadd.s32 4294967169, %v3219_v2  ;;  %v7450_v38 = vadd.s32 4294967169, %v3323_v1  ;;  %v3223_v0 = vor.u32 8388608, %v3222_v3  ;;  %v3327_v23 = vor.u32 8388608, %v3326_v32 }
 0x24e   : > { %v7454_v21 = vadd.s32 4294967169, %v3427_v29  ;;  %v9439_v22 = vadd.f32 %v3202_v53, %v3168_v42  ;;  %v9447_v60 = vand.u32 8388607, %v3423_v30  ;;  %vm3217_vm5 = vcmp.lt.s32.totalorder %v9412_v33, 0 }
 0x24f   : > { %v3225_v28 = vadd.s32 1, %v7446_v34  ;;  %v3329_v7 = vadd.s32 1, %v7450_v38  ;;  %v9441_v46 = vshll.u32 %v3223_v0, 8  ;;  %v9443_v31 = vshll.u32 %v3327_v23, 8 }
 0x250   : > { %v9449_v40 = vadd.s32 1, %v7454_v21  ;;  %vm9536_vm6 = vcmp.le.f32.partialorder %v3215_v11, 0.7853982 }
 0x251   : > { %vm3226_vm9 = vcmp.gt.s32.totalorder %v3225_v28, 0  ;;  %vm3330_vm10 = vcmp.gt.s32.totalorder %v3329_v7, 0 }
 0x252   : > { %v3227_v45 = vsel %vm3226_vm9, %v3225_v28, 0  ;;  %v3331_v49 = vsel %vm3330_vm10, %v3329_v7, 0  ;;  %vm3434_vm14 = vcmp.gt.s32.totalorder %v9449_v40, 0 }
 0x253   : > { %v3228_v61 = vshrl.u32 %v3227_v45, 5  ;;  %v3229_v15 = vand.u32 31, %v3227_v45  ;;  %v9452_v63 = vshrl.u32 %v3331_v49, 5  ;;  %v3333_v59 = vand.u32 31, %v3331_v49 }
 0x255   : > { %v3230_v4 = vsub.s32 32, %v3229_v15  ;;  %v3232_v56 = vshll.u32 %v8054_v35, %v3229_v15  ;;  %v3235_v36 = vshll.u32 %v8055_v37, %v3229_v15  ;;  %v3238_v26 = vshll.u32 %v8056_v39, %v3229_v15 }
 0x256   : > { %v3241_v48 = vshll.u32 %v8057_v41, %v3229_v15  ;;  %v3244_v27 = vshll.u32 %v8058_v43, %v3229_v15  ;;  %vm3247_vm7 = vcmp.lt.s32.totalorder %v3228_v61, 1  ;;  %vm3248_vm11 = vcmp.lt.s32.totalorder %v3228_v61, 2 }
 0x257   : > { %v3233_v13 = vshrl.u32 %v8055_v37, %v3230_v4  ;;  %v3236_v16 = vshrl.u32 %v8056_v39, %v3230_v4  ;;  %v3239_v52 = vshrl.u32 %v8057_v41, %v3230_v4  ;;  %v3231_v9 = vshrl.u32 %v8054_v35, %v3230_v4 }
 0x258   : > { %v3242_v8 = vshrl.u32 %v8058_v43, %v3230_v4  ;;  %v3245_v14 = vshrl.u32 %v8059_v51, %v3230_v4  ;;  %v3334_v5 = vsub.s32 32, %v3333_v59  ;;  %vm3249_vm12 = vcmp.lt.s32.totalorder %v3228_v61, 3 }
 0x259   : > { %v3234_v18 = vor.u32 %v3233_v13, %v3232_v56  ;;  %v3237_v54 = vor.u32 %v3236_v16, %v3235_v36  ;;  %v3240_v20 = vor.u32 %v3239_v52, %v3238_v26  ;;  %vm3250_vm13 = vcmp.lt.s32.totalorder %v3228_v61, 4 }
 0x25a   : > { %v3243_v25 = vor.u32 %v3242_v8, %v3241_v48  ;;  %v3246_v50 = vor.u32 %v3245_v14, %v3244_v27  ;;  %v3336_v34 = vshll.u32 %v8054_v35, %v3333_v59  ;;  %v3337_v42 = vshrl.u32 %v8055_v37, %v3334_v5 }
 0x25b   : > { %v3251_v2 = vsel %vm3247_vm7, %v3231_v9, %v3234_v18  ;;  %v3252_v3 = vsel %vm3250_vm13, %v3240_v20, 2102212464  ;;  %v3255_v1 = vsel %vm3247_vm7, %v3234_v18, %v3237_v54  ;;  %v3259_v32 = vsel %vm3247_vm7, %v3237_v54, %v3240_v20 }
 0x25c   : > { %v3253_v62 = vsel %vm3249_vm12, %v3237_v54, %v3252_v3  ;;  %v3256_v6 = vsel %vm3250_vm13, %v3243_v25, 920167782  ;;  %v3260_v19 = vsel %vm3250_vm13, %v3246_v50, 1326507024  ;;  %v3339_v0 = vshll.u32 %v8055_v37, %v3333_v59 }
 0x25d   : > { %v3257_v38 = vsel %vm3249_vm12, %v3240_v20, %v3256_v6  ;;  %v3261_v29 = vsel %vm3249_vm12, %v3243_v25, %v3260_v19  ;;  %v3254_v28 = vsel %vm3248_vm11, %v3251_v2, %v3253_v62  ;;  %v3340_v21 = vshrl.u32 %v8056_v39, %v3334_v5 }
 0x25e   : > { %v3258_v23 = vsel %vm3248_vm11, %v3255_v1, %v3257_v38  ;;  %v3262_v7 = vsel %vm3248_vm11, %v3259_v32, %v3261_v29  ;;  %v3338_v4 = vor.u32 %v3337_v42, %v3336_v34  ;;  %v3342_v36 = vshll.u32 %v8056_v39, %v3333_v59 }
 0x25f   : > { %v9476_v53 = vmul.u32.u64.low %v9441_v46, %v3262_v7  ;;  %v9477_v45 = vmul.u32.u64.high %v9441_v46, %v3262_v7, %v9476_v53  ;;  %v9480_v15 = vmul.u32.u64.low %v9441_v46, %v3258_v23  ;;  %v9481_v49 = vmul.u32.u64.high %v9441_v46, %v3258_v23, %v9480_v15 }
 0x260   : > { %v3341_v56 = vor.u32 %v3340_v21, %v3339_v0  ;;  %v3343_v26 = vshrl.u32 %v8057_v41, %v3334_v5  ;;  %v3335_v48 = vshrl.u32 %v8054_v35, %v3334_v5  ;;  %v3345_v61 = vshll.u32 %v8057_v41, %v3333_v59 }
 0x261   : > { %v3346_v27 = vshrl.u32 %v8058_v43, %v3334_v5  ;;  %v3349_v13 = vshrl.u32 %v8059_v51, %v3334_v5  ;;  %v3270_v16 = vmul.u32 %v9441_v46, %v3254_v28  ;;  %v3348_v9 = vshll.u32 %v8058_v43, %v3333_v59 }
 0x262   : > { %v3344_v52 = vor.u32 %v3343_v26, %v3342_v36  ;;  %vm3351_vm15 = vcmp.lt.s32.totalorder %v9452_v63, 1  ;;  %vm3272_vm0 = vc.u32 %v9477_v45, %v9480_v15  ;;  %v3273_v8 = vadd.s32 1, %v9481_v49 }
 0x263   : > { %v3347_v14 = vor.u32 %v3346_v27, %v3345_v61  ;;  %vm3352_vm1 = vcmp.lt.s32.totalorder %v9452_v63, 2  ;;  %v3350_v18 = vor.u32 %v3349_v13, %v3348_v9  ;;  %vm3353_vm2 = vcmp.lt.s32.totalorder %v9452_v63, 3 }
 0x264   : > { %vm3354_vm3 = vcmp.lt.s32.totalorder %v9452_v63, 4  ;;  %v3359_v54 = vsel %vm3351_vm15, %v3338_v4, %v3341_v56  ;;  %v3274_v46 = vsel %vm3272_vm0, %v3273_v8, %v9481_v49  ;;  %v3363_v59 = vsel %vm3351_vm15, %v3341_v56, %v3344_v52 }
 0x265   : > { %v3356_v20 = vsel %vm3354_vm3, %v3344_v52, 2102212464  ;;  %v3360_v5 = vsel %vm3354_vm3, %v3347_v14, 920167782  ;;  %v3275_v25 = vadd.s32 %v3274_v46, %v3270_v16  ;;  %v3355_v50 = vsel %vm3351_vm15, %v3335_v48, %v3338_v4 }
 0x266   : > { %v3361_v2 = vsel %vm3353_vm2, %v3344_v52, %v3360_v5  ;;  %v3364_v3 = vsel %vm3354_vm3, %v3350_v18, 1326507024  ;;  %v3357_v1 = vsel %vm3353_vm2, %v3341_v56, %v3356_v20  ;;  %v3435_v6 = vsel %vm3434_vm14, %v9449_v40, 0 }
 0x267   : > { %v3362_v32 = vsel %vm3352_vm1, %v3359_v54, %v3361_v2  ;;  %v3365_v62 = vsel %vm3353_vm2, %v3347_v14, %v3364_v3  ;;  %v3276_v19 = vadd.s32 536870912, %v3275_v25  ;;  %v3358_v23 = vsel %vm3352_vm1, %v3355_v50, %v3357_v1 }
 0x268   : > { %v3366_v34 = vsel %vm3352_vm1, %v3363_v59, %v3365_v62  ;;  %v9506_v38 = vmul.u32.u64.low %v9443_v31, %v3362_v32  ;;  %v9507_v29 = vmul.u32.u64.high %v9443_v31, %v3362_v32, %v9506_v38  ;;  %v3437_v7 = vand.u32 31, %v3435_v6 }
 0x269   : > { %v9511_v42 = vmul.u32.u64.low %v9443_v31, %v3366_v34  ;;  %v9512_v0 = vmul.u32.u64.high %v9443_v31, %v3366_v34, %v9511_v42  ;;  %v3277_v28 = vshrl.u32 %v3276_v19, 30  ;;  %v3527_v40 = vand.u32 2147483647, %v9439_v22 }
 0x26a   : > { %v3431_v21 = vor.u32 8388608, %v9447_v60  ;;  %v3530_v53 = vand.u32 2139095040, %v9439_v22  ;;  %v3377_v4 = vadd.s32 1, %v9507_v29  ;;  %v3438_v56 = vsub.s32 32, %v3437_v7 }
 0x26b   : > { %v3278_v49 = vshll.u32 %v3277_v28, 30  ;;  %v3374_v36 = vmul.u32 %v9443_v31, %v3358_v23  ;;  %vm3376_vm4 = vc.u32 %v9512_v0, %v9506_v38  ;;  %v9529_v60 = vand.u32 8388607, %v3527_v40 }
 0x26c   : > { %v3378_v26 = vsel %vm3376_vm4, %v3377_v4, %v9507_v29  ;;  %v3441_v61 = vshrl.u32 %v8055_v37, %v3438_v56  ;;  %v9532_v27 = vshll.u32 %v3431_v21, 8  ;;  %v3531_v13 = vshrl.u32 %v3530_v53, 23 }
 0x26d   : > { %v9524_v63 = vsub.s32 %v3275_v25, %v3278_v49  ;;  %v3379_v48 = vadd.s32 %v3378_v26, %v3374_v36  ;;  %v3271_v16 = vadd.s32 %v9480_v15, %v9477_v45  ;;  %v3444_v9 = vshrl.u32 %v8056_v39, %v3438_v56 }
 0x26e   : > { %v3447_v8 = vshrl.u32 %v8057_v41, %v3438_v56  ;;  %v3301_v14 = vsub.s32 4, %v3277_v28  ;;  %v9544_v54 = vshrl.u32 %v3435_v6, 5  ;;  %v3440_v46 = vshll.u32 %v8054_v35, %v3437_v7 }
 0x26f   : > { %v3281_v52 = vsub.s32 0, %v9524_v63  ;;  %v3380_v18 = vadd.s32 536870912, %v3379_v48  ;;  %v3443_v11 = vshll.u32 %v8055_v37, %v3437_v7  ;;  %v3446_v5 = vshll.u32 %v8056_v39, %v3437_v7 }
 0x270   : > { %v3450_v45 = vshrl.u32 %v8058_v43, %v3438_v56  ;;  %v3442_v59 = vor.u32 %v3441_v61, %v3440_v46  ;;  %v3449_v25 = vshll.u32 %v8057_v41, %v3437_v7  ;;  %v3453_v50 = vshrl.u32 %v8059_v51, %v3438_v56 }
 0x271   : > { %v7447_v20 = vmin.u32 %v3281_v52, %v9524_v63  ;;  %v9551_v15 = vshrl.u32 %v3380_v18, 30  ;;  %v3445_v3 = vor.u32 %v3444_v9, %v3443_v11  ;;  %v3448_v1 = vor.u32 %v3447_v8, %v3446_v5 }
 0x272   : > { %v3452_v32 = vshll.u32 %v8058_v43, %v3437_v7  ;;  %v3451_v6 = vor.u32 %v3450_v45, %v3449_v25  ;;  %vm3455_vm8 = vcmp.lt.s32.totalorder %v9544_v54, 1  ;;  %v7458_v19 = vadd.s32 4294967169, %v3531_v13 }
 0x273   : > { %v3283_v2 = vclz %v7447_v20  ;;  %v3382_v62 = vshll.u32 %v9551_v15, 30  ;;  %v3302_v29 = vsel %vm3217_vm5, %v3301_v14, %v3277_v28  ;;  %vm3458_vm9 = vcmp.lt.s32.totalorder %v9544_v54, 4 }
 0x274   : > { %v3454_v42 = vor.u32 %v3453_v50, %v3452_v32  ;;  %vm3456_vm10 = vcmp.lt.s32.totalorder %v9544_v54, 2  ;;  %vm3457_vm7 = vcmp.lt.s32.totalorder %v9544_v54, 3  ;;  %v3464_v7 = vsel %vm3458_vm9, %v3451_v6, 920167782 }
 0x275   : > { %v7448_v34 = vadd.s32 4294967294, %v3283_v2  ;;  %v9561_v23 = vsub.s32 %v3379_v48, %v3382_v62  ;;  %v3439_v21 = vshrl.u32 %v8054_v35, %v3438_v56  ;;  %v3463_v53 = vsel %vm3455_vm8, %v3442_v59, %v3445_v3 }
 0x276   : > { %v3465_v28 = vsel %vm3457_vm7, %v3448_v1, %v3464_v7  ;;  %v3304_v4 = vsel %vm9536_vm6, 0, %v3302_v29  ;;  %v3467_v26 = vsel %vm3455_vm8, %v3445_v3, %v3448_v1  ;;  %vm3321_vm12 = vcmp.lt.s32.totalorder %v9414_v44, 0 }
 0x277   : > { %vm7449_vm11 = vcmp.lt.s32.totalorder %v7448_v34, 0  ;;  %v3385_v36 = vsub.s32 0, %v9561_v23  ;;  %v3460_v56 = vsel %vm3458_vm9, %v3448_v1, 2102212464  ;;  %v3468_v13 = vsel %vm3458_vm9, %v3454_v42, 1326507024 }
 0x278   : > { %v3286_v49 = vsel %vm7449_vm11, 0, %v7448_v34  ;;  %v3466_v8 = vsel %vm3456_vm10, %v3463_v53, %v3465_v28  ;;  %v3469_v14 = vsel %vm3457_vm7, %v3451_v6, %v3468_v13  ;;  %v3537_v11 = vadd.s32 1, %v7458_v19 }
 0x279   : > { %v3287_v48 = vsub.s32 32, %v3286_v49  ;;  %v3291_v61 = vsub.s32 4294967266, %v3286_v49  ;;  %v3288_v52 = vshll.u32 %v9524_v63, %v3286_v49  ;;  %v7451_v9 = vmin.u32 %v3385_v36, %v9561_v23 }
 0x27a   : > { %v3470_v20 = vsel %vm3456_vm10, %v3467_v26, %v3469_v14  ;;  %v3405_v45 = vsub.s32 4, %v9551_v15  ;;  %v3459_v63 = vsel %vm3455_vm8, %v3439_v21, %v3442_v59  ;;  %v3461_v25 = vsel %vm3457_vm7, %v3445_v3, %v3460_v56 }
 0x27b   : > { %v3289_v18 = vshrl.u32 %v3271_v16, %v3287_v48  ;;  %v3292_v46 = vadd.s32 127, %v3291_v61  ;;  %v3387_v5 = vclz %v7451_v9  ;;  %vm3538_vm13 = vcmp.gt.s32.totalorder %v3537_v11, 0 }
 0x27c   : > { %v9596_v1 = vmul.u32.u64.low %v9532_v27, %v3470_v20  ;;  %v9597_v32 = vmul.u32.u64.high %v9532_v27, %v3470_v20, %v9596_v1  ;;  %v9600_v62 = vmul.u32.u64.low %v9532_v27, %v3466_v8  ;;  %v9601_v6 = vmul.u32.u64.high %v9532_v27, %v3466_v8, %v9600_v62 }
 0x27d   : > { %v3290_v50 = vor.u32 %v3289_v18, %v3288_v52  ;;  %v3293_v2 = vshll.u32 %v3292_v46, 23  ;;  %v7452_v16 = vadd.s32 4294967294, %v3387_v5  ;;  %v3375_v59 = vadd.s32 %v9506_v38, %v9512_v0 }
 0x27e   : > { %v3535_v34 = vor.u32 8388608, %v9529_v60  ;;  %v3539_v3 = vsel %vm3538_vm13, %v3537_v11, 0  ;;  %v3308_v29 = vadd.s32 3, %v3304_v4  ;;  %v3462_v42 = vsel %vm3456_vm10, %v3459_v63, %v3461_v25 }
 0x27f   : > { %v3294_v19 = vor.u32 4788187, %v3293_v2  ;;  %vm7453_vm14 = vcmp.lt.s32.totalorder %v7452_v16, 0  ;;  %v3541_v7 = vand.u32 31, %v3539_v3  ;;  %v3297_v53 = vcvt.s32.f32 %v3290_v50 }
 0x280   : > { %v3390_v28 = vsel %vm7453_vm14, 0, %v7452_v16  ;;  %vm3480_vm15 = vc.u32 %v9597_v32, %v9600_v62  ;;  %v9614_v38 = vsel %vm3321_vm12, %v3405_v45, %v9551_v15  ;;  %v3481_v0 = vadd.s32 1, %v9601_v6 }
 0x281   : > { %v3295_v21 = vand.u32 2147483647, %v3294_v19  ;;  %v3391_v49 = vsub.s32 32, %v3390_v28  ;;  %v3395_v36 = vsub.s32 4294967266, %v3390_v28  ;;  %v3478_v54 = vmul.u32 %v9532_v27, %v3462_v42 }
 0x282   : > { %v9618_v4 = vshrl.u32 %v3539_v3, 5  ;;  %v3542_v26 = vsub.s32 32, %v3541_v7  ;;  %v3392_v48 = vshll.u32 %v9561_v23, %v3390_v28  ;;  %v3482_v13 = vsel %vm3480_vm15, %v3481_v0, %v9601_v6 }
 0x283   : > { %v3298_v60 = vmul.f32 %v3297_v53, %v3295_v21  ;;  %v3393_v61 = vshrl.u32 %v3375_v59, %v3391_v49  ;;  %v3396_v56 = vadd.s32 127, %v3395_v36  ;;  %v3483_v9 = vadd.s32 %v3482_v13, %v3478_v54 }
 0x284   : > { %v3544_v8 = vshll.u32 %v8054_v35, %v3541_v7  ;;  %v3545_v15 = vshrl.u32 %v8055_v37, %v3542_v26  ;;  %v3547_v46 = vshll.u32 %v8055_v37, %v3541_v7  ;;  %v3548_v27 = vshrl.u32 %v8056_v39, %v3542_v26 }
 0x285   : > { %v3299_v52 = vxor.u32 2147483648, %v3298_v60  ;;  %v3394_v14 = vor.u32 %v3393_v61, %v3392_v48  ;;  %v3397_v18 = vshll.u32 %v3396_v56, 23  ;;  %v3484_v23 = vadd.s32 536870912, %v3483_v9 }
 0x286   : > { %v3550_v11 = vshll.u32 %v8056_v39, %v3541_v7  ;;  %v3551_v5 = vshrl.u32 %v8057_v41, %v3542_v26  ;;  %v3546_v25 = vor.u32 %v3545_v15, %v3544_v8  ;;  %v3553_v50 = vshll.u32 %v8057_v41, %v3541_v7 }
 0x287   : > { %v3300_v20 = vsel %vm3217_vm5, %v3299_v52, %v3298_v60  ;;  %v3398_v63 = vor.u32 4788187, %v3397_v18  ;;  %v3401_v2 = vcvt.s32.f32 %v3394_v14  ;;  %v3485_v1 = vshrl.u32 %v3484_v23, 30 }
 0x288   : > { %v3303_v45 = vsel %vm9536_vm6, %v9412_v33, %v3300_v20  ;;  %v3554_v16 = vshrl.u32 %v8058_v43, %v3542_v26  ;;  %v3549_v19 = vor.u32 %v3548_v27, %v3547_v46  ;;  %v3557_v59 = vshrl.u32 %v8059_v51, %v3542_v26 }
 0x289   : > { %7859 = vcosq.f32 %v3303_v45  ;;  %v3399_v6 = vand.u32 2147483647, %v3398_v63  ;;  %v9636_v3 = vand.u32 3, %v3308_v29  ;;  %vm9640_vm0 = vcmp.le.f32.partialorder %v3319_v17, 0.7853982 }
 0x28a   : > { %7861 = vsinq.f32 %v3303_v45  ;;  %v3486_v42 = vshll.u32 %v3485_v1, 30  ;;  %v3555_v21 = vor.u32 %v3554_v16, %v3553_v50  ;;  %v3408_v28 = vsel %vm9640_vm0, 0, %v9614_v38 }
 0x28b   : > { %v3402_v53 = vmul.f32 %v3401_v2, %v3399_v6  ;;  %vm3425_vm1 = vcmp.lt.s32.totalorder %v9416_v47, 0  ;;  %v3552_v49 = vor.u32 %v3551_v5, %v3550_v11  ;;  %v3556_v36 = vshll.u32 %v8058_v43, %v3541_v7 }
 0x28c   : > { %v9649_v29 = vsub.s32 %v3483_v9, %v3486_v42  ;;  %v3543_v0 = vshrl.u32 %v8054_v35, %v3542_v26  ;;  %vm3559_vm2 = vcmp.lt.s32.totalorder %v9618_v4, 1  ;;  %v9653_v17 = vshll.u32 %v3535_v34, 8 }
 0x28d   : > { %v3403_v60 = vxor.u32 2147483648, %v3402_v53  ;;  %v3558_v54 = vor.u32 %v3557_v59, %v3556_v36  ;;  %vm3562_vm3 = vcmp.lt.s32.totalorder %v9618_v4, 4  ;;  %v3567_v38 = vsel %vm3559_vm2, %v3546_v25, %v3549_v19 }
 0x28e   : > { %vm9660_vm4 = vcmp.le.f32.partialorder %v3423_v30, 0.7853982  ;;  %v3489_v7 = vsub.s32 0, %v9649_v29  ;;  %v3509_v26 = vsub.s32 4, %v3485_v1  ;;  %vm3561_vm5 = vcmp.lt.s32.totalorder %v9618_v4, 3 }
 0x28f   : > { %v3568_v34 = vsel %vm3562_vm3, %v3555_v21, 920167782  ;;  %v3404_v61 = vsel %vm3321_vm12, %v3403_v60, %v3402_v53  ;;  %vm3560_vm6 = vcmp.lt.s32.totalorder %v9618_v4, 2  ;;  %v3564_v56 = vsel %vm3562_vm3, %v3552_v49, 2102212464 }
 0x290   : > { %v3569_v30 = vsel %vm3561_vm5, %v3552_v49, %v3568_v34  ;;  %v3407_v13 = vsel %vm9640_vm0, %v9414_v44, %v3404_v61  ;;  %v7455_v52 = vmin.u32 %v3489_v7, %v9649_v29  ;;  %v3571_v8 = vsel %vm3559_vm2, %v3549_v19, %v3552_v49 }
 0x291   : > { %v3570_v9 = vsel %vm3560_vm6, %v3567_v38, %v3569_v30  ;;  %7863 = vcosq.f32 %v3407_v13  ;;  %v3572_v15 = vsel %vm3562_vm3, %v3558_v54, 1326507024  ;;  %vm3307_vm8 = vweird.f32 %v9412_v33 }
 0x292   : > { %v9686_v14 = vmul.u32.u64.low %v9653_v17, %v3570_v9  ;;  %v9687_v18 = vmul.u32.u64.high %v9653_v17, %v3570_v9, %v9686_v14  ;;  %7865 = vsinq.f32 %v3407_v13  ;;  %v3491_v46 = vclz %v7455_v52 }
 0x293   : > { %v3563_v27 = vsel %vm3559_vm2, %v3543_v0, %v3546_v25  ;;  %v3565_v20 = vsel %vm3561_vm5, %v3549_v19, %v3564_v56  ;;  %vm3310_vm9 = vcmp.lt.s32.totalorder %v9636_v3, 2  ;;  %vm3311_vm10 = vcmp.eq.s32.totalorder %v9636_v3, 0 }
 0x294   : > { %vm3314_vm7 = vcmp.eq.s32.totalorder %v9636_v3, 2  ;;  %v3573_v23 = vsel %vm3561_vm5, %v3555_v21, %v3572_v15  ;;  %v7456_v11 = vadd.s32 4294967294, %v3491_v46  ;;  %v3510_v5 = vsel %vm3425_vm1, %v3509_v26, %v3485_v1 }
 0x295   : > { %v3574_v45 = vsel %vm3560_vm6, %v3571_v8, %v3573_v23  ;;  %v3634_v63 = vand.u32 2139095040, %v9418_v55  ;;  %v3412_v50 = vadd.s32 3, %v3408_v28  ;;  %v3566_v2 = vsel %vm3560_vm6, %v3563_v27, %v3565_v20 }
 0x296   : > { %v7860_v25 = vpop.eup %7859  ;;  %v9708_v16 = vmul.u32.u64.low %v9653_v17, %v3574_v45  ;;  %v9709_v6 = vmul.u32.u64.high %v9653_v17, %v3574_v45, %v9708_v16  ;;  %vm7457_vm11 = vcmp.lt.s32.totalorder %v7456_v11, 0  ;;  %v3585_v31 = vadd.s32 1, %v9687_v18 }
 0x297   : > { %v7862_v19 = vpop.eup %7861  ;;  %v3315_v59 = vxor.u32 2147483648, %v7860_v25  ;;  %v3635_v1 = vshrl.u32 %v3634_v63, 23  ;;  %v3479_v21 = vadd.s32 %v9600_v62, %v9597_v32  ;;  %v3494_v53 = vsel %vm7457_vm11, 0, %v7456_v11 }
 0x298   : > { %v3312_v42 = vxor.u32 2147483648, %v7862_v19  ;;  %v3512_v28 = vsel %vm9660_vm4, 0, %v3510_v5  ;;  %v3495_v49 = vsub.s32 32, %v3494_v53  ;;  %v3499_v36 = vsub.s32 4294967266, %v3494_v53 }
 0x299   : > { %v3316_v4 = vsel %vm3314_vm7, %v3315_v59, %v7862_v19  ;;  %v3582_v0 = vmul.u32 %v9653_v17, %v3566_v2  ;;  %v3496_v54 = vshll.u32 %v9649_v29, %v3494_v53  ;;  %vm3584_vm12 = vc.u32 %v9709_v6, %v9686_v14 }
 0x29a   : > { %v3313_v60 = vsel %vm3311_vm10, %v7860_v25, %v3312_v42  ;;  %v7462_v32 = vadd.s32 4294967169, %v3635_v1  ;;  %v3497_v38 = vshrl.u32 %v3479_v21, %v3495_v49  ;;  %v3500_v7 = vadd.s32 127, %v3499_v36 }
 0x29b   : > { %v3317_v62 = vsel %vm3310_vm9, %v3313_v60, %v3316_v4  ;;  %v3586_v26 = vsel %vm3584_vm12, %v3585_v31, %v9687_v18  ;;  %v3631_v61 = vand.u32 2147483647, %v9418_v55  ;;  %v3413_v30 = vand.u32 3, %v3412_v50 }
 0x29c   : > { %v3318_v34 = vsel %vm3307_vm8, nan, %v3317_v62  ;;  %v3587_v17 = vadd.s32 %v3586_v26, %v3582_v0  ;;  %v3641_v56 = vadd.s32 1, %v7462_v32  ;;  %v3498_v29 = vor.u32 %v3497_v38, %v3496_v54 }
 0x29d   : > { %v3501_v13 = vshll.u32 %v3500_v7, 23  ;;  %4047 = vst [vmem:[#allocation2] sm:$0xff] %v3318_v34  ;;  %vm3411_vm14 = vweird.f32 %v9414_v44  ;;  %v3516_v8 = vadd.s32 3, %v3512_v28  ;;  %v3638_v27 = vand.u32 8388607, %v3631_v61 }
 0x29e   : > { %v3588_v52 = vadd.s32 536870912, %v3587_v17  ;;  %vm3642_vm13 = vcmp.gt.s32.totalorder %v3641_v56, 0  ;;  %v7864_v9 = vpop.eup %7863  ;;  %vm3418_vm15 = vcmp.eq.s32.totalorder %v3413_v30, 2  ;;  %v3505_v5 = vcvt.s32.f32 %v3498_v29 }
 0x29f   : > { %v3502_v3 = vor.u32 4788187, %v3501_v13  ;;  %v3643_v15 = vsel %vm3642_vm13, %v3641_v56, 0  ;;  %v7866_v18 = vpop.eup %7865  ;;  %v3419_v46 = vxor.u32 2147483648, %v7864_v9  ;;  %vm3415_vm0 = vcmp.eq.s32.totalorder %v3413_v30, 0 }
 0x2a0   : > { %v9731_v33 = vshrl.u32 %v3588_v52, 30  ;;  %v3645_v20 = vand.u32 31, %v3643_v15  ;;  %v3416_v23 = vxor.u32 2147483648, %v7866_v18  ;;  %vm3414_vm2 = vcmp.lt.s32.totalorder %v3413_v30, 2 }
 0x2a1   : > { %v3503_v11 = vand.u32 2147483647, %v3502_v3  ;;  %v3420_v45 = vsel %vm3418_vm15, %v3419_v46, %v7866_v18  ;;  %v9736_v16 = vand.u32 3, %v3516_v8  ;;  %v3583_v59 = vadd.s32 %v9686_v14, %v9709_v6 }
 0x2a2   : > { %v3590_v63 = vshll.u32 %v9731_v33, 30  ;;  %v3646_v25 = vsub.s32 32, %v3645_v20  ;;  %v3417_v50 = vsel %vm3415_vm0, %v7864_v9, %v3416_v23  ;;  %v3639_v1 = vor.u32 8388608, %v3638_v27 }
 0x2a3   : > { %v3506_v2 = vmul.f32 %v3505_v5, %v3503_v11  ;;  %v3421_v19 = vsel %vm3414_vm2, %v3417_v50, %v3420_v45  ;;  %v3738_v28 = vand.u32 2139095040, %v9420_v10  ;;  %v3644_v49 = vshrl.u32 %v3643_v15, 5 }
 0x2a4   : > { %v9740_v31 = vsub.s32 %v3587_v17, %v3590_v63  ;;  %v3422_v42 = vsel %vm3411_vm14, nan, %v3421_v19  ;;  %v3649_v53 = vshrl.u32 %v8055_v37, %v3646_v25  ;;  %v3648_v36 = vshll.u32 %v8054_v35, %v3645_v20 }
 0x2a5   : > { %v3507_v21 = vxor.u32 2147483648, %v3506_v2  ;;  %v3652_v0 = vshrl.u32 %v8056_v39, %v3646_v25  ;;  %4048 = vst [vmem:[#allocation2 + $0x8] sm:$0xff] %v3422_v42  ;;  %v3651_v6 = vshll.u32 %v8055_v37, %v3645_v20  ;;  %v3654_v44 = vshll.u32 %v8056_v39, %v3645_v20 }
 0x2a6   : > { %v3593_v4 = vsub.s32 0, %v9740_v31  ;;  %v3655_v60 = vshrl.u32 %v8057_v41, %v3646_v25  ;;  %v3650_v62 = vor.u32 %v3649_v53, %v3648_v36  ;;  %v3657_v38 = vshll.u32 %v8057_v41, %v3645_v20 }
 0x2a7   : > { %v3508_v14 = vsel %vm3425_vm1, %v3507_v21, %v3506_v2  ;;  %v3653_v7 = vor.u32 %v3652_v0, %v3651_v6  ;;  %v3658_v34 = vshrl.u32 %v8058_v43, %v3646_v25  ;;  %v9760_v56 = vshll.u32 %v3639_v1, 8 }
 0x2a8   : > { %v3511_v54 = vsel %vm9660_vm4, %v9416_v47, %v3508_v14  ;;  %v7459_v32 = vmin.u32 %v3593_v4, %v9740_v31  ;;  %v3656_v26 = vor.u32 %v3655_v60, %v3654_v44  ;;  %v3739_v30 = vshrl.u32 %v3738_v28, 23 }
 0x2a9   : > { %7867 = vcosq.f32 %v3511_v54  ;;  %v3613_v29 = vsub.s32 4, %v9731_v33  ;;  %v3659_v13 = vor.u32 %v3658_v34, %v3657_v38  ;;  %v3660_v48 = vshll.u32 %v8058_v43, %v3645_v20 }
 0x2aa   : > { %7869 = vsinq.f32 %v3511_v54  ;;  %v3595_v17 = vclz %v7459_v32  ;;  %v3661_v52 = vshrl.u32 %v8059_v51, %v3646_v25  ;;  %v3647_v3 = vshrl.u32 %v8054_v35, %v3646_v25 }
 0x2ab   : > { %vm3663_vm1 = vcmp.lt.s32.totalorder %v3644_v49, 1  ;;  %vm3666_vm3 = vcmp.lt.s32.totalorder %v3644_v49, 4  ;;  %vm3664_vm4 = vcmp.lt.s32.totalorder %v3644_v49, 2  ;;  %vm3665_vm6 = vcmp.lt.s32.totalorder %v3644_v49, 3 }
 0x2ac   : > { %v7460_v9 = vadd.s32 4294967294, %v3595_v17  ;;  %v3662_v8 = vor.u32 %v3661_v52, %v3660_v48  ;;  %v3668_v15 = vsel %vm3666_vm3, %v3656_v26, 2102212464  ;;  %v3671_v18 = vsel %vm3663_vm1, %v3650_v62, %v3653_v7 }
 0x2ad   : > { %v3667_v46 = vsel %vm3663_vm1, %v3647_v3, %v3650_v62  ;;  %v3672_v27 = vsel %vm3666_vm3, %v3659_v13, 920167782  ;;  %v3675_v5 = vsel %vm3663_vm1, %v3653_v7, %v3656_v26  ;;  %v3669_v50 = vsel %vm3665_vm6, %v3653_v7, %v3668_v15 }
 0x2ae   : > { %vm7461_vm5 = vcmp.lt.s32.totalorder %v7460_v9, 0  ;;  %v3673_v11 = vsel %vm3665_vm6, %v3656_v26, %v3672_v27  ;;  %v3676_v45 = vsel %vm3666_vm3, %v3662_v8, 1326507024  ;;  %v7466_v4 = vadd.s32 4294967169, %v3739_v30 }
 0x2af   : > { %v3598_v23 = vsel %vm7461_vm5, 0, %v7460_v9  ;;  %v3674_v2 = vsel %vm3664_vm4, %v3671_v18, %v3673_v11  ;;  %v3677_v19 = vsel %vm3665_vm6, %v3659_v13, %v3676_v45  ;;  %vm3515_vm8 = vweird.f32 %v9416_v47 }
 0x2b0   : > { %v3599_v20 = vsub.s32 32, %v3598_v23  ;;  %v3603_v63 = vsub.s32 4294967266, %v3598_v23  ;;  %v3600_v25 = vshll.u32 %v9740_v31, %v3598_v23  ;;  %v3678_v28 = vsel %vm3664_vm4, %v3675_v5, %v3677_v19 }
 0x2b1   : > { %v9769_v1 = vmul.u32.u64.low %v9760_v56, %v3674_v2  ;;  %v9770_v42 = vmul.u32.u64.high %v9760_v56, %v3674_v2, %v9769_v1  ;;  %vm9777_vm9 = vcmp.le.f32.partialorder %v3527_v40, 0.7853982  ;;  %vm3529_vm10 = vcmp.lt.s32.totalorder %v9439_v22, 0 }
 0x2b2   : > { %v3601_v21 = vshrl.u32 %v3583_v59, %v3599_v20  ;;  %v3604_v53 = vadd.s32 127, %v3603_v63  ;;  %v9783_v31 = vmul.u32.u64.low %v9760_v56, %v3678_v28  ;;  %v9784_v0 = vmul.u32.u64.high %v9760_v56, %v3678_v28, %v9783_v31 }
 0x2b3   : > { %v3670_v6 = vsel %vm3664_vm4, %v3667_v46, %v3669_v50  ;;  %v3745_v44 = vadd.s32 1, %v7466_v4  ;;  %vm3518_vm7 = vcmp.lt.s32.totalorder %v9736_v16, 2  ;;  %vm3519_vm11 = vcmp.eq.s32.totalorder %v9736_v16, 0 }
 0x2b4   : > { %v3602_v14 = vor.u32 %v3601_v21, %v3600_v25  ;;  %v3605_v59 = vshll.u32 %v3604_v53, 23  ;;  %v3689_v40 = vadd.s32 1, %v9770_v42  ;;  %v3735_v60 = vand.u32 2147483647, %v9420_v10 }
 0x2b5   : > { %vm3522_vm12 = vcmp.eq.s32.totalorder %v9736_v16, 2  ;;  %v3614_v62 = vsel %vm3529_vm10, %v3613_v29, %v9731_v33  ;;  %vm3746_vm13 = vcmp.gt.s32.totalorder %v3745_v44, 0  ;;  %v3686_v7 = vmul.u32 %v9760_v56, %v3670_v6 }
 0x2b6   : > { %v7868_v54 = vpop.eup %7867  ;;  %v3606_v32 = vor.u32 4788187, %v3605_v59  ;;  %vm3688_vm14 = vc.u32 %v9784_v0, %v9769_v1  ;;  %v3747_v26 = vsel %vm3746_vm13, %v3745_v44, 0  ;;  %v3609_v30 = vcvt.s32.f32 %v3602_v14 }
 0x2b7   : > { %v7870_v49 = vpop.eup %7869  ;;  %v3523_v38 = vxor.u32 2147483648, %v7868_v54  ;;  %v3690_v13 = vsel %vm3688_vm14, %v3689_v40, %v9770_v42  ;;  %v3742_v9 = vand.u32 8388607, %v3735_v60  ;;  %v3749_v33 = vand.u32 31, %v3747_v26 }
 0x2b8   : > { %v3520_v34 = vxor.u32 2147483648, %v7870_v49  ;;  %v3607_v17 = vand.u32 2147483647, %v3606_v32  ;;  %v3691_v52 = vadd.s32 %v3690_v13, %v3686_v7  ;;  %v3616_v56 = vsel %vm9777_vm9, 0, %v3614_v62 }
 0x2b9   : > { %v3524_v48 = vsel %vm3522_vm12, %v3523_v38, %v7870_v49  ;;  %v3842_v8 = vand.u32 2139095040, %v9422_v24  ;;  %v3748_v46 = vshrl.u32 %v3747_v26, 5  ;;  %v3750_v27 = vsub.s32 32, %v3749_v33 }
 0x2ba   : > { %v3521_v29 = vsel %vm3519_vm11, %v7868_v54, %v3520_v34  ;;  %v3610_v3 = vmul.f32 %v3609_v30, %v3607_v17  ;;  %v3692_v18 = vadd.s32 536870912, %v3691_v52  ;;  %v3752_v5 = vshll.u32 %v8054_v35, %v3749_v33 }
 0x2bb   : > { %v3525_v15 = vsel %vm3518_vm7, %v3521_v29, %v3524_v48  ;;  %v3755_v45 = vshll.u32 %v8055_v37, %v3749_v33  ;;  %v3753_v63 = vshrl.u32 %v8055_v37, %v3750_v27  ;;  %v3756_v50 = vshrl.u32 %v8056_v39, %v3750_v27 }
 0x2bc   : > { %v3526_v23 = vsel %vm3515_vm8, nan, %v3525_v15  ;;  %v3611_v11 = vxor.u32 2147483648, %v3610_v3  ;;  %v3693_v20 = vshrl.u32 %v3692_v18, 30  ;;  %v3758_v2 = vshll.u32 %v8056_v39, %v3749_v33 }
 0x2bd   : > { %4049 = vst [vmem:[#allocation2 + $0x10] sm:$0xff] %v3526_v23  ;;  %v3759_v25 = vshrl.u32 %v8057_v41, %v3750_v27  ;;  %v3761_v47 = vshll.u32 %v8057_v41, %v3749_v33  ;;  %v3762_v19 = vshrl.u32 %v8058_v43, %v3750_v27  ;;  %v3754_v53 = vor.u32 %v3753_v63, %v3752_v5 }
 0x2be   : > { %v3612_v16 = vsel %vm3529_vm10, %v3611_v11, %v3610_v3  ;;  %v3694_v21 = vshll.u32 %v3693_v20, 30  ;;  %vm3633_vm15 = vcmp.lt.s32.totalorder %v9418_v55, 0  ;;  %v3757_v28 = vor.u32 %v3756_v50, %v3755_v45 }
 0x2bf   : > { %v3615_v42 = vsel %vm9777_vm9, %v9439_v22, %v3612_v16  ;;  %v3760_v4 = vor.u32 %v3759_v25, %v3758_v2  ;;  %v3763_v31 = vor.u32 %v3762_v19, %v3761_v47  ;;  %v3620_v14 = vadd.s32 3, %v3616_v56 }
 0x2c0   : > { %7871 = vcosq.f32 %v3615_v42  ;;  %v9824_v59 = vsub.s32 %v3691_v52, %v3694_v21  ;;  %v3743_v6 = vor.u32 8388608, %v3742_v9  ;;  %v3764_v44 = vshll.u32 %v8058_v43, %v3749_v33 }
 0x2c1   : > { %7873 = vsinq.f32 %v3615_v42  ;;  %v3765_v40 = vshrl.u32 %v8059_v51, %v3750_v27  ;;  %vm3767_vm0 = vcmp.lt.s32.totalorder %v3748_v46, 1  ;;  %v3843_v36 = vshrl.u32 %v3842_v8, 23 }
 0x2c2   : > { %vm9830_vm2 = vcmp.le.f32.partialorder %v3631_v61, 0.7853982  ;;  %v3697_v32 = vsub.s32 0, %v9824_v59  ;;  %vm3768_vm1 = vcmp.lt.s32.totalorder %v3748_v46, 2  ;;  %vm3769_vm3 = vcmp.lt.s32.totalorder %v3748_v46, 3 }
 0x2c3   : > { %vm3770_vm4 = vcmp.lt.s32.totalorder %v3748_v46, 4  ;;  %v3766_v62 = vor.u32 %v3765_v40, %v3764_v44  ;;  %v3775_v38 = vsel %vm3767_vm0, %v3754_v53, %v3757_v28  ;;  %v3717_v34 = vsub.s32 4, %v3693_v20 }
 0x2c4   : > { %v3772_v49 = vsel %vm3770_vm4, %v3760_v4, 2102212464  ;;  %v3776_v7 = vsel %vm3770_vm4, %v3763_v31, 920167782  ;;  %v7463_v26 = vmin.u32 %v3697_v32, %v9824_v59  ;;  %v3751_v17 = vshrl.u32 %v8054_v35, %v3750_v27 }
 0x2c5   : > { %v3777_v61 = vsel %vm3769_vm3, %v3760_v4, %v3776_v7  ;;  %v3779_v13 = vsel %vm3767_vm0, %v3757_v28, %v3760_v4  ;;  %v3780_v48 = vsel %vm3770_vm4, %v3766_v62, 1326507024  ;;  %v3783_v52 = vshll.u32 %v3743_v6, 8 }
 0x2c6   : > { %v3778_v30 = vsel %vm3768_vm1, %v3775_v38, %v3777_v61  ;;  %v3621_v9 = vand.u32 3, %v3620_v14  ;;  %v3699_v33 = vclz %v7463_v26  ;;  %v3771_v29 = vsel %vm3767_vm0, %v3751_v17, %v3754_v53 }
 0x2c7   : > { %v3773_v3 = vsel %vm3769_vm3, %v3757_v28, %v3772_v49  ;;  %v3781_v56 = vsel %vm3769_vm3, %v3763_v31, %v3780_v48  ;;  %v9844_v8 = vmul.u32.u64.low %v3783_v52, %v3778_v30  ;;  %v9845_v15 = vmul.u32.u64.high %v3783_v52, %v3778_v30, %v9844_v8 }
 0x2c8   : > { %v7470_v18 = vadd.s32 4294967169, %v3843_v36  ;;  %v7464_v27 = vadd.s32 4294967294, %v3699_v33  ;;  %v3718_v23 = vsel %vm3633_vm15, %v3717_v34, %v3693_v20  ;;  %v3782_v11 = vsel %vm3768_vm1, %v3779_v13, %v3781_v56 }
 0x2c9   : > { %v3839_v5 = vand.u32 2147483647, %v9422_v24  ;;  %vm3619_vm5 = vweird.f32 %v9439_v22  ;;  %v3774_v45 = vsel %vm3768_vm1, %v3771_v29, %v3773_v3  ;;  %vm3622_vm6 = vcmp.lt.s32.totalorder %v3621_v9, 2 }
 0x2ca   : > { %v9854_v63 = vmul.u32.u64.low %v3783_v52, %v3782_v11  ;;  %v9855_v50 = vmul.u32.u64.high %v3783_v52, %v3782_v11, %v9854_v63  ;;  %v3849_v2 = vadd.s32 1, %v7470_v18  ;;  %vm3626_vm8 = vcmp.eq.s32.totalorder %v3621_v9, 2 }
 0x2cb   : > { %v3687_v16 = vadd.s32 %v9769_v1, %v9784_v0  ;;  %vm7465_vm9 = vcmp.lt.s32.totalorder %v7464_v27, 0  ;;  %v3720_v20 = vsel %vm9830_vm2, 0, %v3718_v23  ;;  %v3793_v47 = vadd.s32 1, %v9845_v15 }
 0x2cc   : > { %v3702_v25 = vsel %vm7465_vm9, 0, %v7464_v27  ;;  %vm3850_vm10 = vcmp.gt.s32.totalorder %v3849_v2, 0  ;;  %v3790_v21 = vmul.u32 %v3783_v52, %v3774_v45  ;;  %vm3792_vm7 = vc.u32 %v9855_v50, %v9844_v8 }
 0x2cd   : > { %v7872_v19 = vpop.eup %7871  ;;  %v3703_v46 = vsub.s32 32, %v3702_v25  ;;  %v3707_v42 = vsub.s32 4294967266, %v3702_v25  ;;  %v3851_v53 = vsel %vm3850_vm10, %v3849_v2, 0  ;;  %v3704_v31 = vshll.u32 %v9824_v59, %v3702_v25 }
 0x2ce   : > { %v7874_v28 = vpop.eup %7873  ;;  %v3627_v4 = vxor.u32 2147483648, %v7872_v19  ;;  %v9867_v1 = vand.u32 8388607, %v3839_v5  ;;  %v3794_v44 = vsel %vm3792_vm7, %v3793_v47, %v9845_v15  ;;  %vm3623_vm11 = vcmp.eq.s32.totalorder %v3621_v9, 0 }
 0x2cf   : > { %v3624_v0 = vxor.u32 2147483648, %v7874_v28  ;;  %v3705_v14 = vshrl.u32 %v3687_v16, %v3703_v46  ;;  %v3708_v6 = vadd.s32 127, %v3707_v42  ;;  %v3795_v36 = vadd.s32 %v3794_v44, %v3790_v21 }
 0x2d0   : > { %v3628_v40 = vsel %vm3626_vm8, %v3627_v4, %v7874_v28  ;;  %v3853_v32 = vand.u32 31, %v3851_v53  ;;  %v9871_v38 = vadd.s32 3, %v3720_v20  ;;  %v9874_v34 = vshrl.u32 %v3851_v53, 5 }
 0x2d1   : > { %v3625_v62 = vsel %vm3623_vm11, %v7872_v19, %v3624_v0  ;;  %v3706_v49 = vor.u32 %v3705_v14, %v3704_v31  ;;  %v3709_v59 = vshll.u32 %v3708_v6, 23  ;;  %v3796_v26 = vadd.s32 536870912, %v3795_v36 }
 0x2d2   : > { %v3629_v7 = vsel %vm3622_vm6, %v3625_v62, %v3628_v40  ;;  %v3854_v17 = vsub.s32 32, %v3853_v32  ;;  %v3847_v13 = vor.u32 8388608, %v9867_v1  ;;  %v3943_v48 = vand.u32 2147483647, %v9424_v12 }
 0x2d3   : > { %v3630_v61 = vsel %vm3619_vm5, nan, %v3629_v7  ;;  %v3710_v30 = vor.u32 4788187, %v3709_v59  ;;  %vm3737_vm12 = vcmp.lt.s32.totalorder %v9420_v10, 0  ;;  %v3797_v52 = vshrl.u32 %v3796_v26, 30 }
 0x2d4   : > { %v3857_v33 = vshrl.u32 %v8055_v37, %v3854_v17  ;;  %v3860_v9 = vshrl.u32 %v8056_v39, %v3854_v17  ;;  %v3946_v29 = vand.u32 2139095040, %v9424_v12  ;;  %4050 = vst [vmem:[#allocation2 + $0x18] sm:$0xff] %v3630_v61  ;;  %v3713_v56 = vcvt.s32.f32 %v3706_v49 }
 0x2d5   : > { %v3711_v3 = vand.u32 2147483647, %v3710_v30  ;;  %v3862_v22 = vshll.u32 %v8056_v39, %v3853_v32  ;;  %v3863_v15 = vshrl.u32 %v8057_v41, %v3854_v17  ;;  %v3798_v18 = vshll.u32 %v3797_v52, 30 }
 0x2d6   : > { %v3856_v27 = vshll.u32 %v8054_v35, %v3853_v32  ;;  %v3859_v23 = vshll.u32 %v8055_v37, %v3853_v32  ;;  %vm3871_vm13 = vcmp.lt.s32.totalorder %v9874_v34, 1  ;;  %vm9891_vm14 = vcmp.le.f32.partialorder %v3735_v60, 0.7853982 }
 0x2d7   : > { %v3714_v11 = vmul.f32 %v3713_v56, %v3711_v3  ;;  %v3864_v63 = vor.u32 %v3863_v15, %v3862_v22  ;;  %v3865_v2 = vshll.u32 %v8057_v41, %v3853_v32  ;;  %v3866_v16 = vshrl.u32 %v8058_v43, %v3854_v17 }
 0x2d8   : > { %v9897_v25 = vsub.s32 %v3795_v36, %v3798_v18  ;;  %v3858_v20 = vor.u32 %v3857_v33, %v3856_v27  ;;  %v3861_v47 = vor.u32 %v3860_v9, %v3859_v23  ;;  %v3869_v19 = vshrl.u32 %v8059_v51, %v3854_v17 }
 0x2d9   : > { %v3715_v46 = vxor.u32 2147483648, %v3714_v11  ;;  %v3821_v42 = vsub.s32 4, %v3797_v52  ;;  %v3867_v21 = vor.u32 %v3866_v16, %v3865_v2  ;;  %v3868_v53 = vshll.u32 %v8058_v43, %v3853_v32 }
 0x2da   : > { %v3801_v60 = vsub.s32 0, %v9897_v25  ;;  %v3855_v28 = vshrl.u32 %v8054_v35, %v3854_v17  ;;  %vm3872_vm0 = vcmp.lt.s32.totalorder %v9874_v34, 2  ;;  %vm3874_vm1 = vcmp.lt.s32.totalorder %v9874_v34, 4 }
 0x2db   : > { %v3716_v4 = vsel %vm3633_vm15, %v3715_v46, %v3714_v11  ;;  %v3870_v31 = vor.u32 %v3869_v19, %v3868_v53  ;;  %v3876_v1 = vsel %vm3874_vm1, %v3864_v63, 2102212464  ;;  %v3880_v0 = vsel %vm3874_vm1, %v3867_v21, 920167782 }
 0x2dc   : > { %v3719_v14 = vsel %vm9830_vm2, %v9418_v55, %v3716_v4  ;;  %v7467_v6 = vmin.u32 %v3801_v60, %v9897_v25  ;;  %vm3873_vm3 = vcmp.lt.s32.totalorder %v9874_v34, 3  ;;  %v3879_v44 = vsel %vm3871_vm13, %v3858_v20, %v3861_v47  ;;  %v9966_v60 = vld [vmem:[%s9960_s17 + $0x8] sm:$0xff] }
 0x2dd   : > { %7875 = vcosq.f32 %v3719_v14  ;;  %v3822_v40 = vsel %vm3737_vm12, %v3821_v42, %v3797_v52  ;;  %v3875_v36 = vsel %vm3871_vm13, %v3855_v28, %v3858_v20  ;;  %v3881_v32 = vsel %vm3873_vm3, %v3864_v63, %v3880_v0 }
 0x2de   : > { %7877 = vsinq.f32 %v3719_v14  ;;  %v3803_v54 = vclz %v7467_v6  ;;  %v3877_v62 = vsel %vm3873_vm3, %v3861_v47, %v3876_v1  ;;  %v3883_v49 = vsel %vm3871_vm13, %v3861_v47, %v3864_v63 }
 0x2df   : > { %v3882_v59 = vsel %vm3872_vm0, %v3879_v44, %v3881_v32  ;;  %v3884_v7 = vsel %vm3874_vm1, %v3870_v31, 1326507024  ;;  %v3887_v26 = vshll.u32 %v3847_v13, 8  ;;  %v3950_v17 = vand.u32 8388607, %v3943_v48 }
 0x2e0   : > { %v7468_v61 = vadd.s32 4294967294, %v3803_v54  ;;  %v3824_v30 = vsel %vm9891_vm14, 0, %v3822_v40  ;;  %v3885_v52 = vsel %vm3873_vm3, %v3867_v21, %v3884_v7  ;;  %v3947_v33 = vshrl.u32 %v3946_v29, 23 }
 0x2e1   : > { %v3878_v9 = vsel %vm3872_vm0, %v3875_v36, %v3877_v62  ;;  %v3886_v3 = vsel %vm3872_vm0, %v3883_v49, %v3885_v52  ;;  %v9942_v56 = vmul.u32.u64.low %v3887_v26, %v3882_v59  ;;  %v9943_v22 = vmul.u32.u64.high %v3887_v26, %v3882_v59, %v9942_v56 }
 0x2e2   : > { %vm7469_vm15 = vcmp.lt.s32.totalorder %v7468_v61, 0  ;;  %v9946_v13 = vmul.u32.u64.low %v3887_v26, %v3886_v3  ;;  %v9947_v15 = vmul.u32.u64.high %v3887_v26, %v3886_v3, %v9946_v13  ;;  %v7474_v18 = vadd.s32 4294967169, %v3947_v33 }
 0x2e3   : > { %v3725_v27 = vand.u32 3, %v9871_v38  ;;  %v3806_v23 = vsel %vm7469_vm15, 0, %v7468_v61  ;;  %v3791_v29 = vadd.s32 %v9844_v8, %v9855_v50  ;;  %v3828_v2 = vadd.s32 3, %v3824_v30  ;;  %v9963_v50 = vld [vmem:[%s9960_s17] sm:$0xff] }
 0x2e4   : > { %v3807_v11 = vsub.s32 32, %v3806_v23  ;;  %v3811_v63 = vsub.s32 4294967266, %v3806_v23  ;;  %v3953_v34 = vadd.s32 1, %v7474_v18  ;;  %v3894_v16 = vmul.u32 %v3887_v26, %v3878_v9 }
 0x2e5   : > { %v3897_v20 = vadd.s32 1, %v9943_v22  ;;  %v3951_v47 = vor.u32 8388608, %v3950_v17  ;;  %v3808_v19 = vshll.u32 %v9897_v25, %v3806_v23  ;;  %vm3896_vm2 = vc.u32 %v9947_v15, %v9942_v56 }
 0x2e6   : > { %v3809_v46 = vshrl.u32 %v3791_v29, %v3807_v11  ;;  %v3812_v42 = vadd.s32 127, %v3811_v63  ;;  %vm3723_vm4 = vweird.f32 %v9418_v55  ;;  %vm3726_vm5 = vcmp.lt.s32.totalorder %v3725_v27, 2 }
 0x2e7   : > { %vm3727_vm6 = vcmp.eq.s32.totalorder %v3725_v27, 0  ;;  %vm3841_vm8 = vcmp.lt.s32.totalorder %v9422_v24, 0  ;;  %v3898_v8 = vsel %vm3896_vm2, %v3897_v20, %v9943_v22  ;;  %vm3954_vm9 = vcmp.gt.s32.totalorder %v3953_v34, 0 }
 0x2e8   : > { %v3810_v38 = vor.u32 %v3809_v46, %v3808_v19  ;;  %v3813_v25 = vshll.u32 %v3812_v42, 23  ;;  %v3899_v21 = vadd.s32 %v3898_v8, %v3894_v16  ;;  %v3955_v53 = vsel %vm3954_vm9, %v3953_v34, 0  ;;  %v10006_v8 = vld [vmem:[%s9960_s17 + $0x10] sm:$0xff] }
 0x2e9   : > { %vm3730_vm10 = vcmp.eq.s32.totalorder %v3725_v27, 2  ;;  %v9968_v28 = vand.u32 3, %v3828_v2  ;;  %vm9972_vm7 = vcmp.le.f32.partialorder %v3839_v5, 0.7853982  ;;  %v3957_v31 = vand.u32 31, %v3955_v53 }
 0x2ea   : > { %v9976_v1 = vshll.u32 %v3951_v47, 8  ;;  %v7876_v0 = vpop.eup %7875  ;;  %v3814_v14 = vor.u32 4788187, %v3813_v25  ;;  %v3900_v6 = vadd.s32 536870912, %v3899_v21  ;;  %v4059_v44 = vunpack.c.l.bf16 %v9963_v50 }
 0x2eb   : > { %v4060_v40 = vunpack.c.h.bf16 %v9963_v50  ;;  %v7878_v36 = vpop.eup %7877  ;;  %v3731_v32 = vxor.u32 2147483648, %v7876_v0  ;;  %v9980_v54 = vshrl.u32 %v3955_v53, 5  ;;  %v3958_v62 = vsub.s32 32, %v3957_v31 }
 0x2ec   : > { %v4061_v5 = vunpack.c.l.bf16 %v9966_v60  ;;  %v3728_v49 = vxor.u32 2147483648, %v7878_v36  ;;  %v3815_v59 = vand.u32 2147483647, %v3814_v14  ;;  %v3817_v7 = vcvt.s32.f32 %v3810_v38 }
 0x2ed   : > { %v3901_v26 = vshrl.u32 %v3900_v6, 30  ;;  %v3732_v17 = vsel %vm3730_vm10, %v3731_v32, %v7878_v36  ;;  %v3960_v61 = vshll.u32 %v8054_v35, %v3957_v31  ;;  %v3961_v30 = vshrl.u32 %v8055_v37, %v3958_v62 }
 0x2ee   : > { %v3964_v52 = vshrl.u32 %v8056_v39, %v3958_v62  ;;  %v3729_v33 = vsel %vm3727_vm6, %v7876_v0, %v3728_v49  ;;  %v3818_v9 = vmul.f32 %v3817_v7, %v3815_v59  ;;  %v3963_v18 = vshll.u32 %v8055_v37, %v3957_v31 }
 0x2ef   : > { %v3902_v3 = vshll.u32 %v3901_v26, 30  ;;  %v3925_v22 = vsub.s32 4, %v3901_v26  ;;  %v3733_v13 = vsel %vm3726_vm5, %v3729_v33, %v3732_v17  ;;  %v3966_v23 = vshll.u32 %v8056_v39, %v3957_v31  ;;  %v10024_v17 = vld [vmem:[%s9960_s17 + $0x18] sm:$0xff] }
 0x2f0   : > { %v3967_v29 = vshrl.u32 %v8057_v41, %v3958_v62  ;;  %v3734_v11 = vsel %vm3723_vm4, nan, %v3733_v13  ;;  %v3819_v63 = vxor.u32 2147483648, %v3818_v9  ;;  %v3962_v16 = vor.u32 %v3961_v30, %v3960_v61  ;;  %v10034_v13 = vld [vmem:[%s8374_s1] sm:$0xff] }
 0x2f1   : > { %v9994_v34 = vsub.s32 %v3899_v21, %v3902_v3  ;;  %v3926_v2 = vsel %vm3841_vm8, %v3925_v22, %v3901_v26  ;;  %v3965_v20 = vor.u32 %v3964_v52, %v3963_v18  ;;  %v3969_v27 = vshll.u32 %v8057_v41, %v3957_v31  ;;  %4051 = vst [vmem:[#allocation2 + $0x20] sm:$0xff] %v3734_v11 }
 0x2f2   : > { %v3970_v47 = vshrl.u32 %v8058_v43, %v3958_v62  ;;  %v3820_v19 = vsel %vm3737_vm12, %v3819_v63, %v3818_v9  ;;  %v3928_v55 = vsel %vm9972_vm7, 0, %v3926_v2  ;;  %v3968_v42 = vor.u32 %v3967_v29, %v3966_v23 }
 0x2f3   : > { %v3905_v46 = vsub.s32 0, %v9994_v34  ;;  %v3823_v38 = vsel %vm9891_vm14, %v9420_v10, %v3820_v19  ;;  %v3972_v21 = vshll.u32 %v8058_v43, %v3957_v31  ;;  %v3973_v53 = vshrl.u32 %v8059_v51, %v3958_v62 }
 0x2f4   : > { %v3971_v25 = vor.u32 %v3970_v47, %v3969_v27  ;;  %7879 = vcosq.f32 %v3823_v38  ;;  %v3895_v0 = vadd.s32 %v9942_v56, %v9947_v15  ;;  %v4062_v6 = vunpack.c.h.bf16 %v9966_v60  ;;  %v4070_v27 = vld [vmem:[%s8374_s1 + $0x10] sm:$0xff]  ;;  %v7483_v60 = vld [vmem:[%s8374_s1 + $0x48] sm:$0xff] }
 0x2f5   : > { %v7471_v14 = vmin.u32 %v3905_v46, %v9994_v34  ;;  %7881 = vsinq.f32 %v3823_v38  ;;  %v3959_v36 = vshrl.u32 %v8054_v35, %v3958_v62  ;;  %v3974_v32 = vor.u32 %v3973_v53, %v3972_v21  ;;  %v4069_v53 = vld [vmem:[%s8374_s1 + $0x8] sm:$0xff] }
 0x2f6   : > { %v4063_v45 = vunpack.c.l.bf16 %v10006_v8  ;;  %v3932_v59 = vadd.s32 3, %v3928_v55  ;;  %vm3975_vm11 = vcmp.lt.s32.totalorder %v9980_v54, 1  ;;  %vm3978_vm12 = vcmp.lt.s32.totalorder %v9980_v54, 4  ;;  %v4067_v55 = vld [vmem:[#allocation2] ss:$8 sm:$0x3] }
 0x2f7   : > { %v3907_v49 = vclz %v7471_v14  ;;  %vm3977_vm13 = vcmp.lt.s32.totalorder %v9980_v54, 3  ;;  %v3980_v56 = vsel %vm3978_vm12, %v3968_v42, 2102212464  ;;  %v3983_v15 = vsel %vm3975_vm11, %v3962_v16, %v3965_v20  ;;  %v4071_v14 = vld [vmem:[%s8374_s1 + $0x18] sm:$0xff] }
 0x2f8   : > { %v3984_v31 = vsel %vm3978_vm12, %v3971_v25, 920167782  ;;  %vm3976_vm14 = vcmp.lt.s32.totalorder %v9980_v54, 2  ;;  %v3987_v62 = vsel %vm3975_vm11, %v3965_v20, %v3968_v42  ;;  %v3979_v61 = vsel %vm3975_vm11, %v3959_v36, %v3962_v16 }
 0x2f9   : > { %v7472_v7 = vadd.s32 4294967294, %v3907_v49  ;;  %v3985_v26 = vsel %vm3977_vm13, %v3968_v42, %v3984_v31  ;;  %v3981_v30 = vsel %vm3977_vm13, %v3965_v20, %v3980_v56  ;;  %v3988_v33 = vsel %vm3978_vm12, %v3974_v32, 1326507024 }
 0x2fa   : > { %v3986_v52 = vsel %vm3976_vm14, %v3983_v15, %v3985_v26  ;;  %v3989_v9 = vsel %vm3977_vm13, %v3971_v25, %v3988_v33  ;;  %vm3834_vm1 = vcmp.eq.s32.totalorder %v9968_v28, 2  ;;  %v4064_v29 = vunpack.c.h.bf16 %v10006_v8  ;;  %v10064_v26 = vld [vmem:[%s8374_s1 + $0x20] sm:$0xff] }
 0x2fb   : > { %vm7473_vm0 = vcmp.lt.s32.totalorder %v7472_v7, 0  ;;  %v10029_v3 = vmul.u32.u64.low %v9976_v1, %v3986_v52  ;;  %v10030_v22 = vmul.u32.u64.high %v9976_v1, %v3986_v52, %v10029_v3  ;;  %v3990_v23 = vsel %vm3976_vm14, %v3987_v62, %v3989_v9 }
 0x2fc   : > { %v3910_v18 = vsel %vm7473_vm0, 0, %v7472_v7  ;;  %v4065_v11 = vunpack.c.l.bf16 %v10024_v17  ;;  %vm3831_vm3 = vcmp.eq.s32.totalorder %v9968_v28, 0  ;;  %v3982_v16 = vsel %vm3976_vm14, %v3979_v61, %v3981_v30 }
 0x2fd   : > { %v3911_v63 = vsub.s32 32, %v3910_v18  ;;  %v3915_v2 = vsub.s32 4294967266, %v3910_v18  ;;  %v4066_v20 = vunpack.c.h.bf16 %v10024_v17  ;;  %vm3830_vm15 = vcmp.lt.s32.totalorder %v9968_v28, 2 }
 0x2fe   : > { %v10047_v47 = vand.u32 3, %v3932_v59  ;;  %v10050_v19 = vmul.u32.u64.low %v9976_v1, %v3990_v23  ;;  %v10051_v46 = vmul.u32.u64.high %v9976_v1, %v3990_v23, %v10050_v19  ;;  %v4072_v42 = vunpack.c.l.bf16 %v10034_v13 }
 0x2ff   : > { %vm3827_vm2 = vweird.f32 %v9420_v10  ;;  %v3912_v54 = vshll.u32 %v9994_v34, %v3910_v18  ;;  %v3913_v38 = vshrl.u32 %v3895_v0, %v3911_v63  ;;  %v3916_v25 = vadd.s32 127, %v3915_v2  ;;  %v10077_v2 = vld [vmem:[%s8374_s1 + $0x28] sm:$0xff] }
 0x300   : > { %v4001_v21 = vadd.s32 1, %v10030_v22  ;;  %v3998_v36 = vmul.u32 %v9976_v1, %v3982_v16  ;;  %v4073_v32 = vunpack.c.h.bf16 %v10034_v13  ;;  %v4076_v49 = vunpack.c.l.bf16 %v4070_v27 }
 0x301   : > { %v4077_v59 = vunpack.c.h.bf16 %v4070_v27  ;;  %v3914_v56 = vor.u32 %v3913_v38, %v3912_v54  ;;  %v3917_v15 = vshll.u32 %v3916_v25, 23  ;;  %v4084_v31 = vrot.slane %v4067_v55, %v8395_v57  ;;  %v7880_v34 = vpop.eup %7879 }
 0x302   : > { %v4088_v7 = vrot.slane %v4067_v55, %v8397_v58  ;;  %vm4000_vm4 = vc.u32 %v10051_v46, %v10029_v3  ;;  %v4074_v0 = vunpack.c.l.bf16 %v4069_v53  ;;  %v4078_v62 = vunpack.c.l.bf16 %v4071_v14  ;;  %v7882_v61 = vpop.eup %7881 }
 0x303   : > { %v4079_v1 = vunpack.c.h.bf16 %v4071_v14  ;;  %v3835_v30 = vxor.u32 2147483648, %v7880_v34  ;;  %v3918_v52 = vor.u32 4788187, %v3917_v15  ;;  %vm3945_vm5 = vcmp.lt.s32.totalorder %v9424_v12, 0 }
 0x304   : > { %v4002_v33 = vsel %vm4000_vm4, %v4001_v21, %v10030_v22  ;;  %v4075_v9 = vunpack.c.h.bf16 %v4069_v53  ;;  %v3832_v13 = vxor.u32 2147483648, %v7882_v61  ;;  %v3921_v18 = vcvt.s32.f32 %v3914_v56 }
 0x305   : > { %vm10072_vm6 = vcmp.le.f32.partialorder %v3943_v48, 0.7853982  ;;  %v4003_v63 = vadd.s32 %v4002_v33, %v3998_v36  ;;  %v4113_v16 = vunpack.c.l.bf16 %v10064_v26  ;;  %v3836_v27 = vsel %vm3834_vm1, %v3835_v30, %v7882_v61 }
 0x306   : > { %v3919_v19 = vand.u32 2147483647, %v3918_v52  ;;  %v4095_v22 = vmul.f32 %v4084_v31, %v4076_v49  ;;  %v4096_v55 = vmul.f32 %v4088_v7, %v4077_v59  ;;  %v3833_v54 = vsel %vm3831_vm3, %v7880_v34, %v3832_v13  ;;  %v7480_v34 = vld [vmem:[%s8374_s1 + $0x30] sm:$0xff] }
 0x307   : > { %v4004_v38 = vadd.s32 536870912, %v4003_v63  ;;  %v4097_v48 = vmul.f32 %v4084_v31, %v4078_v62  ;;  %v4098_v25 = vmul.f32 %v4088_v7, %v4079_v1  ;;  %v3837_v21 = vsel %vm3830_vm15, %v3833_v54, %v3836_v27 }
 0x308   : > { %v3922_v53 = vmul.f32 %v3921_v18, %v3919_v19  ;;  %v4114_v14 = vunpack.c.h.bf16 %v10064_v26  ;;  %v4115_v36 = vunpack.c.l.bf16 %v10077_v2  ;;  %v3838_v56 = vsel %vm3827_vm2, nan, %v3837_v21 }
 0x309   : > { %v10092_v49 = vadd.s32 %v10029_v3, %v10051_v46  ;;  %v4005_v59 = vshrl.u32 %v4004_v38, 30  ;;  %v4091_v15 = vmul.f32 %v4084_v31, %v4072_v42  ;;  %4052 = vst [vmem:[#allocation2 + $0x28] sm:$0xff] %v3838_v56  ;;  %v4103_v28 = vadd.f32 %v4095_v22, %v4063_v45  ;;  %v4107_v46 = vld [vmem:[#allocation2 + $0x1] ss:$8 sm:$0x3]  ;;  %v7481_v45 = vld [vmem:[%s8374_s1 + $0x38] sm:$0xff] }
 0x30a   : > { %v3923_v62 = vxor.u32 2147483648, %v3922_v53  ;;  %v4104_v26 = vadd.f32 %v4096_v55, %v4064_v29  ;;  %v4105_v10 = vadd.f32 %v4097_v48, %v4065_v11  ;;  %v4092_v30 = vmul.f32 %v4088_v7, %v4073_v32 }
 0x30b   : > { %v4006_v1 = vshll.u32 %v4005_v59, 30  ;;  %v4029_v61 = vsub.s32 4, %v4005_v59  ;;  %v4106_v3 = vadd.f32 %v4098_v25, %v4066_v20  ;;  %v4093_v52 = vmul.f32 %v4084_v31, %v4074_v0 }
 0x30c   : > { %v3924_v42 = vsel %vm3841_vm8, %v3923_v62, %v3922_v53  ;;  %v4094_v33 = vmul.f32 %v4088_v7, %v4075_v9  ;;  %v4117_v13 = vunpack.c.l.bf16 %v7480_v34  ;;  %v4118_v17 = vunpack.c.h.bf16 %v7480_v34  ;;  %v7482_v7 = vld [vmem:[%s8374_s1 + $0x40] sm:$0xff] }
 0x30d   : > { %v3927_v8 = vsel %vm9972_vm7, %v9422_v24, %v3924_v42  ;;  %v10109_v29 = vsub.s32 %v4003_v63, %v4006_v1  ;;  %v4030_v11 = vsel %vm3945_vm5, %v4029_v61, %v4005_v59  ;;  %v4125_v32 = vrot.slane %v4107_v46, %v8395_v57  ;;  %v4148_v34 = vld [vmem:[#allocation2 + $0x2] ss:$8 sm:$0x3]  ;;  %v7484_v1 = vld [vmem:[%s8374_s1 + $0x50] sm:$0xff] }
 0x30e   : > { %7883 = vcosq.f32 %v3927_v8  ;;  %v4032_v20 = vsel %vm10072_vm6, 0, %v4030_v11  ;;  %v4129_v31 = vrot.slane %v4107_v46, %v8397_v58  ;;  %v4119_v4 = vunpack.c.l.bf16 %v7481_v45 }
 0x30f   : > { %7885 = vsinq.f32 %v3927_v8  ;;  %v4009_v0 = vsub.s32 0, %v10109_v29  ;;  %v4120_v9 = vunpack.c.h.bf16 %v7481_v45  ;;  %v4036_v18 = vadd.s32 3, %v4032_v20 }
 0x310   : > { %v4099_v63 = vadd.f32 %v4091_v15, %v4059_v44  ;;  %v4100_v27 = vadd.f32 %v4092_v30, %v4060_v40  ;;  %v4116_v19 = vunpack.c.h.bf16 %v10077_v2  ;;  %v4101_v55 = vadd.f32 %v4093_v52, %v4061_v5 }
 0x311   : > { %v7475_v22 = vmin.u32 %v4009_v0, %v10109_v29  ;;  %v4102_v54 = vadd.f32 %v4094_v33, %v4062_v6  ;;  %v4154_v38 = vunpack.c.l.bf16 %v7482_v7  ;;  %v4132_v48 = vmul.f32 %v4125_v32, %v4113_v16 }
 0x312   : > { %v4133_v25 = vmul.f32 %v4129_v31, %v4114_v14  ;;  %v4136_v21 = vmul.f32 %v4125_v32, %v4117_v13  ;;  %v4137_v53 = vmul.f32 %v4129_v31, %v4118_v17  ;;  %v4134_v50 = vmul.f32 %v4125_v32, %v4115_v36 }
 0x313   : > { %v4011_v44 = vclz %v7475_v22  ;;  %v4138_v40 = vmul.f32 %v4125_v32, %v4119_v4  ;;  %v4139_v56 = vmul.f32 %v4129_v31, %v4120_v9  ;;  %v10129_v2 = vand.u32 3, %v4036_v18 }
 0x314   : > { %v4135_v59 = vmul.f32 %v4129_v31, %v4116_v19  ;;  %v4144_v15 = vadd.f32 %v4136_v21, %v4103_v28  ;;  %v4145_v5 = vadd.f32 %v4137_v53, %v4104_v26  ;;  %vm3938_vm8 = vcmp.eq.s32.totalorder %v10047_v47, 2  ;;  %v7485_v28 = vld [vmem:[%s8374_s1 + $0x58] sm:$0xff]  ;;  %v7487_v53 = vld [vmem:[%s8374_s1 + $0x68] sm:$0xff] }
 0x315   : > { %v7476_v6 = vadd.s32 4294967294, %v4011_v44  ;;  %v4140_v16 = vadd.f32 %v4132_v48, %v4099_v63  ;;  %v4146_v14 = vadd.f32 %v4138_v40, %v4105_v10  ;;  %v4147_v62 = vadd.f32 %v4139_v56, %v4106_v3  ;;  %v10145_v10 = vld [vmem:[%s8374_s1 + $0x60] sm:$0xff]  ;;  %v7488_v56 = vld [vmem:[%s8374_s1 + $0x70] sm:$0xff] }
 0x316   : > { %vm3935_vm9 = vcmp.eq.s32.totalorder %v10047_v47, 0  ;;  %v10135_v36 = vadd.f32 %v4133_v25, %v4100_v27  ;;  %v10137_v61 = vadd.f32 %v4134_v50, %v4101_v55  ;;  %v10139_v30 = vadd.f32 %v4135_v59, %v4102_v54 }
 0x317   : > { %v4155_v26 = vunpack.c.h.bf16 %v7482_v7  ;;  %vm3934_vm10 = vcmp.lt.s32.totalorder %v10047_v47, 2  ;;  %vm7477_vm7 = vcmp.lt.s32.totalorder %v7476_v6, 0  ;;  %v4156_v46 = vunpack.c.l.bf16 %v7483_v60 }
 0x318   : > { %v4157_v42 = vunpack.c.h.bf16 %v7483_v60  ;;  %v4166_v52 = vrot.slane %v4148_v34, %v8395_v57  ;;  %vm3931_vm11 = vweird.f32 %v9422_v24  ;;  %v4014_v3 = vsel %vm7477_vm7, 0, %v7476_v6 }
 0x319   : > { %v4158_v33 = vunpack.c.l.bf16 %v7484_v1  ;;  %v4159_v45 = vunpack.c.h.bf16 %v7484_v1  ;;  %v4170_v13 = vrot.slane %v4148_v34, %v8397_v58  ;;  %v4015_v8 = vsub.s32 32, %v4014_v3  ;;  %v4189_v1 = vld [vmem:[#allocation2 + $0x3] ss:$8 sm:$0x3] }
 0x31a   : > { %v4019_v11 = vsub.s32 4294967266, %v4014_v3  ;;  %v4160_v17 = vunpack.c.l.bf16 %v7485_v28  ;;  %v4161_v20 = vunpack.c.h.bf16 %v7485_v28  ;;  %v4016_v32 = vshll.u32 %v10109_v29, %v4014_v3  ;;  %v7489_v28 = vld [vmem:[%s8374_s1 + $0x78] sm:$0xff] }
 0x31b   : > { %v4173_v31 = vmul.f32 %v4166_v52, %v4154_v38  ;;  %v4195_v7 = vunpack.c.l.bf16 %v10145_v10  ;;  %v4196_v0 = vunpack.c.h.bf16 %v10145_v10  ;;  %v7884_v4 = vpop.eup %7883  ;;  %v4017_v9 = vshrl.u32 %v10092_v49, %v4015_v8 }
 0x31c   : > { %v4020_v18 = vadd.s32 127, %v4019_v11  ;;  %v4174_v63 = vmul.f32 %v4170_v13, %v4155_v26  ;;  %v4175_v27 = vmul.f32 %v4166_v52, %v4156_v46  ;;  %v7886_v19 = vpop.eup %7885  ;;  %v3939_v22 = vxor.u32 2147483648, %v7884_v4 }
 0x31d   : > { %v4176_v55 = vmul.f32 %v4170_v13, %v4157_v42  ;;  %v4177_v54 = vmul.f32 %v4166_v52, %v4158_v33  ;;  %v4178_v48 = vmul.f32 %v4170_v13, %v4159_v45  ;;  %v3936_v29 = vxor.u32 2147483648, %v7886_v19  ;;  %v7490_v33 = vld [vmem:[%s8374_s1 + $0x80] sm:$0xff]  ;;  %v7491_v45 = vld [vmem:[%s8374_s1 + $0x88] sm:$0xff] }
 0x31e   : > { %v4018_v38 = vor.u32 %v4017_v9, %v4016_v32  ;;  %v4021_v25 = vshll.u32 %v4020_v18, 23  ;;  %v4179_v21 = vmul.f32 %v4166_v52, %v4160_v17  ;;  %v3940_v44 = vsel %vm3938_vm8, %v3939_v22, %v7886_v19 }
 0x31f   : > { %v4180_v50 = vmul.f32 %v4170_v13, %v4161_v20  ;;  %v4185_v49 = vadd.f32 %v4177_v54, %v4144_v15  ;;  %v4186_v40 = vadd.f32 %v4178_v48, %v4145_v5  ;;  %v3937_v59 = vsel %vm3935_vm9, %v7884_v4, %v3936_v29 }
 0x320   : > { %v4022_v34 = vor.u32 4788187, %v4021_v25  ;;  %v4181_v60 = vadd.f32 %v4173_v31, %v4140_v16  ;;  %v4187_v6 = vadd.f32 %v4179_v21, %v4146_v14  ;;  %v3941_v26 = vsel %vm3934_vm10, %v3937_v59, %v3940_v44  ;;  %v7495_v59 = vld [vmem:[%s8374_s1 + $0xa8] sm:$0xff] }
 0x321   : > { %v4025_v46 = vcvt.s32.f32 %v4018_v38  ;;  %v4188_v42 = vadd.f32 %v4180_v50, %v4147_v62  ;;  %v4197_v52 = vunpack.c.l.bf16 %v7487_v53  ;;  %v3942_v15 = vsel %vm3931_vm11, nan, %v3941_v26  ;;  %v7492_v38 = vld [vmem:[%s8374_s1 + $0x90] sm:$0xff] }
 0x322   : > { %v4023_v5 = vand.u32 2147483647, %v4022_v34  ;;  %v4199_v10 = vunpack.c.l.bf16 %v7488_v56  ;;  %v4200_v3 = vunpack.c.h.bf16 %v7488_v56  ;;  %4053 = vst [vmem:[#allocation2 + $0x30] sm:$0xff] %v3942_v15  ;;  %v4201_v13 = vunpack.c.l.bf16 %v7489_v28  ;;  %v7494_v56 = vld [vmem:[%s8374_s1 + $0xa0] sm:$0xff] }
 0x323   : > { %v4202_v16 = vunpack.c.h.bf16 %v7489_v28  ;;  %v4207_v14 = vrot.slane %v4189_v1, %v8395_v57  ;;  %v4211_v8 = vrot.slane %v4189_v1, %v8397_v58  ;;  %v4182_v62 = vadd.f32 %v4174_v63, %v10135_v36  ;;  %v7493_v36 = vld [vmem:[%s8374_s1 + $0x98] sm:$0xff] }
 0x324   : > { %v4026_v47 = vmul.f32 %v4025_v46, %v4023_v5  ;;  %v4183_v24 = vadd.f32 %v4175_v27, %v10137_v61  ;;  %v4198_v11 = vunpack.c.h.bf16 %v7487_v53  ;;  %v4184_v17 = vadd.f32 %v4176_v55, %v10139_v30  ;;  %v4230_v55 = vld [vmem:[#allocation2 + $0x4] ss:$8 sm:$0x3] }
 0x325   : > { %v4236_v20 = vunpack.c.l.bf16 %v7490_v33  ;;  %v4237_v32 = vunpack.c.h.bf16 %v7490_v33  ;;  %v4238_v31 = vunpack.c.l.bf16 %v7491_v45  ;;  %v4214_v9 = vmul.f32 %v4207_v14, %v4195_v7  ;;  %v7496_v33 = vld [vmem:[%s8374_s1 + $0xb0] sm:$0xff] }
 0x326   : > { %v4027_v4 = vxor.u32 2147483648, %v4026_v47  ;;  %v4218_v18 = vmul.f32 %v4207_v14, %v4199_v10  ;;  %v4219_v19 = vmul.f32 %v4211_v8, %v4200_v3  ;;  %v4215_v22 = vmul.f32 %v4211_v8, %v4196_v0 }
 0x327   : > { %v4216_v54 = vmul.f32 %v4207_v14, %v4197_v52  ;;  %v4220_v48 = vmul.f32 %v4207_v14, %v4201_v13  ;;  %v4221_v29 = vmul.f32 %v4211_v8, %v4202_v16  ;;  %v4217_v63 = vmul.f32 %v4211_v8, %v4198_v11  ;;  %v4271_v8 = vld [vmem:[#allocation2 + $0x5] ss:$8 sm:$0x3] }
 0x328   : > { %v4028_v61 = vsel %vm3945_vm5, %v4027_v4, %v4026_v47  ;;  %v4226_v30 = vadd.f32 %v4218_v18, %v4185_v49  ;;  %v4227_v27 = vadd.f32 %v4219_v19, %v4186_v40  ;;  %v4239_v21 = vunpack.c.h.bf16 %v7491_v45  ;;  %v7497_v45 = vld [vmem:[%s8374_s1 + $0xb8] sm:$0xff] }
 0x329   : > { %v4031_v7 = vsel %vm10072_vm6, %v9424_v12, %v4028_v61  ;;  %v4228_v25 = vadd.f32 %v4220_v48, %v4187_v6  ;;  %v4229_v0 = vadd.f32 %v4221_v29, %v4188_v42  ;;  %v4240_v53 = vunpack.c.l.bf16 %v7492_v38 }
 0x32a   : > { %7887 = vcosq.f32 %v4031_v7  ;;  %v4241_v44 = vunpack.c.h.bf16 %v7492_v38  ;;  %v4242_v50 = vunpack.c.l.bf16 %v7493_v36  ;;  %v4243_v34 = vunpack.c.h.bf16 %v7493_v36 }
 0x32b   : > { %7889 = vsinq.f32 %v4031_v7  ;;  %v4248_v49 = vrot.slane %v4230_v55, %v8395_v57  ;;  %v4252_v40 = vrot.slane %v4230_v55, %v8397_v58  ;;  %v4222_v1 = vadd.f32 %v4214_v9, %v4181_v60 }
 0x32c   : > { %v4223_v23 = vadd.f32 %v4215_v22, %v4182_v62  ;;  %v4224_v28 = vadd.f32 %v4216_v54, %v4183_v24  ;;  %v4225_v6 = vadd.f32 %v4217_v63, %v4184_v17  ;;  %v4277_v26 = vunpack.c.l.bf16 %v7494_v56  ;;  %v10185_v17 = vld [vmem:[%s8374_s1 + $0xc0] sm:$0xff]  ;;  %v7499_v22 = vld [vmem:[%s8374_s1 + $0xc8] sm:$0xff]  ;;  %v7500_v54 = vld [vmem:[%s8374_s1 + $0xd0] sm:$0xff] }
 0x32d   : > { %v4278_v46 = vunpack.c.h.bf16 %v7494_v56  ;;  %v4279_v42 = vunpack.c.l.bf16 %v7495_v59  ;;  %v4280_v52 = vunpack.c.h.bf16 %v7495_v59  ;;  %v4259_v15 = vmul.f32 %v4248_v49, %v4240_v53  ;;  %v4312_v53 = vld [vmem:[#allocation2 + $0x6] ss:$8 sm:$0x3] }
 0x32e   : > { %v4260_v5 = vmul.f32 %v4252_v40, %v4241_v44  ;;  %v4261_v10 = vmul.f32 %v4248_v49, %v4242_v50  ;;  %v4262_v3 = vmul.f32 %v4252_v40, %v4243_v34  ;;  %v4255_v13 = vmul.f32 %v4248_v49, %v4236_v20  ;;  %v7501_v44 = vld [vmem:[%s8374_s1 + $0xd8] sm:$0xff] }
 0x32f   : > { %v4256_v16 = vmul.f32 %v4252_v40, %v4237_v32  ;;  %v4257_v14 = vmul.f32 %v4248_v49, %v4238_v31  ;;  %v4258_v60 = vmul.f32 %v4252_v40, %v4239_v21  ;;  %v4267_v47 = vadd.f32 %v4259_v15, %v4226_v30 }
 0x330   : > { %v4268_v62 = vadd.f32 %v4260_v5, %v4227_v27  ;;  %v4269_v24 = vadd.f32 %v4261_v10, %v4228_v25  ;;  %v4270_v11 = vadd.f32 %v4262_v3, %v4229_v0  ;;  %vm4042_vm12 = vcmp.eq.s32.totalorder %v10129_v2, 2 }
 0x331   : > { %v4281_v4 = vunpack.c.l.bf16 %v7496_v33  ;;  %v4282_v9 = vunpack.c.h.bf16 %v7496_v33  ;;  %v4283_v18 = vunpack.c.l.bf16 %v7497_v45  ;;  %v4284_v19 = vunpack.c.h.bf16 %v7497_v45 }
 0x332   : > { %vm4039_vm13 = vcmp.eq.s32.totalorder %v10129_v2, 0  ;;  %v4263_v20 = vadd.f32 %v4255_v13, %v4222_v1  ;;  %v4264_v32 = vadd.f32 %v4256_v16, %v4223_v23  ;;  %v4289_v31 = vrot.slane %v4271_v8, %v8395_v57 }
 0x333   : > { %v4293_v48 = vrot.slane %v4271_v8, %v8397_v58  ;;  %vm4038_vm14 = vcmp.lt.s32.totalorder %v10129_v2, 2  ;;  %v4265_v29 = vadd.f32 %v4257_v14, %v4224_v28  ;;  %v4266_v38 = vadd.f32 %v4258_v60, %v4225_v6  ;;  %v7502_v6 = vld [vmem:[%s8374_s1 + $0xe0] sm:$0xff] }
 0x334   : > { %v4318_v36 = vunpack.c.l.bf16 %v10185_v17  ;;  %v4319_v61 = vunpack.c.h.bf16 %v10185_v17  ;;  %vm4035_vm0 = vweird.f32 %v9424_v12  ;;  %v4320_v63 = vunpack.c.l.bf16 %v7499_v22 }
 0x335   : > { %v4321_v30 = vunpack.c.h.bf16 %v7499_v22  ;;  %v4322_v27 = vunpack.c.l.bf16 %v7500_v54  ;;  %v4323_v55 = vunpack.c.h.bf16 %v7500_v54  ;;  %v4300_v7 = vmul.f32 %v4289_v31, %v4281_v4 }
 0x336   : > { %v4301_v25 = vmul.f32 %v4293_v48, %v4282_v9  ;;  %v4302_v0 = vmul.f32 %v4289_v31, %v4283_v18  ;;  %v4303_v21 = vmul.f32 %v4293_v48, %v4284_v19  ;;  %v4296_v50 = vmul.f32 %v4289_v31, %v4277_v26  ;;  %v7503_v9 = vld [vmem:[%s8374_s1 + $0xe8] sm:$0xff]  ;;  %v7504_v18 = vld [vmem:[%s8374_s1 + $0xf0] sm:$0xff] }
 0x337   : > { %v4297_v56 = vmul.f32 %v4293_v48, %v4278_v46  ;;  %v4298_v59 = vmul.f32 %v4289_v31, %v4279_v42  ;;  %v4299_v34 = vmul.f32 %v4293_v48, %v4280_v52  ;;  %v7888_v49 = vpop.eup %7887  ;;  %v4308_v40 = vadd.f32 %v4300_v7, %v4267_v47  ;;  %v7505_v31 = vld [vmem:[%s8374_s1 + $0xf8] sm:$0xff] }
 0x338   : > { %v4309_v1 = vadd.f32 %v4301_v25, %v4268_v62  ;;  %v4310_v23 = vadd.f32 %v4302_v0, %v4269_v24  ;;  %v4311_v28 = vadd.f32 %v4303_v21, %v4270_v11  ;;  %v7890_v15 = vpop.eup %7889  ;;  %v4043_v5 = vxor.u32 2147483648, %v7888_v49  ;;  %v7506_v25 = vld [vmem:[%s8374_s1 + $0x100] sm:$0xff]  ;;  %v7507_v0 = vld [vmem:[%s8374_s1 + $0x108] sm:$0xff] }
 0x339   : > { %v4324_v10 = vunpack.c.l.bf16 %v7501_v44  ;;  %v4325_v3 = vunpack.c.h.bf16 %v7501_v44  ;;  %v4330_v33 = vrot.slane %v4312_v53, %v8395_v57  ;;  %v4040_v45 = vxor.u32 2147483648, %v7890_v15 }
 0x33a   : > { %v4304_v13 = vadd.f32 %v4296_v50, %v4263_v20  ;;  %v4305_v26 = vadd.f32 %v4297_v56, %v4264_v32  ;;  %v4334_v46 = vrot.slane %v4312_v53, %v8397_v58  ;;  %v4044_v42 = vsel %vm4042_vm12, %v4043_v5, %v7890_v15  ;;  %v4353_v32 = vld [vmem:[#allocation2 + $0x7] ss:$8 sm:$0x3]  ;;  %v7509_v15 = vld [vmem:[%s8374_s1 + $0x118] sm:$0xff] }
 0x33b   : > { %v4306_v52 = vadd.f32 %v4298_v59, %v4265_v29  ;;  %v4307_v16 = vadd.f32 %v4299_v34, %v4266_v38  ;;  %v4359_v14 = vunpack.c.l.bf16 %v7502_v6  ;;  %v4041_v60 = vsel %vm4039_vm13, %v7888_v49, %v4040_v45  ;;  %v4394_v45 = vld [vmem:[#allocation2 + $0x10] ss:$8 sm:$0x3] }
 0x33c   : > { %v4337_v8 = vmul.f32 %v4330_v33, %v4318_v36  ;;  %v4341_v47 = vmul.f32 %v4330_v33, %v4322_v27  ;;  %v4360_v62 = vunpack.c.h.bf16 %v7502_v6  ;;  %v4045_v24 = vsel %vm4038_vm14, %v4041_v60, %v4044_v42  ;;  %v7508_v6 = vld [vmem:[%s8374_s1 + $0x110] sm:$0xff] }
 0x33d   : > { %v4342_v11 = vmul.f32 %v4334_v46, %v4323_v55  ;;  %v4343_v17 = vmul.f32 %v4330_v33, %v4324_v10  ;;  %v4344_v4 = vmul.f32 %v4334_v46, %v4325_v3  ;;  %v4046_v19 = vsel %vm4035_vm0, nan, %v4045_v24  ;;  %v7511_v24 = vld [vmem:[%s8374_s1 + $0x128] sm:$0xff] }
 0x33e   : > { %v4338_v22 = vmul.f32 %v4334_v46, %v4319_v61  ;;  %v4339_v54 = vmul.f32 %v4330_v33, %v4320_v63  ;;  %v4340_v20 = vmul.f32 %v4334_v46, %v4321_v30  ;;  %4054 = vst [vmem:[#allocation2 + $0x38] sm:$0xff] %v4046_v19  ;;  %v4349_v48 = vadd.f32 %v4341_v47, %v4308_v40 }
 0x33f   : > { %v4350_v29 = vadd.f32 %v4342_v11, %v4309_v1  ;;  %v4351_v2 = vadd.f32 %v4343_v17, %v4310_v23  ;;  %v4352_v38 = vadd.f32 %v4344_v4, %v4311_v28  ;;  %v4361_v36 = vunpack.c.l.bf16 %v7503_v9  ;;  %v7512_v11 = vld [vmem:[%s8374_s1 + $0x130] sm:$0xff] }
 0x340   : > { %v4362_v27 = vunpack.c.h.bf16 %v7503_v9  ;;  %v4363_v55 = vunpack.c.l.bf16 %v7504_v18  ;;  %v4364_v7 = vunpack.c.h.bf16 %v7504_v18  ;;  %v4365_v12 = vunpack.c.l.bf16 %v7505_v31 }
 0x341   : > { %v4366_v21 = vunpack.c.h.bf16 %v7505_v31  ;;  %v4371_v61 = vrot.slane %v4353_v32, %v8395_v57  ;;  %v4375_v63 = vrot.slane %v4353_v32, %v8397_v58  ;;  %v4345_v30 = vadd.f32 %v4337_v8, %v4304_v13 }
 0x342   : > { %v4346_v53 = vadd.f32 %v4338_v22, %v4305_v26  ;;  %v4347_v44 = vadd.f32 %v4339_v54, %v4306_v52  ;;  %v4348_v50 = vadd.f32 %v4340_v20, %v4307_v16  ;;  %v4400_v56 = vunpack.c.l.bf16 %v7506_v25  ;;  %v7510_v52 = vld [vmem:[%s8374_s1 + $0x120] sm:$0xff] }
 0x343   : > { %v4401_v59 = vunpack.c.h.bf16 %v7506_v25  ;;  %v4402_v34 = vunpack.c.l.bf16 %v7507_v0  ;;  %v4403_v49 = vunpack.c.h.bf16 %v7507_v0  ;;  %v4382_v40 = vmul.f32 %v4371_v61, %v4363_v55 }
 0x344   : > { %v4383_v1 = vmul.f32 %v4375_v63, %v4364_v7  ;;  %v4384_v23 = vmul.f32 %v4371_v61, %v4365_v12  ;;  %v4385_v28 = vmul.f32 %v4375_v63, %v4366_v21  ;;  %v4378_v5 = vmul.f32 %v4371_v61, %v4359_v14 }
 0x345   : > { %v4379_v10 = vmul.f32 %v4375_v63, %v4360_v62  ;;  %v4380_v3 = vmul.f32 %v4371_v61, %v4361_v36  ;;  %v4381_v33 = vmul.f32 %v4375_v63, %v4362_v27  ;;  %v4390_v13 = vadd.f32 %v4382_v40, %v4349_v48  ;;  %v4435_v36 = vld [vmem:[#allocation2 + $0x11] ss:$8 sm:$0x3] }
 0x346   : > { %v4391_v26 = vadd.f32 %v4383_v1, %v4350_v29  ;;  %v4392_v46 = vadd.f32 %v4384_v23, %v4351_v2  ;;  %v4393_v42 = vadd.f32 %v4385_v28, %v4352_v38  ;;  %v4404_v16 = vunpack.c.l.bf16 %v7508_v6  ;;  %v7513_v27 = vld [vmem:[%s8374_s1 + $0x138] sm:$0xff] }
 0x347   : > { %v4405_v60 = vunpack.c.h.bf16 %v7508_v6  ;;  %v4406_v8 = vunpack.c.l.bf16 %v7509_v15  ;;  %v4407_v47 = vunpack.c.h.bf16 %v7509_v15  ;;  %v4386_v17 = vadd.f32 %v4378_v5, %v4345_v30  ;;  %v7514_v30 = vld [vmem:[%s8374_s1 + $0x140] sm:$0xff] }
 0x348   : > { %v4387_v4 = vadd.f32 %v4379_v10, %v4346_v53  ;;  %v4412_v14 = vrot.slane %v4394_v45, %v8395_v57  ;;  %v4416_v62 = vrot.slane %v4394_v45, %v8397_v58  ;;  %v4388_v9 = vadd.f32 %v4380_v3, %v4347_v44  ;;  %v7515_v53 = vld [vmem:[%s8374_s1 + $0x148] sm:$0xff]  ;;  %v7516_v45 = vld [vmem:[%s8374_s1 + $0x150] sm:$0xff] }
 0x349   : > { %v4389_v18 = vadd.f32 %v4381_v33, %v4348_v50  ;;  %v4441_v19 = vunpack.c.l.bf16 %v7510_v52  ;;  %v4442_v22 = vunpack.c.h.bf16 %v7510_v52  ;;  %v4443_v54 = vunpack.c.l.bf16 %v7511_v24 }
 0x34a   : > { %v4444_v20 = vunpack.c.h.bf16 %v7511_v24  ;;  %v4445_v32 = vunpack.c.l.bf16 %v7512_v11  ;;  %v4446_v31 = vunpack.c.h.bf16 %v7512_v11  ;;  %v4423_v48 = vmul.f32 %v4412_v14, %v4404_v16  ;;  %v4476_v16 = vld [vmem:[#allocation2 + $0x12] ss:$8 sm:$0x3]  ;;  %v7518_v11 = vld [vmem:[%s8374_s1 + $0x160] sm:$0xff] }
 0x34b   : > { %v4424_v29 = vmul.f32 %v4416_v62, %v4405_v60  ;;  %v4425_v2 = vmul.f32 %v4412_v14, %v4406_v8  ;;  %v4426_v38 = vmul.f32 %v4416_v62, %v4407_v47  ;;  %v4419_v55 = vmul.f32 %v4412_v14, %v4400_v56 }
 0x34c   : > { %v4420_v7 = vmul.f32 %v4416_v62, %v4401_v59  ;;  %v4421_v25 = vmul.f32 %v4412_v14, %v4402_v34  ;;  %v4422_v0 = vmul.f32 %v4416_v62, %v4403_v49  ;;  %v4431_v12 = vadd.f32 %v4423_v48, %v4390_v13  ;;  %v7517_v13 = vld [vmem:[%s8374_s1 + $0x158] sm:$0xff] }
 0x34d   : > { %v4432_v21 = vadd.f32 %v4424_v29, %v4391_v26  ;;  %v4433_v61 = vadd.f32 %v4425_v2, %v4392_v46  ;;  %v4434_v63 = vadd.f32 %v4426_v38, %v4393_v42  ;;  %v4447_v44 = vunpack.c.l.bf16 %v7513_v27 }
 0x34e   : > { %v4448_v50 = vunpack.c.h.bf16 %v7513_v27  ;;  %v4453_v40 = vrot.slane %v4435_v36, %v8395_v57  ;;  %v4457_v1 = vrot.slane %v4435_v36, %v8397_v58  ;;  %v4427_v23 = vadd.f32 %v4419_v55, %v4386_v17 }
 0x34f   : > { %v4428_v28 = vadd.f32 %v4420_v7, %v4387_v4  ;;  %v4429_v56 = vadd.f32 %v4421_v25, %v4388_v9  ;;  %v4430_v59 = vadd.f32 %v4422_v0, %v4389_v18  ;;  %v4482_v34 = vunpack.c.l.bf16 %v7514_v30  ;;  %v7519_v9 = vld [vmem:[%s8374_s1 + $0x168] sm:$0xff]  ;;  %v7520_v18 = vld [vmem:[%s8374_s1 + $0x170] sm:$0xff] }
 0x350   : > { %v4483_v49 = vunpack.c.h.bf16 %v7514_v30  ;;  %v4484_v6 = vunpack.c.l.bf16 %v7515_v53  ;;  %v4485_v15 = vunpack.c.h.bf16 %v7515_v53  ;;  %v4464_v5 = vmul.f32 %v4453_v40, %v4445_v32 }
 0x351   : > { %v4465_v10 = vmul.f32 %v4457_v1, %v4446_v31  ;;  %v4466_v3 = vmul.f32 %v4453_v40, %v4447_v44  ;;  %v4467_v33 = vmul.f32 %v4457_v1, %v4448_v50  ;;  %v4460_v26 = vmul.f32 %v4453_v40, %v4441_v19 }
 0x352   : > { %v4461_v46 = vmul.f32 %v4457_v1, %v4442_v22  ;;  %v4462_v42 = vmul.f32 %v4453_v40, %v4443_v54  ;;  %v4463_v52 = vmul.f32 %v4457_v1, %v4444_v20  ;;  %v4472_v60 = vadd.f32 %v4464_v5, %v4431_v12  ;;  %v4517_v12 = vld [vmem:[#allocation2 + $0x13] ss:$8 sm:$0x3] }
 0x353   : > { %v4473_v8 = vadd.f32 %v4465_v10, %v4432_v21  ;;  %v4474_v47 = vadd.f32 %v4466_v3, %v4433_v61  ;;  %v4475_v24 = vadd.f32 %v4467_v33, %v4434_v63  ;;  %v4486_v17 = vunpack.c.l.bf16 %v7516_v45  ;;  %v7521_v21 = vld [vmem:[%s8374_s1 + $0x178] sm:$0xff] }
 0x354   : > { %v4487_v4 = vunpack.c.h.bf16 %v7516_v45  ;;  %v4488_v14 = vunpack.c.l.bf16 %v7517_v13  ;;  %v4489_v62 = vunpack.c.h.bf16 %v7517_v13  ;;  %v4468_v32 = vadd.f32 %v4460_v26, %v4427_v23  ;;  %v7522_v23 = vld [vmem:[%s8374_s1 + $0x180] sm:$0xff] }
 0x355   : > { %v4469_v31 = vadd.f32 %v4461_v46, %v4428_v28  ;;  %v4494_v19 = vrot.slane %v4476_v16, %v8395_v57  ;;  %v4498_v22 = vrot.slane %v4476_v16, %v8397_v58  ;;  %v4470_v54 = vadd.f32 %v4462_v42, %v4429_v56  ;;  %v7523_v28 = vld [vmem:[%s8374_s1 + $0x188] sm:$0xff]  ;;  %v7524_v16 = vld [vmem:[%s8374_s1 + $0x190] sm:$0xff] }
 0x356   : > { %v4471_v20 = vadd.f32 %v4463_v52, %v4430_v59  ;;  %v4523_v48 = vunpack.c.l.bf16 %v7518_v11  ;;  %v4524_v29 = vunpack.c.h.bf16 %v7518_v11  ;;  %v4525_v2 = vunpack.c.l.bf16 %v7519_v9 }
 0x357   : > { %v4526_v38 = vunpack.c.h.bf16 %v7519_v9  ;;  %v4527_v36 = vunpack.c.l.bf16 %v7520_v18  ;;  %v4528_v27 = vunpack.c.h.bf16 %v7520_v18  ;;  %v4505_v55 = vmul.f32 %v4494_v19, %v4486_v17  ;;  %v4558_v17 = vld [vmem:[#allocation2 + $0x14] ss:$8 sm:$0x3]  ;;  %v7526_v18 = vld [vmem:[%s8374_s1 + $0x1a0] sm:$0xff] }
 0x358   : > { %v4506_v7 = vmul.f32 %v4498_v22, %v4487_v4  ;;  %v4507_v25 = vmul.f32 %v4494_v19, %v4488_v14  ;;  %v4508_v0 = vmul.f32 %v4498_v22, %v4489_v62  ;;  %v4501_v61 = vmul.f32 %v4494_v19, %v4482_v34 }
 0x359   : > { %v4502_v63 = vmul.f32 %v4498_v22, %v4483_v49  ;;  %v4503_v30 = vmul.f32 %v4494_v19, %v4484_v6  ;;  %v4504_v53 = vmul.f32 %v4498_v22, %v4485_v15  ;;  %v4513_v44 = vadd.f32 %v4505_v55, %v4472_v60  ;;  %v7525_v60 = vld [vmem:[%s8374_s1 + $0x198] sm:$0xff] }
 0x35a   : > { %v4514_v50 = vadd.f32 %v4506_v7, %v4473_v8  ;;  %v4515_v40 = vadd.f32 %v4507_v25, %v4474_v47  ;;  %v4516_v1 = vadd.f32 %v4508_v0, %v4475_v24  ;;  %v4529_v56 = vunpack.c.l.bf16 %v7521_v21 }
 0x35b   : > { %v4530_v59 = vunpack.c.h.bf16 %v7521_v21  ;;  %v4535_v5 = vrot.slane %v4517_v12, %v8395_v57  ;;  %v4539_v10 = vrot.slane %v4517_v12, %v8397_v58  ;;  %v4509_v3 = vadd.f32 %v4501_v61, %v4468_v32 }
 0x35c   : > { %v4510_v33 = vadd.f32 %v4502_v63, %v4469_v31  ;;  %v4511_v34 = vadd.f32 %v4503_v30, %v4470_v54  ;;  %v4512_v49 = vadd.f32 %v4504_v53, %v4471_v20  ;;  %v4564_v6 = vunpack.c.l.bf16 %v7522_v23  ;;  %v7527_v54 = vld [vmem:[%s8374_s1 + $0x1a8] sm:$0xff]  ;;  %v7528_v20 = vld [vmem:[%s8374_s1 + $0x1b0] sm:$0xff] }
 0x35d   : > { %v4565_v15 = vunpack.c.h.bf16 %v7522_v23  ;;  %v4566_v45 = vunpack.c.l.bf16 %v7523_v28  ;;  %v4567_v13 = vunpack.c.h.bf16 %v7523_v28  ;;  %v4546_v26 = vmul.f32 %v4535_v5, %v4527_v36 }
 0x35e   : > { %v4547_v46 = vmul.f32 %v4539_v10, %v4528_v27  ;;  %v4548_v42 = vmul.f32 %v4535_v5, %v4529_v56  ;;  %v4549_v52 = vmul.f32 %v4539_v10, %v4530_v59  ;;  %v4542_v8 = vmul.f32 %v4535_v5, %v4523_v48 }
 0x35f   : > { %v4543_v47 = vmul.f32 %v4539_v10, %v4524_v29  ;;  %v4544_v24 = vmul.f32 %v4535_v5, %v4525_v2  ;;  %v4545_v11 = vmul.f32 %v4539_v10, %v4526_v38  ;;  %v4554_v4 = vadd.f32 %v4546_v26, %v4513_v44  ;;  %v4599_v44 = vld [vmem:[#allocation2 + $0x15] ss:$8 sm:$0x3] }
 0x360   : > { %v4555_v14 = vadd.f32 %v4547_v46, %v4514_v50  ;;  %v4556_v62 = vadd.f32 %v4548_v42, %v4515_v40  ;;  %v4557_v9 = vadd.f32 %v4549_v52, %v4516_v1  ;;  %v4568_v32 = vunpack.c.l.bf16 %v7524_v16  ;;  %v7529_v50 = vld [vmem:[%s8374_s1 + $0x1b8] sm:$0xff] }
 0x361   : > { %v4569_v31 = vunpack.c.h.bf16 %v7524_v16  ;;  %v4570_v19 = vunpack.c.l.bf16 %v7525_v60  ;;  %v4571_v22 = vunpack.c.h.bf16 %v7525_v60  ;;  %v4550_v36 = vadd.f32 %v4542_v8, %v4509_v3  ;;  %v7530_v3 = vld [vmem:[%s8374_s1 + $0x1c0] sm:$0xff] }
 0x362   : > { %v4551_v27 = vadd.f32 %v4543_v47, %v4510_v33  ;;  %v4576_v48 = vrot.slane %v4558_v17, %v8395_v57  ;;  %v4580_v29 = vrot.slane %v4558_v17, %v8397_v58  ;;  %v4552_v2 = vadd.f32 %v4544_v24, %v4511_v34  ;;  %v7531_v33 = vld [vmem:[%s8374_s1 + $0x1c8] sm:$0xff]  ;;  %v7532_v17 = vld [vmem:[%s8374_s1 + $0x1d0] sm:$0xff] }
 0x363   : > { %v4553_v38 = vadd.f32 %v4545_v11, %v4512_v49  ;;  %v4605_v55 = vunpack.c.l.bf16 %v7526_v18  ;;  %v4606_v7 = vunpack.c.h.bf16 %v7526_v18  ;;  %v4607_v25 = vunpack.c.l.bf16 %v7527_v54 }
 0x364   : > { %v4608_v0 = vunpack.c.h.bf16 %v7527_v54  ;;  %v4609_v12 = vunpack.c.l.bf16 %v7528_v20  ;;  %v4610_v21 = vunpack.c.h.bf16 %v7528_v20  ;;  %v4587_v61 = vmul.f32 %v4576_v48, %v4568_v32  ;;  %v4640_v32 = vld [vmem:[#allocation2 + $0x16] ss:$8 sm:$0x3]  ;;  %v7534_v20 = vld [vmem:[%s8374_s1 + $0x1e0] sm:$0xff] }
 0x365   : > { %v4588_v63 = vmul.f32 %v4580_v29, %v4569_v31  ;;  %v4589_v30 = vmul.f32 %v4576_v48, %v4570_v19  ;;  %v4590_v53 = vmul.f32 %v4580_v29, %v4571_v22  ;;  %v4583_v40 = vmul.f32 %v4576_v48, %v4564_v6 }
 0x366   : > { %v4584_v1 = vmul.f32 %v4580_v29, %v4565_v15  ;;  %v4585_v23 = vmul.f32 %v4576_v48, %v4566_v45  ;;  %v4586_v28 = vmul.f32 %v4580_v29, %v4567_v13  ;;  %v4595_v56 = vadd.f32 %v4587_v61, %v4554_v4  ;;  %v7533_v4 = vld [vmem:[%s8374_s1 + $0x1d8] sm:$0xff] }
 0x367   : > { %v4596_v59 = vadd.f32 %v4588_v63, %v4555_v14  ;;  %v4597_v5 = vadd.f32 %v4589_v30, %v4556_v62  ;;  %v4598_v10 = vadd.f32 %v4590_v53, %v4557_v9  ;;  %v4611_v34 = vunpack.c.l.bf16 %v7529_v50 }
 0x368   : > { %v4612_v49 = vunpack.c.h.bf16 %v7529_v50  ;;  %v4617_v26 = vrot.slane %v4599_v44, %v8395_v57  ;;  %v4621_v46 = vrot.slane %v4599_v44, %v8397_v58  ;;  %v4591_v42 = vadd.f32 %v4583_v40, %v4550_v36 }
 0x369   : > { %v4592_v52 = vadd.f32 %v4584_v1, %v4551_v27  ;;  %v4593_v6 = vadd.f32 %v4585_v23, %v4552_v2  ;;  %v4594_v15 = vadd.f32 %v4586_v28, %v4553_v38  ;;  %v4646_v45 = vunpack.c.l.bf16 %v7530_v3  ;;  %v7535_v2 = vld [vmem:[%s8374_s1 + $0x1e8] sm:$0xff]  ;;  %v7536_v38 = vld [vmem:[%s8374_s1 + $0x1f0] sm:$0xff] }
 0x36a   : > { %v4647_v13 = vunpack.c.h.bf16 %v7530_v3  ;;  %v4648_v16 = vunpack.c.l.bf16 %v7531_v33  ;;  %v4649_v60 = vunpack.c.h.bf16 %v7531_v33  ;;  %v4628_v8 = vmul.f32 %v4617_v26, %v4609_v12 }
 0x36b   : > { %v4629_v47 = vmul.f32 %v4621_v46, %v4610_v21  ;;  %v4630_v24 = vmul.f32 %v4617_v26, %v4611_v34  ;;  %v4631_v11 = vmul.f32 %v4621_v46, %v4612_v49  ;;  %v4624_v14 = vmul.f32 %v4617_v26, %v4605_v55 }
 0x36c   : > { %v4625_v62 = vmul.f32 %v4621_v46, %v4606_v7  ;;  %v4626_v9 = vmul.f32 %v4617_v26, %v4607_v25  ;;  %v4627_v18 = vmul.f32 %v4621_v46, %v4608_v0  ;;  %v4636_v31 = vadd.f32 %v4628_v8, %v4595_v56  ;;  %v4681_v56 = vld [vmem:[#allocation2 + $0x17] ss:$8 sm:$0x3] }
 0x36d   : > { %v4637_v19 = vadd.f32 %v4629_v47, %v4596_v59  ;;  %v4638_v22 = vadd.f32 %v4630_v24, %v4597_v5  ;;  %v4639_v54 = vadd.f32 %v4631_v11, %v4598_v10  ;;  %v4650_v36 = vunpack.c.l.bf16 %v7532_v17  ;;  %v7537_v59 = vld [vmem:[%s8374_s1 + $0x1f8] sm:$0xff] }
 0x36e   : > { %v4651_v27 = vunpack.c.h.bf16 %v7532_v17  ;;  %v4652_v48 = vunpack.c.l.bf16 %v7533_v4  ;;  %v4653_v29 = vunpack.c.h.bf16 %v7533_v4  ;;  %v4632_v12 = vadd.f32 %v4624_v14, %v4591_v42  ;;  %v7538_v42 = vld [vmem:[%s8374_s1 + $0x200] sm:$0xff] }
 0x36f   : > { %v4633_v21 = vadd.f32 %v4625_v62, %v4592_v52  ;;  %v4658_v55 = vrot.slane %v4640_v32, %v8395_v57  ;;  %v4662_v7 = vrot.slane %v4640_v32, %v8397_v58  ;;  %v4634_v25 = vadd.f32 %v4626_v9, %v4593_v6  ;;  %v7539_v52 = vld [vmem:[%s8374_s1 + $0x208] sm:$0xff]  ;;  %v7540_v32 = vld [vmem:[%s8374_s1 + $0x210] sm:$0xff] }
 0x370   : > { %v4635_v0 = vadd.f32 %v4627_v18, %v4594_v15  ;;  %v4687_v61 = vunpack.c.l.bf16 %v7534_v20  ;;  %v4688_v63 = vunpack.c.h.bf16 %v7534_v20  ;;  %v4689_v30 = vunpack.c.l.bf16 %v7535_v2 }
 0x371   : > { %v4690_v53 = vunpack.c.h.bf16 %v7535_v2  ;;  %v4691_v44 = vunpack.c.l.bf16 %v7536_v38  ;;  %v4692_v50 = vunpack.c.h.bf16 %v7536_v38  ;;  %v4669_v40 = vmul.f32 %v4658_v55, %v4650_v36  ;;  %v4722_v36 = vld [vmem:[#allocation2 + $0x20] ss:$8 sm:$0x3] }
 0x372   : > { %v4670_v1 = vmul.f32 %v4662_v7, %v4651_v27  ;;  %v4671_v23 = vmul.f32 %v4658_v55, %v4652_v48  ;;  %v4672_v28 = vmul.f32 %v4662_v7, %v4653_v29  ;;  %v4665_v5 = vmul.f32 %v4658_v55, %v4646_v45  ;;  %v7542_v38 = vld [vmem:[%s8374_s1 + $0x220] sm:$0xff] }
 0x373   : > { %v4666_v10 = vmul.f32 %v4662_v7, %v4647_v13  ;;  %v4667_v3 = vmul.f32 %v4658_v55, %v4648_v16  ;;  %v4668_v33 = vmul.f32 %v4662_v7, %v4649_v60  ;;  %v4677_v34 = vadd.f32 %v4669_v40, %v4636_v31  ;;  %v7541_v31 = vld [vmem:[%s8374_s1 + $0x218] sm:$0xff] }
 0x374   : > { %v4678_v49 = vadd.f32 %v4670_v1, %v4637_v19  ;;  %v4679_v26 = vadd.f32 %v4671_v23, %v4638_v22  ;;  %v4680_v46 = vadd.f32 %v4672_v28, %v4639_v54  ;;  %v4693_v6 = vunpack.c.l.bf16 %v7537_v59 }
 0x375   : > { %v4694_v15 = vunpack.c.h.bf16 %v7537_v59  ;;  %v4699_v8 = vrot.slane %v4681_v56, %v8395_v57  ;;  %v4703_v47 = vrot.slane %v4681_v56, %v8397_v58  ;;  %v4673_v24 = vadd.f32 %v4665_v5, %v4632_v12 }
 0x376   : > { %v4674_v11 = vadd.f32 %v4666_v10, %v4633_v21  ;;  %v4675_v45 = vadd.f32 %v4667_v3, %v4634_v25  ;;  %v4676_v13 = vadd.f32 %v4668_v33, %v4635_v0  ;;  %v4728_v16 = vunpack.c.l.bf16 %v7538_v42  ;;  %v7543_v25 = vld [vmem:[%s8374_s1 + $0x228] sm:$0xff]  ;;  %v7544_v0 = vld [vmem:[%s8374_s1 + $0x230] sm:$0xff] }
 0x377   : > { %v4729_v60 = vunpack.c.h.bf16 %v7538_v42  ;;  %v4730_v17 = vunpack.c.l.bf16 %v7539_v52  ;;  %v4731_v4 = vunpack.c.h.bf16 %v7539_v52  ;;  %v4710_v14 = vmul.f32 %v4699_v8, %v4691_v44 }
 0x378   : > { %v4711_v62 = vmul.f32 %v4703_v47, %v4692_v50  ;;  %v4712_v9 = vmul.f32 %v4699_v8, %v4693_v6  ;;  %v4713_v18 = vmul.f32 %v4703_v47, %v4694_v15  ;;  %v4706_v19 = vmul.f32 %v4699_v8, %v4687_v61 }
 0x379   : > { %v4707_v22 = vmul.f32 %v4703_v47, %v4688_v63  ;;  %v4708_v54 = vmul.f32 %v4699_v8, %v4689_v30  ;;  %v4709_v20 = vmul.f32 %v4703_v47, %v4690_v53  ;;  %v4718_v27 = vadd.f32 %v4710_v14, %v4677_v34  ;;  %v4763_v34 = vld [vmem:[#allocation2 + $0x21] ss:$8 sm:$0x3] }
 0x37a   : > { %v4719_v48 = vadd.f32 %v4711_v62, %v4678_v49  ;;  %v4720_v29 = vadd.f32 %v4712_v9, %v4679_v26  ;;  %v4721_v2 = vadd.f32 %v4713_v18, %v4680_v46  ;;  %v4732_v12 = vunpack.c.l.bf16 %v7540_v32  ;;  %v7545_v49 = vld [vmem:[%s8374_s1 + $0x238] sm:$0xff] }
 0x37b   : > { %v4733_v21 = vunpack.c.h.bf16 %v7540_v32  ;;  %v4734_v55 = vunpack.c.l.bf16 %v7541_v31  ;;  %v4735_v7 = vunpack.c.h.bf16 %v7541_v31  ;;  %v4714_v44 = vadd.f32 %v4706_v19, %v4673_v24  ;;  %v7546_v24 = vld [vmem:[%s8374_s1 + $0x240] sm:$0xff] }
 0x37c   : > { %v4715_v50 = vadd.f32 %v4707_v22, %v4674_v11  ;;  %v4740_v61 = vrot.slane %v4722_v36, %v8395_v57  ;;  %v4744_v63 = vrot.slane %v4722_v36, %v8397_v58  ;;  %v4716_v30 = vadd.f32 %v4708_v54, %v4675_v45  ;;  %v7547_v11 = vld [vmem:[%s8374_s1 + $0x248] sm:$0xff]  ;;  %v7548_v36 = vld [vmem:[%s8374_s1 + $0x250] sm:$0xff] }
 0x37d   : > { %v4717_v53 = vadd.f32 %v4709_v20, %v4676_v13  ;;  %v4769_v40 = vunpack.c.l.bf16 %v7542_v38  ;;  %v4770_v1 = vunpack.c.h.bf16 %v7542_v38  ;;  %v4771_v23 = vunpack.c.l.bf16 %v7543_v25 }
 0x37e   : > { %v4772_v28 = vunpack.c.h.bf16 %v7543_v25  ;;  %v4773_v56 = vunpack.c.l.bf16 %v7544_v0  ;;  %v4774_v59 = vunpack.c.h.bf16 %v7544_v0  ;;  %v4751_v5 = vmul.f32 %v4740_v61, %v4732_v12  ;;  %v4804_v12 = vld [vmem:[#allocation2 + $0x22] ss:$8 sm:$0x3] }
 0x37f   : > { %v4752_v10 = vmul.f32 %v4744_v63, %v4733_v21  ;;  %v4753_v3 = vmul.f32 %v4740_v61, %v4734_v55  ;;  %v4754_v33 = vmul.f32 %v4744_v63, %v4735_v7  ;;  %v4747_v26 = vmul.f32 %v4740_v61, %v4728_v16  ;;  %v7550_v0 = vld [vmem:[%s8374_s1 + $0x260] sm:$0xff] }
 0x380   : > { %v4748_v46 = vmul.f32 %v4744_v63, %v4729_v60  ;;  %v4749_v42 = vmul.f32 %v4740_v61, %v4730_v17  ;;  %v4750_v52 = vmul.f32 %v4744_v63, %v4731_v4  ;;  %v4759_v6 = vadd.f32 %v4751_v5, %v4718_v27  ;;  %v7549_v27 = vld [vmem:[%s8374_s1 + $0x258] sm:$0xff] }
 0x381   : > { %v4760_v15 = vadd.f32 %v4752_v10, %v4719_v48  ;;  %v4761_v8 = vadd.f32 %v4753_v3, %v4720_v29  ;;  %v4762_v47 = vadd.f32 %v4754_v33, %v4721_v2  ;;  %v4775_v45 = vunpack.c.l.bf16 %v7545_v49 }
 0x382   : > { %v4776_v13 = vunpack.c.h.bf16 %v7545_v49  ;;  %v4781_v14 = vrot.slane %v4763_v34, %v8395_v57  ;;  %v4785_v62 = vrot.slane %v4763_v34, %v8397_v58  ;;  %v4755_v9 = vadd.f32 %v4747_v26, %v4714_v44 }
 0x383   : > { %v4756_v18 = vadd.f32 %v4748_v46, %v4715_v50  ;;  %v4757_v16 = vadd.f32 %v4749_v42, %v4716_v30  ;;  %v4758_v60 = vadd.f32 %v4750_v52, %v4717_v53  ;;  %v4810_v17 = vunpack.c.l.bf16 %v7546_v24  ;;  %v7551_v30 = vld [vmem:[%s8374_s1 + $0x268] sm:$0xff]  ;;  %v7552_v53 = vld [vmem:[%s8374_s1 + $0x270] sm:$0xff] }
 0x384   : > { %v4811_v4 = vunpack.c.h.bf16 %v7546_v24  ;;  %v4812_v32 = vunpack.c.l.bf16 %v7547_v11  ;;  %v4813_v31 = vunpack.c.h.bf16 %v7547_v11  ;;  %v4792_v19 = vmul.f32 %v4781_v14, %v4773_v56 }
 0x385   : > { %v4793_v22 = vmul.f32 %v4785_v62, %v4774_v59  ;;  %v4794_v54 = vmul.f32 %v4781_v14, %v4775_v45  ;;  %v4795_v20 = vmul.f32 %v4785_v62, %v4776_v13  ;;  %v4788_v48 = vmul.f32 %v4781_v14, %v4769_v40 }
 0x386   : > { %v4789_v29 = vmul.f32 %v4785_v62, %v4770_v1  ;;  %v4790_v2 = vmul.f32 %v4781_v14, %v4771_v23  ;;  %v4791_v38 = vmul.f32 %v4785_v62, %v4772_v28  ;;  %v4800_v21 = vadd.f32 %v4792_v19, %v4759_v6  ;;  %v4845_v6 = vld [vmem:[#allocation2 + $0x23] ss:$8 sm:$0x3] }
 0x387   : > { %v4801_v55 = vadd.f32 %v4793_v22, %v4760_v15  ;;  %v4802_v7 = vadd.f32 %v4794_v54, %v4761_v8  ;;  %v4803_v25 = vadd.f32 %v4795_v20, %v4762_v47  ;;  %v4814_v44 = vunpack.c.l.bf16 %v7548_v36  ;;  %v7553_v15 = vld [vmem:[%s8374_s1 + $0x278] sm:$0xff] }
 0x388   : > { %v4815_v50 = vunpack.c.h.bf16 %v7548_v36  ;;  %v4816_v61 = vunpack.c.l.bf16 %v7549_v27  ;;  %v4817_v63 = vunpack.c.h.bf16 %v7549_v27  ;;  %v4796_v56 = vadd.f32 %v4788_v48, %v4755_v9  ;;  %v7554_v9 = vld [vmem:[%s8374_s1 + $0x280] sm:$0xff] }
 0x389   : > { %v4797_v59 = vadd.f32 %v4789_v29, %v4756_v18  ;;  %v4822_v40 = vrot.slane %v4804_v12, %v8395_v57  ;;  %v4826_v1 = vrot.slane %v4804_v12, %v8397_v58  ;;  %v4798_v23 = vadd.f32 %v4790_v2, %v4757_v16  ;;  %v7555_v18 = vld [vmem:[%s8374_s1 + $0x288] sm:$0xff]  ;;  %v7556_v12 = vld [vmem:[%s8374_s1 + $0x290] sm:$0xff] }
 0x38a   : > { %v4799_v28 = vadd.f32 %v4791_v38, %v4758_v60  ;;  %v4851_v5 = vunpack.c.l.bf16 %v7550_v0  ;;  %v4852_v10 = vunpack.c.h.bf16 %v7550_v0  ;;  %v4853_v3 = vunpack.c.l.bf16 %v7551_v30 }
 0x38b   : > { %v4854_v33 = vunpack.c.h.bf16 %v7551_v30  ;;  %v4855_v34 = vunpack.c.l.bf16 %v7552_v53  ;;  %v4856_v49 = vunpack.c.h.bf16 %v7552_v53  ;;  %v4833_v26 = vmul.f32 %v4822_v40, %v4814_v44  ;;  %v4886_v44 = vld [vmem:[#allocation2 + $0x24] ss:$8 sm:$0x3] }
 0x38c   : > { %v4834_v46 = vmul.f32 %v4826_v1, %v4815_v50  ;;  %v4835_v42 = vmul.f32 %v4822_v40, %v4816_v61  ;;  %v4836_v52 = vmul.f32 %v4826_v1, %v4817_v63  ;;  %v4829_v8 = vmul.f32 %v4822_v40, %v4810_v17  ;;  %v7558_v53 = vld [vmem:[%s8374_s1 + $0x2a0] sm:$0xff] }
 0x38d   : > { %v4830_v47 = vmul.f32 %v4826_v1, %v4811_v4  ;;  %v4831_v24 = vmul.f32 %v4822_v40, %v4812_v32  ;;  %v4832_v11 = vmul.f32 %v4826_v1, %v4813_v31  ;;  %v4841_v45 = vadd.f32 %v4833_v26, %v4800_v21  ;;  %v7557_v21 = vld [vmem:[%s8374_s1 + $0x298] sm:$0xff] }
 0x38e   : > { %v4842_v13 = vadd.f32 %v4834_v46, %v4801_v55  ;;  %v4843_v14 = vadd.f32 %v4835_v42, %v4802_v7  ;;  %v4844_v62 = vadd.f32 %v4836_v52, %v4803_v25  ;;  %v4857_v16 = vunpack.c.l.bf16 %v7553_v15 }
 0x38f   : > { %v4858_v60 = vunpack.c.h.bf16 %v7553_v15  ;;  %v4863_v19 = vrot.slane %v4845_v6, %v8395_v57  ;;  %v4867_v22 = vrot.slane %v4845_v6, %v8397_v58  ;;  %v4837_v54 = vadd.f32 %v4829_v8, %v4796_v56 }
 0x390   : > { %v4838_v20 = vadd.f32 %v4830_v47, %v4797_v59  ;;  %v4839_v17 = vadd.f32 %v4831_v24, %v4798_v23  ;;  %v4840_v4 = vadd.f32 %v4832_v11, %v4799_v28  ;;  %v4892_v32 = vunpack.c.l.bf16 %v7554_v9  ;;  %v7559_v23 = vld [vmem:[%s8374_s1 + $0x2a8] sm:$0xff]  ;;  %v7560_v28 = vld [vmem:[%s8374_s1 + $0x2b0] sm:$0xff] }
 0x391   : > { %v4893_v31 = vunpack.c.h.bf16 %v7554_v9  ;;  %v4894_v36 = vunpack.c.l.bf16 %v7555_v18  ;;  %v4895_v27 = vunpack.c.h.bf16 %v7555_v18  ;;  %v4874_v48 = vmul.f32 %v4863_v19, %v4855_v34 }
 0x392   : > { %v4875_v29 = vmul.f32 %v4867_v22, %v4856_v49  ;;  %v4876_v2 = vmul.f32 %v4863_v19, %v4857_v16  ;;  %v4877_v38 = vmul.f32 %v4867_v22, %v4858_v60  ;;  %v4870_v55 = vmul.f32 %v4863_v19, %v4851_v5 }
 0x393   : > { %v4871_v7 = vmul.f32 %v4867_v22, %v4852_v10  ;;  %v4872_v25 = vmul.f32 %v4863_v19, %v4853_v3  ;;  %v4873_v0 = vmul.f32 %v4867_v22, %v4854_v33  ;;  %v4882_v50 = vadd.f32 %v4874_v48, %v4841_v45  ;;  %v4927_v45 = vld [vmem:[#allocation2 + $0x25] ss:$8 sm:$0x3] }
 0x394   : > { %v4883_v61 = vadd.f32 %v4875_v29, %v4842_v13  ;;  %v4884_v63 = vadd.f32 %v4876_v2, %v4843_v14  ;;  %v4885_v30 = vadd.f32 %v4877_v38, %v4844_v62  ;;  %v4896_v56 = vunpack.c.l.bf16 %v7556_v12  ;;  %v7561_v13 = vld [vmem:[%s8374_s1 + $0x2b8] sm:$0xff] }
 0x395   : > { %v4897_v59 = vunpack.c.h.bf16 %v7556_v12  ;;  %v4898_v40 = vunpack.c.l.bf16 %v7557_v21  ;;  %v4899_v1 = vunpack.c.h.bf16 %v7557_v21  ;;  %v4878_v34 = vadd.f32 %v4870_v55, %v4837_v54  ;;  %v7562_v54 = vld [vmem:[%s8374_s1 + $0x2c0] sm:$0xff] }
 0x396   : > { %v4879_v49 = vadd.f32 %v4871_v7, %v4838_v20  ;;  %v4904_v5 = vrot.slane %v4886_v44, %v8395_v57  ;;  %v4908_v10 = vrot.slane %v4886_v44, %v8397_v58  ;;  %v4880_v3 = vadd.f32 %v4872_v25, %v4839_v17  ;;  %v7563_v20 = vld [vmem:[%s8374_s1 + $0x2c8] sm:$0xff]  ;;  %v7564_v44 = vld [vmem:[%s8374_s1 + $0x2d0] sm:$0xff] }
 0x397   : > { %v4881_v33 = vadd.f32 %v4873_v0, %v4840_v4  ;;  %v4933_v26 = vunpack.c.l.bf16 %v7558_v53  ;;  %v4934_v46 = vunpack.c.h.bf16 %v7558_v53  ;;  %v4935_v42 = vunpack.c.l.bf16 %v7559_v23 }
 0x398   : > { %v4936_v52 = vunpack.c.h.bf16 %v7559_v23  ;;  %v4937_v6 = vunpack.c.l.bf16 %v7560_v28  ;;  %v4938_v15 = vunpack.c.h.bf16 %v7560_v28  ;;  %v4915_v8 = vmul.f32 %v4904_v5, %v4896_v56  ;;  %v4968_v56 = vld [vmem:[#allocation2 + $0x26] ss:$8 sm:$0x3] }
 0x399   : > { %v4916_v47 = vmul.f32 %v4908_v10, %v4897_v59  ;;  %v4917_v24 = vmul.f32 %v4904_v5, %v4898_v40  ;;  %v4918_v11 = vmul.f32 %v4908_v10, %v4899_v1  ;;  %v4911_v14 = vmul.f32 %v4904_v5, %v4892_v32  ;;  %v7566_v28 = vld [vmem:[%s8374_s1 + $0x2e0] sm:$0xff] }
 0x39a   : > { %v4912_v62 = vmul.f32 %v4908_v10, %v4893_v31  ;;  %v4913_v9 = vmul.f32 %v4904_v5, %v4894_v36  ;;  %v4914_v18 = vmul.f32 %v4908_v10, %v4895_v27  ;;  %v4923_v16 = vadd.f32 %v4915_v8, %v4882_v50  ;;  %v7565_v50 = vld [vmem:[%s8374_s1 + $0x2d8] sm:$0xff] }
 0x39b   : > { %v4924_v60 = vadd.f32 %v4916_v47, %v4883_v61  ;;  %v4925_v19 = vadd.f32 %v4917_v24, %v4884_v63  ;;  %v4926_v22 = vadd.f32 %v4918_v11, %v4885_v30  ;;  %v4939_v17 = vunpack.c.l.bf16 %v7561_v13 }
 0x39c   : > { %v4940_v4 = vunpack.c.h.bf16 %v7561_v13  ;;  %v4945_v48 = vrot.slane %v4927_v45, %v8395_v57  ;;  %v4949_v29 = vrot.slane %v4927_v45, %v8397_v58  ;;  %v4919_v2 = vadd.f32 %v4911_v14, %v4878_v34 }
 0x39d   : > { %v4920_v38 = vadd.f32 %v4912_v62, %v4879_v49  ;;  %v4921_v32 = vadd.f32 %v4913_v9, %v4880_v3  ;;  %v4922_v31 = vadd.f32 %v4914_v18, %v4881_v33  ;;  %v4974_v36 = vunpack.c.l.bf16 %v7562_v54  ;;  %v7567_v3 = vld [vmem:[%s8374_s1 + $0x2e8] sm:$0xff]  ;;  %v7568_v33 = vld [vmem:[%s8374_s1 + $0x2f0] sm:$0xff] }
 0x39e   : > { %v4975_v27 = vunpack.c.h.bf16 %v7562_v54  ;;  %v4976_v12 = vunpack.c.l.bf16 %v7563_v20  ;;  %v4977_v21 = vunpack.c.h.bf16 %v7563_v20  ;;  %v4956_v55 = vmul.f32 %v4945_v48, %v4937_v6 }
 0x39f   : > { %v4957_v7 = vmul.f32 %v4949_v29, %v4938_v15  ;;  %v4958_v25 = vmul.f32 %v4945_v48, %v4939_v17  ;;  %v4959_v0 = vmul.f32 %v4949_v29, %v4940_v4  ;;  %v4952_v61 = vmul.f32 %v4945_v48, %v4933_v26 }
 0x3a0   : > { %v4953_v63 = vmul.f32 %v4949_v29, %v4934_v46  ;;  %v4954_v30 = vmul.f32 %v4945_v48, %v4935_v42  ;;  %v4955_v53 = vmul.f32 %v4949_v29, %v4936_v52  ;;  %v4964_v59 = vadd.f32 %v4956_v55, %v4923_v16  ;;  %v5009_v16 = vld [vmem:[#allocation2 + $0x27] ss:$8 sm:$0x3] }
 0x3a1   : > { %v4965_v40 = vadd.f32 %v4957_v7, %v4924_v60  ;;  %v4966_v1 = vadd.f32 %v4958_v25, %v4925_v19  ;;  %v4967_v23 = vadd.f32 %v4959_v0, %v4926_v22  ;;  %v4978_v34 = vunpack.c.l.bf16 %v7564_v44  ;;  %v7569_v60 = vld [vmem:[%s8374_s1 + $0x2f8] sm:$0xff] }
 0x3a2   : > { %v4979_v49 = vunpack.c.h.bf16 %v7564_v44  ;;  %v4980_v5 = vunpack.c.l.bf16 %v7565_v50  ;;  %v4981_v10 = vunpack.c.h.bf16 %v7565_v50  ;;  %v4960_v6 = vadd.f32 %v4952_v61, %v4919_v2  ;;  %v7570_v2 = vld [vmem:[%s8374_s1 + $0x300] sm:$0xff] }
 0x3a3   : > { %v4961_v15 = vadd.f32 %v4953_v63, %v4920_v38  ;;  %v4986_v26 = vrot.slane %v4968_v56, %v8395_v57  ;;  %v4990_v46 = vrot.slane %v4968_v56, %v8397_v58  ;;  %v4962_v42 = vadd.f32 %v4954_v30, %v4921_v32  ;;  %v7571_v38 = vld [vmem:[%s8374_s1 + $0x308] sm:$0xff]  ;;  %v7573_v56 = vld [vmem:[%s8374_s1 + $0x318] sm:$0xff] }
 0x3a4   : > { %v4963_v52 = vadd.f32 %v4955_v53, %v4922_v31  ;;  %v5015_v8 = vunpack.c.l.bf16 %v7566_v28  ;;  %v5016_v47 = vunpack.c.h.bf16 %v7566_v28  ;;  %v5017_v24 = vunpack.c.l.bf16 %v7567_v3  ;;  %v7572_v53 = vld [vmem:[%s8374_s1 + $0x310] sm:$0xff] }
 0x3a5   : > { %v5018_v11 = vunpack.c.h.bf16 %v7567_v3  ;;  %v5019_v45 = vunpack.c.l.bf16 %v7568_v33  ;;  %v5020_v13 = vunpack.c.h.bf16 %v7568_v33  ;;  %v4997_v14 = vmul.f32 %v4986_v26, %v4978_v34  ;;  %v5050_v28 = vld [vmem:[#allocation2 + $0x30] ss:$8 sm:$0x3]  ;;  %v7574_v3 = vld [vmem:[%s8374_s1 + $0x320] sm:$0xff] }
 0x3a6   : > { %v4998_v62 = vmul.f32 %v4990_v46, %v4979_v49  ;;  %v4999_v9 = vmul.f32 %v4986_v26, %v4980_v5  ;;  %v5000_v18 = vmul.f32 %v4990_v46, %v4981_v10  ;;  %v4993_v19 = vmul.f32 %v4986_v26, %v4974_v36 }
 0x3a7   : > { %v4994_v22 = vmul.f32 %v4990_v46, %v4975_v27  ;;  %v4995_v54 = vmul.f32 %v4986_v26, %v4976_v12  ;;  %v4996_v20 = vmul.f32 %v4990_v46, %v4977_v21  ;;  %v5005_v17 = vadd.f32 %v4997_v14, %v4964_v59  ;;  %v10316_v46 = vld [vmem:[%s8374_s1 + $0x328] sm:$0xff] }
 0x3a8   : > { %v5006_v4 = vadd.f32 %v4998_v62, %v4965_v40  ;;  %v5007_v48 = vadd.f32 %v4999_v9, %v4966_v1  ;;  %v5008_v29 = vadd.f32 %v5000_v18, %v4967_v23  ;;  %v5021_v32 = vunpack.c.l.bf16 %v7569_v60 }
 0x3a9   : > { %v5022_v31 = vunpack.c.h.bf16 %v7569_v60  ;;  %v5027_v55 = vrot.slane %v5009_v16, %v8395_v57  ;;  %v5031_v7 = vrot.slane %v5009_v16, %v8397_v58  ;;  %v5001_v25 = vadd.f32 %v4993_v19, %v4960_v6 }
 0x3aa   : > { %v5002_v0 = vadd.f32 %v4994_v22, %v4961_v15  ;;  %v5003_v36 = vadd.f32 %v4995_v54, %v4962_v42  ;;  %v5004_v27 = vadd.f32 %v4996_v20, %v4963_v52  ;;  %v5056_v12 = vunpack.c.l.bf16 %v7570_v2  ;;  %v7576_v42 = vld [vmem:[%s8374_s1 + $0x330] sm:$0xff] }
 0x3ab   : > { %v5057_v21 = vunpack.c.h.bf16 %v7570_v2  ;;  %v5058_v44 = vunpack.c.l.bf16 %v7571_v38  ;;  %v5038_v50 = vmul.f32 %v5027_v55, %v5019_v45  ;;  %v5039_v61 = vmul.f32 %v5031_v7, %v5020_v13  ;;  %v5091_v20 = vld [vmem:[#allocation2 + $0x31] ss:$8 sm:$0x3] }
 0x3ac   : > { %v5040_v63 = vmul.f32 %v5027_v55, %v5021_v32  ;;  %v5041_v30 = vmul.f32 %v5031_v7, %v5022_v31  ;;  %v5034_v59 = vmul.f32 %v5027_v55, %v5015_v8  ;;  %v5035_v40 = vmul.f32 %v5031_v7, %v5016_v47 }
 0x3ad   : > { %v5036_v1 = vmul.f32 %v5027_v55, %v5017_v24  ;;  %v5037_v23 = vmul.f32 %v5031_v7, %v5018_v11  ;;  %v5046_v34 = vadd.f32 %v5038_v50, %v5005_v17  ;;  %v5047_v49 = vadd.f32 %v5039_v61, %v5006_v4  ;;  %v7577_v17 = vld [vmem:[%s8374_s1 + $0x338] sm:$0xff]  ;;  %v7578_v50 = vld [vmem:[%s8374_s1 + $0x340] sm:$0xff] }
 0x3ae   : > { %v5048_v5 = vadd.f32 %v5040_v63, %v5007_v48  ;;  %v5049_v10 = vadd.f32 %v5041_v30, %v5008_v29  ;;  %v5060_v33 = vunpack.c.l.bf16 %v7572_v53  ;;  %v5061_v6 = vunpack.c.h.bf16 %v7572_v53 }
 0x3af   : > { %v5062_v15 = vunpack.c.l.bf16 %v7573_v56  ;;  %v5063_v26 = vunpack.c.h.bf16 %v7573_v56  ;;  %v5042_v52 = vadd.f32 %v5034_v59, %v5001_v25  ;;  %v5059_v45 = vunpack.c.h.bf16 %v7571_v38  ;;  %v7580_v59 = vld [vmem:[%s8374_s1 + $0x350] sm:$0xff] }
 0x3b0   : > { %v5068_v8 = vrot.slane %v5050_v28, %v8395_v57  ;;  %v5072_v47 = vrot.slane %v5050_v28, %v8397_v58  ;;  %v5043_v24 = vadd.f32 %v5035_v40, %v5002_v0  ;;  %v5044_v11 = vadd.f32 %v5036_v1, %v5003_v36  ;;  %v7581_v40 = vld [vmem:[%s8374_s1 + $0x358] sm:$0xff] }
 0x3b1   : > { %v5045_v13 = vadd.f32 %v5037_v23, %v5004_v27  ;;  %v5097_v14 = vunpack.c.l.bf16 %v7574_v3  ;;  %v5098_v62 = vunpack.c.h.bf16 %v7574_v3  ;;  %v5099_v9 = vunpack.c.l.bf16 %v10316_v46 }
 0x3b2   : > { %v5101_v18 = vunpack.c.l.bf16 %v7576_v42  ;;  %v5102_v16 = vunpack.c.h.bf16 %v7576_v42  ;;  %v5079_v60 = vmul.f32 %v5068_v8, %v5060_v33  ;;  %v5080_v19 = vmul.f32 %v5072_v47, %v5061_v6 }
 0x3b3   : > { %v5081_v22 = vmul.f32 %v5068_v8, %v5062_v15  ;;  %v5082_v54 = vmul.f32 %v5072_v47, %v5063_v26  ;;  %v5075_v4 = vmul.f32 %v5068_v8, %v5056_v12  ;;  %v5076_v48 = vmul.f32 %v5072_v47, %v5057_v21 }
 0x3b4   : > { %v5077_v29 = vmul.f32 %v5068_v8, %v5058_v44  ;;  %v5078_v2 = vmul.f32 %v5072_v47, %v5059_v45  ;;  %v5087_v38 = vadd.f32 %v5079_v60, %v5046_v34  ;;  %v5088_v32 = vadd.f32 %v5080_v19, %v5047_v49  ;;  %v5132_v34 = vld [vmem:[#allocation2 + $0x32] ss:$8 sm:$0x3]  ;;  %v10330_v49 = vld [vmem:[%s8374_s1 + $0x348] sm:$0xff] }
 0x3b5   : > { %v5089_v31 = vadd.f32 %v5081_v22, %v5048_v5  ;;  %v5090_v55 = vadd.f32 %v5082_v54, %v5049_v10  ;;  %v5103_v7 = vunpack.c.l.bf16 %v7577_v17  ;;  %v5104_v25 = vunpack.c.h.bf16 %v7577_v17  ;;  %v10334_v45 = vld [vmem:[%s8374_s1 + $0x368] sm:$0xff]  ;;  %v7584_v8 = vld [vmem:[%s8374_s1 + $0x370] sm:$0xff] }
 0x3b6   : > { %v5109_v0 = vrot.slane %v5091_v20, %v8395_v57  ;;  %v5113_v36 = vrot.slane %v5091_v20, %v8397_v58  ;;  %v5100_v27 = vunpack.c.h.bf16 %v10316_v46  ;;  %v5083_v12 = vadd.f32 %v5075_v4, %v5042_v52  ;;  %v7582_v52 = vld [vmem:[%s8374_s1 + $0x360] sm:$0xff] }
 0x3b7   : > { %v5084_v21 = vadd.f32 %v5076_v48, %v5043_v24  ;;  %v5085_v44 = vadd.f32 %v5077_v29, %v5044_v11  ;;  %v5086_v61 = vadd.f32 %v5078_v2, %v5045_v13  ;;  %v5138_v5 = vunpack.c.l.bf16 %v7578_v50  ;;  %v5173_v48 = vld [vmem:[#allocation2 + $0x33] ss:$8 sm:$0x3] }
 0x3b8   : > { %v5120_v63 = vmul.f32 %v5109_v0, %v5101_v18  ;;  %v5121_v30 = vmul.f32 %v5113_v36, %v5102_v16  ;;  %v5122_v53 = vmul.f32 %v5109_v0, %v5103_v7  ;;  %v5123_v56 = vmul.f32 %v5113_v36, %v5104_v25  ;;  %v7585_v29 = vld [vmem:[%s8374_s1 + $0x378] sm:$0xff] }
 0x3b9   : > { %v5116_v1 = vmul.f32 %v5109_v0, %v5097_v14  ;;  %v5117_v23 = vmul.f32 %v5113_v36, %v5098_v62  ;;  %v5118_v28 = vmul.f32 %v5109_v0, %v5099_v9  ;;  %v5142_v15 = vunpack.c.l.bf16 %v7580_v59 }
 0x3ba   : > { %v5128_v10 = vadd.f32 %v5120_v63, %v5087_v38  ;;  %v5129_v3 = vadd.f32 %v5121_v30, %v5088_v32  ;;  %v5130_v33 = vadd.f32 %v5122_v53, %v5089_v31  ;;  %v5131_v6 = vadd.f32 %v5123_v56, %v5090_v55 }
 0x3bb   : > { %v5143_v26 = vunpack.c.h.bf16 %v7580_v59  ;;  %v5144_v46 = vunpack.c.l.bf16 %v7581_v40  ;;  %v5145_v42 = vunpack.c.h.bf16 %v7581_v40  ;;  %v5139_v47 = vunpack.c.h.bf16 %v7578_v50 }
 0x3bc   : > { %v5140_v24 = vunpack.c.l.bf16 %v10330_v49  ;;  %v5150_v11 = vrot.slane %v5132_v34, %v8395_v57  ;;  %v5154_v13 = vrot.slane %v5132_v34, %v8397_v58  ;;  %v5119_v14 = vmul.f32 %v5113_v36, %v5100_v27  ;;  %v7586_v36 = vld [vmem:[%s8374_s1 + $0x380] sm:$0xff] }
 0x3bd   : > { %v5124_v62 = vadd.f32 %v5116_v1, %v5083_v12  ;;  %v5125_v9 = vadd.f32 %v5117_v23, %v5084_v21  ;;  %v5126_v18 = vadd.f32 %v5118_v28, %v5085_v44  ;;  %v5179_v16 = vunpack.c.l.bf16 %v7582_v52 }
 0x3be   : > { %v5180_v60 = vunpack.c.h.bf16 %v7582_v52  ;;  %v5181_v19 = vunpack.c.l.bf16 %v10334_v45  ;;  %v5183_v22 = vunpack.c.l.bf16 %v7584_v8  ;;  %v5161_v54 = vmul.f32 %v5150_v11, %v5142_v15 }
 0x3bf   : > { %v5162_v20 = vmul.f32 %v5154_v13, %v5143_v26  ;;  %v5163_v17 = vmul.f32 %v5150_v11, %v5144_v46  ;;  %v5164_v4 = vmul.f32 %v5154_v13, %v5145_v42  ;;  %v5157_v2 = vmul.f32 %v5150_v11, %v5138_v5  ;;  %v7588_v5 = vld [vmem:[%s8374_s1 + $0x390] sm:$0xff] }
 0x3c0   : > { %v5158_v38 = vmul.f32 %v5154_v13, %v5139_v47  ;;  %v5159_v32 = vmul.f32 %v5150_v11, %v5140_v24  ;;  %v5184_v31 = vunpack.c.h.bf16 %v7584_v8  ;;  %v5169_v55 = vadd.f32 %v5161_v54, %v5128_v10  ;;  %v7589_v10 = vld [vmem:[%s8374_s1 + $0x398] sm:$0xff] }
 0x3c1   : > { %v5170_v7 = vadd.f32 %v5162_v20, %v5129_v3  ;;  %v5171_v25 = vadd.f32 %v5163_v17, %v5130_v33  ;;  %v5172_v0 = vadd.f32 %v5164_v4, %v5131_v6  ;;  %v5185_v27 = vunpack.c.l.bf16 %v7585_v29  ;;  %v5214_v33 = vld [vmem:[#allocation2 + $0x34] ss:$8 sm:$0x3]  ;;  %v10355_v6 = vld [vmem:[%s8374_s1 + $0x388] sm:$0xff] }
 0x3c2   : > { %v5186_v50 = vunpack.c.h.bf16 %v7585_v29  ;;  %v5191_v12 = vrot.slane %v5173_v48, %v8395_v57  ;;  %v10345_v21 = vrot.slane %v5173_v48, %v8397_v58  ;;  %v5127_v44 = vadd.f32 %v5119_v14, %v5086_v61  ;;  %v10359_v14 = vld [vmem:[%s8374_s1 + $0x3a8] sm:$0xff] }
 0x3c3   : > { %v5141_v63 = vunpack.c.h.bf16 %v10330_v49  ;;  %v5182_v30 = vunpack.c.h.bf16 %v10334_v45  ;;  %v5165_v53 = vadd.f32 %v5157_v2, %v5124_v62  ;;  %v5166_v56 = vadd.f32 %v5158_v38, %v5125_v9  ;;  %v7590_v45 = vld [vmem:[%s8374_s1 + $0x3a0] sm:$0xff]  ;;  %v7592_v62 = vld [vmem:[%s8374_s1 + $0x3b0] sm:$0xff] }
 0x3c4   : > { %v5167_v59 = vadd.f32 %v5159_v32, %v5126_v18  ;;  %v5220_v40 = vunpack.c.l.bf16 %v7586_v36  ;;  %v5202_v1 = vmul.f32 %v5191_v12, %v5183_v22  ;;  %v5203_v23 = vmul.f32 %v10345_v21, %v5184_v31 }
 0x3c5   : > { %v5204_v28 = vmul.f32 %v5191_v12, %v5185_v27  ;;  %v5205_v34 = vmul.f32 %v10345_v21, %v5186_v50  ;;  %v5198_v61 = vmul.f32 %v5191_v12, %v5179_v16  ;;  %v5199_v49 = vmul.f32 %v10345_v21, %v5180_v60 }
 0x3c6   : > { %v5200_v3 = vmul.f32 %v5191_v12, %v5181_v19  ;;  %v5221_v15 = vunpack.c.h.bf16 %v7586_v36  ;;  %v5210_v26 = vadd.f32 %v5202_v1, %v5169_v55  ;;  %v5211_v46 = vadd.f32 %v5203_v23, %v5170_v7  ;;  %v5255_v55 = vld [vmem:[#allocation2 + $0x35] ss:$8 sm:$0x3] }
 0x3c7   : > { %v5212_v42 = vadd.f32 %v5204_v28, %v5171_v25  ;;  %v5213_v52 = vadd.f32 %v5205_v34, %v5172_v0  ;;  %v5224_v8 = vunpack.c.l.bf16 %v7588_v5  ;;  %v5225_v47 = vunpack.c.h.bf16 %v7588_v5  ;;  %v7593_v7 = vld [vmem:[%s8374_s1 + $0x3b8] sm:$0xff] }
 0x3c8   : > { %v5226_v24 = vunpack.c.l.bf16 %v7589_v10  ;;  %v5227_v11 = vunpack.c.h.bf16 %v7589_v10  ;;  %v5206_v9 = vadd.f32 %v5198_v61, %v5165_v53  ;;  %v5222_v18 = vunpack.c.l.bf16 %v10355_v6  ;;  %v7594_v53 = vld [vmem:[%s8374_s1 + $0x3c0] sm:$0xff]  ;;  %v10380_v10 = vld [vmem:[%s8374_s1 + $0x3c8] sm:$0xff] }
 0x3c9   : > { %v5232_v16 = vrot.slane %v5214_v33, %v8395_v57  ;;  %v10365_v60 = vrot.slane %v5214_v33, %v8397_v58  ;;  %v5160_v19 = vmul.f32 %v5154_v13, %v5141_v63  ;;  %v5207_v22 = vadd.f32 %v5199_v49, %v5166_v56 }
 0x3ca   : > { %v5208_v54 = vadd.f32 %v5200_v3, %v5167_v59  ;;  %v5261_v20 = vunpack.c.l.bf16 %v7590_v45  ;;  %v5262_v4 = vunpack.c.h.bf16 %v7590_v45  ;;  %v5263_v48 = vunpack.c.l.bf16 %v10359_v14  ;;  %v5296_v45 = vld [vmem:[#allocation2 + $0x36] ss:$8 sm:$0x3] }
 0x3cb   : > { %v5239_v17 = vmul.f32 %v5232_v16, %v5220_v40  ;;  %v5265_v29 = vunpack.c.l.bf16 %v7592_v62  ;;  %v5243_v2 = vmul.f32 %v5232_v16, %v5224_v8  ;;  %v5244_v38 = vmul.f32 %v10365_v60, %v5225_v47 }
 0x3cc   : > { %v5245_v32 = vmul.f32 %v5232_v16, %v5226_v24  ;;  %v5246_v31 = vmul.f32 %v10365_v60, %v5227_v11  ;;  %v5240_v25 = vmul.f32 %v10365_v60, %v5221_v15  ;;  %v5241_v13 = vmul.f32 %v5232_v16, %v5222_v18  ;;  %v10390_v18 = vld [vmem:[%s8374_s1 + $0x3e8] sm:$0xff] }
 0x3cd   : > { %v5247_v0 = vadd.f32 %v5239_v17, %v5206_v9  ;;  %v5266_v36 = vunpack.c.h.bf16 %v7592_v62  ;;  %v5251_v27 = vadd.f32 %v5243_v2, %v5210_v26  ;;  %v5252_v50 = vadd.f32 %v5244_v38, %v5211_v46  ;;  %v7598_v9 = vld [vmem:[%s8374_s1 + $0x3e0] sm:$0xff] }
 0x3ce   : > { %v5253_v12 = vadd.f32 %v5245_v32, %v5212_v42  ;;  %v5254_v63 = vadd.f32 %v5246_v31, %v5213_v52  ;;  %v5267_v56 = vunpack.c.l.bf16 %v7593_v7  ;;  %v5268_v59 = vunpack.c.h.bf16 %v7593_v7  ;;  %v7597_v52 = vld [vmem:[%s8374_s1 + $0x3d8] sm:$0xff] }
 0x3cf   : > { %v5273_v40 = vrot.slane %v5255_v55, %v8395_v57  ;;  %v10375_v1 = vrot.slane %v5255_v55, %v8397_v58  ;;  %v5168_v23 = vadd.f32 %v5160_v19, %v5127_v44  ;;  %v5201_v28 = vmul.f32 %v10345_v21, %v5182_v30  ;;  %v7596_v44 = vld [vmem:[%s8374_s1 + $0x3d0] sm:$0xff] }
 0x3d0   : > { %v5223_v34 = vunpack.c.h.bf16 %v10355_v6  ;;  %v5248_v5 = vadd.f32 %v5240_v25, %v5207_v22  ;;  %v5249_v61 = vadd.f32 %v5241_v13, %v5208_v54  ;;  %v5302_v3 = vunpack.c.l.bf16 %v7594_v53 }
 0x3d1   : > { %v5280_v49 = vmul.f32 %v5273_v40, %v5261_v20  ;;  %v5303_v33 = vunpack.c.h.bf16 %v7594_v53  ;;  %v5284_v15 = vmul.f32 %v5273_v40, %v5265_v29  ;;  %v5285_v26 = vmul.f32 %v10375_v1, %v5266_v36  ;;  %v7600_v20 = vld [vmem:[%s8374_s1 + $0x3f0] sm:$0xff] }
 0x3d2   : > { %v5286_v46 = vmul.f32 %v5273_v40, %v5267_v56  ;;  %v5287_v42 = vmul.f32 %v10375_v1, %v5268_v59  ;;  %v5281_v21 = vmul.f32 %v10375_v1, %v5262_v4  ;;  %v5282_v30 = vmul.f32 %v5273_v40, %v5263_v48 }
 0x3d3   : > { %v5288_v6 = vadd.f32 %v5280_v49, %v5247_v0  ;;  %v5304_v8 = vunpack.c.l.bf16 %v10380_v10  ;;  %v5292_v47 = vadd.f32 %v5284_v15, %v5251_v27  ;;  %v5293_v24 = vadd.f32 %v5285_v26, %v5252_v50 }
 0x3d4   : > { %v5294_v11 = vadd.f32 %v5286_v46, %v5253_v12  ;;  %v5295_v62 = vadd.f32 %v5287_v42, %v5254_v63  ;;  %v5306_v16 = vunpack.c.l.bf16 %v7596_v44  ;;  %v5307_v19 = vunpack.c.h.bf16 %v7596_v44  ;;  %v5337_v12 = vld [vmem:[#allocation2 + $0x37] ss:$8 sm:$0x3] }
 0x3d5   : > { %v5308_v22 = vunpack.c.l.bf16 %v7597_v52  ;;  %v5309_v54 = vunpack.c.h.bf16 %v7597_v52  ;;  %v5289_v17 = vadd.f32 %v5281_v21, %v5248_v5  ;;  %v5290_v29 = vadd.f32 %v5282_v30, %v5249_v61  ;;  %v7601_v63 = vld [vmem:[%s8374_s1 + $0x3f8] sm:$0xff]  ;;  %s898_s1 = scalar_lea.vmem [#allocation13], %s7280_s14 }
 0x3d6   : > { %v5314_v4 = vrot.slane %v5296_v45, %v8395_v57  ;;  %v5318_v48 = vrot.slane %v5296_v45, %v8397_v58  ;;  %v5209_v2 = vadd.f32 %v5201_v28, %v5168_v23  ;;  %v5343_v38 = vunpack.c.l.bf16 %v7598_v9  ;;  %s7041_s3 = sshll.u32 %s898_s1, 4  ;;  %s7042_s3 = int_to_ptr.vmem [resolvable:$true] %s7041_s3 }
 0x3d7   : > { %v5344_v32 = vunpack.c.h.bf16 %v7598_v9  ;;  %v5345_v31 = vunpack.c.l.bf16 %v10390_v18  ;;  %v5347_v13 = vunpack.c.l.bf16 %v7600_v20  ;;  %v5348_v40 = vunpack.c.h.bf16 %v7600_v20  ;;  %s7979_s17 = scalar_lea.vmem %s7042_s3, 128 }
 0x3d8   : > { %v5321_v55 = vmul.f32 %v5314_v4, %v5302_v3  ;;  %v5322_v7 = vmul.f32 %v5318_v48, %v5303_v33  ;;  %v5323_v25 = vmul.f32 %v5314_v4, %v5304_v8  ;;  %v5325_v0 = vmul.f32 %v5314_v4, %v5306_v16  ;;  %p7980_p6 = scmp.ne.s32.totalorder %s7042_s3, %s7979_s17 }
 0x3d9   : > { %v5326_v36 = vmul.f32 %v5318_v48, %v5307_v19  ;;  %v5327_v27 = vmul.f32 %v5314_v4, %v5308_v22  ;;  %v5328_v50 = vmul.f32 %v5318_v48, %v5309_v54  ;;  %v5349_v49 = vunpack.c.l.bf16 %v7601_v63 }
 0x3da   : > { %v5329_v53 = vadd.f32 %v5321_v55, %v5288_v6  ;;  %v5330_v56 = vadd.f32 %v5322_v7, %v5289_v17  ;;  %v5331_v59 = vadd.f32 %v5323_v25, %v5290_v29  ;;  %v5333_v5 = vadd.f32 %v5325_v0, %v5292_v47  ;;  %p7981_p3 = pnand %p7980_p6, %p11316_p2 }
 0x3db   : > { %v5334_v23 = vadd.f32 %v5326_v36, %v5293_v24  ;;  %v5335_v28 = vadd.f32 %v5327_v27, %v5294_v11  ;;  %v5336_v61 = vadd.f32 %v5328_v50, %v5295_v62  ;;  %v5350_v15 = vunpack.c.h.bf16 %v7601_v63 }
 0x3dc   : > { %v5355_v3 = vrot.slane %v5337_v12, %v8395_v57  ;;  %v5359_v33 = vrot.slane %v5337_v12, %v8397_v58  ;;  %v5264_v26 = vunpack.c.h.bf16 %v10359_v14  ;;  %v5242_v46 = vmul.f32 %v10365_v60, %v5223_v34  ;;  %p7982_p4 = pneg %p7981_p3 }
 0x3dd   : > { %v5305_v16 = vunpack.c.h.bf16 %v10380_v10 }
 0x3de   : > { %v5362_v42 = vmul.f32 %v5355_v3, %v5343_v38  ;;  %v5363_v44 = vmul.f32 %v5359_v33, %v5344_v32  ;;  %v5364_v52 = vmul.f32 %v5355_v3, %v5345_v31  ;;  %v5366_v21 = vmul.f32 %v5355_v3, %v5347_v13 }
 0x3df   : > { %v5367_v30 = vmul.f32 %v5359_v33, %v5348_v40  ;;  %v5368_v6 = vmul.f32 %v5355_v3, %v5349_v49  ;;  %v5369_v45 = vmul.f32 %v5359_v33, %v5350_v15  ;;  %v5250_v8 = vadd.f32 %v5242_v46, %v5209_v2 }
 0x3e0   : > { %v10401_v47 = vadd.f32 %v5362_v42, %v5329_v53  ;;  %v10403_v24 = vadd.f32 %v5363_v44, %v5330_v56  ;;  %v10405_v11 = vadd.f32 %v5364_v52, %v5331_v59  ;;  %v10407_v62 = vadd.f32 %v5366_v21, %v5333_v5 }
 0x3e1   : > { %v10409_v9 = vadd.f32 %v5367_v30, %v5334_v23  ;;  %v10411_v14 = vadd.f32 %v5368_v6, %v5335_v28  ;;  %v10413_v60 = vadd.f32 %v5369_v45, %v5336_v61  ;;  %v5283_v34 = vmul.f32 %v10375_v1, %v5264_v26 }
 0x3e2   : > { %v5378_v19 = vand.u32 2147483647, %v10401_v47  ;;  %v5381_v22 = vand.u32 2139095040, %v10401_v47  ;;  %v5482_v54 = vand.u32 2147483647, %v10403_v24  ;;  %v5485_v20 = vand.u32 2139095040, %v10403_v24 }
 0x3e3   : > { %v5291_v17 = vadd.f32 %v5283_v34, %v5250_v8  ;;  %v5589_v1 = vand.u32 2139095040, %v10405_v11  ;;  %v5324_v10 = vmul.f32 %v5318_v48, %v5305_v16  ;;  %v5346_v32 = vunpack.c.h.bf16 %v10390_v18 }
 0x3e4   : > { %v5382_v29 = vshrl.u32 %v5381_v22, 23  ;;  %v5385_v4 = vand.u32 8388607, %v5378_v19  ;;  %v5486_v2 = vshrl.u32 %v5485_v20, 23  ;;  %v5489_v38 = vand.u32 8388607, %v5482_v54 }
 0x3e5   : > { %v5590_v7 = vshrl.u32 %v5589_v1, 23  ;;  %v5332_v25 = vadd.f32 %v5324_v10, %v5291_v17  ;;  %v5586_v50 = vand.u32 2147483647, %v10405_v11  ;;  %v5365_v63 = vmul.f32 %v5359_v33, %v5346_v32 }
 0x3e6   : > { %v7602_v31 = vadd.s32 4294967169, %v5382_v29  ;;  %v7606_v55 = vadd.s32 4294967169, %v5486_v2  ;;  %v5386_v13 = vor.u32 8388608, %v5385_v4  ;;  %v5490_v36 = vor.u32 8388608, %v5489_v38 }
 0x3e7   : > { %v7610_v12 = vadd.s32 4294967169, %v5590_v7  ;;  %v10428_v56 = vadd.f32 %v5365_v63, %v5332_v25  ;;  %v10436_v23 = vand.u32 8388607, %v5586_v50  ;;  %vm5380_vm13 = vcmp.lt.s32.totalorder %v10401_v47, 0 }
 0x3e8   : > { %v5388_v0 = vadd.s32 1, %v7602_v31  ;;  %v5492_v27 = vadd.s32 1, %v7606_v55  ;;  %v10430_v40 = vshll.u32 %v5386_v13, 8  ;;  %v10432_v5 = vshll.u32 %v5490_v36, 8 }
 0x3e9   : > { %v10438_v28 = vadd.s32 1, %v7610_v12  ;;  %vm10538_vm14 = vcmp.le.f32.partialorder %v5378_v19, 0.7853982 }
 0x3ea   : > { %vm5389_vm1 = vcmp.gt.s32.totalorder %v5388_v0, 0  ;;  %vm5493_vm3 = vcmp.gt.s32.totalorder %v5492_v27, 0 }
 0x3eb   : > { %v5390_v53 = vsel %vm5389_vm1, %v5388_v0, 0  ;;  %v5494_v18 = vsel %vm5493_vm3, %v5492_v27, 0  ;;  %vm5597_vm6 = vcmp.gt.s32.totalorder %v10438_v28, 0 }
 0x3ec   : > { %v5391_v48 = vshrl.u32 %v5390_v53, 5  ;;  %v5392_v59 = vand.u32 31, %v5390_v53  ;;  %v10441_v15 = vshrl.u32 %v5494_v18, 5  ;;  %v5496_v3 = vand.u32 31, %v5494_v18 }
 0x3ee   : > { %v5393_v61 = vsub.s32 32, %v5392_v59  ;;  %v5395_v49 = vshll.u32 %v8054_v35, %v5392_v59  ;;  %v5398_v33 = vshll.u32 %v8055_v37, %v5392_v59  ;;  %v5401_v26 = vshll.u32 %v8056_v39, %v5392_v59 }
 0x3ef   : > { %v5404_v46 = vshll.u32 %v8057_v41, %v5392_v59  ;;  %v5407_v42 = vshll.u32 %v8058_v43, %v5392_v59  ;;  %vm5410_vm15 = vcmp.lt.s32.totalorder %v5391_v48, 1  ;;  %vm5411_vm2 = vcmp.lt.s32.totalorder %v5391_v48, 2 }
 0x3f0   : > { %v5396_v44 = vshrl.u32 %v8055_v37, %v5393_v61  ;;  %v5399_v52 = vshrl.u32 %v8056_v39, %v5393_v61  ;;  %v5402_v21 = vshrl.u32 %v8057_v41, %v5393_v61  ;;  %v5394_v30 = vshrl.u32 %v8054_v35, %v5393_v61 }
 0x3f1   : > { %v5405_v6 = vshrl.u32 %v8058_v43, %v5393_v61  ;;  %v5408_v45 = vshrl.u32 %v8059_v51, %v5393_v61  ;;  %v5497_v22 = vsub.s32 32, %v5496_v3  ;;  %vm5412_vm4 = vcmp.lt.s32.totalorder %v5391_v48, 3 }
 0x3f2   : > { %v5397_v8 = vor.u32 %v5396_v44, %v5395_v49  ;;  %v5400_v34 = vor.u32 %v5399_v52, %v5398_v33  ;;  %v5403_v16 = vor.u32 %v5402_v21, %v5401_v26  ;;  %vm5413_vm5 = vcmp.lt.s32.totalorder %v5391_v48, 4 }
 0x3f3   : > { %v5406_v20 = vor.u32 %v5405_v6, %v5404_v46  ;;  %v5409_v17 = vor.u32 %v5408_v45, %v5407_v42  ;;  %v5499_v31 = vshll.u32 %v8054_v35, %v5496_v3  ;;  %v5500_v25 = vshrl.u32 %v8055_v37, %v5497_v22 }
 0x3f4   : > { %v5414_v29 = vsel %vm5410_vm15, %v5394_v30, %v5397_v8  ;;  %v5415_v4 = vsel %vm5413_vm5, %v5403_v16, 2102212464  ;;  %v5418_v2 = vsel %vm5410_vm15, %v5397_v8, %v5400_v34  ;;  %v5422_v38 = vsel %vm5410_vm15, %v5400_v34, %v5403_v16 }
 0x3f5   : > { %v5416_v1 = vsel %vm5412_vm4, %v5400_v34, %v5415_v4  ;;  %v5419_v10 = vsel %vm5413_vm5, %v5406_v20, 920167782  ;;  %v5423_v32 = vsel %vm5413_vm5, %v5409_v17, 1326507024  ;;  %v5502_v13 = vshll.u32 %v8055_v37, %v5496_v3 }
 0x3f6   : > { %v5420_v55 = vsel %vm5412_vm4, %v5403_v16, %v5419_v10  ;;  %v5424_v7 = vsel %vm5412_vm4, %v5406_v20, %v5423_v32  ;;  %v5417_v0 = vsel %vm5411_vm2, %v5414_v29, %v5416_v1  ;;  %v5503_v12 = vshrl.u32 %v8056_v39, %v5497_v22 }
 0x3f7   : > { %v5421_v36 = vsel %vm5411_vm2, %v5418_v2, %v5420_v55  ;;  %v5425_v27 = vsel %vm5411_vm2, %v5422_v38, %v5424_v7  ;;  %v5501_v61 = vor.u32 %v5500_v25, %v5499_v31  ;;  %v5505_v33 = vshll.u32 %v8056_v39, %v5496_v3 }
 0x3f8   : > { %v10465_v63 = vmul.u32.u64.low %v10430_v40, %v5425_v27  ;;  %v10466_v53 = vmul.u32.u64.high %v10430_v40, %v5425_v27, %v10465_v63  ;;  %v10469_v59 = vmul.u32.u64.low %v10430_v40, %v5421_v36  ;;  %v10470_v18 = vmul.u32.u64.high %v10430_v40, %v5421_v36, %v10469_v59 }
 0x3f9   : > { %v5504_v49 = vor.u32 %v5503_v12, %v5502_v13  ;;  %v5506_v26 = vshrl.u32 %v8057_v41, %v5497_v22  ;;  %v5498_v46 = vshrl.u32 %v8054_v35, %v5497_v22  ;;  %v5508_v48 = vshll.u32 %v8057_v41, %v5496_v3 }
 0x3fa   : > { %v5509_v42 = vshrl.u32 %v8058_v43, %v5497_v22  ;;  %v5512_v44 = vshrl.u32 %v8059_v51, %v5497_v22  ;;  %v5433_v52 = vmul.u32 %v10430_v40, %v5417_v0  ;;  %v5511_v30 = vshll.u32 %v8058_v43, %v5496_v3 }
 0x3fb   : > { %v5507_v21 = vor.u32 %v5506_v26, %v5505_v33  ;;  %vm5514_vm8 = vcmp.lt.s32.totalorder %v10441_v15, 1  ;;  %vm5435_vm9 = vc.u32 %v10466_v53, %v10469_v59  ;;  %v5436_v6 = vadd.s32 1, %v10470_v18 }
 0x3fc   : > { %v5510_v45 = vor.u32 %v5509_v42, %v5508_v48  ;;  %vm5515_vm10 = vcmp.lt.s32.totalorder %v10441_v15, 2  ;;  %v5513_v8 = vor.u32 %v5512_v44, %v5511_v30  ;;  %vm5516_vm7 = vcmp.lt.s32.totalorder %v10441_v15, 3 }
 0x3fd   : > { %vm5517_vm11 = vcmp.lt.s32.totalorder %v10441_v15, 4  ;;  %v5522_v34 = vsel %vm5514_vm8, %v5501_v61, %v5504_v49  ;;  %v5437_v40 = vsel %vm5435_vm9, %v5436_v6, %v10470_v18  ;;  %v5526_v3 = vsel %vm5514_vm8, %v5504_v49, %v5507_v21 }
 0x3fe   : > { %v5519_v16 = vsel %vm5517_vm11, %v5507_v21, 2102212464  ;;  %v5523_v22 = vsel %vm5517_vm11, %v5510_v45, 920167782  ;;  %v5438_v20 = vadd.s32 %v5437_v40, %v5433_v52  ;;  %v5518_v17 = vsel %vm5514_vm8, %v5498_v46, %v5501_v61 }
 0x3ff   : > { %v5524_v29 = vsel %vm5516_vm7, %v5507_v21, %v5523_v22  ;;  %v5527_v4 = vsel %vm5517_vm11, %v5513_v8, 1326507024  ;;  %v5520_v2 = vsel %vm5516_vm7, %v5504_v49, %v5519_v16  ;;  %v5598_v10 = vsel %vm5597_vm6, %v10438_v28, 0 }
 0x400   : > { %v5525_v38 = vsel %vm5515_vm10, %v5522_v34, %v5524_v29  ;;  %v5528_v1 = vsel %vm5516_vm7, %v5510_v45, %v5527_v4  ;;  %v5439_v32 = vadd.s32 536870912, %v5438_v20  ;;  %v5693_v0 = vand.u32 2139095040, %v10428_v56 }
 0x401   : > { %v5529_v31 = vsel %vm5515_vm10, %v5526_v3, %v5528_v1  ;;  %v10495_v55 = vmul.u32.u64.low %v10432_v5, %v5525_v38  ;;  %v10496_v7 = vmul.u32.u64.high %v10432_v5, %v5525_v38, %v10495_v55  ;;  %v5521_v27 = vsel %vm5515_vm10, %v5518_v17, %v5520_v2 }
 0x402   : > { %v10500_v25 = vmul.u32.u64.low %v10432_v5, %v5529_v31  ;;  %v10501_v13 = vmul.u32.u64.high %v10432_v5, %v5529_v31, %v10500_v25  ;;  %v5440_v36 = vshrl.u32 %v5439_v32, 30  ;;  %v5600_v28 = vand.u32 31, %v5598_v10 }
 0x403   : > { %v5690_v12 = vand.u32 2147483647, %v10428_v56  ;;  %v5594_v63 = vor.u32 8388608, %v10436_v23  ;;  %v5540_v61 = vadd.s32 1, %v10496_v7  ;;  %v5537_v33 = vmul.u32 %v10432_v5, %v5521_v27 }
 0x404   : > { %v5441_v18 = vshll.u32 %v5440_v36, 30  ;;  %v5601_v49 = vsub.s32 32, %v5600_v28  ;;  %vm5539_vm12 = vc.u32 %v10501_v13, %v10495_v55  ;;  %v5694_v26 = vshrl.u32 %v5693_v0, 23 }
 0x405   : > { %v5541_v15 = vsel %vm5539_vm12, %v5540_v61, %v10496_v7  ;;  %v10518_v48 = vand.u32 8388607, %v5690_v12  ;;  %v5434_v23 = vadd.s32 %v10469_v59, %v10466_v53  ;;  %v10522_v5 = vshll.u32 %v5594_v63, 8 }
 0x406   : > { %v10513_v46 = vsub.s32 %v5438_v20, %v5441_v18  ;;  %v5542_v42 = vadd.s32 %v5541_v15, %v5537_v33  ;;  %v5604_v44 = vshrl.u32 %v8055_v37, %v5601_v49  ;;  %v10525_v21 = vshrl.u32 %v5598_v10, 5 }
 0x407   : > { %v5607_v30 = vshrl.u32 %v8056_v39, %v5601_v49  ;;  %v5610_v6 = vshrl.u32 %v8057_v41, %v5601_v49  ;;  %v5464_v45 = vsub.s32 4, %v5440_v36  ;;  %v5603_v34 = vshll.u32 %v8054_v35, %v5600_v28 }
 0x408   : > { %v5444_v52 = vsub.s32 0, %v10513_v46  ;;  %v5543_v8 = vadd.s32 536870912, %v5542_v42  ;;  %v7614_v40 = vadd.s32 4294967169, %v5694_v26  ;;  %v5606_v59 = vshll.u32 %v8055_v37, %v5600_v28 }
 0x409   : > { %v5609_v16 = vshll.u32 %v8056_v39, %v5600_v28  ;;  %v5613_v22 = vshrl.u32 %v8058_v43, %v5601_v49  ;;  %v5605_v20 = vor.u32 %v5604_v44, %v5603_v34  ;;  %v5612_v17 = vshll.u32 %v8057_v41, %v5600_v28 }
 0x40a   : > { %v7603_v53 = vmin.u32 %v5444_v52, %v10513_v46  ;;  %v5544_v3 = vshrl.u32 %v5543_v8, 30  ;;  %v5616_v29 = vshrl.u32 %v8059_v51, %v5601_v49  ;;  %v5608_v38 = vor.u32 %v5607_v30, %v5606_v59 }
 0x40b   : > { %v5611_v1 = vor.u32 %v5610_v6, %v5609_v16  ;;  %v5615_v10 = vshll.u32 %v8058_v43, %v5600_v28  ;;  %v5614_v31 = vor.u32 %v5613_v22, %v5612_v17  ;;  %vm5618_vm0 = vcmp.lt.s32.totalorder %v10525_v21, 1 }
 0x40c   : > { %v5446_v2 = vclz %v7603_v53  ;;  %v5545_v32 = vshll.u32 %v5544_v3, 30  ;;  %v5698_v7 = vor.u32 8388608, %v10518_v48  ;;  %vm5619_vm1 = vcmp.lt.s32.totalorder %v10525_v21, 2 }
 0x40d   : > { %v5617_v0 = vor.u32 %v5616_v29, %v5615_v10  ;;  %vm5621_vm3 = vcmp.lt.s32.totalorder %v10525_v21, 4  ;;  %v5465_v19 = vsel %vm5380_vm13, %v5464_v45, %v5440_v36  ;;  %vm5484_vm15 = vcmp.lt.s32.totalorder %v10403_v24, 0 }
 0x40e   : > { %v7604_v25 = vadd.s32 4294967294, %v5446_v2  ;;  %v10550_v27 = vsub.s32 %v5542_v42, %v5545_v32  ;;  %vm5620_vm2 = vcmp.lt.s32.totalorder %v10525_v21, 3  ;;  %v5627_v28 = vsel %vm5621_vm3, %v5614_v31, 920167782 }
 0x40f   : > { %v5602_v63 = vshrl.u32 %v8054_v35, %v5601_v49  ;;  %v5626_v18 = vsel %vm5618_vm0, %v5605_v20, %v5608_v38  ;;  %v5628_v61 = vsel %vm5620_vm2, %v5611_v1, %v5627_v28  ;;  %v5568_v26 = vsub.s32 4, %v5544_v3 }
 0x410   : > { %vm7605_vm4 = vcmp.lt.s32.totalorder %v7604_v25, 0  ;;  %v5548_v36 = vsub.s32 0, %v10550_v27  ;;  %v5630_v15 = vsel %vm5618_vm0, %v5608_v38, %v5611_v1  ;;  %vm10565_vm5 = vcmp.le.f32.partialorder %v5482_v54, 0.7853982 }
 0x411   : > { %v5449_v33 = vsel %vm7605_vm4, 0, %v7604_v25  ;;  %v5623_v49 = vsel %vm5621_vm3, %v5611_v1, 2102212464  ;;  %v5631_v30 = vsel %vm5621_vm3, %v5617_v0, 1326507024  ;;  %v5629_v8 = vsel %vm5619_vm1, %v5626_v18, %v5628_v61 }
 0x412   : > { %v5450_v42 = vsub.s32 32, %v5449_v33  ;;  %v5454_v44 = vsub.s32 4294967266, %v5449_v33  ;;  %v5451_v6 = vshll.u32 %v10513_v46, %v5449_v33  ;;  %v7607_v45 = vmin.u32 %v5548_v36, %v10550_v27 }
 0x413   : > { %v5632_v34 = vsel %vm5620_vm2, %v5614_v31, %v5631_v30  ;;  %v5700_v16 = vadd.s32 1, %v7614_v40  ;;  %v5467_v22 = vsel %vm10538_vm14, 0, %v5465_v19  ;;  %v5622_v46 = vsel %vm5618_vm0, %v5602_v63, %v5605_v20 }
 0x414   : > { %v5452_v54 = vshrl.u32 %v5434_v23, %v5450_v42  ;;  %v5455_v53 = vadd.s32 127, %v5454_v44  ;;  %v5633_v59 = vsel %vm5619_vm1, %v5630_v15, %v5632_v34  ;;  %v5550_v17 = vclz %v7607_v45 }
 0x415   : > { %v5624_v29 = vsel %vm5620_vm2, %v5608_v38, %v5623_v49  ;;  %v10588_v10 = vmul.u32.u64.low %v10522_v5, %v5633_v59  ;;  %v10589_v23 = vmul.u32.u64.high %v10522_v5, %v5633_v59, %v10588_v10  ;;  %vm5701_vm6 = vcmp.gt.s32.totalorder %v5700_v16, 0 }
 0x416   : > { %v5453_v2 = vor.u32 %v5452_v54, %v5451_v6  ;;  %v5456_v1 = vshll.u32 %v5455_v53, 23  ;;  %v7608_v32 = vadd.s32 4294967294, %v5550_v17  ;;  %v5538_v20 = vadd.s32 %v10495_v55, %v10501_v13 }
 0x417   : > { %v10592_v31 = vmul.u32.u64.low %v10522_v5, %v5629_v8  ;;  %v10593_v40 = vmul.u32.u64.high %v10522_v5, %v5629_v8, %v10592_v31  ;;  %v5569_v38 = vsel %vm5484_vm15, %v5568_v26, %v5544_v3  ;;  %v5702_v0 = vsel %vm5701_vm6, %v5700_v16, 0 }
 0x418   : > { %v5457_v25 = vor.u32 4788187, %v5456_v1  ;;  %v5471_v19 = vadd.s32 3, %v5467_v22  ;;  %vm7609_vm8 = vcmp.lt.s32.totalorder %v7608_v32, 0  ;;  %v5625_v28 = vsel %vm5619_vm1, %v5622_v46, %v5624_v29 }
 0x419   : > { %v5704_v63 = vand.u32 31, %v5702_v0  ;;  %v5460_v61 = vcvt.s32.f32 %v5453_v2  ;;  %v5553_v33 = vsel %vm7609_vm8, 0, %v7608_v32  ;;  %vm5643_vm9 = vc.u32 %v10589_v23, %v10592_v31 }
 0x41a   : > { %v5458_v18 = vand.u32 2147483647, %v5457_v25  ;;  %v5554_v36 = vsub.s32 32, %v5553_v33  ;;  %v5558_v15 = vsub.s32 4294967266, %v5553_v33  ;;  %v5571_v55 = vsel %vm10565_vm5, 0, %v5569_v38 }
 0x41b   : > { %v5644_v13 = vadd.s32 1, %v10593_v40  ;;  %v5641_v26 = vmul.u32 %v10522_v5, %v5625_v28  ;;  %v10608_v42 = vshrl.u32 %v5702_v0, 5  ;;  %v5705_v21 = vsub.s32 32, %v5704_v63 }
 0x41c   : > { %v5461_v3 = vmul.f32 %v5460_v61, %v5458_v18  ;;  %v5555_v44 = vshll.u32 %v10550_v27, %v5553_v33  ;;  %v5556_v49 = vshrl.u32 %v5538_v20, %v5554_v36  ;;  %v5559_v30 = vadd.s32 127, %v5558_v15 }
 0x41d   : > { %v5645_v6 = vsel %vm5643_vm9, %v5644_v13, %v10593_v40  ;;  %v5707_v34 = vshll.u32 %v8054_v35, %v5704_v63  ;;  %v5708_v54 = vshrl.u32 %v8055_v37, %v5705_v21  ;;  %v5710_v16 = vshll.u32 %v8055_v37, %v5704_v63 }
 0x41e   : > { %v5462_v45 = vxor.u32 2147483648, %v5461_v3  ;;  %v5646_v8 = vadd.s32 %v5645_v6, %v5641_v26  ;;  %v5557_v53 = vor.u32 %v5556_v49, %v5555_v44  ;;  %v5560_v59 = vshll.u32 %v5559_v30, 23 }
 0x41f   : > { %v5711_v5 = vshrl.u32 %v8056_v39, %v5705_v21  ;;  %v5713_v17 = vshll.u32 %v8056_v39, %v5704_v63  ;;  %v5714_v46 = vshrl.u32 %v8057_v41, %v5705_v21  ;;  %v5709_v1 = vor.u32 %v5708_v54, %v5707_v34 }
 0x420   : > { %v5463_v22 = vsel %vm5380_vm13, %v5462_v45, %v5461_v3  ;;  %v5647_v27 = vadd.s32 536870912, %v5646_v8  ;;  %v5561_v2 = vor.u32 4788187, %v5560_v59  ;;  %v5716_v10 = vshll.u32 %v8057_v41, %v5704_v63 }
 0x421   : > { %v5466_v29 = vsel %vm10538_vm14, %v10401_v47, %v5463_v22  ;;  %v5564_v32 = vcvt.s32.f32 %v5557_v53  ;;  %v5717_v25 = vshrl.u32 %v8058_v43, %v5705_v21  ;;  %v5712_v38 = vor.u32 %v5711_v5, %v5710_v16 }
 0x422   : > { %7891 = vcosq.f32 %v5466_v29  ;;  %v5648_v40 = vshrl.u32 %v5647_v27, 30  ;;  %v5562_v20 = vand.u32 2147483647, %v5561_v2  ;;  %v5720_v0 = vshrl.u32 %v8059_v51, %v5705_v21 }
 0x423   : > { %7893 = vsinq.f32 %v5466_v29  ;;  %v10626_v28 = vand.u32 3, %v5471_v19  ;;  %v5718_v61 = vor.u32 %v5717_v25, %v5716_v10  ;;  %v5575_v33 = vadd.s32 3, %v5571_v55 }
 0x424   : > { %v5649_v18 = vshll.u32 %v5648_v40, 30  ;;  %v5565_v4 = vmul.f32 %v5564_v32, %v5562_v20  ;;  %vm5588_vm10 = vcmp.lt.s32.totalorder %v10405_v11, 0  ;;  %v5715_v36 = vor.u32 %v5714_v46, %v5713_v17 }
 0x425   : > { %v5719_v15 = vshll.u32 %v8058_v43, %v5704_v63  ;;  %v5706_v3 = vshrl.u32 %v8054_v35, %v5705_v21  ;;  %vm5722_vm7 = vcmp.lt.s32.totalorder %v10608_v42, 1  ;;  %v10636_v26 = vshll.u32 %v5698_v7, 8 }
 0x426   : > { %v10630_v13 = vsub.s32 %v5646_v8, %v5649_v18  ;;  %v5566_v19 = vxor.u32 2147483648, %v5565_v4  ;;  %vm5725_vm11 = vcmp.lt.s32.totalorder %v10608_v42, 4  ;;  %v5730_v55 = vsel %vm5722_vm7, %v5709_v1, %v5712_v38 }
 0x427   : > { %v5721_v44 = vor.u32 %v5720_v0, %v5719_v15  ;;  %vm10643_vm12 = vcmp.le.f32.partialorder %v5586_v50, 0.7853982  ;;  %v5672_v49 = vsub.s32 4, %v5648_v40  ;;  %vm5724_vm13 = vcmp.lt.s32.totalorder %v10608_v42, 3 }
 0x428   : > { %v5652_v21 = vsub.s32 0, %v10630_v13  ;;  %v5731_v48 = vsel %vm5725_vm11, %v5718_v61, 920167782  ;;  %v5567_v7 = vsel %vm5484_vm15, %v5566_v19, %v5565_v4  ;;  %vm5723_vm14 = vcmp.lt.s32.totalorder %v10608_v42, 2 }
 0x429   : > { %v5727_v30 = vsel %vm5725_vm11, %v5715_v36, 2102212464  ;;  %v5732_v50 = vsel %vm5724_vm13, %v5715_v36, %v5731_v48  ;;  %v5570_v6 = vsel %vm10565_vm5, %v10403_v24, %v5567_v7  ;;  %v5734_v34 = vsel %vm5722_vm7, %v5712_v38, %v5715_v36 }
 0x42a   : > { %v7611_v45 = vmin.u32 %v5652_v21, %v10630_v13  ;;  %v5733_v8 = vsel %vm5723_vm14, %v5730_v55, %v5732_v50  ;;  %7895 = vcosq.f32 %v5570_v6  ;;  %v5735_v54 = vsel %vm5725_vm11, %v5721_v44, 1326507024 }
 0x42b   : > { %v10669_v53 = vmul.u32.u64.low %v10636_v26, %v5733_v8  ;;  %v10670_v59 = vmul.u32.u64.high %v10636_v26, %v5733_v8, %v10669_v53  ;;  %vm5470_vm0 = vweird.f32 %v10401_v47  ;;  %7897 = vsinq.f32 %v5570_v6 }
 0x42c   : > { %v5654_v52 = vclz %v7611_v45  ;;  %v5726_v16 = vsel %vm5722_vm7, %v5706_v3, %v5709_v1  ;;  %v5728_v5 = vsel %vm5724_vm13, %v5712_v38, %v5727_v30  ;;  %vm5473_vm1 = vcmp.lt.s32.totalorder %v10626_v28, 2 }
 0x42d   : > { %vm5474_vm3 = vcmp.eq.s32.totalorder %v10626_v28, 0  ;;  %vm5477_vm15 = vcmp.eq.s32.totalorder %v10626_v28, 2  ;;  %v5736_v22 = vsel %vm5724_vm13, %v5718_v61, %v5735_v54  ;;  %v5673_v17 = vsel %vm5588_vm10, %v5672_v49, %v5648_v40 }
 0x42e   : > { %v7612_v27 = vadd.s32 4294967294, %v5654_v52  ;;  %v5737_v46 = vsel %vm5723_vm14, %v5734_v34, %v5736_v22  ;;  %v5797_v29 = vand.u32 2139095040, %v10407_v62  ;;  %v5576_v1 = vand.u32 3, %v5575_v33 }
 0x42f   : > { %v7892_v2 = vpop.eup %7891  ;;  %v5729_v10 = vsel %vm5723_vm14, %v5726_v16, %v5728_v5  ;;  %v10691_v32 = vmul.u32.u64.low %v10636_v26, %v5737_v46  ;;  %v10692_v25 = vmul.u32.u64.high %v10636_v26, %v5737_v46, %v10691_v32  ;;  %v5748_v0 = vadd.s32 1, %v10670_v59 }
 0x430   : > { %v7894_v20 = vpop.eup %7893  ;;  %v5478_v38 = vxor.u32 2147483648, %v7892_v2  ;;  %vm7613_vm2 = vcmp.lt.s32.totalorder %v7612_v27, 0  ;;  %v5798_v40 = vshrl.u32 %v5797_v29, 23  ;;  %v5642_v61 = vadd.s32 %v10592_v31, %v10589_v23 }
 0x431   : > { %v5475_v18 = vxor.u32 2147483648, %v7894_v20  ;;  %v5657_v4 = vsel %vm7613_vm2, 0, %v7612_v27  ;;  %v5675_v33 = vsel %vm10643_vm12, 0, %v5673_v17  ;;  %v5745_v3 = vmul.u32 %v10636_v26, %v5729_v10 }
 0x432   : > { %v5479_v42 = vsel %vm5477_vm15, %v5478_v38, %v7894_v20  ;;  %v5658_v36 = vsub.s32 32, %v5657_v4  ;;  %v5662_v15 = vsub.s32 4294967266, %v5657_v4  ;;  %v5659_v44 = vshll.u32 %v10630_v13, %v5657_v4 }
 0x433   : > { %v5476_v19 = vsel %vm5474_vm3, %v7892_v2, %v5475_v18  ;;  %vm5747_vm4 = vc.u32 %v10692_v25, %v10669_v53  ;;  %v7618_v23 = vadd.s32 4294967169, %v5798_v40  ;;  %v5794_v7 = vand.u32 2147483647, %v10407_v62 }
 0x434   : > { %v5480_v31 = vsel %vm5473_vm1, %v5476_v19, %v5479_v42  ;;  %v5660_v55 = vshrl.u32 %v5642_v61, %v5658_v36  ;;  %v5663_v21 = vadd.s32 127, %v5662_v15  ;;  %v5749_v49 = vsel %vm5747_vm4, %v5748_v0, %v10670_v59 }
 0x435   : > { %v5481_v48 = vsel %vm5470_vm0, nan, %v5480_v31  ;;  %v5750_v26 = vadd.s32 %v5749_v49, %v5745_v3  ;;  %v5804_v30 = vadd.s32 1, %v7618_v23  ;;  %vm5574_vm5 = vweird.f32 %v10403_v24 }
 0x436   : > { %v5661_v50 = vor.u32 %v5660_v55, %v5659_v44  ;;  %v5664_v13 = vshll.u32 %v5663_v21, 23  ;;  %6210 = vst [vmem:[#allocation2] sm:$0xff] %v5481_v48  ;;  %vm5577_vm8 = vcmp.lt.s32.totalorder %v5576_v1, 2  ;;  %v5679_v8 = vadd.s32 3, %v5675_v33 }
 0x437   : > { %v5751_v6 = vadd.s32 536870912, %v5750_v26  ;;  %vm5805_vm6 = vcmp.gt.s32.totalorder %v5804_v30, 0  ;;  %v7896_v28 = vpop.eup %7895  ;;  %v5801_v52 = vand.u32 8388607, %v5794_v7  ;;  %vm5581_vm9 = vcmp.eq.s32.totalorder %v5576_v1, 2 }
 0x438   : > { %v5665_v45 = vor.u32 4788187, %v5664_v13  ;;  %v5806_v34 = vsel %vm5805_vm6, %v5804_v30, 0  ;;  %v7898_v54 = vpop.eup %7897  ;;  %v5582_v59 = vxor.u32 2147483648, %v7896_v28  ;;  %v5668_v27 = vcvt.s32.f32 %v5661_v50 }
 0x439   : > { %v10714_v47 = vshrl.u32 %v5751_v6, 30  ;;  %v5808_v16 = vand.u32 31, %v5806_v34  ;;  %v5579_v5 = vxor.u32 2147483648, %v7898_v54  ;;  %vm5578_vm7 = vcmp.eq.s32.totalorder %v5576_v1, 0 }
 0x43a   : > { %v5666_v22 = vand.u32 2147483647, %v5665_v45  ;;  %v5583_v17 = vsel %vm5581_vm9, %v5582_v59, %v7898_v54  ;;  %v10719_v32 = vand.u32 3, %v5679_v8  ;;  %v5898_v20 = vand.u32 2147483647, %v10409_v9 }
 0x43b   : > { %v5753_v46 = vshll.u32 %v10714_v47, 30  ;;  %v5809_v29 = vsub.s32 32, %v5808_v16  ;;  %v5580_v2 = vsel %vm5578_vm7, %v7896_v28, %v5579_v5  ;;  %v5746_v0 = vadd.s32 %v10669_v53, %v10692_v25 }
 0x43c   : > { %v5669_v10 = vmul.f32 %v5668_v27, %v5666_v22  ;;  %v5584_v38 = vsel %vm5577_vm8, %v5580_v2, %v5583_v17  ;;  %v5802_v18 = vor.u32 8388608, %v5801_v52  ;;  %v5901_v42 = vand.u32 2139095040, %v10409_v9 }
 0x43d   : > { %v10725_v40 = vsub.s32 %v5750_v26, %v5753_v46  ;;  %v5585_v61 = vsel %vm5574_vm5, nan, %v5584_v38  ;;  %v5812_v33 = vshrl.u32 %v8055_v37, %v5809_v29  ;;  %v5807_v15 = vshrl.u32 %v5806_v34, 5 }
 0x43e   : > { %v5670_v4 = vxor.u32 2147483648, %v5669_v10  ;;  %v5811_v1 = vshll.u32 %v8054_v35, %v5808_v16  ;;  %v5815_v3 = vshrl.u32 %v8056_v39, %v5809_v29  ;;  %6211 = vst [vmem:[#allocation2 + $0x8] sm:$0xff] %v5585_v61  ;;  %v5814_v25 = vshll.u32 %v8055_v37, %v5808_v16 }
 0x43f   : > { %v5756_v36 = vsub.s32 0, %v10725_v40  ;;  %v5817_v24 = vshll.u32 %v8056_v39, %v5808_v16  ;;  %v5818_v19 = vshrl.u32 %v8057_v41, %v5809_v29  ;;  %v5820_v55 = vshll.u32 %v8057_v41, %v5808_v16 }
 0x440   : > { %v5671_v53 = vsel %vm5588_vm10, %v5670_v4, %v5669_v10  ;;  %v5813_v31 = vor.u32 %v5812_v33, %v5811_v1  ;;  %v5816_v21 = vor.u32 %v5815_v3, %v5814_v25  ;;  %v5821_v48 = vshrl.u32 %v8058_v43, %v5809_v29 }
 0x441   : > { %v5674_v44 = vsel %vm10643_vm12, %v10405_v11, %v5671_v53  ;;  %v7615_v23 = vmin.u32 %v5756_v36, %v10725_v40  ;;  %v5819_v49 = vor.u32 %v5818_v19, %v5817_v24  ;;  %v10745_v30 = vshll.u32 %v5802_v18, 8 }
 0x442   : > { %7899 = vcosq.f32 %v5674_v44  ;;  %v5902_v50 = vshrl.u32 %v5901_v42, 23  ;;  %v5776_v13 = vsub.s32 4, %v10714_v47  ;;  %v5822_v6 = vor.u32 %v5821_v48, %v5820_v55 }
 0x443   : > { %7901 = vsinq.f32 %v5674_v44  ;;  %v5758_v26 = vclz %v7615_v23  ;;  %v5823_v63 = vshll.u32 %v8058_v43, %v5808_v16  ;;  %v5824_v28 = vshrl.u32 %v8059_v51, %v5809_v29 }
 0x444   : > { %v5810_v8 = vshrl.u32 %v8054_v35, %v5809_v29  ;;  %vm5826_vm10 = vcmp.lt.s32.totalorder %v5807_v15, 1  ;;  %vm5829_vm11 = vcmp.lt.s32.totalorder %v5807_v15, 4  ;;  %vm5827_vm12 = vcmp.lt.s32.totalorder %v5807_v15, 2 }
 0x445   : > { %v7616_v45 = vadd.s32 4294967294, %v5758_v26  ;;  %v5825_v34 = vor.u32 %v5824_v28, %v5823_v63  ;;  %v5831_v54 = vsel %vm5829_vm11, %v5819_v49, 2102212464  ;;  %v5834_v59 = vsel %vm5826_vm10, %v5813_v31, %v5816_v21 }
 0x446   : > { %vm5828_vm14 = vcmp.lt.s32.totalorder %v5807_v15, 3  ;;  %v5830_v52 = vsel %vm5826_vm10, %v5810_v8, %v5813_v31  ;;  %v5835_v5 = vsel %vm5829_vm11, %v5822_v6, 920167782  ;;  %v5838_v17 = vsel %vm5826_vm10, %v5816_v21, %v5819_v49 }
 0x447   : > { %vm7617_vm13 = vcmp.lt.s32.totalorder %v7616_v45, 0  ;;  %v5836_v27 = vsel %vm5828_vm14, %v5819_v49, %v5835_v5  ;;  %v5839_v46 = vsel %vm5829_vm11, %v5825_v34, 1326507024  ;;  %v5832_v10 = vsel %vm5828_vm14, %v5816_v21, %v5831_v54 }
 0x448   : > { %v5761_v22 = vsel %vm7617_vm13, 0, %v7616_v45  ;;  %v5837_v38 = vsel %vm5827_vm12, %v5834_v59, %v5836_v27  ;;  %v5840_v18 = vsel %vm5828_vm14, %v5822_v6, %v5839_v46  ;;  %v7622_v1 = vadd.s32 4294967169, %v5902_v50 }
 0x449   : > { %v5762_v16 = vsub.s32 32, %v5761_v22  ;;  %v5766_v2 = vsub.s32 4294967266, %v5761_v22  ;;  %v5763_v29 = vshll.u32 %v10725_v40, %v5761_v22  ;;  %v5841_v36 = vsel %vm5827_vm12, %v5838_v17, %v5840_v18 }
 0x44a   : > { %v10754_v61 = vmul.u32.u64.low %v10745_v30, %v5837_v38  ;;  %v10755_v4 = vmul.u32.u64.high %v10745_v30, %v5837_v38, %v10754_v61  ;;  %vm5678_vm0 = vweird.f32 %v10405_v11  ;;  %vm10762_vm1 = vcmp.le.f32.partialorder %v5690_v12, 0.7853982 }
 0x44b   : > { %v5764_v33 = vshrl.u32 %v5746_v0, %v5762_v16  ;;  %v5767_v42 = vadd.s32 127, %v5766_v2  ;;  %v10767_v40 = vmul.u32.u64.low %v10745_v30, %v5841_v36  ;;  %v10768_v53 = vmul.u32.u64.high %v10745_v30, %v5841_v36, %v10767_v40 }
 0x44c   : > { %v5833_v0 = vsel %vm5827_vm12, %v5830_v52, %v5832_v10  ;;  %v5908_v19 = vadd.s32 1, %v7622_v1  ;;  %vm5681_vm3 = vcmp.lt.s32.totalorder %v10719_v32, 2  ;;  %vm5685_vm15 = vcmp.eq.s32.totalorder %v10719_v32, 2 }
 0x44d   : > { %v5765_v25 = vor.u32 %v5764_v33, %v5763_v29  ;;  %v5768_v24 = vshll.u32 %v5767_v42, 23  ;;  %vm5692_vm2 = vcmp.lt.s32.totalorder %v10428_v56, 0  ;;  %v5852_v12 = vadd.s32 1, %v10755_v4 }
 0x44e   : > { %v5777_v31 = vsel %vm5692_vm2, %v5776_v13, %v10714_v47  ;;  %v5905_v55 = vand.u32 8388607, %v5898_v20  ;;  %vm5909_vm4 = vcmp.gt.s32.totalorder %v5908_v19, 0  ;;  %v5849_v49 = vmul.u32 %v10745_v30, %v5833_v0 }
 0x44f   : > { %v7900_v44 = vpop.eup %7899  ;;  %v5769_v23 = vor.u32 4788187, %v5768_v24  ;;  %vm5851_vm5 = vc.u32 %v10768_v53, %v10754_v61  ;;  %v5910_v48 = vsel %vm5909_vm4, %v5908_v19, 0  ;;  %v5772_v6 = vcvt.s32.f32 %v5765_v25 }
 0x450   : > { %v7902_v15 = vpop.eup %7901  ;;  %v5686_v21 = vxor.u32 2147483648, %v7900_v44  ;;  %v5853_v63 = vsel %vm5851_vm5, %v5852_v12, %v10755_v4  ;;  %vm5682_vm6 = vcmp.eq.s32.totalorder %v10719_v32, 0  ;;  %v5912_v28 = vand.u32 31, %v5910_v48 }
 0x451   : > { %v5683_v26 = vxor.u32 2147483648, %v7902_v15  ;;  %v5770_v50 = vand.u32 2147483647, %v5769_v23  ;;  %v5854_v13 = vadd.s32 %v5853_v63, %v5849_v49  ;;  %v5779_v30 = vsel %vm10762_vm1, 0, %v5777_v31 }
 0x452   : > { %v5687_v47 = vsel %vm5685_vm15, %v5686_v21, %v7902_v15  ;;  %v5906_v34 = vor.u32 8388608, %v5905_v55  ;;  %v5913_v52 = vsub.s32 32, %v5912_v28  ;;  %v6005_v5 = vand.u32 2139095040, %v10411_v14 }
 0x453   : > { %v5684_v45 = vsel %vm5682_vm6, %v7900_v44, %v5683_v26  ;;  %v5773_v8 = vmul.f32 %v5772_v6, %v5770_v50  ;;  %v5855_v59 = vadd.s32 536870912, %v5854_v13  ;;  %v5915_v17 = vshll.u32 %v8054_v35, %v5912_v28 }
 0x454   : > { %v5688_v54 = vsel %vm5681_vm3, %v5684_v45, %v5687_v47  ;;  %v5918_v46 = vshll.u32 %v8055_v37, %v5912_v28  ;;  %vm5796_vm8 = vcmp.lt.s32.totalorder %v10407_v62, 0  ;;  %v5916_v2 = vshrl.u32 %v8055_v37, %v5913_v52 }
 0x455   : > { %v5689_v22 = vsel %vm5678_vm0, nan, %v5688_v54  ;;  %v5774_v27 = vxor.u32 2147483648, %v5773_v8  ;;  %v5856_v16 = vshrl.u32 %v5855_v59, 30  ;;  %v5919_v32 = vshrl.u32 %v8056_v39, %v5913_v52 }
 0x456   : > { %v5921_v10 = vshll.u32 %v8056_v39, %v5912_v28  ;;  %6212 = vst [vmem:[#allocation2 + $0x10] sm:$0xff] %v5689_v22  ;;  %v5922_v11 = vshrl.u32 %v8057_v41, %v5913_v52  ;;  %v5924_v29 = vshll.u32 %v8057_v41, %v5912_v28  ;;  %v5925_v18 = vshrl.u32 %v8058_v43, %v5913_v52 }
 0x457   : > { %v5775_v38 = vsel %vm5692_vm2, %v5774_v27, %v5773_v8  ;;  %v5857_v33 = vshll.u32 %v5856_v16, 30  ;;  %v5911_v42 = vshrl.u32 %v5910_v48, 5  ;;  %v5917_v36 = vor.u32 %v5916_v2, %v5915_v17 }
 0x458   : > { %v5778_v4 = vsel %vm10762_vm1, %v10428_v56, %v5775_v38  ;;  %vm10810_vm9 = vcmp.le.f32.partialorder %v5794_v7, 0.7853982  ;;  %v5920_v40 = vor.u32 %v5919_v32, %v5918_v46  ;;  %v5923_v25 = vor.u32 %v5922_v11, %v5921_v10 }
 0x459   : > { %7903 = vcosq.f32 %v5778_v4  ;;  %v5926_v24 = vor.u32 %v5925_v18, %v5924_v29  ;;  %v5783_v0 = vadd.s32 3, %v5779_v30  ;;  %v10814_v19 = vsub.s32 %v5854_v13, %v5857_v33 }
 0x45a   : > { %7905 = vsinq.f32 %v5778_v4  ;;  %v10816_v12 = vshll.u32 %v5906_v34, 8  ;;  %v5880_v3 = vsub.s32 4, %v5856_v16  ;;  %v5927_v44 = vshll.u32 %v8058_v43, %v5912_v28 }
 0x45b   : > { %v5928_v23 = vshrl.u32 %v8059_v51, %v5913_v52  ;;  %v6006_v31 = vshrl.u32 %v6005_v5, 23  ;;  %v5860_v7 = vsub.s32 0, %v10814_v19  ;;  %vm5930_vm7 = vcmp.lt.s32.totalorder %v5911_v42, 1 }
 0x45c   : > { %vm5932_vm10 = vcmp.lt.s32.totalorder %v5911_v42, 3  ;;  %vm5933_vm11 = vcmp.lt.s32.totalorder %v5911_v42, 4  ;;  %v5938_v21 = vsel %vm5930_vm7, %v5917_v36, %v5920_v40  ;;  %v5914_v26 = vshrl.u32 %v8054_v35, %v5913_v52 }
 0x45d   : > { %v5929_v55 = vor.u32 %v5928_v23, %v5927_v44  ;;  %v5935_v15 = vsel %vm5933_vm11, %v5923_v25, 2102212464  ;;  %v5939_v49 = vsel %vm5933_vm11, %v5926_v24, 920167782  ;;  %v7619_v48 = vmin.u32 %v5860_v7, %v10814_v19 }
 0x45e   : > { %vm5931_vm12 = vcmp.lt.s32.totalorder %v5911_v42, 2  ;;  %v5940_v50 = vsel %vm5932_vm10, %v5923_v25, %v5939_v49  ;;  %v5881_v6 = vsel %vm5796_vm8, %v5880_v3, %v5856_v16  ;;  %v5942_v47 = vsel %vm5930_vm7, %v5920_v40, %v5923_v25 }
 0x45f   : > { %v5941_v63 = vsel %vm5931_vm12, %v5938_v21, %v5940_v50  ;;  %v5943_v13 = vsel %vm5933_vm11, %v5929_v55, 1326507024  ;;  %v5784_v28 = vand.u32 3, %v5783_v0  ;;  %v5862_v45 = vclz %v7619_v48 }
 0x460   : > { %v5934_v8 = vsel %vm5930_vm7, %v5914_v26, %v5917_v36  ;;  %v5936_v30 = vsel %vm5932_vm10, %v5920_v40, %v5935_v15  ;;  %v5944_v34 = vsel %vm5932_vm10, %v5926_v24, %v5943_v13  ;;  %v7626_v52 = vadd.s32 4294967169, %v6006_v31 }
 0x461   : > { %v10833_v54 = vmul.u32.u64.low %v10816_v12, %v5941_v63  ;;  %v10834_v59 = vmul.u32.u64.high %v10816_v12, %v5941_v63, %v10833_v54  ;;  %v7620_v5 = vadd.s32 4294967294, %v5862_v45  ;;  %v5883_v22 = vsel %vm10810_vm9, 0, %v5881_v6 }
 0x462   : > { %v5945_v27 = vsel %vm5931_vm12, %v5942_v47, %v5944_v34  ;;  %v6002_v17 = vand.u32 2147483647, %v10411_v14  ;;  %vm5782_vm13 = vweird.f32 %v10428_v56  ;;  %v5937_v46 = vsel %vm5931_vm12, %v5934_v8, %v5936_v30 }
 0x463   : > { %v10844_v16 = vmul.u32.u64.low %v10816_v12, %v5945_v27  ;;  %v10845_v2 = vmul.u32.u64.high %v10816_v12, %v5945_v27, %v10844_v16  ;;  %v6012_v32 = vadd.s32 1, %v7626_v52  ;;  %vm5785_vm14 = vcmp.lt.s32.totalorder %v5784_v28, 2 }
 0x464   : > { %vm5789_vm0 = vcmp.eq.s32.totalorder %v5784_v28, 2  ;;  %v5850_v10 = vadd.s32 %v10754_v61, %v10768_v53  ;;  %vm7621_vm1 = vcmp.lt.s32.totalorder %v7620_v5, 0  ;;  %v5887_v11 = vadd.s32 3, %v5883_v22 }
 0x465   : > { %v5865_v38 = vsel %vm7621_vm1, 0, %v7620_v5  ;;  %v5956_v29 = vadd.s32 1, %v10834_v59  ;;  %vm6013_vm3 = vcmp.gt.s32.totalorder %v6012_v32, 0  ;;  %v5953_v42 = vmul.u32 %v10816_v12, %v5937_v46 }
 0x466   : > { %v7904_v18 = vpop.eup %7903  ;;  %v5866_v4 = vsub.s32 32, %v5865_v38  ;;  %v5870_v33 = vsub.s32 4294967266, %v5865_v38  ;;  %v6014_v36 = vsel %vm6013_vm3, %v6012_v32, 0  ;;  %v5867_v24 = vshll.u32 %v10814_v19, %v5865_v38 }
 0x467   : > { %v7906_v40 = vpop.eup %7905  ;;  %v5790_v25 = vxor.u32 2147483648, %v7904_v18  ;;  %vm5955_vm15 = vc.u32 %v10845_v2, %v10833_v54  ;;  %v10856_v61 = vand.u32 8388607, %v6002_v17  ;;  %vm5786_vm2 = vcmp.eq.s32.totalorder %v5784_v28, 0 }
 0x468   : > { %v5787_v53 = vxor.u32 2147483648, %v7906_v40  ;;  %v5868_v0 = vshrl.u32 %v5850_v10, %v5866_v4  ;;  %v5871_v3 = vadd.s32 127, %v5870_v33  ;;  %v5957_v44 = vsel %vm5955_vm15, %v5956_v29, %v10834_v59 }
 0x469   : > { %v5791_v12 = vsel %vm5789_vm0, %v5790_v25, %v7906_v40  ;;  %v5958_v23 = vadd.s32 %v5957_v44, %v5953_v42  ;;  %v6016_v31 = vand.u32 31, %v6014_v36  ;;  %v10860_v15 = vand.u32 3, %v5887_v11 }
 0x46a   : > { %v5788_v7 = vsel %vm5786_vm2, %v7904_v18, %v5787_v53  ;;  %v5869_v55 = vor.u32 %v5868_v0, %v5867_v24  ;;  %v5872_v19 = vshll.u32 %v5871_v3, 23  ;;  %v10863_v48 = vshrl.u32 %v6014_v36, 5 }
 0x46b   : > { %v5792_v21 = vsel %vm5785_vm14, %v5788_v7, %v5791_v12  ;;  %v5959_v49 = vadd.s32 536870912, %v5958_v23  ;;  %v6017_v26 = vsub.s32 32, %v6016_v31  ;;  %v6010_v63 = vor.u32 8388608, %v10856_v61 }
 0x46c   : > { %v5793_v50 = vsel %vm5782_vm13, nan, %v5792_v21  ;;  %v5873_v6 = vor.u32 4788187, %v5872_v19  ;;  %v6106_v47 = vand.u32 2147483647, %v10413_v60  ;;  %vm5900_vm4 = vcmp.lt.s32.totalorder %v10409_v9, 0 }
 0x46d   : > { %v5960_v13 = vshrl.u32 %v5959_v49, 30  ;;  %v6020_v45 = vshrl.u32 %v8055_v37, %v6017_v26  ;;  %v6023_v28 = vshrl.u32 %v8056_v39, %v6017_v26  ;;  %v6109_v8 = vand.u32 2139095040, %v10413_v60  ;;  %6213 = vst [vmem:[#allocation2 + $0x18] sm:$0xff] %v5793_v50 }
 0x46e   : > { %v5874_v30 = vand.u32 2147483647, %v5873_v6  ;;  %v5876_v34 = vcvt.s32.f32 %v5869_v55  ;;  %v6025_v56 = vshll.u32 %v8056_v39, %v6016_v31  ;;  %v6026_v59 = vshrl.u32 %v8057_v41, %v6017_v26 }
 0x46f   : > { %v5961_v52 = vshll.u32 %v5960_v13, 30  ;;  %v6019_v5 = vshll.u32 %v8054_v35, %v6016_v31  ;;  %v6022_v22 = vshll.u32 %v8055_v37, %v6016_v31  ;;  %vm6034_vm5 = vcmp.lt.s32.totalorder %v10863_v48, 1 }
 0x470   : > { %v5877_v27 = vmul.f32 %v5876_v34, %v5874_v30  ;;  %vm10880_vm6 = vcmp.le.f32.partialorder %v5898_v20, 0.7853982  ;;  %v6027_v16 = vor.u32 %v6026_v59, %v6025_v56  ;;  %v6028_v32 = vshll.u32 %v8057_v41, %v6016_v31 }
 0x471   : > { %v6029_v10 = vshrl.u32 %v8058_v43, %v6017_v26  ;;  %v10886_v38 = vsub.s32 %v5958_v23, %v5961_v52  ;;  %v6021_v11 = vor.u32 %v6020_v45, %v6019_v5  ;;  %v6024_v29 = vor.u32 %v6023_v28, %v6022_v22  ;;  %v6221_v5 = vld [vmem:[%s10938_s29] sm:$0xff]  }
 0x472   : > { %v6032_v18 = vshrl.u32 %v8059_v51, %v6017_v26  ;;  %v5878_v4 = vxor.u32 2147483648, %v5877_v27  ;;  %v5984_v33 = vsub.s32 4, %v5960_v13  ;;  %v6031_v20 = vshll.u32 %v8058_v43, %v6016_v31 }
 0x473   : > { %v6030_v42 = vor.u32 %v6029_v10, %v6028_v32  ;;  %v5964_v36 = vsub.s32 0, %v10886_v38  ;;  %v6018_v40 = vshrl.u32 %v8054_v35, %v6017_v26  ;;  %vm6035_vm7 = vcmp.lt.s32.totalorder %v10863_v48, 2 }
 0x474   : > { %vm6037_vm10 = vcmp.lt.s32.totalorder %v10863_v48, 4  ;;  %v5879_v25 = vsel %vm5796_vm8, %v5878_v4, %v5877_v27  ;;  %v6033_v24 = vor.u32 %v6032_v18, %v6031_v20  ;;  %vm6036_vm11 = vcmp.lt.s32.totalorder %v10863_v48, 3  ;;  %v6220_v27 = vld [vmem:[#allocation2] ss:$8 sm:$0x3] }
 0x475   : > { %v6039_v61 = vsel %vm6037_vm10, %v6027_v16, 2102212464  ;;  %v6043_v53 = vsel %vm6037_vm10, %v6030_v42, 920167782  ;;  %v5882_v0 = vsel %vm10810_vm9, %v10407_v62, %v5879_v25  ;;  %v7623_v3 = vmin.u32 %v5964_v36, %v10886_v38 }
 0x476   : > { %v6042_v44 = vsel %vm6034_vm5, %v6021_v11, %v6024_v29  ;;  %7907 = vcosq.f32 %v5882_v0  ;;  %v5985_v12 = vsel %vm5900_vm4, %v5984_v33, %v5960_v13  ;;  %v6038_v23 = vsel %vm6034_vm5, %v6018_v40, %v6021_v11 }
 0x477   : > { %v6044_v31 = vsel %vm6036_vm11, %v6027_v16, %v6043_v53  ;;  %7909 = vsinq.f32 %v5882_v0  ;;  %v5966_v1 = vclz %v7623_v3  ;;  %v6040_v7 = vsel %vm6036_vm11, %v6024_v29, %v6039_v61 }
 0x478   : > { %v6046_v55 = vsel %vm6034_vm5, %v6024_v29, %v6027_v16  ;;  %v6045_v19 = vsel %vm6035_vm7, %v6042_v44, %v6044_v31  ;;  %v6047_v21 = vsel %vm6037_vm10, %v6033_v24, 1326507024  ;;  %v6050_v49 = vshll.u32 %v6010_v63, 8 }
 0x479   : > { %v6113_v26 = vand.u32 8388607, %v6106_v47  ;;  %v7624_v50 = vadd.s32 4294967294, %v5966_v1  ;;  %v5987_v6 = vsel %vm10880_vm6, 0, %v5985_v12  ;;  %v6048_v13 = vsel %vm6036_vm11, %v6030_v42, %v6047_v21  ;;  %v10954_v42 = vld [vmem:[%s916_s25] sm:$0xf] }
 0x47a   : > { %v6110_v45 = vshrl.u32 %v6109_v8, 23  ;;  %v6041_v28 = vsel %vm6035_vm7, %v6038_v23, %v6040_v7  ;;  %v6049_v30 = vsel %vm6035_vm7, %v6046_v55, %v6048_v13  ;;  %v5954_v48 = vadd.s32 %v10833_v54, %v10845_v2 }
 0x47b   : > { %v10932_v34 = vmul.u32.u64.low %v6050_v49, %v6045_v19  ;;  %v10933_v56 = vmul.u32.u64.high %v6050_v49, %v6045_v19, %v10932_v34  ;;  %vm7625_vm8 = vcmp.lt.s32.totalorder %v7624_v50, 0  ;;  %v5991_v22 = vadd.s32 3, %v5987_v6 }
 0x47c   : > { %v10935_v63 = vmul.u32.u64.low %v6050_v49, %v6049_v30  ;;  %v10936_v59 = vmul.u32.u64.high %v6050_v49, %v6049_v30, %v10935_v63  ;;  %v7630_v52 = vadd.s32 4294967169, %v6110_v45  ;;  %v5969_v8 = vsel %vm7625_vm8, 0, %v7624_v50 }
 0x47d   : > { %vm5893_vm9 = vcmp.eq.s32.totalorder %v10860_v15, 2  ;;  %v5970_v16 = vsub.s32 32, %v5969_v8  ;;  %v5974_v32 = vsub.s32 4294967266, %v5969_v8  ;;  %v6114_v10 = vor.u32 8388608, %v6113_v26 }
 0x47e   : > { %v6116_v11 = vadd.s32 1, %v7630_v52  ;;  %vm5890_vm12 = vcmp.eq.s32.totalorder %v10860_v15, 0  ;;  %v5971_v29 = vshll.u32 %v10886_v38, %v5969_v8  ;;  %v6057_v18 = vmul.u32 %v6050_v49, %v6041_v28 }
 0x47f   : > { %v6060_v4 = vadd.s32 1, %v10933_v56  ;;  %v6222_v33 = vunpack.c.l.bf16 %v6221_v5  ;;  %vm5889_vm13 = vcmp.lt.s32.totalorder %v10860_v15, 2  ;;  %v5972_v54 = vshrl.u32 %v5954_v48, %v5970_v16 }
 0x480   : > { %v5975_v2 = vadd.s32 127, %v5974_v32  ;;  %vm6059_vm14 = vc.u32 %v10936_v59, %v10932_v34  ;;  %v6227_v20 = vrot.slane %v6220_v27, %v8395_v57  ;;  %vm5886_vm0 = vweird.f32 %v10407_v62 }
 0x481   : > { %v6061_v36 = vsel %vm6059_vm14, %v6060_v4, %v10933_v56  ;;  %vm6117_vm1 = vcmp.gt.s32.totalorder %v6116_v11, 0  ;;  %v6231_v38 = vrot.slane %v6220_v27, %v8397_v58  ;;  %v6235_v40 = vcombine.high %v6222_v33, %v6222_v33 }
 0x482   : > { %v5973_v25 = vor.u32 %v5972_v54, %v5971_v29  ;;  %v5976_v24 = vshll.u32 %v5975_v2, 23  ;;  %v6062_v61 = vadd.s32 %v6061_v36, %v6057_v18  ;;  %v6118_v53 = vsel %vm6117_vm1, %v6116_v11, 0  ;;  %v6244_v54 = vld [vmem:[#allocation2 + $0x1] ss:$8 sm:$0x3] }
 0x483   : > { %v10960_v0 = vand.u32 3, %v5991_v22  ;;  %vm6004_vm3 = vcmp.lt.s32.totalorder %v10411_v14, 0  ;;  %v6120_v3 = vand.u32 31, %v6118_v53  ;;  %v10963_v44 = vshll.u32 %v6114_v10, 8  ;;  %v7908_v23 = vpop.eup %7907 }
 0x484   : > { %v6219_v12 = vunpack.c.l.bf16 %v10954_v42  ;;  %v5977_v31 = vor.u32 4788187, %v5976_v24  ;;  %v10967_v1 = vadd.s32 %v10932_v34, %v10936_v59  ;;  %v6063_v7 = vadd.s32 536870912, %v6062_v61  ;;  %v7910_v19 = vpop.eup %7909 }
 0x485   : > { %v10969_v55 = vmul.f32 %v6227_v20, %v6222_v33  ;;  %v5894_v21 = vxor.u32 2147483648, %v7908_v23  ;;  %v10971_v49 = vshrl.u32 %v6118_v53, 5  ;;  %v6121_v26 = vsub.s32 32, %v6120_v3 }
 0x486   : > { %v10973_v50 = vmul.f32 %v6235_v40, %v6231_v38  ;;  %v5891_v6 = vxor.u32 2147483648, %v7910_v19  ;;  %v5978_v13 = vand.u32 2147483647, %v5977_v31  ;;  %v5980_v45 = vcvt.s32.f32 %v5973_v25 }
 0x487   : > { %vm10977_vm15 = vcmp.le.f32.partialorder %v6002_v17, 0.7853982  ;;  %v6064_v30 = vshrl.u32 %v6063_v7, 30  ;;  %v5895_v34 = vsel %vm5893_vm9, %v5894_v21, %v7910_v19  ;;  %v6124_v56 = vshrl.u32 %v8055_v37, %v6121_v26 }
 0x488   : > { %v6127_v63 = vshrl.u32 %v8056_v39, %v6121_v26  ;;  %v10985_v59 = vunpack.c.h.bf16 %v6221_v5  ;;  %v5892_v52 = vsel %vm5890_vm12, %v7908_v23, %v5891_v6  ;;  %v5981_v48 = vmul.f32 %v5980_v45, %v5978_v13 }
 0x489   : > { %v6065_v8 = vshll.u32 %v6064_v30, 30  ;;  %v6088_v22 = vsub.s32 4, %v6064_v30  ;;  %v5896_v17 = vsel %vm5889_vm13, %v5892_v52, %v5895_v34  ;;  %v6123_v27 = vshll.u32 %v8054_v35, %v6120_v3 }
 0x48a   : > { %v6126_v16 = vshll.u32 %v8055_v37, %v6120_v3  ;;  %v6130_v32 = vshrl.u32 %v8057_v41, %v6121_v26  ;;  %v5897_v10 = vsel %vm5886_vm0, nan, %v5896_v17  ;;  %v5982_v5 = vxor.u32 2147483648, %v5981_v48 }
 0x48b   : > { %v10996_v11 = vsub.s32 %v6062_v61, %v6065_v8  ;;  %v6129_v29 = vshll.u32 %v8056_v39, %v6120_v3  ;;  %v6125_v18 = vor.u32 %v6124_v56, %v6123_v27  ;;  %v6132_v33 = vshll.u32 %v8057_v41, %v6120_v3  ;;  %6214 = vst [vmem:[#allocation2 + $0x20] sm:$0xff] %v5897_v10  ;;  %v7635_v8 = vld [vmem:[%s10938_s29 + $0x8] sm:$0xff]  }
 0x48c   : > { %v6128_v4 = vor.u32 %v6127_v63, %v6126_v16  ;;  %v6133_v15 = vshrl.u32 %v8058_v43, %v6121_v26  ;;  %v5983_v37 = vsel %vm5900_vm4, %v5982_v5, %v5981_v48  ;;  %v6089_v62 = vsel %vm6004_vm3, %v6088_v22, %v6064_v30 }
 0x48d   : > { %v6068_v2 = vsub.s32 0, %v10996_v11  ;;  %v6131_v20 = vor.u32 %v6130_v32, %v6129_v29  ;;  %v5986_v39 = vsel %vm10880_vm6, %v10409_v9, %v5983_v37  ;;  %v6135_v41 = vshll.u32 %v8058_v43, %v6120_v3  ;;  %v6269_v32 = vld [vmem:[#allocation2 + $0x2] ss:$8 sm:$0x3] }
 0x48e   : > { %v6134_v36 = vor.u32 %v6133_v15, %v6132_v33  ;;  %v6136_v38 = vshrl.u32 %v8059_v51, %v6121_v26  ;;  %7911 = vcosq.f32 %v5986_v39  ;;  %v6122_v25 = vshrl.u32 %v8054_v35, %v6121_v26 }
 0x48f   : > { %v7627_v40 = vmin.u32 %v6068_v2, %v10996_v11  ;;  %v6252_v24 = vrot.slane %v6244_v54, %v8395_v57  ;;  %7913 = vsinq.f32 %v5986_v39  ;;  %v6091_v61 = vsel %vm10977_vm15, 0, %v6089_v62 }
 0x490   : > { %v6137_v53 = vor.u32 %v6136_v38, %v6135_v41  ;;  %vm6138_vm2 = vcmp.lt.s32.totalorder %v10971_v49, 1  ;;  %vm6139_vm4 = vcmp.lt.s32.totalorder %v10971_v49, 2  ;;  %vm6140_vm5 = vcmp.lt.s32.totalorder %v10971_v49, 3 }
 0x491   : > { %v6070_v46 = vclz %v7627_v40  ;;  %vm6141_vm6 = vcmp.lt.s32.totalorder %v10971_v49, 4  ;;  %v6142_v43 = vsel %vm6138_vm2, %v6122_v25, %v6125_v18  ;;  %v6146_v3 = vsel %vm6138_vm2, %v6125_v18, %v6128_v4 }
 0x492   : > { %v6143_v51 = vsel %vm6141_vm6, %v6131_v20, 2102212464  ;;  %v6147_v35 = vsel %vm6141_vm6, %v6134_v36, 920167782  ;;  %v6150_v19 = vsel %vm6138_vm2, %v6128_v4, %v6131_v20  ;;  %v11020_v21 = vadd.s32 3, %v6091_v61 }
 0x493   : > { %v7628_v23 = vadd.s32 4294967294, %v6070_v46  ;;  %v6144_v31 = vsel %vm6140_vm5, %v6128_v4, %v6143_v51  ;;  %v6148_v7 = vsel %vm6140_vm5, %v6131_v20, %v6147_v35  ;;  %v6151_v13 = vsel %vm6141_vm6, %v6137_v53, 1326507024  ;;  %v6294_v4 = vld [vmem:[#allocation2 + $0x3] ss:$8 sm:$0x3] }
 0x494   : > { %v6145_v26 = vsel %vm6139_vm4, %v6142_v43, %v6144_v31  ;;  %v6149_v6 = vsel %vm6139_vm4, %v6146_v3, %v6148_v7  ;;  %v6152_v45 = vsel %vm6140_vm5, %v6134_v36, %v6151_v13  ;;  %vm5997_vm10 = vcmp.eq.s32.totalorder %v10960_v0, 2  ;;  %v7637_v43 = vld [vmem:[%s10938_s29 + $0x10] sm:$0xff]   ;;  %v6319_v31 = vld [vmem:[#allocation2 + $0x4] ss:$8 sm:$0x3] }
 0x495   : > { %vm7629_vm7 = vcmp.lt.s32.totalorder %v7628_v23, 0  ;;  %v11027_v30 = vmul.u32.u64.low %v10963_v44, %v6149_v6  ;;  %v11028_v34 = vmul.u32.u64.high %v10963_v44, %v6149_v6, %v11027_v30  ;;  %v6153_v63 = vsel %vm6139_vm4, %v6150_v19, %v6152_v45 }
 0x496   : > { %v6073_v56 = vsel %vm7629_vm7, 0, %v7628_v23  ;;  %v6161_v52 = vmul.u32 %v10963_v44, %v6145_v26  ;;  %v6241_v48 = vcombine.low %v10969_v55, %v10973_v50  ;;  %vm5994_vm11 = vcmp.eq.s32.totalorder %v10960_v0, 0 }
 0x497   : > { %v6074_v22 = vsub.s32 32, %v6073_v56  ;;  %v6075_v17 = vshll.u32 %v10996_v11, %v6073_v56  ;;  %v6078_v27 = vsub.s32 4294967266, %v6073_v56  ;;  %v6256_v16 = vrot.slane %v6244_v54, %v8397_v58 }
 0x498   : > { %vm5993_vm8 = vcmp.lt.s32.totalorder %v10960_v0, 2  ;;  %v11043_v49 = vmul.u32.u64.low %v10963_v44, %v6153_v63  ;;  %v11044_v10 = vmul.u32.u64.high %v10963_v44, %v6153_v63, %v11043_v49  ;;  %v6260_v5 = vcombine.high %v10985_v59, %v10985_v59 }
 0x499   : > { %v6262_v55 = vmul.f32 %v6252_v24, %v10985_v59  ;;  %vm5990_vm9 = vweird.f32 %v10409_v9  ;;  %v6076_v50 = vshrl.u32 %v10967_v1, %v6074_v22  ;;  %v6079_v11 = vadd.s32 127, %v6078_v27 }
 0x49a   : > { %v6164_v29 = vadd.s32 1, %v11028_v34  ;;  %v6272_v18 = vunpack.c.l.bf16 %v7635_v8  ;;  %v6243_v33 = vadd.f32 %v6241_v48, %v6219_v12  ;;  %v6263_v15 = vmul.f32 %v6260_v5, %v6256_v16 }
 0x49b   : > { %v6277_v44 = vrot.slane %v6269_v32, %v8395_v57  ;;  %v6281_v54 = vrot.slane %v6269_v32, %v8397_v58  ;;  %v6077_v37 = vor.u32 %v6076_v50, %v6075_v17  ;;  %v6080_v2 = vshll.u32 %v6079_v11, 23  ;;  %v7912_v20 = vpop.eup %7911 }
 0x49c   : > { %v6285_v59 = vcombine.high %v6272_v18, %v6272_v18  ;;  %v6297_v62 = vunpack.c.h.bf16 %v7635_v8  ;;  %vm6163_vm12 = vc.u32 %v11044_v10, %v11027_v30  ;;  %v6266_v1 = vcombine.low %v6262_v55, %v6263_v15  ;;  %v7914_v42 = vpop.eup %7913  ;;  %v6344_v8 = vld [vmem:[#allocation2 + $0x5] ss:$8 sm:$0x3]  ;;  %v6369_v15 = vld [vmem:[#allocation2 + $0x6] ss:$8 sm:$0x3] }
 0x49d   : > { %v6287_v39 = vmul.f32 %v6277_v44, %v6272_v18  ;;  %v6302_v36 = vrot.slane %v6294_v4, %v8395_v57  ;;  %v5998_v12 = vxor.u32 2147483648, %v7912_v20  ;;  %v6081_v41 = vor.u32 4788187, %v6080_v2  ;;  %v7639_v44 = vld [vmem:[%s10938_s29 + $0x18] sm:$0xff]  }
 0x49e   : > { %v6084_v38 = vcvt.s32.f32 %v6077_v37  ;;  %vm6108_vm13 = vcmp.lt.s32.totalorder %v10413_v60, 0  ;;  %v6165_v40 = vsel %vm6163_vm12, %v6164_v29, %v11028_v34  ;;  %v5995_v25 = vxor.u32 2147483648, %v7914_v42 }
 0x49f   : > { %vm11063_vm14 = vcmp.le.f32.partialorder %v6106_v47, 0.7853982  ;;  %v6166_v61 = vadd.s32 %v6165_v40, %v6161_v52  ;;  %v6268_v53 = vadd.f32 %v6266_v1, %v6243_v33  ;;  %v6288_v46 = vmul.f32 %v6285_v59, %v6281_v54 }
 0x4a0   : > { %v5999_v51 = vsel %vm5997_vm10, %v5998_v12, %v7914_v42  ;;  %v6082_v3 = vand.u32 2147483647, %v6081_v41  ;;  %v6306_v35 = vrot.slane %v6294_v4, %v8397_v58  ;;  %v6310_v23 = vcombine.high %v6297_v62, %v6297_v62 }
 0x4a1   : > { %v5996_v7 = vsel %vm5994_vm11, %v7912_v20, %v5995_v25  ;;  %v6167_v19 = vadd.s32 536870912, %v6166_v61  ;;  %v6291_v47 = vcombine.low %v6287_v39, %v6288_v46  ;;  %v6312_v26 = vmul.f32 %v6302_v36, %v6297_v62  ;;  %v6394_v20 = vld [vmem:[#allocation2 + $0x7] ss:$8 sm:$0x3] }
 0x4a2   : > { %v6000_v6 = vsel %vm5993_vm8, %v5996_v7, %v5999_v51  ;;  %v6085_v13 = vmul.f32 %v6084_v38, %v6082_v3  ;;  %v6313_v45 = vmul.f32 %v6310_v23, %v6306_v35  ;;  %v6322_v34 = vunpack.c.l.bf16 %v7637_v43  ;;  %v7641_v51 = vld [vmem:[%s10938_s29 + $0x20] sm:$0xff]  }
 0x4a3   : > { %v6001_v56 = vsel %vm5990_vm9, nan, %v6000_v6  ;;  %v6168_v63 = vshrl.u32 %v6167_v19, 30  ;;  %v6293_v52 = vadd.f32 %v6291_v47, %v6268_v53  ;;  %v6327_v48 = vrot.slane %v6319_v31, %v8395_v57  ;;  %v6444_v47 = vld [vmem:[#allocation2 + $0x11] ss:$8 sm:$0x3] }
 0x4a4   : > { %v6086_v22 = vxor.u32 2147483648, %v6085_v13  ;;  %6215 = vst [vmem:[#allocation2 + $0x28] sm:$0xff] %v6001_v56  ;;  %v6316_v17 = vcombine.low %v6312_v26, %v6313_v45  ;;  %v6331_v27 = vrot.slane %v6319_v31, %v8397_v58  ;;  %v6335_v16 = vcombine.high %v6322_v34, %v6322_v34 }
 0x4a5   : > { %v6169_v0 = vshll.u32 %v6168_v63, 30  ;;  %v6192_v32 = vsub.s32 4, %v6168_v63  ;;  %v6337_v49 = vmul.f32 %v6327_v48, %v6322_v34  ;;  %v6347_v5 = vunpack.c.h.bf16 %v7637_v43  ;;  %v6419_v43 = vld [vmem:[#allocation2 + $0x10] ss:$8 sm:$0x3] }
 0x4a6   : > { %v6087_v9 = vsel %vm6004_vm3, %v6086_v22, %v6085_v13  ;;  %v6318_v55 = vadd.f32 %v6316_v17, %v6293_v52  ;;  %v6338_v50 = vmul.f32 %v6335_v16, %v6331_v27  ;;  %v6352_v11 = vrot.slane %v6344_v8, %v8395_v57 }
 0x4a7   : > { %v6090_v29 = vsel %vm10977_vm15, %v10411_v14, %v6087_v9  ;;  %v11085_v18 = vsub.s32 %v6166_v61, %v6169_v0  ;;  %v6193_v4 = vsel %vm6108_vm13, %v6192_v32, %v6168_v63  ;;  %v6356_v33 = vrot.slane %v6344_v8, %v8397_v58  ;;  %v7643_v8 = vld [vmem:[%s10938_s29 + $0x28] sm:$0xff]   ;;  %v6469_v0 = vld [vmem:[#allocation2 + $0x12] ss:$8 sm:$0x3] }
 0x4a8   : > { %7915 = vcosq.f32 %v6090_v29  ;;  %v6195_v54 = vsel %vm11063_vm14, 0, %v6193_v4  ;;  %v6341_v37 = vcombine.low %v6337_v49, %v6338_v50  ;;  %v6360_v2 = vcombine.high %v6347_v5, %v6347_v5 }
 0x4a9   : > { %7917 = vsinq.f32 %v6090_v29  ;;  %v6172_v59 = vsub.s32 0, %v11085_v18  ;;  %v6199_v28 = vadd.s32 3, %v6195_v54  ;;  %v6362_v62 = vmul.f32 %v6352_v11, %v6347_v5 }
 0x4aa   : > { %v6343_v1 = vadd.f32 %v6341_v37, %v6318_v55  ;;  %v6363_v39 = vmul.f32 %v6360_v2, %v6356_v33  ;;  %v6372_v36 = vunpack.c.l.bf16 %v7639_v44  ;;  %v6377_v42 = vrot.slane %v6369_v15, %v8395_v57 }
 0x4ab   : > { %v11096_v12 = vand.u32 3, %v11020_v21  ;;  %v7631_v41 = vmin.u32 %v6172_v59, %v11085_v18  ;;  %v6381_v38 = vrot.slane %v6369_v15, %v8397_v58  ;;  %v6397_v40 = vunpack.c.h.bf16 %v7639_v44 }
 0x4ac   : > { %v6366_v25 = vcombine.low %v6362_v62, %v6363_v39  ;;  %v6385_v61 = vcombine.high %v6372_v36, %v6372_v36  ;;  %v6387_v53 = vmul.f32 %v6377_v42, %v6372_v36  ;;  %v6402_v46 = vrot.slane %v6394_v20, %v8395_v57  ;;  %v6494_v36 = vld [vmem:[#allocation2 + $0x13] ss:$8 sm:$0x3] }
 0x4ad   : > { %v6162_v3 = vadd.s32 %v11027_v30, %v11044_v10  ;;  %v6174_v35 = vclz %v7631_v41  ;;  %v11104_v23 = vand.u32 3, %v6199_v28  ;;  %v6406_v7 = vrot.slane %v6394_v20, %v8397_v58 }
 0x4ae   : > { %v6368_v21 = vadd.f32 %v6366_v25, %v6343_v1  ;;  %v6388_v31 = vmul.f32 %v6385_v61, %v6381_v38  ;;  %v6410_v19 = vcombine.high %v6397_v40, %v6397_v40  ;;  %vm6101_vm0 = vcmp.eq.s32.totalorder %v11096_v12, 2 }
 0x4af   : > { %v7632_v26 = vadd.s32 4294967294, %v6174_v35  ;;  %v6412_v6 = vmul.f32 %v6402_v46, %v6397_v40  ;;  %v6422_v13 = vunpack.c.l.bf16 %v7641_v51  ;;  %v6427_v45 = vrot.slane %v6419_v43, %v8395_v57 }
 0x4b0   : > { %vm6098_vm1 = vcmp.eq.s32.totalorder %v11096_v12, 0  ;;  %v6391_v30 = vcombine.low %v6387_v53, %v6388_v31  ;;  %v6413_v10 = vmul.f32 %v6410_v19, %v6406_v7  ;;  %v6431_v34 = vrot.slane %v6419_v43, %v8397_v58  ;;  %v6519_v43 = vld [vmem:[#allocation2 + $0x14] ss:$8 sm:$0x3] }
 0x4b1   : > { %v6447_v56 = vunpack.c.h.bf16 %v7641_v51  ;;  %vm6097_vm3 = vcmp.lt.s32.totalorder %v11096_v12, 2  ;;  %vm7633_vm15 = vcmp.lt.s32.totalorder %v7632_v26, 0  ;;  %v6435_v63 = vcombine.high %v6422_v13, %v6422_v13  ;;  %v7645_v51 = vld [vmem:[%s10938_s29 + $0x30] sm:$0xff]   ;;  %v7647_v12 = vld [vmem:[%s10938_s29 + $0x38] sm:$0xff]  }
 0x4b2   : > { %v6437_v52 = vmul.f32 %v6427_v45, %v6422_v13  ;;  %v6452_v48 = vrot.slane %v6444_v47, %v8395_v57  ;;  %vm6094_vm2 = vweird.f32 %v10411_v14  ;;  %v6177_v22 = vsel %vm7633_vm15, 0, %v7632_v26 }
 0x4b3   : > { %v6393_v17 = vadd.f32 %v6391_v30, %v6368_v21  ;;  %v6416_v27 = vcombine.low %v6412_v6, %v6413_v10  ;;  %v6456_v16 = vrot.slane %v6444_v47, %v8397_v58  ;;  %v6178_v32 = vsub.s32 32, %v6177_v22  ;;  %v6544_v6 = vld [vmem:[#allocation2 + $0x15] ss:$8 sm:$0x3] }
 0x4b4   : > { %v6179_v49 = vshll.u32 %v11085_v18, %v6177_v22  ;;  %v6182_v5 = vsub.s32 4294967266, %v6177_v22  ;;  %v6438_v9 = vmul.f32 %v6435_v63, %v6431_v34  ;;  %v6460_v50 = vcombine.high %v6447_v56, %v6447_v56 }
 0x4b5   : > { %v6418_v55 = vadd.f32 %v6416_v27, %v6393_v17  ;;  %v6462_v11 = vmul.f32 %v6452_v48, %v6447_v56  ;;  %v6472_v29 = vunpack.c.l.bf16 %v7643_v8  ;;  %v7916_v4 = vpop.eup %7915  ;;  %v6180_v33 = vshrl.u32 %v6162_v3, %v6178_v32  ;;  %v6569_v48 = vld [vmem:[#allocation2 + $0x16] ss:$8 sm:$0x3] }
 0x4b6   : > { %v6183_v15 = vadd.s32 127, %v6182_v5  ;;  %v6441_v44 = vcombine.low %v6437_v52, %v6438_v9  ;;  %v6477_v54 = vrot.slane %v6469_v0, %v8395_v57  ;;  %v7918_v37 = vpop.eup %7917  ;;  %v6102_v2 = vxor.u32 2147483648, %v7916_v4 }
 0x4b7   : > { %v6463_v59 = vmul.f32 %v6460_v50, %v6456_v16  ;;  %v6481_v28 = vrot.slane %v6469_v0, %v8397_v58  ;;  %v6485_v62 = vcombine.high %v6472_v29, %v6472_v29  ;;  %v6099_v18 = vxor.u32 2147483648, %v7918_v37  ;;  %v6594_v50 = vld [vmem:[#allocation2 + $0x17] ss:$8 sm:$0x3] }
 0x4b8   : > { %v6181_v20 = vor.u32 %v6180_v33, %v6179_v49  ;;  %v6184_v1 = vshll.u32 %v6183_v15, 23  ;;  %v6443_v39 = vadd.f32 %v6441_v44, %v6418_v55  ;;  %v6103_v42 = vsel %vm6101_vm0, %v6102_v2, %v7918_v37  ;;  %v6619_v2 = vld [vmem:[#allocation2 + $0x20] ss:$8 sm:$0x3] }
 0x4b9   : > { %v6466_v41 = vcombine.low %v6462_v11, %v6463_v59  ;;  %v6487_v38 = vmul.f32 %v6477_v54, %v6472_v29  ;;  %v6488_v40 = vmul.f32 %v6485_v62, %v6481_v28  ;;  %v6100_v25 = vsel %vm6098_vm1, %v7916_v4, %v6099_v18  ;;  %v7649_v59 = vld [vmem:[%s10938_s29 + $0x40] sm:$0xff]  }
 0x4ba   : > { %v6185_v61 = vor.u32 4788187, %v6184_v1  ;;  %v6188_v53 = vcvt.s32.f32 %v6181_v20  ;;  %v6497_v46 = vunpack.c.h.bf16 %v7643_v8  ;;  %v6104_v3 = vsel %vm6097_vm3, %v6100_v25, %v6103_v42 }
 0x4bb   : > { %v6468_v35 = vadd.f32 %v6466_v41, %v6443_v39  ;;  %v6491_v21 = vcombine.low %v6487_v38, %v6488_v40  ;;  %v6502_v31 = vrot.slane %v6494_v36, %v8395_v57  ;;  %v6105_v7 = vsel %vm6094_vm2, nan, %v6104_v3  ;;  %v7651_v40 = vld [vmem:[%s10938_s29 + $0x48] sm:$0xff]  }
 0x4bc   : > { %v6186_v19 = vand.u32 2147483647, %v6185_v61  ;;  %v6506_v47 = vrot.slane %v6494_v36, %v8397_v58  ;;  %v6510_v26 = vcombine.high %v6497_v46, %v6497_v46  ;;  %6216 = vst [vmem:[#allocation2 + $0x30] sm:$0xff] %v6105_v7  ;;  %v6522_v30 = vunpack.c.l.bf16 %v7645_v51  ;;  %v6644_v36 = vld [vmem:[#allocation2 + $0x21] ss:$8 sm:$0x3] }
 0x4bd   : > { %v6493_v13 = vadd.f32 %v6491_v21, %v6468_v35  ;;  %v6512_v45 = vmul.f32 %v6502_v31, %v6497_v46  ;;  %v6527_v10 = vrot.slane %v6519_v43, %v8395_v57  ;;  %v6531_v63 = vrot.slane %v6519_v43, %v8397_v58  ;;  %v6669_v43 = vld [vmem:[#allocation2 + $0x22] ss:$8 sm:$0x3] }
 0x4be   : > { %v6189_v34 = vmul.f32 %v6188_v53, %v6186_v19  ;;  %v6513_v56 = vmul.f32 %v6510_v26, %v6506_v47  ;;  %v6547_v52 = vunpack.c.h.bf16 %v7645_v51  ;;  %v6535_v14 = vcombine.high %v6522_v30, %v6522_v30  ;;  %v6694_v26 = vld [vmem:[#allocation2 + $0x23] ss:$8 sm:$0x3] }
 0x4bf   : > { %v6537_v8 = vmul.f32 %v6527_v10, %v6522_v30  ;;  %v6552_v22 = vrot.slane %v6544_v6, %v8395_v57  ;;  %v6556_v17 = vrot.slane %v6544_v6, %v8397_v58  ;;  %v6572_v32 = vunpack.c.l.bf16 %v7647_v12  ;;  %v7653_v10 = vld [vmem:[%s10938_s29 + $0x50] sm:$0xff]  }
 0x4c0   : > { %v6190_v27 = vxor.u32 2147483648, %v6189_v34  ;;  %v6516_v16 = vcombine.low %v6512_v45, %v6513_v56  ;;  %v6560_v0 = vcombine.high %v6547_v52, %v6547_v52  ;;  %v6538_v49 = vmul.f32 %v6535_v14, %v6531_v63 }
 0x4c1   : > { %v6562_v5 = vmul.f32 %v6552_v22, %v6547_v52  ;;  %v6577_v9 = vrot.slane %v6569_v48, %v8395_v57  ;;  %v6581_v55 = vrot.slane %v6569_v48, %v8397_v58  ;;  %v6585_v33 = vcombine.high %v6572_v32, %v6572_v32  ;;  %v6719_v52 = vld [vmem:[#allocation2 + $0x24] ss:$8 sm:$0x3] }
 0x4c2   : > { %v6191_v11 = vsel %vm6108_vm13, %v6190_v27, %v6189_v34  ;;  %v6518_v29 = vadd.f32 %v6516_v16, %v6493_v13  ;;  %v6563_v4 = vmul.f32 %v6560_v0, %v6556_v17  ;;  %v6541_v44 = vcombine.low %v6537_v8, %v6538_v49 }
 0x4c3   : > { %v6194_v15 = vsel %vm11063_vm14, %v10413_v60, %v6191_v11  ;;  %v6587_v54 = vmul.f32 %v6577_v9, %v6572_v32  ;;  %v6597_v37 = vunpack.c.h.bf16 %v7647_v12  ;;  %v6588_v62 = vmul.f32 %v6585_v33, %v6581_v55  ;;  %v6744_v32 = vld [vmem:[#allocation2 + $0x25] ss:$8 sm:$0x3] }
 0x4c4   : > { %7919 = vcosq.f32 %v6194_v15  ;;  %v6566_v28 = vcombine.low %v6562_v5, %v6563_v4  ;;  %v6602_v18 = vrot.slane %v6594_v50, %v8395_v57  ;;  %v6543_v20 = vadd.f32 %v6541_v44, %v6518_v29 }
 0x4c5   : > { %7921 = vsinq.f32 %v6194_v15  ;;  %v6606_v1 = vrot.slane %v6594_v50, %v8397_v58  ;;  %v6610_v39 = vcombine.high %v6597_v37, %v6597_v37  ;;  %v6591_v42 = vcombine.low %v6587_v54, %v6588_v62  ;;  %v7655_v50 = vld [vmem:[%s10938_s29 + $0x58] sm:$0xff]   ;;  %v6769_v15 = vld [vmem:[#allocation2 + $0x26] ss:$8 sm:$0x3] }
 0x4c6   : > { %v6612_v24 = vmul.f32 %v6602_v18, %v6597_v37  ;;  %v6622_v41 = vunpack.c.l.bf16 %v7649_v59  ;;  %v6627_v38 = vrot.slane %v6619_v2, %v8395_v57  ;;  %v6568_v25 = vadd.f32 %v6566_v28, %v6543_v20 }
 0x4c7   : > { %v6613_v61 = vmul.f32 %v6610_v39, %v6606_v1  ;;  %v6631_v53 = vrot.slane %v6619_v2, %v8397_v58  ;;  %v6647_v46 = vunpack.c.h.bf16 %v7649_v59  ;;  %v6652_v35 = vrot.slane %v6644_v36, %v8395_v57 }
 0x4c8   : > { %v6635_v51 = vcombine.high %v6622_v41, %v6622_v41  ;;  %v6637_v3 = vmul.f32 %v6627_v38, %v6622_v41  ;;  %v6656_v21 = vrot.slane %v6644_v36, %v8397_v58  ;;  %v6593_v31 = vadd.f32 %v6591_v42, %v6568_v25  ;;  %v6794_v41 = vld [vmem:[#allocation2 + $0x27] ss:$8 sm:$0x3] }
 0x4c9   : > { %v6616_v7 = vcombine.low %v6612_v24, %v6613_v61  ;;  %v6660_v19 = vcombine.high %v6647_v46, %v6647_v46  ;;  %v6672_v47 = vunpack.c.l.bf16 %v7651_v40  ;;  %v6662_v13 = vmul.f32 %v6652_v35, %v6647_v46 }
 0x4ca   : > { %v6638_v6 = vmul.f32 %v6635_v51, %v6631_v53  ;;  %v6677_v45 = vrot.slane %v6669_v43, %v8395_v57  ;;  %v6681_v30 = vrot.slane %v6669_v43, %v8397_v58  ;;  %vm6205_vm4 = vcmp.eq.s32.totalorder %v11104_v23, 2 }
 0x4cb   : > { %v6618_v12 = vadd.f32 %v6616_v7, %v6593_v31  ;;  %v6663_v34 = vmul.f32 %v6660_v19, %v6656_v21  ;;  %v6685_v56 = vcombine.high %v6672_v47, %v6672_v47  ;;  %v6697_v63 = vunpack.c.h.bf16 %v7651_v40 }
 0x4cc   : > { %vm6202_vm5 = vcmp.eq.s32.totalorder %v11104_v23, 0  ;;  %v6641_v48 = vcombine.low %v6637_v3, %v6638_v6  ;;  %v6687_v14 = vmul.f32 %v6677_v45, %v6672_v47  ;;  %v6702_v8 = vrot.slane %v6694_v26, %v8395_v57  ;;  %v7657_v45 = vld [vmem:[%s10938_s29 + $0x60] sm:$0xff]  }
 0x4cd   : > { %v6706_v22 = vrot.slane %v6694_v26, %v8397_v58  ;;  %vm6201_vm6 = vcmp.lt.s32.totalorder %v11104_v23, 2  ;;  %v6666_v17 = vcombine.low %v6662_v13, %v6663_v34  ;;  %v6688_v27 = vmul.f32 %v6685_v56, %v6681_v30 }
 0x4ce   : > { %v6710_v16 = vcombine.high %v6697_v63, %v6697_v63  ;;  %v6722_v0 = vunpack.c.l.bf16 %v7653_v10  ;;  %vm6198_vm7 = vweird.f32 %v10413_v60  ;;  %v6643_v49 = vadd.f32 %v6641_v48, %v6618_v12 }
 0x4cf   : > { %v6712_v5 = vmul.f32 %v6702_v8, %v6697_v63  ;;  %v6727_v9 = vrot.slane %v6719_v52, %v8395_v57  ;;  %v6731_v55 = vrot.slane %v6719_v52, %v8397_v58  ;;  %v6691_v11 = vcombine.low %v6687_v14, %v6688_v27  ;;  %v7661_v8 = vld [vmem:[%s10938_s29 + $0x70] sm:$0xff]  }
 0x4d0   : > { %v6713_v29 = vmul.f32 %v6710_v16, %v6706_v22  ;;  %v6735_v4 = vcombine.high %v6722_v0, %v6722_v0  ;;  %v6747_v33 = vunpack.c.h.bf16 %v7653_v10  ;;  %v6668_v44 = vadd.f32 %v6666_v17, %v6643_v49  ;;  %v7659_v10 = vld [vmem:[%s10938_s29 + $0x68] sm:$0xff]   ;;  %v7663_v16 = vld [vmem:[%s10938_s29 + $0x78] sm:$0xff]   ;;  %s7983_s29 = sshll.u32 %s8060_s2, 4  ;;  %s7984_s29 = int_to_ptr.vmem [resolvable:$false] %s7983_s29 }
 0x4d1   : > { %v6737_v54 = vmul.f32 %v6727_v9, %v6722_v0  ;;  %v6752_v37 = vrot.slane %v6744_v32, %v8395_v57  ;;  %v6756_v2 = vrot.slane %v6744_v32, %v8397_v58  ;;  %v7920_v59 = vpop.eup %7919  ;;  %v6772_v20 = vunpack.c.l.bf16 %v7655_v50  ;;  %s7985_s13 = scalar_lea.vmem %s7984_s29, 256  ;;  %p7986_p7 = scmp.lt.s32.totalorder %s7042_s3, %s7984_s29 }
 0x4d2   : > { %v6716_v28 = vcombine.low %v6712_v5, %v6713_v29  ;;  %v6738_v62 = vmul.f32 %v6735_v4, %v6731_v55  ;;  %v6760_v18 = vcombine.high %v6747_v33, %v6747_v33  ;;  %v7922_v1 = vpop.eup %7921  ;;  %v6206_v39 = vxor.u32 2147483648, %v7920_v59  ;;  %p7987_p8 = scmp.lt.s32.totalorder %s7985_s13, %s7979_s17 }
 0x4d3   : > { %v6693_v36 = vadd.f32 %v6691_v11, %v6668_v44  ;;  %v6762_v42 = vmul.f32 %v6752_v37, %v6747_v33  ;;  %v6777_v24 = vrot.slane %v6769_v15, %v8395_v57  ;;  %v6203_v38 = vxor.u32 2147483648, %v7922_v1 }
 0x4d4   : > { %v6741_v40 = vcombine.low %v6737_v54, %v6738_v62  ;;  %v6763_v25 = vmul.f32 %v6760_v18, %v6756_v2  ;;  %v6781_v61 = vrot.slane %v6769_v15, %v8397_v58  ;;  %v6207_v53 = vsel %vm6205_vm4, %v6206_v39, %v7922_v1  ;;  %p7988_p12 = por %p7987_p8, %p7986_p7 }
 0x4d5   : > { %v6718_v46 = vadd.f32 %v6716_v28, %v6693_v36  ;;  %v6785_v43 = vcombine.high %v6772_v20, %v6772_v20  ;;  %v6787_v51 = vmul.f32 %v6777_v24, %v6772_v20  ;;  %v6204_v3 = vsel %vm6202_vm5, %v7920_v59, %v6203_v38 }
 0x4d6   : > { %v6766_v35 = vcombine.low %v6762_v42, %v6763_v25  ;;  %v6797_v21 = vunpack.c.h.bf16 %v7655_v50  ;;  %v6802_v31 = vrot.slane %v6794_v41, %v8395_v57  ;;  %v6208_v7 = vsel %vm6201_vm6, %v6204_v3, %v6207_v53  ;;  %p7989_p13 = pnand %p7988_p12, %p7982_p4 }
 0x4d7   : > { %v6743_v19 = vadd.f32 %v6741_v40, %v6718_v46  ;;  %v6788_v47 = vmul.f32 %v6785_v43, %v6781_v61  ;;  %v6806_v26 = vrot.slane %v6794_v41, %v8397_v58  ;;  %v6209_v6 = vsel %vm6198_vm7, nan, %v6208_v7 }
 0x4d8   : > { %v6810_v13 = vcombine.high %v6797_v21, %v6797_v21  ;;  %6217 = vst [vmem:[#allocation2 + $0x38] sm:$0xff] %v6209_v6  ;;  %v6812_v34 = vmul.f32 %v6802_v31, %v6797_v21  ;;  %v6822_v63 = vunpack.c.l.bf16 %v7657_v45  ;;  %v6847_v23 = vunpack.c.h.bf16 %v7657_v45 }
 0x4d9   : > { %v6768_v30 = vadd.f32 %v6766_v35, %v6743_v19  ;;  %v6791_v12 = vcombine.low %v6787_v51, %v6788_v47  ;;  %v6872_v48 = vunpack.c.l.bf16 %v7659_v10  ;;  %v6897_v14 = vunpack.c.h.bf16 %v7659_v10 }
 0x4da   : > { %v6813_v56 = vmul.f32 %v6810_v13, %v6806_v26  ;;  %v6835_v17 = vcombine.high %v6822_v63, %v6822_v63  ;;  %v6860_v27 = vcombine.high %v6847_v23, %v6847_v23  ;;  %v6922_v60 = vunpack.c.l.bf16 %v7661_v8 }
 0x4db   : > { %v6793_v52 = vadd.f32 %v6791_v12, %v6768_v30  ;;  %v6885_v5 = vcombine.high %v6872_v48, %v6872_v48  ;;  %v6910_v9 = vcombine.high %v6897_v14, %v6897_v14  ;;  %v6947_v55 = vunpack.c.h.bf16 %v7661_v8 }
 0x4dc   : > { %v6816_v22 = vcombine.low %v6812_v34, %v6813_v56  ;;  %v6972_v42 = vunpack.c.l.bf16 %v7663_v16  ;;  %v6935_v40 = vcombine.high %v6922_v60, %v6922_v60  ;;  %v6997_v43 = vunpack.c.h.bf16 %v7663_v16 }
 0x4dd   : > { %v6960_v21 = vcombine.high %v6947_v55, %v6947_v55 }
 0x4de   : > { %v6818_v0 = vadd.f32 %v6816_v22, %v6793_v52  ;;  %v6985_v19 = vcombine.high %v6972_v42, %v6972_v42  ;;  %v7010_v12 = vcombine.high %v6997_v43, %v6997_v43 }
 0x4df   : > { %v6819_v32 = vld [vmem:[#allocation2 + $0x30] ss:$8 sm:$0x3]  ;;  %v6844_v49 = vld [vmem:[#allocation2 + $0x31] ss:$8 sm:$0x3] }
 0x4e0   : > { %v6827_v50 = vrot.slane %v6819_v32, %v8395_v57  ;;  %v6831_v11 = vrot.slane %v6819_v32, %v8397_v58  ;;  %v6852_v29 = vrot.slane %v6844_v49, %v8395_v57  ;;  %v6856_v4 = vrot.slane %v6844_v49, %v8397_v58  ;;  %v6869_v33 = vld [vmem:[#allocation2 + $0x32] ss:$8 sm:$0x3]  ;;  %v6894_v15 = vld [vmem:[#allocation2 + $0x33] ss:$8 sm:$0x3] }
 0x4e1   : > { %v6877_v44 = vrot.slane %v6869_v33, %v8395_v57  ;;  %v6881_v54 = vrot.slane %v6869_v33, %v8397_v58  ;;  %v6902_v37 = vrot.slane %v6894_v15, %v8395_v57  ;;  %v6906_v2 = vrot.slane %v6894_v15, %v8397_v58  ;;  %v6919_v59 = vld [vmem:[#allocation2 + $0x34] ss:$8 sm:$0x3]  ;;  %v6944_v1 = vld [vmem:[#allocation2 + $0x35] ss:$8 sm:$0x3] }
 0x4e2   : > { %v6837_v28 = vmul.f32 %v6827_v50, %v6822_v63  ;;  %v6838_v62 = vmul.f32 %v6835_v17, %v6831_v11  ;;  %v6862_v18 = vmul.f32 %v6852_v29, %v6847_v23  ;;  %v6863_v20 = vmul.f32 %v6860_v27, %v6856_v4  ;;  %v6969_v46 = vld [vmem:[#allocation2 + $0x36] ss:$8 sm:$0x3]  ;;  %v6994_v47 = vld [vmem:[#allocation2 + $0x37] ss:$8 sm:$0x3] }
 0x4e3   : > { %v6887_v39 = vmul.f32 %v6877_v44, %v6872_v48  ;;  %v6888_v36 = vmul.f32 %v6885_v5, %v6881_v54  ;;  %v6927_v41 = vrot.slane %v6919_v59, %v8395_v57  ;;  %v6931_v38 = vrot.slane %v6919_v59, %v8397_v58 }
 0x4e4   : > { %v6841_v24 = vcombine.low %v6837_v28, %v6838_v62  ;;  %v6912_v25 = vmul.f32 %v6902_v37, %v6897_v14  ;;  %v6913_v61 = vmul.f32 %v6910_v9, %v6906_v2  ;;  %v6952_v53 = vrot.slane %v6944_v1, %v8395_v57 }
 0x4e5   : > { %v6866_v3 = vcombine.low %v6862_v18, %v6863_v20  ;;  %v6956_v35 = vrot.slane %v6944_v1, %v8397_v58  ;;  %v6891_v31 = vcombine.low %v6887_v39, %v6888_v36  ;;  %v6937_v7 = vmul.f32 %v6927_v41, %v6922_v60 }
 0x4e6   : > { %v6843_v51 = vadd.f32 %v6841_v24, %v6818_v0  ;;  %v6938_v6 = vmul.f32 %v6935_v40, %v6931_v38  ;;  %v6977_v13 = vrot.slane %v6969_v46, %v8395_v57  ;;  %v6981_v45 = vrot.slane %v6969_v46, %v8397_v58 }
 0x4e7   : > { %v6916_v30 = vcombine.low %v6912_v25, %v6913_v61  ;;  %v6962_v10 = vmul.f32 %v6952_v53, %v6947_v55  ;;  %v6963_v56 = vmul.f32 %v6960_v21, %v6956_v35  ;;  %v7002_v63 = vrot.slane %v6994_v47, %v8395_v57 }
 0x4e8   : > { %v6868_v26 = vadd.f32 %v6866_v3, %v6843_v51  ;;  %v7006_v23 = vrot.slane %v6994_v47, %v8397_v58  ;;  %v6941_v48 = vcombine.low %v6937_v7, %v6938_v6  ;;  %v6987_v14 = vmul.f32 %v6977_v13, %v6972_v42 }
 0x4e9   : > { %v6988_v8 = vmul.f32 %v6985_v19, %v6981_v45  ;;  %v6966_v17 = vcombine.low %v6962_v10, %v6963_v56  ;;  %v7012_v27 = vmul.f32 %v7002_v63, %v6997_v43 }
 0x4ea   : > { %v6893_v34 = vadd.f32 %v6891_v31, %v6868_v26  ;;  %v7013_v60 = vmul.f32 %v7010_v12, %v7006_v23 }
 0x4eb   : > { %v6991_v0 = vcombine.low %v6987_v14, %v6988_v8 }
 0x4ec   : > { %v6918_v52 = vadd.f32 %v6916_v30, %v6893_v34  ;;  %v7016_v49 = vcombine.low %v7012_v27, %v7013_v60 }
 0x4ee   : > { %v6943_v22 = vadd.f32 %v6941_v48, %v6918_v52 }
 0x4f0   : > { %v6968_v16 = vadd.f32 %v6966_v17, %v6943_v22 }
 0x4f2   : > { %v6993_v32 = vadd.f32 %v6991_v0, %v6968_v16 }
 0x4f4   : > { %v7018_v5 = vadd.f32 %v7016_v49, %v6993_v32 }
 0x4f6   : > { %v7665_v9 = vmul.f32 -1.442695, %v7018_v5 }
 0x4f8   : > { %7923 = vpow2.f32 %v7665_v9 }
 0x505   : > { %v7924_v57 = vpop.eup %7923 }
 0x506   : > { %v7022_v58 = vadd.f32 1.0, %v7924_v57 }
 0x508   : > { %7925 = vrcp.f32 %v7022_v58 }
 0x515   : > { %v7926_v55 = vpop.eup %7925 }
 0x516   : > { %7025 = vst [vmem:[%s898_s1] sm:$0x77] %v7926_v55 }
 0x517   : > { %7992 = shalt.err (!%p7989_p13)
}
 0x518   : > { %s7993_s16 = scalar_lea.hbm %s11201_s26, 128  ;;  %s7997_s25 = scalar_lea.hbm %s11247_s9, 256 }
 0x519   : > { %p7994_p9 = scmp.ne.s32.totalorder %s11201_s26, %s7993_s16  ;;  %p7998_p11 = scmp.lt.s32.totalorder %s11201_s26, %s11247_s9 }
 0x51a   : > { %p7999_p0 = scmp.lt.s32.totalorder %s7997_s25, %s7993_s16 }
 0x51b   : > { %p7995_p10 = pnand %p7994_p9, %p11316_p2 }
 0x51c   : > { %p8000_p1 = por %p7999_p0, %p7998_p11 }
 0x51d   : > { %p7996_p5 = pneg %p7995_p10 }
 0x51f   : > { %p8001_p6 = pnand %p8000_p1, %p7996_p5 }
 0x521   : > { %8004 = shalt.err (!%p8001_p6)
}
 0x522   : > { %7779 = dma.vmem_to_hbm [thread:$0]  (%p11316_p2), %s7042_s3, 128, %s11201_s26, %s7027_s20  }
 0x523 PF: > { %s7053_s1 = sand.u32 1, %s8035_s30   ;;  %p11317_p3 = scmp.ne.s32.totalorder %s11260_s22, 0 }
 0x524   : > { %p11318_p4 = scmp.ge.s32.totalorder %s8047_s12, 2  ;;  %s7054_s28 = scalar_lea.sflag [#allocation7], %s7053_s1 }
 0x526   : > { %p7782_p7 = pnand %p11318_p4, %p11317_p3 }
 0x528   : > { %p7783_p8 = pneg %p7782_p7 }
 0x52a   : > { %8030 = dma.done.wait (%p7783_p8), %s7054_s28, 128  }
 0x52b   : > { %8032 = vsyncadd (%p7783_p8), %s7054_s28, 4294967168  ;;  %p25_p12 = scmp.ge.s32.totalorder %s8136_s15, 4   ;;  %s11319_s30 = smov %s8039_s10 }
 0x52c   : > { %s11320_s10 = smov %s8043_s11  ;;  %s11321_s11 = smov %s8148_s18 }
 0x52d   : > { %s11322_s12 = smov %s8136_s15  ;;  %27 = sbr.rel (!%p25_p12) target bundleno = 11 (0xb), region = 479 }
 0x532   :  { %7059 = vsyncpa [#allocation6], 1 }
 0x533   :  { %7061 = vsyncpa [#allocation6 + $0x1], 1 }
 0x534   :  { %7062 = vsyncpa [#allocation10], 1 }
 0x535   :  { %7064 = vsyncpa [#allocation10 + $0x1], 1 }
 0x536   :  { %7065 = vsyncpa [#allocation7], 1 }
 0x537   :  { %7067 = vsyncpa [#allocation7 + $0x1], 1 }

</bundles_post_ra>
